<compile_context>
chip_gen: v7x
topology: tpu7x:2x2x1
jax: 0.10.0
libtpu: 0.0.40
codegen_flags: <defaults>
</compile_context>

<pallas_src>
import functools
import math

import jax
import jax.numpy as jnp
from jax.experimental import pallas as pl
from jax.experimental.pallas import tpu as pltpu

LEN_OF_SEGMENTS = 400
LEN_OF_INPUT = 4 * LEN_OF_SEGMENTS     # 1600
LEN_OF_OUTPUT = 5 * LEN_OF_SEGMENTS    # 2000

L1 = 400            # conv1 output length (k=4, stride=4)
L1P = 133           # after maxpool(3)
L2 = L1P            # conv2 "same" output length
L2P = 44            # after maxpool(3)
L3 = L2P            # conv3 "same" output length
L3P = 14            # after maxpool(3)
TO_LINEAR = 64 * L3P                    # 896  (PyTorch self._to_linear)

CPAD = 128          # conv channels padded 32/64 -> 128 (lane-dense)
NPAD = 2048         # fc2 output padded 2000 -> 2048 (lane-dense)
P2 = L2 + 4         # 137: padded rows / sample for conv2 input ("same", k=5)
P3 = L3 + 4         # 48 : padded rows / sample for conv3 input


# ---------------------------------------------------------------------------
# Fused kernel
# ---------------------------------------------------------------------------
def _conv5_same(src_ref, w_ref, b_ref, dst_ref, m):
    """dst[0:m] = relu(sum_t src[t:t+m] @ w[t] + b): 5 shifted batched matmuls."""
    dst_ref[pl.ds(0, m), :] = jnp.dot(
        src_ref[pl.ds(0, m), :].astype(jnp.bfloat16), w_ref[0],
        preferred_element_type=jnp.float32)
    for t in range(1, 5):
        dst_ref[pl.ds(0, m), :] += jnp.dot(
            src_ref[pl.ds(t, m), :].astype(jnp.bfloat16), w_ref[t],
            preferred_element_type=jnp.float32)
    dst_ref[pl.ds(0, m), :] = jnp.maximum(dst_ref[pl.ds(0, m), :] + b_ref[...],
                                          0.0)


def _pool3(src_ref, base, n_out):
    """max_pool1d(kernel=3, stride=3) over rows [base, base + 3*n_out)."""
    p = src_ref[pl.ds(base + 0, n_out, stride=3), :]
    p = jnp.maximum(p, src_ref[pl.ds(base + 1, n_out, stride=3), :])
    p = jnp.maximum(p, src_ref[pl.ds(base + 2, n_out, stride=3), :])
    return p


def net_conv_kernel(x_ref, w1_ref, b1_ref, w2_ref, b2_ref, w3_ref, b3_ref,
                    wfc1_ref, bfc1_ref, wfc2_ref, bfc2_ref, o_ref,
                    s1, h1p, s2, h2p, s3, h3s, *, bb):
    zpad = jnp.zeros((2, CPAD), jnp.float32)

    # conv1 (k=4, stride=4): one batched (bb*400, 4) @ (4, 128) matmul (f32).
    s1[...] = jnp.maximum(
        jnp.dot(x_ref[...], w1_ref[...], preferred_element_type=jnp.float32)
        + b1_ref[...], 0.0)

    # maxpool(3) + in-kernel zero "same" padding into the conv2 input buffer.
    for b in range(bb):
        dst = b * P2
        h1p[pl.ds(dst, 2), :] = zpad
        h1p[pl.ds(dst + 2, L1P), :] = _pool3(s1, b * L1, L1P)
        h1p[pl.ds(dst + 2 + L1P, 2), :] = zpad

    # conv2 (k=5, padding=2) + relu, batched across the whole block.
    _conv5_same(h1p, w2_ref, b2_ref, s2, bb * P2 - 4)

    # maxpool(3) + zero padding into the conv3 input buffer.
    for b in range(bb):
        dst = b * P3
        h2p[pl.ds(dst, 2), :] = zpad
        h2p[pl.ds(dst + 2, L2P), :] = _pool3(s2, b * P2, L2P)
        h2p[pl.ds(dst + 2 + L2P, 2), :] = zpad

    # conv3 (k=5, padding=2) + relu.
    _conv5_same(h2p, w3_ref, b3_ref, s3, bb * P3 - 4)

    # maxpool(3) -> (bb*14, 128) channels-last feature map.
    for b in range(bb):
        h3s[pl.ds(b * L3P, L3P), :] = _pool3(s3, b * P3, L3P)

    # fc1: the (C, L) flatten is absorbed into wfc1's row permutation, so it is
    # a sum of 14 per-position (bb, 128) @ (128, 512) matmuls.
    h = jnp.dot(h3s[pl.ds(0, bb, stride=L3P), :].astype(jnp.bfloat16),
                wfc1_ref[0], preferred_element_type=jnp.float32)
    for l in range(1, L3P):
        h += jnp.dot(h3s[pl.ds(l, bb, stride=L3P), :].astype(jnp.bfloat16),
                     wfc1_ref[l], preferred_element_type=jnp.float32)
    h = jnp.maximum(h + bfc1_ref[...], 0.0)

    # fc2: (bb, 512) @ (512, 2048); padded lanes are zero and sliced off outside.
    o_ref[...] = jnp.dot(h.astype(jnp.bfloat16), wfc2_ref[...],
                         preferred_element_type=jnp.float32) + bfc2_ref[...]


# ---------------------------------------------------------------------------
# Wrapper
# ---------------------------------------------------------------------------
def net_conv_forward(x, params, batch_block=16):
    """x: (B, 1, 1600) float32 (NCL, like PyTorch).  Returns (B, 2000) f32."""
    B = x.shape[0]
    bb = min(batch_block, B)
    n_blk = -(-B // bb)
    b_pad = n_blk * bb

    # conv1 has kernel_size == stride == 4: exact non-overlapping 4-patches.
    x2 = x.reshape(B, L1, 4)
    if b_pad != B:
        x2 = jnp.concatenate(
            [x2, jnp.zeros((b_pad - B, L1, 4), x2.dtype)], axis=0)
    x2 = x2.reshape(b_pad * L1, 4)

    kern = functools.partial(net_conv_kernel, bb=bb)
    out = pl.pallas_call(
        kern,
        grid=(n_blk,),
        in_specs=[
            pl.BlockSpec((bb * L1, 4), lambda i: (i, 0)),          # x patches
            pl.BlockSpec((4, CPAD), lambda i: (0, 0)),             # w1
            pl.BlockSpec((1, CPAD), lambda i: (0, 0)),             # b1
            pl.BlockSpec((5, CPAD, CPAD), lambda i: (0, 0, 0)),    # w2
            pl.BlockSpec((1, CPAD), lambda i: (0, 0)),             # b2
            pl.BlockSpec((5, CPAD, CPAD), lambda i: (0, 0, 0)),    # w3
            pl.BlockSpec((1, CPAD), lambda i: (0, 0)),             # b3
            pl.BlockSpec((L3P, CPAD, 512), lambda i: (0, 0, 0)),   # wfc1
            pl.BlockSpec((1, 512), lambda i: (0, 0)),              # bfc1
            pl.BlockSpec((512, NPAD), lambda i: (0, 0)),           # wfc2
            pl.BlockSpec((1, NPAD), lambda i: (0, 0)),             # bfc2
        ],
        out_specs=pl.BlockSpec((bb, NPAD), lambda i: (i, 0)),
        out_shape=jax.ShapeDtypeStruct((b_pad, NPAD), jnp.float32),
        scratch_shapes=[
            pltpu.VMEM((bb * L1, CPAD), jnp.float32),    # conv1 pre-pool
            pltpu.VMEM((bb * P2, CPAD), jnp.float32),    # conv2 padded input
            pltpu.VMEM((bb * P2, CPAD), jnp.float32),    # conv2 pre-pool
            pltpu.VMEM((bb * P3, CPAD), jnp.float32),    # conv3 padded input
            pltpu.VMEM((bb * P3, CPAD), jnp.float32),    # conv3 pre-pool
            pltpu.VMEM((bb * L3P, CPAD), jnp.float32),   # pooled conv3 features
        ],
        compiler_params=pltpu.CompilerParams(
            dimension_semantics=("parallel",)),          # megacore on v7x
    )(x2, params["w1"], params["b1"], params["w2"], params["b2"],
      params["w3"], params["b3"], params["wfc1"], params["bfc1"],
      params["wfc2"], params["bfc2"])
    return out[:B, :LEN_OF_OUTPUT]


# ---------------------------------------------------------------------------
# Parameter packing (one-time, outside the kernel)
# ---------------------------------------------------------------------------
def _kaiming_uniform(key, shape, fan_in):
    bound = math.sqrt(6.0 / fan_in)
    return jax.random.uniform(key, shape, jnp.float32, -bound, bound)


def _bias_uniform(key, shape, fan_in):
    bound = 1.0 / math.sqrt(fan_in)
    return jax.random.uniform(key, shape, jnp.float32, -bound, bound)


def _pad_last(a, n):
    return jnp.pad(a, [(0, 0)] * (a.ndim - 1) + [(0, n - a.shape[-1])])


def _pad_conv(w):   # (5, cin, cout) -> (5, 128, 128) bf16, zero-padded
    return jnp.pad(w, ((0, 0), (0, CPAD - w.shape[1]),
                       (0, CPAD - w.shape[2]))).astype(jnp.bfloat16)


def pack_params(w1, b1, w2, b2, w3, b3, wfc1, bfc1, wfc2, bfc2):
    """Repack PyTorch-layout weights into the kernel's lane-dense layouts."""
    # conv1 (32,1,4) -> (4,128) f32; padded out-channels have zero weight+bias
    # so their activations are exactly zero through relu/pool everywhere.
    w1m = _pad_last(jnp.transpose(w1[:, 0, :], (1, 0)), CPAD)
    # conv2/3 (Cout,Cin,5) -> (5,128,128) [tap, Cin, Cout], bf16.
    w2m = _pad_conv(jnp.transpose(w2, (2, 1, 0)))
    w3m = _pad_conv(jnp.transpose(w3, (2, 1, 0)))
    # fc1 (512,896): PyTorch flatten order is (channel, position); the kernel is
    # channels-last, so permute rows to (position, channel) and pad the channel
    # dim to 128 -> (14, 128, 512) bf16.  This removes the runtime transpose.
    wfc1m = jnp.transpose(wfc1.reshape(512, 64, L3P), (2, 1, 0))
    wfc1m = jnp.pad(wfc1m, ((0, 0), (0, CPAD - 64), (0, 0))).astype(jnp.bfloat16)
    # fc2 (2000,512) -> (512,2048) bf16 (padded output lanes are zero).
    wfc2m = _pad_last(jnp.transpose(wfc2, (1, 0)), NPAD).astype(jnp.bfloat16)
    return {
        "w1": w1m, "b1": _pad_last(b1[None, :], CPAD),
        "w2": w2m, "b2": _pad_last(b2[None, :], CPAD),
        "w3": w3m, "b3": _pad_last(b3[None, :], CPAD),
        "wfc1": wfc1m, "bfc1": bfc1[None, :],
        "wfc2": wfc2m, "bfc2": _pad_last(bfc2[None, :], NPAD),
    }


def init_params(key):
    """Synthetic params matching the PyTorch module's init distributions."""
    ks = jax.random.split(key, 10)
    w1 = _kaiming_uniform(ks[0], (32, 1, 4), 1 * 4)
    b1 = _bias_uniform(ks[1], (32,), 1 * 4)
    w2 = _kaiming_uniform(ks[2], (64, 32, 5), 32 * 5)
    b2 = _bias_uniform(ks[3], (64,), 32 * 5)
    w3 = _kaiming_uniform(ks[4], (64, 64, 5), 64 * 5)
    b3 = _bias_uniform(ks[5], (64,), 64 * 5)
    wfc1 = _kaiming_uniform(ks[6], (512, TO_LINEAR), TO_LINEAR)
    bfc1 = _bias_uniform(ks[7], (512,), TO_LINEAR)
    wfc2 = _kaiming_uniform(ks[8], (LEN_OF_OUTPUT, 512), 512)
    bfc2 = _bias_uniform(ks[9], (LEN_OF_OUTPUT,), 512)
    # conv4..conv7 exist in __init__ but are never used by forward(); omitted.
    return pack_params(w1, b1, w2, b2, w3, b3, wfc1, bfc1, wfc2, bfc2)


if __name__ == "__main__":
    key = jax.random.PRNGKey(0)
    pkey, xkey = jax.random.split(key)
    params = init_params(pkey)

    B = 2
    x = jax.random.normal(xkey, (B, 1, LEN_OF_INPUT), jnp.float32)

    out = jax.jit(net_conv_forward)(x, params)
    out = jax.block_until_ready(out)
    assert out.shape == (B, LEN_OF_OUTPUT), out.shape
    assert bool(jnp.all(jnp.isfinite(out)))
    print("KERNEL_OK")
</pallas_src>

<mosaic_0001>
module attributes {stable_mosaic.version = 11 : i64} {
  func.func @net_conv_kernel(%arg0: i32, %arg1: memref<800x4xf32, #tpu.memory_space<vmem>>, %arg2: memref<4x128xf32, #tpu.memory_space<vmem>>, %arg3: memref<1x128xf32, #tpu.memory_space<vmem>>, %arg4: memref<5x128x128xbf16, #tpu.memory_space<vmem>>, %arg5: memref<1x128xf32, #tpu.memory_space<vmem>>, %arg6: memref<5x128x128xbf16, #tpu.memory_space<vmem>>, %arg7: memref<1x128xf32, #tpu.memory_space<vmem>>, %arg8: memref<14x128x512xbf16, #tpu.memory_space<vmem>>, %arg9: memref<1x512xf32, #tpu.memory_space<vmem>>, %arg10: memref<512x2048xbf16, #tpu.memory_space<vmem>>, %arg11: memref<1x2048xf32, #tpu.memory_space<vmem>>, %arg12: memref<2x2048xf32, #tpu.memory_space<vmem>>, %arg13: memref<800x128xf32, #tpu.memory_space<vmem>>, %arg14: memref<274x128xf32, #tpu.memory_space<vmem>>, %arg15: memref<274x128xf32, #tpu.memory_space<vmem>>, %arg16: memref<96x128xf32, #tpu.memory_space<vmem>>, %arg17: memref<96x128xf32, #tpu.memory_space<vmem>>, %arg18: memref<28x128xf32, #tpu.memory_space<vmem>>) attributes {dimension_semantics = [#tpu.dimension_semantics<parallel>], iteration_bounds = array<i64: 1>, scalar_prefetch = 0 : i64, scratch_operands = 6 : i64, tpu.core_type = #tpu.core_type<tc>, window_params = [{transform_indices = @transform_0, window_bounds = array<i64: 800, 4>}, {pipeline_mode = #tpu.pipeline_mode<synchronous>, transform_indices = @transform_1, window_bounds = array<i64: 4, 128>}, {pipeline_mode = #tpu.pipeline_mode<synchronous>, transform_indices = @transform_2, window_bounds = array<i64: 1, 128>}, {pipeline_mode = #tpu.pipeline_mode<synchronous>, transform_indices = @transform_3, window_bounds = array<i64: 5, 128, 128>}, {pipeline_mode = #tpu.pipeline_mode<synchronous>, transform_indices = @transform_4, window_bounds = array<i64: 1, 128>}, {pipeline_mode = #tpu.pipeline_mode<synchronous>, transform_indices = @transform_5, window_bounds = array<i64: 5, 128, 128>}, {pipeline_mode = #tpu.pipeline_mode<synchronous>, transform_indices = @transform_6, window_bounds = array<i64: 1, 128>}, {pipeline_mode = #tpu.pipeline_mode<synchronous>, transform_indices = @transform_7, window_bounds = array<i64: 14, 128, 512>}, {pipeline_mode = #tpu.pipeline_mode<synchronous>, transform_indices = @transform_8, window_bounds = array<i64: 1, 512>}, {pipeline_mode = #tpu.pipeline_mode<synchronous>, transform_indices = @transform_9, window_bounds = array<i64: 512, 2048>}, {pipeline_mode = #tpu.pipeline_mode<synchronous>, transform_indices = @transform_10, window_bounds = array<i64: 1, 2048>}, {transform_indices = @transform_11, window_bounds = array<i64: 2, 2048>}]} {
    %cst = arith.constant 0.000000e+00 : f32
    %0 = vector.broadcast %cst : f32 to vector<2x128xf32>
    %c0 = arith.constant 0 : index
    %c0_0 = arith.constant 0 : index
    %1 = vector.load %arg1[%c0, %c0_0] : memref<800x4xf32, #tpu.memory_space<vmem>>, vector<800x4xf32>
    %c0_1 = arith.constant 0 : index
    %c0_2 = arith.constant 0 : index
    %2 = vector.load %arg2[%c0_1, %c0_2] : memref<4x128xf32, #tpu.memory_space<vmem>>, vector<4x128xf32>
    %cst_3 = arith.constant dense<0.000000e+00> : vector<800x128xf32>
    %3 = tpu.matmul %1, %2, %cst_3 {dimension_numbers = #tpu.dot_dimension_numbers<[1], [0], [0], [1], [0, 0, 1, 1], [], []>} : vector<800x4xf32>, vector<4x128xf32>, vector<800x128xf32> -> vector<800x128xf32>
    %c0_4 = arith.constant 0 : index
    %c0_5 = arith.constant 0 : index
    %4 = vector.load %arg3[%c0_4, %c0_5] : memref<1x128xf32, #tpu.memory_space<vmem>>, vector<1x128xf32>
    %5 = vector.broadcast %4 : vector<1x128xf32> to vector<800x128xf32>
    %6 = arith.addf %3, %5 : vector<800x128xf32>
    %cst_6 = arith.constant 0.000000e+00 : f32
    %7 = vector.broadcast %cst_6 : f32 to vector<800x128xf32>
    %8 = arith.maximumf %6, %7 : vector<800x128xf32>
    %c0_7 = arith.constant 0 : index
    %c0_8 = arith.constant 0 : index
    %9 = vector.load %arg13[%c0_7, %c0_8] : memref<800x128xf32, #tpu.memory_space<vmem>>, vector<800x128xf32>
    tpu.vector_store %arg13[%c0_7, %c0_8], %8 {strides = array<i32>} : memref<800x128xf32, #tpu.memory_space<vmem>>, vector<800x128xf32>,
    %c0_9 = arith.constant 0 : index
    %c0_10 = arith.constant 0 : index
    %10 = vector.load %arg14[%c0_9, %c0_10] : memref<274x128xf32, #tpu.memory_space<vmem>>, vector<2x128xf32>
    tpu.vector_store %arg14[%c0_9, %c0_10], %0 {strides = array<i32>} : memref<274x128xf32, #tpu.memory_space<vmem>>, vector<2x128xf32>,
    %c0_11 = arith.constant 0 : index
    %c0_12 = arith.constant 0 : index
    %11 = tpu.strided_load %arg13[%c0_11, %c0_12] {strides = array<i32: 3, 1>} : memref<800x128xf32, #tpu.memory_space<vmem>>, vector<133x128xf32>
    %c1 = arith.constant 1 : index
    %c0_13 = arith.constant 0 : index
    %12 = tpu.strided_load %arg13[%c1, %c0_13] {strides = array<i32: 3, 1>} : memref<800x128xf32, #tpu.memory_space<vmem>>, vector<133x128xf32>
    %13 = arith.maximumf %11, %12 : vector<133x128xf32>
    %c2 = arith.constant 2 : index
    %c0_14 = arith.constant 0 : index
    %14 = tpu.strided_load %arg13[%c2, %c0_14] {strides = array<i32: 3, 1>} : memref<800x128xf32, #tpu.memory_space<vmem>>, vector<133x128xf32>
    %15 = arith.maximumf %13, %14 : vector<133x128xf32>
    %c2_15 = arith.constant 2 : index
    %c0_16 = arith.constant 0 : index
    %16 = vector.load %arg14[%c2_15, %c0_16] : memref<274x128xf32, #tpu.memory_space<vmem>>, vector<133x128xf32>
    tpu.vector_store %arg14[%c2_15, %c0_16], %15 {strides = array<i32>} : memref<274x128xf32, #tpu.memory_space<vmem>>, vector<133x128xf32>,
    %c135 = arith.constant 135 : index
    %c0_17 = arith.constant 0 : index
    %17 = vector.load %arg14[%c135, %c0_17] : memref<274x128xf32, #tpu.memory_space<vmem>>, vector<2x128xf32>
    tpu.vector_store %arg14[%c135, %c0_17], %0 {strides = array<i32>} : memref<274x128xf32, #tpu.memory_space<vmem>>, vector<2x128xf32>,
    %c137 = arith.constant 137 : index
    %c0_18 = arith.constant 0 : index
    %18 = vector.load %arg14[%c137, %c0_18] : memref<274x128xf32, #tpu.memory_space<vmem>>, vector<2x128xf32>
    tpu.vector_store %arg14[%c137, %c0_18], %0 {strides = array<i32>} : memref<274x128xf32, #tpu.memory_space<vmem>>, vector<2x128xf32>,
    %c400 = arith.constant 400 : index
    %c0_19 = arith.constant 0 : index
    %19 = tpu.strided_load %arg13[%c400, %c0_19] {strides = array<i32: 3, 1>} : memref<800x128xf32, #tpu.memory_space<vmem>>, vector<133x128xf32>
    %c401 = arith.constant 401 : index
    %c0_20 = arith.constant 0 : index
    %20 = tpu.strided_load %arg13[%c401, %c0_20] {strides = array<i32: 3, 1>} : memref<800x128xf32, #tpu.memory_space<vmem>>, vector<133x128xf32>
    %21 = arith.maximumf %19, %20 : vector<133x128xf32>
    %c402 = arith.constant 402 : index
    %c0_21 = arith.constant 0 : index
    %22 = tpu.strided_load %arg13[%c402, %c0_21] {strides = array<i32: 3, 1>} : memref<800x128xf32, #tpu.memory_space<vmem>>, vector<133x128xf32>
    %23 = arith.maximumf %21, %22 : vector<133x128xf32>
    %c139 = arith.constant 139 : index
    %c0_22 = arith.constant 0 : index
    %24 = vector.load %arg14[%c139, %c0_22] : memref<274x128xf32, #tpu.memory_space<vmem>>, vector<133x128xf32>
    tpu.vector_store %arg14[%c139, %c0_22], %23 {strides = array<i32>} : memref<274x128xf32, #tpu.memory_space<vmem>>, vector<133x128xf32>,
    %c272 = arith.constant 272 : index
    %c0_23 = arith.constant 0 : index
    %25 = vector.load %arg14[%c272, %c0_23] : memref<274x128xf32, #tpu.memory_space<vmem>>, vector<2x128xf32>
    tpu.vector_store %arg14[%c272, %c0_23], %0 {strides = array<i32>} : memref<274x128xf32, #tpu.memory_space<vmem>>, vector<2x128xf32>,
    %c0_24 = arith.constant 0 : index
    %c0_25 = arith.constant 0 : index
    %26 = vector.load %arg14[%c0_24, %c0_25] : memref<274x128xf32, #tpu.memory_space<vmem>>, vector<270x128xf32>
    %27 = arith.truncf %26 : vector<270x128xf32> to vector<270x128xbf16>
    %c0_26 = arith.constant 0 : index
    %c0_27 = arith.constant 0 : index
    %c0_28 = arith.constant 0 : index
    %28 = vector.load %arg4[%c0_26, %c0_27, %c0_28] : memref<5x128x128xbf16, #tpu.memory_space<vmem>>, vector<1x128x128xbf16>
    %29 = vector.shape_cast %28 : vector<1x128x128xbf16> to vector<128x128xbf16>
    %cst_29 = arith.constant dense<0.000000e+00> : vector<270x128xf32>
    %30 = tpu.matmul %27, %29, %cst_29 {dimension_numbers = #tpu.dot_dimension_numbers<[1], [0], [0], [1], [0, 0, 1, 1], [], []>} : vector<270x128xbf16>, vector<128x128xbf16>, vector<270x128xf32> -> vector<270x128xf32>
    %c0_30 = arith.constant 0 : index
    %c0_31 = arith.constant 0 : index
    %31 = vector.load %arg15[%c0_30, %c0_31] : memref<274x128xf32, #tpu.memory_space<vmem>>, vector<270x128xf32>
    tpu.vector_store %arg15[%c0_30, %c0_31], %30 {strides = array<i32>} : memref<274x128xf32, #tpu.memory_space<vmem>>, vector<270x128xf32>,
    %c0_32 = arith.constant 0 : index
    %c0_33 = arith.constant 0 : index
    %32 = vector.load %arg15[%c0_32, %c0_33] : memref<274x128xf32, #tpu.memory_space<vmem>>, vector<270x128xf32>
    %c1_34 = arith.constant 1 : index
    %c0_35 = arith.constant 0 : index
    %33 = vector.load %arg14[%c1_34, %c0_35] : memref<274x128xf32, #tpu.memory_space<vmem>>, vector<270x128xf32>
    %34 = arith.truncf %33 : vector<270x128xf32> to vector<270x128xbf16>
    %c1_36 = arith.constant 1 : index
    %c0_37 = arith.constant 0 : index
    %c0_38 = arith.constant 0 : index
    %35 = vector.load %arg4[%c1_36, %c0_37, %c0_38] : memref<5x128x128xbf16, #tpu.memory_space<vmem>>, vector<1x128x128xbf16>
    %36 = vector.shape_cast %35 : vector<1x128x128xbf16> to vector<128x128xbf16>
    %cst_39 = arith.constant dense<0.000000e+00> : vector<270x128xf32>
    %37 = tpu.matmul %34, %36, %cst_39 {dimension_numbers = #tpu.dot_dimension_numbers<[1], [0], [0], [1], [0, 0, 1, 1], [], []>} : vector<270x128xbf16>, vector<128x128xbf16>, vector<270x128xf32> -> vector<270x128xf32>
    %38 = arith.addf %32, %37 : vector<270x128xf32>
    %c0_40 = arith.constant 0 : index
    %c0_41 = arith.constant 0 : index
    %39 = vector.load %arg15[%c0_40, %c0_41] : memref<274x128xf32, #tpu.memory_space<vmem>>, vector<270x128xf32>
    tpu.vector_store %arg15[%c0_40, %c0_41], %38 {strides = array<i32>} : memref<274x128xf32, #tpu.memory_space<vmem>>, vector<270x128xf32>,
    %c0_42 = arith.constant 0 : index
    %c0_43 = arith.constant 0 : index
    %40 = vector.load %arg15[%c0_42, %c0_43] : memref<274x128xf32, #tpu.memory_space<vmem>>, vector<270x128xf32>
    %c2_44 = arith.constant 2 : index
    %c0_45 = arith.constant 0 : index
    %41 = vector.load %arg14[%c2_44, %c0_45] : memref<274x128xf32, #tpu.memory_space<vmem>>, vector<270x128xf32>
    %42 = arith.truncf %41 : vector<270x128xf32> to vector<270x128xbf16>
    %c2_46 = arith.constant 2 : index
    %c0_47 = arith.constant 0 : index
    %c0_48 = arith.constant 0 : index
    %43 = vector.load %arg4[%c2_46, %c0_47, %c0_48] : memref<5x128x128xbf16, #tpu.memory_space<vmem>>, vector<1x128x128xbf16>
    %44 = vector.shape_cast %43 : vector<1x128x128xbf16> to vector<128x128xbf16>
    %cst_49 = arith.constant dense<0.000000e+00> : vector<270x128xf32>
    %45 = tpu.matmul %42, %44, %cst_49 {dimension_numbers = #tpu.dot_dimension_numbers<[1], [0], [0], [1], [0, 0, 1, 1], [], []>} : vector<270x128xbf16>, vector<128x128xbf16>, vector<270x128xf32> -> vector<270x128xf32>
    %46 = arith.addf %40, %45 : vector<270x128xf32>
    %c0_50 = arith.constant 0 : index
    %c0_51 = arith.constant 0 : index
    %47 = vector.load %arg15[%c0_50, %c0_51] : memref<274x128xf32, #tpu.memory_space<vmem>>, vector<270x128xf32>
    tpu.vector_store %arg15[%c0_50, %c0_51], %46 {strides = array<i32>} : memref<274x128xf32, #tpu.memory_space<vmem>>, vector<270x128xf32>,
    %c0_52 = arith.constant 0 : index
    %c0_53 = arith.constant 0 : index
    %48 = vector.load %arg15[%c0_52, %c0_53] : memref<274x128xf32, #tpu.memory_space<vmem>>, vector<270x128xf32>
    %c3 = arith.constant 3 : index
    %c0_54 = arith.constant 0 : index
    %49 = vector.load %arg14[%c3, %c0_54] : memref<274x128xf32, #tpu.memory_space<vmem>>, vector<270x128xf32>
    %50 = arith.truncf %49 : vector<270x128xf32> to vector<270x128xbf16>
    %c3_55 = arith.constant 3 : index
    %c0_56 = arith.constant 0 : index
    %c0_57 = arith.constant 0 : index
    %51 = vector.load %arg4[%c3_55, %c0_56, %c0_57] : memref<5x128x128xbf16, #tpu.memory_space<vmem>>, vector<1x128x128xbf16>
    %52 = vector.shape_cast %51 : vector<1x128x128xbf16> to vector<128x128xbf16>
    %cst_58 = arith.constant dense<0.000000e+00> : vector<270x128xf32>
    %53 = tpu.matmul %50, %52, %cst_58 {dimension_numbers = #tpu.dot_dimension_numbers<[1], [0], [0], [1], [0, 0, 1, 1], [], []>} : vector<270x128xbf16>, vector<128x128xbf16>, vector<270x128xf32> -> vector<270x128xf32>
    %54 = arith.addf %48, %53 : vector<270x128xf32>
    %c0_59 = arith.constant 0 : index
    %c0_60 = arith.constant 0 : index
    %55 = vector.load %arg15[%c0_59, %c0_60] : memref<274x128xf32, #tpu.memory_space<vmem>>, vector<270x128xf32>
    tpu.vector_store %arg15[%c0_59, %c0_60], %54 {strides = array<i32>} : memref<274x128xf32, #tpu.memory_space<vmem>>, vector<270x128xf32>,
    %c0_61 = arith.constant 0 : index
    %c0_62 = arith.constant 0 : index
    %56 = vector.load %arg15[%c0_61, %c0_62] : memref<274x128xf32, #tpu.memory_space<vmem>>, vector<270x128xf32>
    %c4 = arith.constant 4 : index
    %c0_63 = arith.constant 0 : index
    %57 = vector.load %arg14[%c4, %c0_63] : memref<274x128xf32, #tpu.memory_space<vmem>>, vector<270x128xf32>
    %58 = arith.truncf %57 : vector<270x128xf32> to vector<270x128xbf16>
    %c4_64 = arith.constant 4 : index
    %c0_65 = arith.constant 0 : index
    %c0_66 = arith.constant 0 : index
    %59 = vector.load %arg4[%c4_64, %c0_65, %c0_66] : memref<5x128x128xbf16, #tpu.memory_space<vmem>>, vector<1x128x128xbf16>
    %60 = vector.shape_cast %59 : vector<1x128x128xbf16> to vector<128x128xbf16>
    %cst_67 = arith.constant dense<0.000000e+00> : vector<270x128xf32>
    %61 = tpu.matmul %58, %60, %cst_67 {dimension_numbers = #tpu.dot_dimension_numbers<[1], [0], [0], [1], [0, 0, 1, 1], [], []>} : vector<270x128xbf16>, vector<128x128xbf16>, vector<270x128xf32> -> vector<270x128xf32>
    %62 = arith.addf %56, %61 : vector<270x128xf32>
    %c0_68 = arith.constant 0 : index
    %c0_69 = arith.constant 0 : index
    %63 = vector.load %arg15[%c0_68, %c0_69] : memref<274x128xf32, #tpu.memory_space<vmem>>, vector<270x128xf32>
    tpu.vector_store %arg15[%c0_68, %c0_69], %62 {strides = array<i32>} : memref<274x128xf32, #tpu.memory_space<vmem>>, vector<270x128xf32>,
    %c0_70 = arith.constant 0 : index
    %c0_71 = arith.constant 0 : index
    %64 = vector.load %arg15[%c0_70, %c0_71] : memref<274x128xf32, #tpu.memory_space<vmem>>, vector<270x128xf32>
    %c0_72 = arith.constant 0 : index
    %c0_73 = arith.constant 0 : index
    %65 = vector.load %arg5[%c0_72, %c0_73] : memref<1x128xf32, #tpu.memory_space<vmem>>, vector<1x128xf32>
    %66 = vector.broadcast %65 : vector<1x128xf32> to vector<270x128xf32>
    %67 = arith.addf %64, %66 : vector<270x128xf32>
    %cst_74 = arith.constant 0.000000e+00 : f32
    %68 = vector.broadcast %cst_74 : f32 to vector<270x128xf32>
    %69 = arith.maximumf %67, %68 : vector<270x128xf32>
    %c0_75 = arith.constant 0 : index
    %c0_76 = arith.constant 0 : index
    %70 = vector.load %arg15[%c0_75, %c0_76] : memref<274x128xf32, #tpu.memory_space<vmem>>, vector<270x128xf32>
    tpu.vector_store %arg15[%c0_75, %c0_76], %69 {strides = array<i32>} : memref<274x128xf32, #tpu.memory_space<vmem>>, vector<270x128xf32>,
    %c0_77 = arith.constant 0 : index
    %c0_78 = arith.constant 0 : index
    %71 = vector.load %arg16[%c0_77, %c0_78] : memref<96x128xf32, #tpu.memory_space<vmem>>, vector<2x128xf32>
    tpu.vector_store %arg16[%c0_77, %c0_78], %0 {strides = array<i32>} : memref<96x128xf32, #tpu.memory_space<vmem>>, vector<2x128xf32>,
    %c0_79 = arith.constant 0 : index
    %c0_80 = arith.constant 0 : index
    %72 = tpu.strided_load %arg15[%c0_79, %c0_80] {strides = array<i32: 3, 1>} : memref<274x128xf32, #tpu.memory_space<vmem>>, vector<44x128xf32>
    %c1_81 = arith.constant 1 : index
    %c0_82 = arith.constant 0 : index
    %73 = tpu.strided_load %arg15[%c1_81, %c0_82] {strides = array<i32: 3, 1>} : memref<274x128xf32, #tpu.memory_space<vmem>>, vector<44x128xf32>
    %74 = arith.maximumf %72, %73 : vector<44x128xf32>
    %c2_83 = arith.constant 2 : index
    %c0_84 = arith.constant 0 : index
    %75 = tpu.strided_load %arg15[%c2_83, %c0_84] {strides = array<i32: 3, 1>} : memref<274x128xf32, #tpu.memory_space<vmem>>, vector<44x128xf32>
    %76 = arith.maximumf %74, %75 : vector<44x128xf32>
    %c2_85 = arith.constant 2 : index
    %c0_86 = arith.constant 0 : index
    %77 = vector.load %arg16[%c2_85, %c0_86] : memref<96x128xf32, #tpu.memory_space<vmem>>, vector<44x128xf32>
    tpu.vector_store %arg16[%c2_85, %c0_86], %76 {strides = array<i32>} : memref<96x128xf32, #tpu.memory_space<vmem>>, vector<44x128xf32>,
    %c46 = arith.constant 46 : index
    %c0_87 = arith.constant 0 : index
    %78 = vector.load %arg16[%c46, %c0_87] : memref<96x128xf32, #tpu.memory_space<vmem>>, vector<2x128xf32>
    tpu.vector_store %arg16[%c46, %c0_87], %0 {strides = array<i32>} : memref<96x128xf32, #tpu.memory_space<vmem>>, vector<2x128xf32>,
    %c48 = arith.constant 48 : index
    %c0_88 = arith.constant 0 : index
    %79 = vector.load %arg16[%c48, %c0_88] : memref<96x128xf32, #tpu.memory_space<vmem>>, vector<2x128xf32>
    tpu.vector_store %arg16[%c48, %c0_88], %0 {strides = array<i32>} : memref<96x128xf32, #tpu.memory_space<vmem>>, vector<2x128xf32>,
    %c137_89 = arith.constant 137 : index
    %c0_90 = arith.constant 0 : index
    %80 = tpu.strided_load %arg15[%c137_89, %c0_90] {strides = array<i32: 3, 1>} : memref<274x128xf32, #tpu.memory_space<vmem>>, vector<44x128xf32>
    %c138 = arith.constant 138 : index
    %c0_91 = arith.constant 0 : index
    %81 = tpu.strided_load %arg15[%c138, %c0_91] {strides = array<i32: 3, 1>} : memref<274x128xf32, #tpu.memory_space<vmem>>, vector<44x128xf32>
    %82 = arith.maximumf %80, %81 : vector<44x128xf32>
    %c139_92 = arith.constant 139 : index
    %c0_93 = arith.constant 0 : index
    %83 = tpu.strided_load %arg15[%c139_92, %c0_93] {strides = array<i32: 3, 1>} : memref<274x128xf32, #tpu.memory_space<vmem>>, vector<44x128xf32>
    %84 = arith.maximumf %82, %83 : vector<44x128xf32>
    %c50 = arith.constant 50 : index
    %c0_94 = arith.constant 0 : index
    %85 = vector.load %arg16[%c50, %c0_94] : memref<96x128xf32, #tpu.memory_space<vmem>>, vector<44x128xf32>
    tpu.vector_store %arg16[%c50, %c0_94], %84 {strides = array<i32>} : memref<96x128xf32, #tpu.memory_space<vmem>>, vector<44x128xf32>,
    %c94 = arith.constant 94 : index
    %c0_95 = arith.constant 0 : index
    %86 = vector.load %arg16[%c94, %c0_95] : memref<96x128xf32, #tpu.memory_space<vmem>>, vector<2x128xf32>
    tpu.vector_store %arg16[%c94, %c0_95], %0 {strides = array<i32>} : memref<96x128xf32, #tpu.memory_space<vmem>>, vector<2x128xf32>,
    %c0_96 = arith.constant 0 : index
    %c0_97 = arith.constant 0 : index
    %87 = vector.load %arg16[%c0_96, %c0_97] : memref<96x128xf32, #tpu.memory_space<vmem>>, vector<92x128xf32>
    %88 = arith.truncf %87 : vector<92x128xf32> to vector<92x128xbf16>
    %c0_98 = arith.constant 0 : index
    %c0_99 = arith.constant 0 : index
    %c0_100 = arith.constant 0 : index
    %89 = vector.load %arg6[%c0_98, %c0_99, %c0_100] : memref<5x128x128xbf16, #tpu.memory_space<vmem>>, vector<1x128x128xbf16>
    %90 = vector.shape_cast %89 : vector<1x128x128xbf16> to vector<128x128xbf16>
    %cst_101 = arith.constant dense<0.000000e+00> : vector<92x128xf32>
    %91 = tpu.matmul %88, %90, %cst_101 {dimension_numbers = #tpu.dot_dimension_numbers<[1], [0], [0], [1], [0, 0, 1, 1], [], []>} : vector<92x128xbf16>, vector<128x128xbf16>, vector<92x128xf32> -> vector<92x128xf32>
    %c0_102 = arith.constant 0 : index
    %c0_103 = arith.constant 0 : index
    %92 = vector.load %arg17[%c0_102, %c0_103] : memref<96x128xf32, #tpu.memory_space<vmem>>, vector<92x128xf32>
    tpu.vector_store %arg17[%c0_102, %c0_103], %91 {strides = array<i32>} : memref<96x128xf32, #tpu.memory_space<vmem>>, vector<92x128xf32>,
    %c0_104 = arith.constant 0 : index
    %c0_105 = arith.constant 0 : index
    %93 = vector.load %arg17[%c0_104, %c0_105] : memref<96x128xf32, #tpu.memory_space<vmem>>, vector<92x128xf32>
    %c1_106 = arith.constant 1 : index
    %c0_107 = arith.constant 0 : index
    %94 = vector.load %arg16[%c1_106, %c0_107] : memref<96x128xf32, #tpu.memory_space<vmem>>, vector<92x128xf32>
    %95 = arith.truncf %94 : vector<92x128xf32> to vector<92x128xbf16>
    %c1_108 = arith.constant 1 : index
    %c0_109 = arith.constant 0 : index
    %c0_110 = arith.constant 0 : index
    %96 = vector.load %arg6[%c1_108, %c0_109, %c0_110] : memref<5x128x128xbf16, #tpu.memory_space<vmem>>, vector<1x128x128xbf16>
    %97 = vector.shape_cast %96 : vector<1x128x128xbf16> to vector<128x128xbf16>
    %cst_111 = arith.constant dense<0.000000e+00> : vector<92x128xf32>
    %98 = tpu.matmul %95, %97, %cst_111 {dimension_numbers = #tpu.dot_dimension_numbers<[1], [0], [0], [1], [0, 0, 1, 1], [], []>} : vector<92x128xbf16>, vector<128x128xbf16>, vector<92x128xf32> -> vector<92x128xf32>
    %99 = arith.addf %93, %98 : vector<92x128xf32>
    %c0_112 = arith.constant 0 : index
    %c0_113 = arith.constant 0 : index
    %100 = vector.load %arg17[%c0_112, %c0_113] : memref<96x128xf32, #tpu.memory_space<vmem>>, vector<92x128xf32>
    tpu.vector_store %arg17[%c0_112, %c0_113], %99 {strides = array<i32>} : memref<96x128xf32, #tpu.memory_space<vmem>>, vector<92x128xf32>,
    %c0_114 = arith.constant 0 : index
    %c0_115 = arith.constant 0 : index
    %101 = vector.load %arg17[%c0_114, %c0_115] : memref<96x128xf32, #tpu.memory_space<vmem>>, vector<92x128xf32>
    %c2_116 = arith.constant 2 : index
    %c0_117 = arith.constant 0 : index
    %102 = vector.load %arg16[%c2_116, %c0_117] : memref<96x128xf32, #tpu.memory_space<vmem>>, vector<92x128xf32>
    %103 = arith.truncf %102 : vector<92x128xf32> to vector<92x128xbf16>
    %c2_118 = arith.constant 2 : index
    %c0_119 = arith.constant 0 : index
    %c0_120 = arith.constant 0 : index
    %104 = vector.load %arg6[%c2_118, %c0_119, %c0_120] : memref<5x128x128xbf16, #tpu.memory_space<vmem>>, vector<1x128x128xbf16>
    %105 = vector.shape_cast %104 : vector<1x128x128xbf16> to vector<128x128xbf16>
    %cst_121 = arith.constant dense<0.000000e+00> : vector<92x128xf32>
    %106 = tpu.matmul %103, %105, %cst_121 {dimension_numbers = #tpu.dot_dimension_numbers<[1], [0], [0], [1], [0, 0, 1, 1], [], []>} : vector<92x128xbf16>, vector<128x128xbf16>, vector<92x128xf32> -> vector<92x128xf32>
    %107 = arith.addf %101, %106 : vector<92x128xf32>
    %c0_122 = arith.constant 0 : index
    %c0_123 = arith.constant 0 : index
    %108 = vector.load %arg17[%c0_122, %c0_123] : memref<96x128xf32, #tpu.memory_space<vmem>>, vector<92x128xf32>
    tpu.vector_store %arg17[%c0_122, %c0_123], %107 {strides = array<i32>} : memref<96x128xf32, #tpu.memory_space<vmem>>, vector<92x128xf32>,
    %c0_124 = arith.constant 0 : index
    %c0_125 = arith.constant 0 : index
    %109 = vector.load %arg17[%c0_124, %c0_125] : memref<96x128xf32, #tpu.memory_space<vmem>>, vector<92x128xf32>
    %c3_126 = arith.constant 3 : index
    %c0_127 = arith.constant 0 : index
    %110 = vector.load %arg16[%c3_126, %c0_127] : memref<96x128xf32, #tpu.memory_space<vmem>>, vector<92x128xf32>
    %111 = arith.truncf %110 : vector<92x128xf32> to vector<92x128xbf16>
    %c3_128 = arith.constant 3 : index
    %c0_129 = arith.constant 0 : index
    %c0_130 = arith.constant 0 : index
    %112 = vector.load %arg6[%c3_128, %c0_129, %c0_130] : memref<5x128x128xbf16, #tpu.memory_space<vmem>>, vector<1x128x128xbf16>
    %113 = vector.shape_cast %112 : vector<1x128x128xbf16> to vector<128x128xbf16>
    %cst_131 = arith.constant dense<0.000000e+00> : vector<92x128xf32>
    %114 = tpu.matmul %111, %113, %cst_131 {dimension_numbers = #tpu.dot_dimension_numbers<[1], [0], [0], [1], [0, 0, 1, 1], [], []>} : vector<92x128xbf16>, vector<128x128xbf16>, vector<92x128xf32> -> vector<92x128xf32>
    %115 = arith.addf %109, %114 : vector<92x128xf32>
    %c0_132 = arith.constant 0 : index
    %c0_133 = arith.constant 0 : index
    %116 = vector.load %arg17[%c0_132, %c0_133] : memref<96x128xf32, #tpu.memory_space<vmem>>, vector<92x128xf32>
    tpu.vector_store %arg17[%c0_132, %c0_133], %115 {strides = array<i32>} : memref<96x128xf32, #tpu.memory_space<vmem>>, vector<92x128xf32>,
    %c0_134 = arith.constant 0 : index
    %c0_135 = arith.constant 0 : index
    %117 = vector.load %arg17[%c0_134, %c0_135] : memref<96x128xf32, #tpu.memory_space<vmem>>, vector<92x128xf32>
    %c4_136 = arith.constant 4 : index
    %c0_137 = arith.constant 0 : index
    %118 = vector.load %arg16[%c4_136, %c0_137] : memref<96x128xf32, #tpu.memory_space<vmem>>, vector<92x128xf32>
    %119 = arith.truncf %118 : vector<92x128xf32> to vector<92x128xbf16>
    %c4_138 = arith.constant 4 : index
    %c0_139 = arith.constant 0 : index
    %c0_140 = arith.constant 0 : index
    %120 = vector.load %arg6[%c4_138, %c0_139, %c0_140] : memref<5x128x128xbf16, #tpu.memory_space<vmem>>, vector<1x128x128xbf16>
    %121 = vector.shape_cast %120 : vector<1x128x128xbf16> to vector<128x128xbf16>
    %cst_141 = arith.constant dense<0.000000e+00> : vector<92x128xf32>
    %122 = tpu.matmul %119, %121, %cst_141 {dimension_numbers = #tpu.dot_dimension_numbers<[1], [0], [0], [1], [0, 0, 1, 1], [], []>} : vector<92x128xbf16>, vector<128x128xbf16>, vector<92x128xf32> -> vector<92x128xf32>
    %123 = arith.addf %117, %122 : vector<92x128xf32>
    %c0_142 = arith.constant 0 : index
    %c0_143 = arith.constant 0 : index
    %124 = vector.load %arg17[%c0_142, %c0_143] : memref<96x128xf32, #tpu.memory_space<vmem>>, vector<92x128xf32>
    tpu.vector_store %arg17[%c0_142, %c0_143], %123 {strides = array<i32>} : memref<96x128xf32, #tpu.memory_space<vmem>>, vector<92x128xf32>,
    %c0_144 = arith.constant 0 : index
    %c0_145 = arith.constant 0 : index
    %125 = vector.load %arg17[%c0_144, %c0_145] : memref<96x128xf32, #tpu.memory_space<vmem>>, vector<92x128xf32>
    %c0_146 = arith.constant 0 : index
    %c0_147 = arith.constant 0 : index
    %126 = vector.load %arg7[%c0_146, %c0_147] : memref<1x128xf32, #tpu.memory_space<vmem>>, vector<1x128xf32>
    %127 = vector.broadcast %126 : vector<1x128xf32> to vector<92x128xf32>
    %128 = arith.addf %125, %127 : vector<92x128xf32>
    %cst_148 = arith.constant 0.000000e+00 : f32
    %129 = vector.broadcast %cst_148 : f32 to vector<92x128xf32>
    %130 = arith.maximumf %128, %129 : vector<92x128xf32>
    %c0_149 = arith.constant 0 : index
    %c0_150 = arith.constant 0 : index
    %131 = vector.load %arg17[%c0_149, %c0_150] : memref<96x128xf32, #tpu.memory_space<vmem>>, vector<92x128xf32>
    tpu.vector_store %arg17[%c0_149, %c0_150], %130 {strides = array<i32>} : memref<96x128xf32, #tpu.memory_space<vmem>>, vector<92x128xf32>,
    %c0_151 = arith.constant 0 : index
    %c0_152 = arith.constant 0 : index
    %132 = tpu.strided_load %arg17[%c0_151, %c0_152] {strides = array<i32: 3, 1>} : memref<96x128xf32, #tpu.memory_space<vmem>>, vector<14x128xf32>
    %c1_153 = arith.constant 1 : index
    %c0_154 = arith.constant 0 : index
    %133 = tpu.strided_load %arg17[%c1_153, %c0_154] {strides = array<i32: 3, 1>} : memref<96x128xf32, #tpu.memory_space<vmem>>, vector<14x128xf32>
    %134 = arith.maximumf %132, %133 : vector<14x128xf32>
    %c2_155 = arith.constant 2 : index
    %c0_156 = arith.constant 0 : index
    %135 = tpu.strided_load %arg17[%c2_155, %c0_156] {strides = array<i32: 3, 1>} : memref<96x128xf32, #tpu.memory_space<vmem>>, vector<14x128xf32>
    %136 = arith.maximumf %134, %135 : vector<14x128xf32>
    %c0_157 = arith.constant 0 : index
    %c0_158 = arith.constant 0 : index
    %137 = vector.load %arg18[%c0_157, %c0_158] : memref<28x128xf32, #tpu.memory_space<vmem>>, vector<14x128xf32>
    tpu.vector_store %arg18[%c0_157, %c0_158], %136 {strides = array<i32>} : memref<28x128xf32, #tpu.memory_space<vmem>>, vector<14x128xf32>,
    %c48_159 = arith.constant 48 : index
    %c0_160 = arith.constant 0 : index
    %138 = tpu.strided_load %arg17[%c48_159, %c0_160] {strides = array<i32: 3, 1>} : memref<96x128xf32, #tpu.memory_space<vmem>>, vector<14x128xf32>
    %c49 = arith.constant 49 : index
    %c0_161 = arith.constant 0 : index
    %139 = tpu.strided_load %arg17[%c49, %c0_161] {strides = array<i32: 3, 1>} : memref<96x128xf32, #tpu.memory_space<vmem>>, vector<14x128xf32>
    %140 = arith.maximumf %138, %139 : vector<14x128xf32>
    %c50_162 = arith.constant 50 : index
    %c0_163 = arith.constant 0 : index
    %141 = tpu.strided_load %arg17[%c50_162, %c0_163] {strides = array<i32: 3, 1>} : memref<96x128xf32, #tpu.memory_space<vmem>>, vector<14x128xf32>
    %142 = arith.maximumf %140, %141 : vector<14x128xf32>
    %c14 = arith.constant 14 : index
    %c0_164 = arith.constant 0 : index
    %143 = vector.load %arg18[%c14, %c0_164] : memref<28x128xf32, #tpu.memory_space<vmem>>, vector<14x128xf32>
    tpu.vector_store %arg18[%c14, %c0_164], %142 {strides = array<i32>} : memref<28x128xf32, #tpu.memory_space<vmem>>, vector<14x128xf32>,
    %c0_165 = arith.constant 0 : index
    %c0_166 = arith.constant 0 : index
    %144 = tpu.strided_load %arg18[%c0_165, %c0_166] {strides = array<i32: 14, 1>} : memref<28x128xf32, #tpu.memory_space<vmem>>, vector<2x128xf32>
    %145 = arith.truncf %144 : vector<2x128xf32> to vector<2x128xbf16>
    %c0_167 = arith.constant 0 : index
    %c0_168 = arith.constant 0 : index
    %c0_169 = arith.constant 0 : index
    %146 = vector.load %arg8[%c0_167, %c0_168, %c0_169] : memref<14x128x512xbf16, #tpu.memory_space<vmem>>, vector<1x128x512xbf16>
    %147 = vector.shape_cast %146 : vector<1x128x512xbf16> to vector<128x512xbf16>
    %cst_170 = arith.constant dense<0.000000e+00> : vector<2x512xf32>
    %148 = tpu.matmul %145, %147, %cst_170 {dimension_numbers = #tpu.dot_dimension_numbers<[1], [0], [0], [1], [0, 0, 1, 1], [], []>} : vector<2x128xbf16>, vector<128x512xbf16>, vector<2x512xf32> -> vector<2x512xf32>
    %c1_171 = arith.constant 1 : index
    %c0_172 = arith.constant 0 : index
    %149 = tpu.strided_load %arg18[%c1_171, %c0_172] {strides = array<i32: 14, 1>} : memref<28x128xf32, #tpu.memory_space<vmem>>, vector<2x128xf32>
    %150 = arith.truncf %149 : vector<2x128xf32> to vector<2x128xbf16>
    %c1_173 = arith.constant 1 : index
    %c0_174 = arith.constant 0 : index
    %c0_175 = arith.constant 0 : index
    %151 = vector.load %arg8[%c1_173, %c0_174, %c0_175] : memref<14x128x512xbf16, #tpu.memory_space<vmem>>, vector<1x128x512xbf16>
    %152 = vector.shape_cast %151 : vector<1x128x512xbf16> to vector<128x512xbf16>
    %cst_176 = arith.constant dense<0.000000e+00> : vector<2x512xf32>
    %153 = tpu.matmul %150, %152, %cst_176 {dimension_numbers = #tpu.dot_dimension_numbers<[1], [0], [0], [1], [0, 0, 1, 1], [], []>} : vector<2x128xbf16>, vector<128x512xbf16>, vector<2x512xf32> -> vector<2x512xf32>
    %154 = arith.addf %148, %153 : vector<2x512xf32>
    %c2_177 = arith.constant 2 : index
    %c0_178 = arith.constant 0 : index
    %155 = tpu.strided_load %arg18[%c2_177, %c0_178] {strides = array<i32: 14, 1>} : memref<28x128xf32, #tpu.memory_space<vmem>>, vector<2x128xf32>
    %156 = arith.truncf %155 : vector<2x128xf32> to vector<2x128xbf16>
    %c2_179 = arith.constant 2 : index
    %c0_180 = arith.constant 0 : index
    %c0_181 = arith.constant 0 : index
    %157 = vector.load %arg8[%c2_179, %c0_180, %c0_181] : memref<14x128x512xbf16, #tpu.memory_space<vmem>>, vector<1x128x512xbf16>
    %158 = vector.shape_cast %157 : vector<1x128x512xbf16> to vector<128x512xbf16>
    %cst_182 = arith.constant dense<0.000000e+00> : vector<2x512xf32>
    %159 = tpu.matmul %156, %158, %cst_182 {dimension_numbers = #tpu.dot_dimension_numbers<[1], [0], [0], [1], [0, 0, 1, 1], [], []>} : vector<2x128xbf16>, vector<128x512xbf16>, vector<2x512xf32> -> vector<2x512xf32>
    %160 = arith.addf %154, %159 : vector<2x512xf32>
    %c3_183 = arith.constant 3 : index
    %c0_184 = arith.constant 0 : index
    %161 = tpu.strided_load %arg18[%c3_183, %c0_184] {strides = array<i32: 14, 1>} : memref<28x128xf32, #tpu.memory_space<vmem>>, vector<2x128xf32>
    %162 = arith.truncf %161 : vector<2x128xf32> to vector<2x128xbf16>
    %c3_185 = arith.constant 3 : index
    %c0_186 = arith.constant 0 : index
    %c0_187 = arith.constant 0 : index
    %163 = vector.load %arg8[%c3_185, %c0_186, %c0_187] : memref<14x128x512xbf16, #tpu.memory_space<vmem>>, vector<1x128x512xbf16>
    %164 = vector.shape_cast %163 : vector<1x128x512xbf16> to vector<128x512xbf16>
    %cst_188 = arith.constant dense<0.000000e+00> : vector<2x512xf32>
    %165 = tpu.matmul %162, %164, %cst_188 {dimension_numbers = #tpu.dot_dimension_numbers<[1], [0], [0], [1], [0, 0, 1, 1], [], []>} : vector<2x128xbf16>, vector<128x512xbf16>, vector<2x512xf32> -> vector<2x512xf32>
    %166 = arith.addf %160, %165 : vector<2x512xf32>
    %c4_189 = arith.constant 4 : index
    %c0_190 = arith.constant 0 : index
    %167 = tpu.strided_load %arg18[%c4_189, %c0_190] {strides = array<i32: 14, 1>} : memref<28x128xf32, #tpu.memory_space<vmem>>, vector<2x128xf32>
    %168 = arith.truncf %167 : vector<2x128xf32> to vector<2x128xbf16>
    %c4_191 = arith.constant 4 : index
    %c0_192 = arith.constant 0 : index
    %c0_193 = arith.constant 0 : index
    %169 = vector.load %arg8[%c4_191, %c0_192, %c0_193] : memref<14x128x512xbf16, #tpu.memory_space<vmem>>, vector<1x128x512xbf16>
    %170 = vector.shape_cast %169 : vector<1x128x512xbf16> to vector<128x512xbf16>
    %cst_194 = arith.constant dense<0.000000e+00> : vector<2x512xf32>
    %171 = tpu.matmul %168, %170, %cst_194 {dimension_numbers = #tpu.dot_dimension_numbers<[1], [0], [0], [1], [0, 0, 1, 1], [], []>} : vector<2x128xbf16>, vector<128x512xbf16>, vector<2x512xf32> -> vector<2x512xf32>
    %172 = arith.addf %166, %171 : vector<2x512xf32>
    %c5 = arith.constant 5 : index
    %c0_195 = arith.constant 0 : index
    %173 = tpu.strided_load %arg18[%c5, %c0_195] {strides = array<i32: 14, 1>} : memref<28x128xf32, #tpu.memory_space<vmem>>, vector<2x128xf32>
    %174 = arith.truncf %173 : vector<2x128xf32> to vector<2x128xbf16>
    %c5_196 = arith.constant 5 : index
    %c0_197 = arith.constant 0 : index
    %c0_198 = arith.constant 0 : index
    %175 = vector.load %arg8[%c5_196, %c0_197, %c0_198] : memref<14x128x512xbf16, #tpu.memory_space<vmem>>, vector<1x128x512xbf16>
    %176 = vector.shape_cast %175 : vector<1x128x512xbf16> to vector<128x512xbf16>
    %cst_199 = arith.constant dense<0.000000e+00> : vector<2x512xf32>
    %177 = tpu.matmul %174, %176, %cst_199 {dimension_numbers = #tpu.dot_dimension_numbers<[1], [0], [0], [1], [0, 0, 1, 1], [], []>} : vector<2x128xbf16>, vector<128x512xbf16>, vector<2x512xf32> -> vector<2x512xf32>
    %178 = arith.addf %172, %177 : vector<2x512xf32>
    %c6 = arith.constant 6 : index
    %c0_200 = arith.constant 0 : index
    %179 = tpu.strided_load %arg18[%c6, %c0_200] {strides = array<i32: 14, 1>} : memref<28x128xf32, #tpu.memory_space<vmem>>, vector<2x128xf32>
    %180 = arith.truncf %179 : vector<2x128xf32> to vector<2x128xbf16>
    %c6_201 = arith.constant 6 : index
    %c0_202 = arith.constant 0 : index
    %c0_203 = arith.constant 0 : index
    %181 = vector.load %arg8[%c6_201, %c0_202, %c0_203] : memref<14x128x512xbf16, #tpu.memory_space<vmem>>, vector<1x128x512xbf16>
    %182 = vector.shape_cast %181 : vector<1x128x512xbf16> to vector<128x512xbf16>
    %cst_204 = arith.constant dense<0.000000e+00> : vector<2x512xf32>
    %183 = tpu.matmul %180, %182, %cst_204 {dimension_numbers = #tpu.dot_dimension_numbers<[1], [0], [0], [1], [0, 0, 1, 1], [], []>} : vector<2x128xbf16>, vector<128x512xbf16>, vector<2x512xf32> -> vector<2x512xf32>
    %184 = arith.addf %178, %183 : vector<2x512xf32>
    %c7 = arith.constant 7 : index
    %c0_205 = arith.constant 0 : index
    %185 = tpu.strided_load %arg18[%c7, %c0_205] {strides = array<i32: 14, 1>} : memref<28x128xf32, #tpu.memory_space<vmem>>, vector<2x128xf32>
    %186 = arith.truncf %185 : vector<2x128xf32> to vector<2x128xbf16>
    %c7_206 = arith.constant 7 : index
    %c0_207 = arith.constant 0 : index
    %c0_208 = arith.constant 0 : index
    %187 = vector.load %arg8[%c7_206, %c0_207, %c0_208] : memref<14x128x512xbf16, #tpu.memory_space<vmem>>, vector<1x128x512xbf16>
    %188 = vector.shape_cast %187 : vector<1x128x512xbf16> to vector<128x512xbf16>
    %cst_209 = arith.constant dense<0.000000e+00> : vector<2x512xf32>
    %189 = tpu.matmul %186, %188, %cst_209 {dimension_numbers = #tpu.dot_dimension_numbers<[1], [0], [0], [1], [0, 0, 1, 1], [], []>} : vector<2x128xbf16>, vector<128x512xbf16>, vector<2x512xf32> -> vector<2x512xf32>
    %190 = arith.addf %184, %189 : vector<2x512xf32>
    %c8 = arith.constant 8 : index
    %c0_210 = arith.constant 0 : index
    %191 = tpu.strided_load %arg18[%c8, %c0_210] {strides = array<i32: 14, 1>} : memref<28x128xf32, #tpu.memory_space<vmem>>, vector<2x128xf32>
    %192 = arith.truncf %191 : vector<2x128xf32> to vector<2x128xbf16>
    %c8_211 = arith.constant 8 : index
    %c0_212 = arith.constant 0 : index
    %c0_213 = arith.constant 0 : index
    %193 = vector.load %arg8[%c8_211, %c0_212, %c0_213] : memref<14x128x512xbf16, #tpu.memory_space<vmem>>, vector<1x128x512xbf16>
    %194 = vector.shape_cast %193 : vector<1x128x512xbf16> to vector<128x512xbf16>
    %cst_214 = arith.constant dense<0.000000e+00> : vector<2x512xf32>
    %195 = tpu.matmul %192, %194, %cst_214 {dimension_numbers = #tpu.dot_dimension_numbers<[1], [0], [0], [1], [0, 0, 1, 1], [], []>} : vector<2x128xbf16>, vector<128x512xbf16>, vector<2x512xf32> -> vector<2x512xf32>
    %196 = arith.addf %190, %195 : vector<2x512xf32>
    %c9 = arith.constant 9 : index
    %c0_215 = arith.constant 0 : index
    %197 = tpu.strided_load %arg18[%c9, %c0_215] {strides = array<i32: 14, 1>} : memref<28x128xf32, #tpu.memory_space<vmem>>, vector<2x128xf32>
    %198 = arith.truncf %197 : vector<2x128xf32> to vector<2x128xbf16>
    %c9_216 = arith.constant 9 : index
    %c0_217 = arith.constant 0 : index
    %c0_218 = arith.constant 0 : index
    %199 = vector.load %arg8[%c9_216, %c0_217, %c0_218] : memref<14x128x512xbf16, #tpu.memory_space<vmem>>, vector<1x128x512xbf16>
    %200 = vector.shape_cast %199 : vector<1x128x512xbf16> to vector<128x512xbf16>
    %cst_219 = arith.constant dense<0.000000e+00> : vector<2x512xf32>
    %201 = tpu.matmul %198, %200, %cst_219 {dimension_numbers = #tpu.dot_dimension_numbers<[1], [0], [0], [1], [0, 0, 1, 1], [], []>} : vector<2x128xbf16>, vector<128x512xbf16>, vector<2x512xf32> -> vector<2x512xf32>
    %202 = arith.addf %196, %201 : vector<2x512xf32>
    %c10 = arith.constant 10 : index
    %c0_220 = arith.constant 0 : index
    %203 = tpu.strided_load %arg18[%c10, %c0_220] {strides = array<i32: 14, 1>} : memref<28x128xf32, #tpu.memory_space<vmem>>, vector<2x128xf32>
    %204 = arith.truncf %203 : vector<2x128xf32> to vector<2x128xbf16>
    %c10_221 = arith.constant 10 : index
    %c0_222 = arith.constant 0 : index
    %c0_223 = arith.constant 0 : index
    %205 = vector.load %arg8[%c10_221, %c0_222, %c0_223] : memref<14x128x512xbf16, #tpu.memory_space<vmem>>, vector<1x128x512xbf16>
    %206 = vector.shape_cast %205 : vector<1x128x512xbf16> to vector<128x512xbf16>
    %cst_224 = arith.constant dense<0.000000e+00> : vector<2x512xf32>
    %207 = tpu.matmul %204, %206, %cst_224 {dimension_numbers = #tpu.dot_dimension_numbers<[1], [0], [0], [1], [0, 0, 1, 1], [], []>} : vector<2x128xbf16>, vector<128x512xbf16>, vector<2x512xf32> -> vector<2x512xf32>
    %208 = arith.addf %202, %207 : vector<2x512xf32>
    %c11 = arith.constant 11 : index
    %c0_225 = arith.constant 0 : index
    %209 = tpu.strided_load %arg18[%c11, %c0_225] {strides = array<i32: 14, 1>} : memref<28x128xf32, #tpu.memory_space<vmem>>, vector<2x128xf32>
    %210 = arith.truncf %209 : vector<2x128xf32> to vector<2x128xbf16>
    %c11_226 = arith.constant 11 : index
    %c0_227 = arith.constant 0 : index
    %c0_228 = arith.constant 0 : index
    %211 = vector.load %arg8[%c11_226, %c0_227, %c0_228] : memref<14x128x512xbf16, #tpu.memory_space<vmem>>, vector<1x128x512xbf16>
    %212 = vector.shape_cast %211 : vector<1x128x512xbf16> to vector<128x512xbf16>
    %cst_229 = arith.constant dense<0.000000e+00> : vector<2x512xf32>
    %213 = tpu.matmul %210, %212, %cst_229 {dimension_numbers = #tpu.dot_dimension_numbers<[1], [0], [0], [1], [0, 0, 1, 1], [], []>} : vector<2x128xbf16>, vector<128x512xbf16>, vector<2x512xf32> -> vector<2x512xf32>
    %214 = arith.addf %208, %213 : vector<2x512xf32>
    %c12 = arith.constant 12 : index
    %c0_230 = arith.constant 0 : index
    %215 = tpu.strided_load %arg18[%c12, %c0_230] {strides = array<i32: 14, 1>} : memref<28x128xf32, #tpu.memory_space<vmem>>, vector<2x128xf32>
    %216 = arith.truncf %215 : vector<2x128xf32> to vector<2x128xbf16>
    %c12_231 = arith.constant 12 : index
    %c0_232 = arith.constant 0 : index
    %c0_233 = arith.constant 0 : index
    %217 = vector.load %arg8[%c12_231, %c0_232, %c0_233] : memref<14x128x512xbf16, #tpu.memory_space<vmem>>, vector<1x128x512xbf16>
    %218 = vector.shape_cast %217 : vector<1x128x512xbf16> to vector<128x512xbf16>
    %cst_234 = arith.constant dense<0.000000e+00> : vector<2x512xf32>
    %219 = tpu.matmul %216, %218, %cst_234 {dimension_numbers = #tpu.dot_dimension_numbers<[1], [0], [0], [1], [0, 0, 1, 1], [], []>} : vector<2x128xbf16>, vector<128x512xbf16>, vector<2x512xf32> -> vector<2x512xf32>
    %220 = arith.addf %214, %219 : vector<2x512xf32>
    %c13 = arith.constant 13 : index
    %c0_235 = arith.constant 0 : index
    %221 = tpu.strided_load %arg18[%c13, %c0_235] {strides = array<i32: 14, 1>} : memref<28x128xf32, #tpu.memory_space<vmem>>, vector<2x128xf32>
    %222 = arith.truncf %221 : vector<2x128xf32> to vector<2x128xbf16>
    %c13_236 = arith.constant 13 : index
    %c0_237 = arith.constant 0 : index
    %c0_238 = arith.constant 0 : index
    %223 = vector.load %arg8[%c13_236, %c0_237, %c0_238] : memref<14x128x512xbf16, #tpu.memory_space<vmem>>, vector<1x128x512xbf16>
    %224 = vector.shape_cast %223 : vector<1x128x512xbf16> to vector<128x512xbf16>
    %cst_239 = arith.constant dense<0.000000e+00> : vector<2x512xf32>
    %225 = tpu.matmul %222, %224, %cst_239 {dimension_numbers = #tpu.dot_dimension_numbers<[1], [0], [0], [1], [0, 0, 1, 1], [], []>} : vector<2x128xbf16>, vector<128x512xbf16>, vector<2x512xf32> -> vector<2x512xf32>
    %226 = arith.addf %220, %225 : vector<2x512xf32>
    %c0_240 = arith.constant 0 : index
    %c0_241 = arith.constant 0 : index
    %227 = vector.load %arg9[%c0_240, %c0_241] : memref<1x512xf32, #tpu.memory_space<vmem>>, vector<1x512xf32>
    %228 = vector.broadcast %227 : vector<1x512xf32> to vector<2x512xf32>
    %229 = arith.addf %226, %228 : vector<2x512xf32>
    %cst_242 = arith.constant 0.000000e+00 : f32
    %230 = vector.broadcast %cst_242 : f32 to vector<2x512xf32>
    %231 = arith.maximumf %229, %230 : vector<2x512xf32>
    %232 = arith.truncf %231 : vector<2x512xf32> to vector<2x512xbf16>
    %c0_243 = arith.constant 0 : index
    %c0_244 = arith.constant 0 : index
    %233 = vector.load %arg10[%c0_243, %c0_244] : memref<512x2048xbf16, #tpu.memory_space<vmem>>, vector<512x2048xbf16>
    %cst_245 = arith.constant dense<0.000000e+00> : vector<2x2048xf32>
    %234 = tpu.matmul %232, %233, %cst_245 {dimension_numbers = #tpu.dot_dimension_numbers<[1], [0], [0], [1], [0, 0, 1, 1], [], []>} : vector<2x512xbf16>, vector<512x2048xbf16>, vector<2x2048xf32> -> vector<2x2048xf32>
    %c0_246 = arith.constant 0 : index
    %c0_247 = arith.constant 0 : index
    %235 = vector.load %arg11[%c0_246, %c0_247] : memref<1x2048xf32, #tpu.memory_space<vmem>>, vector<1x2048xf32>
    %236 = vector.broadcast %235 : vector<1x2048xf32> to vector<2x2048xf32>
    %237 = arith.addf %234, %236 : vector<2x2048xf32>
    %c0_248 = arith.constant 0 : index
    %c0_249 = arith.constant 0 : index
    %238 = vector.load %arg12[%c0_248, %c0_249] : memref<2x2048xf32, #tpu.memory_space<vmem>>, vector<2x2048xf32>
    tpu.vector_store %arg12[%c0_248, %c0_249], %237 {strides = array<i32>} : memref<2x2048xf32, #tpu.memory_space<vmem>>, vector<2x2048xf32>,
    return
  }
  func.func @transform_0(%arg0: i32) -> (i32, i32) {
    %c0_i32 = arith.constant 0 : i32
    %c0_i32_0 = arith.constant 0 : i32
    return %arg0, %c0_i32 : i32, i32
  }
  func.func @transform_1(%arg0: i32) -> (i32, i32) {
    %c0_i32 = arith.constant 0 : i32
    %c0_i32_0 = arith.constant 0 : i32
    %c0_i32_1 = arith.constant 0 : i32
    return %c0_i32, %c0_i32_0 : i32, i32
  }
  func.func @transform_2(%arg0: i32) -> (i32, i32) {
    %c0_i32 = arith.constant 0 : i32
    %c0_i32_0 = arith.constant 0 : i32
    %c0_i32_1 = arith.constant 0 : i32
    return %c0_i32, %c0_i32_0 : i32, i32
  }
  func.func @transform_3(%arg0: i32) -> (i32, i32, i32) {
    %c0_i32 = arith.constant 0 : i32
    %c0_i32_0 = arith.constant 0 : i32
    %c0_i32_1 = arith.constant 0 : i32
    %c0_i32_2 = arith.constant 0 : i32
    return %c0_i32, %c0_i32_0, %c0_i32_1 : i32, i32, i32
  }
  func.func @transform_4(%arg0: i32) -> (i32, i32) {
    %c0_i32 = arith.constant 0 : i32
    %c0_i32_0 = arith.constant 0 : i32
    %c0_i32_1 = arith.constant 0 : i32
    return %c0_i32, %c0_i32_0 : i32, i32
  }
  func.func @transform_5(%arg0: i32) -> (i32, i32, i32) {
    %c0_i32 = arith.constant 0 : i32
    %c0_i32_0 = arith.constant 0 : i32
    %c0_i32_1 = arith.constant 0 : i32
    %c0_i32_2 = arith.constant 0 : i32
    return %c0_i32, %c0_i32_0, %c0_i32_1 : i32, i32, i32
  }
  func.func @transform_6(%arg0: i32) -> (i32, i32) {
    %c0_i32 = arith.constant 0 : i32
    %c0_i32_0 = arith.constant 0 : i32
    %c0_i32_1 = arith.constant 0 : i32
    return %c0_i32, %c0_i32_0 : i32, i32
  }
  func.func @transform_7(%arg0: i32) -> (i32, i32, i32) {
    %c0_i32 = arith.constant 0 : i32
    %c0_i32_0 = arith.constant 0 : i32
    %c0_i32_1 = arith.constant 0 : i32
    %c0_i32_2 = arith.constant 0 : i32
    return %c0_i32, %c0_i32_0, %c0_i32_1 : i32, i32, i32
  }
  func.func @transform_8(%arg0: i32) -> (i32, i32) {
    %c0_i32 = arith.constant 0 : i32
    %c0_i32_0 = arith.constant 0 : i32
    %c0_i32_1 = arith.constant 0 : i32
    return %c0_i32, %c0_i32_0 : i32, i32
  }
  func.func @transform_9(%arg0: i32) -> (i32, i32) {
    %c0_i32 = arith.constant 0 : i32
    %c0_i32_0 = arith.constant 0 : i32
    %c0_i32_1 = arith.constant 0 : i32
    return %c0_i32, %c0_i32_0 : i32, i32
  }
  func.func @transform_10(%arg0: i32) -> (i32, i32) {
    %c0_i32 = arith.constant 0 : i32
    %c0_i32_0 = arith.constant 0 : i32
    %c0_i32_1 = arith.constant 0 : i32
    return %c0_i32, %c0_i32_0 : i32, i32
  }
  func.func @transform_11(%arg0: i32) -> (i32, i32) {
    %c0_i32 = arith.constant 0 : i32
    %c0_i32_0 = arith.constant 0 : i32
    return %arg0, %c0_i32 : i32, i32
  }
}

</mosaic_0001>

<bundles_post_ra>
// kernel: net_conv_forward.1
= control target key start
LH: loop header
LB: loop body
LE: loop exit
PB: predicated region body
PF: predicated region fallthrough
CT: control target
= control target key end

     0   :  { %16 = vsyncpa [#allocation9], 0  ;;  %s17743_s0 = inlined_call_operand.vmem [shape: f32[800,4], index: 0, kind: input, shape index: {}]   ;;  %s17744_s1 = inlined_call_operand.hbm [shape: f32[4,128], index: 1, kind: input, shape index: {}]   ;;  %s17745_s2 = inlined_call_operand.hbm [shape: f32[1,128], index: 2, kind: input, shape index: {}]   ;;  %s17746_s3 = inlined_call_operand.hbm [shape: bf16[5,128,128], index: 3, kind: input, shape index: {}]   ;;  %s17747_s4 = inlined_call_operand.hbm [shape: f32[1,128], index: 4, kind: input, shape index: {}]   ;;  %s17748_s5 = inlined_call_operand.hbm [shape: bf16[5,128,128], index: 5, kind: input, shape index: {}]   ;;  %s17749_s6 = inlined_call_operand.hbm [shape: f32[1,128], index: 6, kind: input, shape index: {}]   ;;  %s17750_s7 = inlined_call_operand.hbm [shape: bf16[14,128,512], index: 7, kind: input, shape index: {}]   ;;  %s17751_s8 = inlined_call_operand.hbm [shape: f32[1,512], index: 8, kind: input, shape index: {}]   ;;  %s17752_s9 = inlined_call_operand.hbm [shape: bf16[512,2048], index: 9, kind: input, shape index: {}]   ;;  %s17753_s10 = inlined_call_operand.hbm [shape: f32[1,2048], index: 10, kind: input, shape index: {}]   ;;  %s17754_s11 = inlined_call_operand.hbm [shape: f32[2,2048], index: 11, kind: output, shape index: {}]  }
   0x1   :  { %17 = vsyncpa [#allocation12], 0 }
   0x2   :  { %18 = vsyncpa [#allocation15], 0 }
   0x3   :  { %19 = vsyncpa [#allocation18], 0 }
   0x4   :  { %20 = vsyncpa [#allocation21], 0 }
   0x5   :  { %21 = vsyncpa [#allocation24], 0 }
   0x6   :  { %22 = vsyncpa [#allocation10], 0  ;;  %s15993_s17 = smov [#allocation11]   ;;  %s15994_s19 = smov [#allocation14]  }
   0x7   :  { %s41_s18 = sshll.u32 %s15993_s17, 4  ;;  %s63_s20 = sshll.u32 %s15994_s19, 4  ;;  %s42_s18 = int_to_ptr.vmem [resolvable:$true] %s41_s18  ;;  %s64_s20 = int_to_ptr.vmem [resolvable:$true] %s63_s20 }
   0x8   :  { %s15737_s23 = scalar_lea.hbm %s17745_s2, 16 }
   0x9   :  { %p15738_p0 = scmp.ne.s32.totalorder %s17745_s2, %s15737_s23  ;;  %p15741_p1 = scmp.lt.u32.totalorder %s15737_s23, %s17745_s2 }
   0xb   :  { %p15743_p2 = pnand %p15741_p1, %p15738_p0 }
   0xd   :  { %15746 = shalt.err (!%p15743_p2)
}
   0xe   :  { %s15747_s28 = scalar_lea.vmem %s42_s18, 16  ;;  %s15751_s29 = scalar_lea.vmem %s42_s18, 32 }
   0xf   :  { %p15748_p3 = scmp.ne.s32.totalorder %s42_s18, %s15747_s28  ;;  %p15752_p4 = scmp.lt.s32.totalorder %s42_s18, %s42_s18 }
  0x10   :  { %p15753_p5 = scmp.lt.s32.totalorder %s15751_s29, %s15747_s28 }
  0x12   :  { %p15754_p6 = por %p15753_p5, %p15752_p4 }
  0x14   :  { %p15755_p7 = pnand %p15754_p6, %p15748_p3 }
  0x16   :  { %15758 = shalt.err (!%p15755_p7)
}
  0x17   :  { %44 = dma.hbm_to_vmem [thread:$0]  %s17745_s2, 16, %s42_s18, [#allocation12]  }
  0x18   :  { %s15759_s15 = scalar_lea.hbm %s17747_s4, 16 }
  0x19   :  { %p15760_p8 = scmp.ne.s32.totalorder %s17747_s4, %s15759_s15  ;;  %p15763_p9 = scmp.lt.u32.totalorder %s15759_s15, %s17747_s4 }
  0x1b   :  { %p15765_p10 = pnand %p15763_p9, %p15760_p8 }
  0x1d   :  { %15768 = shalt.err (!%p15765_p10)
}
  0x1e   :  { %s15769_s22 = scalar_lea.vmem %s64_s20, 16  ;;  %s15773_s23 = scalar_lea.vmem %s64_s20, 32 }
  0x1f   :  { %p15770_p11 = scmp.ne.s32.totalorder %s64_s20, %s15769_s22  ;;  %p15774_p12 = scmp.lt.s32.totalorder %s64_s20, %s64_s20 }
  0x20   :  { %p15775_p13 = scmp.lt.s32.totalorder %s15773_s23, %s15769_s22 }
  0x22   :  { %p15776_p0 = por %p15775_p13, %p15774_p12 }
  0x24   :  { %p15777_p1 = pnand %p15776_p0, %p15770_p11 }
  0x26   :  { %15780 = shalt.err (!%p15777_p1)
}
  0x27   :  { %66 = dma.hbm_to_vmem [thread:$0]  %s17747_s4, 16, %s64_s20, [#allocation15]  }
  0x28   :  { %s15995_s24 = smov [#allocation17]   ;;  %s15996_s26 = smov [#allocation20]  }
  0x29   :  { %s85_s25 = sshll.u32 %s15995_s24, 4  ;;  %s107_s27 = sshll.u32 %s15996_s26, 4  ;;  %s86_s25 = int_to_ptr.vmem [resolvable:$true] %s85_s25  ;;  %s108_s27 = int_to_ptr.vmem [resolvable:$true] %s107_s27 }
  0x2a   :  { %s15781_s30 = scalar_lea.hbm %s17749_s6, 16 }
  0x2b   :  { %p15782_p2 = scmp.ne.s32.totalorder %s17749_s6, %s15781_s30  ;;  %p15785_p3 = scmp.lt.u32.totalorder %s15781_s30, %s17749_s6 }
  0x2d   :  { %p15787_p4 = pnand %p15785_p3, %p15782_p2 }
  0x2f   :  { %15790 = shalt.err (!%p15787_p4)
}
  0x30   :  { %s15791_s4 = scalar_lea.vmem %s86_s25, 16  ;;  %s15795_s20 = scalar_lea.vmem %s86_s25, 32 }
  0x31   :  { %p15792_p5 = scmp.ne.s32.totalorder %s86_s25, %s15791_s4  ;;  %p15796_p6 = scmp.lt.s32.totalorder %s86_s25, %s86_s25 }
  0x32   :  { %p15797_p7 = scmp.lt.s32.totalorder %s15795_s20, %s15791_s4 }
  0x34   :  { %p15798_p8 = por %p15797_p7, %p15796_p6 }
  0x36   :  { %p15799_p9 = pnand %p15798_p8, %p15792_p5 }
  0x38   :  { %15802 = shalt.err (!%p15799_p9)
}
  0x39   :  { %88 = dma.hbm_to_vmem [thread:$0]  %s17749_s6, 16, %s86_s25, [#allocation18]  }
  0x3a   :  { %s15803_s22 = scalar_lea.hbm %s17751_s8, 64 }
  0x3b   :  { %p15804_p10 = scmp.ne.s32.totalorder %s17751_s8, %s15803_s22  ;;  %p15807_p11 = scmp.lt.u32.totalorder %s15803_s22, %s17751_s8 }
  0x3d   :  { %p15809_p12 = pnand %p15807_p11, %p15804_p10 }
  0x3f   :  { %15812 = shalt.err (!%p15809_p12)
}
  0x40   :  { %s15813_s26 = scalar_lea.vmem %s108_s27, 64  ;;  %p15818_p0 = scmp.lt.s32.totalorder %s108_s27, %s108_s27 }
  0x41   :  { %p15814_p13 = scmp.ne.s32.totalorder %s108_s27, %s15813_s26  ;;  %p15819_p1 = scmp.lt.s32.totalorder %s15813_s26, %s15813_s26 }
  0x43   :  { %p15820_p2 = por %p15819_p1, %p15818_p0 }
  0x45   :  { %p15821_p3 = pnand %p15820_p2, %p15814_p13 }
  0x47   :  { %15824 = shalt.err (!%p15821_p3)
}
  0x48   :  { %110 = dma.hbm_to_vmem [thread:$0]  %s17751_s8, 64, %s108_s27, [#allocation21]  }
  0x49   :  { %s15997_s28 = smov [#allocation8]   ;;  %s15998_s30 = smov [#allocation13]  }
  0x4a   :  { %s31_s29 = sshll.u32 %s15997_s28, 4  ;;  %s50_s12 = sshll.u32 %s15998_s30, 4  ;;  %s32_s29 = int_to_ptr.vmem [resolvable:$true] %s31_s29  ;;  %s16121_s12 = int_to_ptr.vmem [resolvable:$true] %s50_s12 }
  0x4b   :  { %s15825_s15 = scalar_lea.hbm %s17744_s1, 64 }
  0x4c   :  { %p15826_p4 = scmp.ne.s32.totalorder %s17744_s1, %s15825_s15  ;;  %p15829_p5 = scmp.lt.u32.totalorder %s15825_s15, %s17744_s1 }
  0x4e   :  { %p15831_p6 = pnand %p15829_p5, %p15826_p4 }
  0x50   :  { %15834 = shalt.err (!%p15831_p6)
}
  0x51   :  { %s15835_s8 = scalar_lea.vmem %s32_s29, 64  ;;  %p15840_p8 = scmp.lt.s32.totalorder %s32_s29, %s32_s29 }
  0x52   :  { %p15836_p7 = scmp.ne.s32.totalorder %s32_s29, %s15835_s8  ;;  %p15841_p9 = scmp.lt.s32.totalorder %s15835_s8, %s15835_s8 }
  0x54   :  { %p15842_p10 = por %p15841_p9, %p15840_p8 }
  0x56   :  { %p15843_p11 = pnand %p15842_p10, %p15836_p7 }
  0x58   :  { %15846 = shalt.err (!%p15843_p11)
}
  0x59   :  { %34 = dma.hbm_to_vmem [thread:$0]  %s17744_s1, 64, %s32_s29, [#allocation9]  }
  0x5a   :  { %s15847_s23 = scalar_lea.hbm %s17746_s3, 5120 }
  0x5b   :  { %p15848_p12 = scmp.ne.s32.totalorder %s17746_s3, %s15847_s23  ;;  %p15851_p13 = scmp.lt.u32.totalorder %s15847_s23, %s17746_s3 }
  0x5d   :  { %p15853_p0 = pnand %p15851_p13, %p15848_p12 }
  0x5f   :  { %15856 = shalt.err (!%p15853_p0)
}
  0x60   :  { %s15857_s6 = scalar_lea.vmem %s16121_s12, 5120  ;;  %p15862_p2 = scmp.lt.s32.totalorder %s16121_s12, %s16121_s12 }
  0x61   :  { %p15858_p1 = scmp.ne.s32.totalorder %s16121_s12, %s15857_s6  ;;  %p15863_p3 = scmp.lt.s32.totalorder %s15857_s6, %s15857_s6 }
  0x63   :  { %p15864_p4 = por %p15863_p3, %p15862_p2 }
  0x65   :  { %p15865_p5 = pnand %p15864_p4, %p15858_p1 }
  0x67   :  { %15868 = shalt.err (!%p15865_p5)
}
  0x68   :  { %s15999_s1 = smov 64   ;;  %s16000_s25 = smov 4  }
  0x69   :  { %56 = dma.hbm_to_vmem [thread:$0]  %s17746_s3, 5120, %s16121_s12, [#allocation12], %s15999_s1, %s15999_s1, %s16000_s25  }
  0x6a   :  { %s16001_s30 = smov [#allocation16]   ;;  %s16002_s14 = smov [#allocation19]  }
  0x6b   :  { %s72_s13 = sshll.u32 %s16001_s30, 4  ;;  %s94_s15 = sshll.u32 %s16002_s14, 4  ;;  %s73_s13 = int_to_ptr.vmem [resolvable:$true] %s72_s13  ;;  %s16154_s15 = int_to_ptr.vmem [resolvable:$true] %s94_s15 }
  0x6c   :  { %s15869_s16 = scalar_lea.hbm %s17748_s5, 5120 }
  0x6d   :  { %p15870_p6 = scmp.ne.s32.totalorder %s17748_s5, %s15869_s16  ;;  %p15873_p7 = scmp.lt.u32.totalorder %s15869_s16, %s17748_s5 }
  0x6f   :  { %p15875_p8 = pnand %p15873_p7, %p15870_p6 }
  0x71   :  { %15878 = shalt.err (!%p15875_p8)
}
  0x72   :  { %s15879_s3 = scalar_lea.vmem %s73_s13, 5120  ;;  %p15884_p10 = scmp.lt.s32.totalorder %s73_s13, %s73_s13 }
  0x73   :  { %p15880_p9 = scmp.ne.s32.totalorder %s73_s13, %s15879_s3  ;;  %p15885_p11 = scmp.lt.s32.totalorder %s15879_s3, %s15879_s3 }
  0x75   :  { %p15886_p12 = por %p15885_p11, %p15884_p10 }
  0x77   :  { %p15887_p13 = pnand %p15886_p12, %p15880_p9 }
  0x79   :  { %15890 = shalt.err (!%p15887_p13)
}
  0x7a   :  { %78 = dma.hbm_to_vmem [thread:$0]  %s17748_s5, 5120, %s73_s13, [#allocation15], %s15999_s1, %s15999_s1, %s16000_s25  }
  0x7b   :  { %s15891_s2 = scalar_lea.hbm %s17750_s7, 57344 }
  0x7c   :  { %p15892_p0 = scmp.ne.s32.totalorder %s17750_s7, %s15891_s2  ;;  %p15895_p1 = scmp.lt.u32.totalorder %s15891_s2, %s17750_s7 }
  0x7e   :  { %p15897_p2 = pnand %p15895_p1, %p15892_p0 }
  0x80   :  { %15900 = shalt.err (!%p15897_p2)
}
  0x81   :  { %s15901_s28 = scalar_lea.vmem %s16154_s15, 57344  ;;  %p15906_p4 = scmp.lt.s32.totalorder %s16154_s15, %s16154_s15 }
  0x82   :  { %p15902_p3 = scmp.ne.s32.totalorder %s16154_s15, %s15901_s28  ;;  %p15907_p5 = scmp.lt.s32.totalorder %s15901_s28, %s15901_s28 }
  0x84   :  { %p15908_p6 = por %p15907_p5, %p15906_p4 }
  0x86   :  { %p15909_p7 = pnand %p15908_p6, %p15902_p3 }
  0x88   :  { %15912 = shalt.err (!%p15909_p7)
}
  0x89   :  { %s16003_s5 = smov 256   ;;  %s16004_s25 = smov 16  }
  0x8a   :  { %100 = dma.hbm_to_vmem [thread:$0]  %s17750_s7, 57344, %s16154_s15, [#allocation18], %s16003_s5, %s16003_s5, %s16004_s25  }
  0x8b   :  { %s16005_s13 = smov [#allocation22]   ;;  %s16006_s4 = smov [#allocation23]  }
  0x8c   :  { %s116_s14 = sshll.u32 %s16005_s13, 4  ;;  %s129_s20 = sshll.u32 %s16006_s4, 4  ;;  %s117_s14 = int_to_ptr.vmem [resolvable:$true] %s116_s14  ;;  %s130_s20 = int_to_ptr.vmem [resolvable:$true] %s129_s20 }
  0x8d   :  { %s15913_s8 = scalar_lea.hbm %s17752_s9, 65536 }
  0x8e   :  { %p15914_p8 = scmp.ne.s32.totalorder %s17752_s9, %s15913_s8  ;;  %p15917_p9 = scmp.lt.u32.totalorder %s15913_s8, %s17752_s9 }
  0x90   :  { %p15919_p10 = pnand %p15917_p9, %p15914_p8 }
  0x92   :  { %15922 = shalt.err (!%p15919_p10)
}
  0x93   :  { %s15923_s7 = scalar_lea.vmem %s117_s14, 65536  ;;  %p15928_p12 = scmp.lt.s32.totalorder %s117_s14, %s117_s14 }
  0x94   :  { %p15924_p11 = scmp.ne.s32.totalorder %s117_s14, %s15923_s7  ;;  %p15929_p13 = scmp.lt.s32.totalorder %s15923_s7, %s15923_s7 }
  0x96   :  { %p15930_p0 = por %p15929_p13, %p15928_p12 }
  0x98   :  { %p15931_p1 = pnand %p15930_p0, %p15924_p11 }
  0x9a   :  { %15934 = shalt.err (!%p15931_p1)
}
  0x9b   :  { %s16007_s15 = smov 1024   ;;  %s15935_s18 = scalar_lea.hbm %s17753_s10, 256 }
  0x9c   :  { %122 = dma.hbm_to_vmem [thread:$0]  %s17752_s9, 65536, %s117_s14, [#allocation21], %s16007_s15, %s16007_s15, %s15999_s1  }
  0x9d   :  { %p15936_p2 = scmp.ne.s32.totalorder %s17753_s10, %s15935_s18  ;;  %p15939_p3 = scmp.lt.u32.totalorder %s15935_s18, %s17753_s10 }
  0x9f   :  { %p15941_p4 = pnand %p15939_p3, %p15936_p2 }
  0xa1   :  { %15944 = shalt.err (!%p15941_p4)
}
  0xa2   :  { %s15945_s5 = scalar_lea.vmem %s130_s20, 256  ;;  %p15950_p6 = scmp.lt.s32.totalorder %s130_s20, %s130_s20 }
  0xa3   :  { %p15946_p5 = scmp.ne.s32.totalorder %s130_s20, %s15945_s5  ;;  %p15951_p7 = scmp.lt.s32.totalorder %s15945_s5, %s15945_s5 }
  0xa5   :  { %p15952_p8 = por %p15951_p7, %p15950_p6 }
  0xa7   :  { %p15953_p9 = pnand %p15952_p8, %p15946_p5 }
  0xa9   :  { %15956 = shalt.err (!%p15953_p9)
}
  0xaa   :  { %132 = dma.hbm_to_vmem [thread:$0]  %s17753_s10, 256, %s130_s20, [#allocation24]  }
  0xab   :  { %15979 = dma.done.wait [#allocation9], 64  }
  0xac   :  { %15980 = vsyncadd [#allocation9], 4294967232 }
  0xad   :  { %15981 = dma.done.wait [#allocation12], 5136  }
  0xae   :  { %15982 = vsyncadd [#allocation12], 4294962160 }
  0xaf   :  { %15983 = dma.done.wait [#allocation15], 5136  }
  0xb0   :  { %15984 = vsyncadd [#allocation15], 4294962160 }
  0xb1   :  { %15985 = dma.done.wait [#allocation18], 57360  }
  0xb2   :  { %15986 = vsyncadd [#allocation18], 4294909936 }
  0xb3   :  { %15987 = dma.done.wait [#allocation21], 65600  }
  0xb4   :  { %15988 = vsyncadd [#allocation21], 4294901696 }
  0xb5   :  { %15989 = dma.done.wait [#allocation24], 256  }
  0xb6   :  { %15990 = vsyncadd [#allocation24], 4294967040  ;;  %vm573_vm0 = vcmask 1043456   ;;  %vm272_vm1 = vcmask 31744   ;;  %v264_v0 = vld [vmem:[#allocation8] sm:$0xf] }
  0xb7   :  { %v164_v1 = vld [vmem:[%s17743_s0] sm:$0xff]  ;;  %v165_v2 = vld [vmem:[%s17743_s0 + $0x8] sm:$0xff]  ;;  %14172 = vmatprep.subr.msk.mxu0 %vm573_vm0, %v264_v0  ;;  %v166_v3 = vld [vmem:[%s17743_s0 + $0x10] sm:$0xff]  ;;  %v16008_v46 = vmov 0.0   ;;  %vm16009_vm2 = vmmov 0  }
  0xb8   :  { %14174 = vmatprep.mubr.msk.f32.mxu0 %vm272_vm1, %v164_v1  ;;  %14173 = vmatpush3.msk.msra.mxu0 %vm573_vm0, %v264_v0  ;;  %v167_v4 = vld [vmem:[%s17743_s0 + $0x18] sm:$0xff]  ;;  %v168_v5 = vld [vmem:[%s17743_s0 + $0x20] sm:$0xff]  ;;  %v169_v6 = vld [vmem:[%s17743_s0 + $0x28] sm:$0xff]  ;;  %1342 = vst [vmem:[#allocation3] sm:$0x3] %v16008_v46 }
  0xb9   :  { %14175 = vmatmul.mubr.msk.f32.vlgmr.msra.gmra.mrb[0].mxu0 %vm272_vm1, %v165_v2  ;;  %v170_v7 = vld [vmem:[%s17743_s0 + $0x30] sm:$0xff]  ;;  %v171_v8 = vld [vmem:[%s17743_s0 + $0x38] sm:$0xff]  ;;  %v172_v9 = vld [vmem:[%s17743_s0 + $0x40] sm:$0xff]  ;;  %14324 = vmatprep.subr.bf16.mxu1 %v16008_v46  ;;  %1495 = vst [vmem:[#allocation3 + $0x87] sm:$0x3] %v16008_v46 }
  0xba   :  { %14177 = vmatprep.mubr.msk.f32.mxu0 %vm272_vm1, %v166_v3  ;;  %v173_v10 = vld [vmem:[%s17743_s0 + $0x48] sm:$0xff]  ;;  %v174_v11 = vld [vmem:[%s17743_s0 + $0x50] sm:$0xff]  ;;  %v175_v12 = vld [vmem:[%s17743_s0 + $0x58] sm:$0xff]  ;;  %1496 = vst [vmem:[#allocation3 + $0x89] sm:$0x3] %v16008_v46  ;;  %14492 = vmatprep.subr.bf16.mxu0 %v16008_v46 }
  0xbb   :  { %v176_v13 = vld [vmem:[%s17743_s0 + $0x60] sm:$0xff]  ;;  %v177_v14 = vld [vmem:[%s17743_s0 + $0x68] sm:$0xff]  ;;  %v178_v15 = vld [vmem:[%s17743_s0 + $0x70] sm:$0xff]  ;;  %1650 = vst [vmem:[#allocation3 + $0x110] sm:$0x3] %v16008_v46  ;;  %14340 = vmatprep.mubr.msk.bf16.mxu1 %vm16009_vm2, %v16008_v46 }
  0xbc   :  { %v179_v16 = vld [vmem:[%s17743_s0 + $0x78] sm:$0xff]  ;;  %v180_v17 = vld [vmem:[%s17743_s0 + $0x80] sm:$0xff]  ;;  %v181_v18 = vld [vmem:[%s17743_s0 + $0x88] sm:$0xff]  ;;  %3660 = vst [vmem:[#allocation5] sm:$0x3] %v16008_v46 }
  0xbd   :  { %14178 = vmatmul.mubr.msk.f32.gmra.mrb[2].mxu0 %vm272_vm1, %v167_v4  ;;  %v182_v19 = vld [vmem:[%s17743_s0 + $0x90] sm:$0xff]  ;;  %v183_v20 = vld [vmem:[%s17743_s0 + $0x98] sm:$0xff]  ;;  %v184_v21 = vld [vmem:[%s17743_s0 + $0xa0] sm:$0xff]  ;;  %3714 = vst [vmem:[#allocation5 + $0x2e] sm:$0x3] %v16008_v46 }
  0xbe   :  { %14180 = vmatprep.mubr.msk.f32.mxu0 %vm272_vm1, %v168_v5  ;;  %v185_v22 = vld [vmem:[%s17743_s0 + $0xa8] sm:$0xff]  ;;  %v186_v23 = vld [vmem:[%s17743_s0 + $0xb0] sm:$0xff]  ;;  %v187_v24 = vld [vmem:[%s17743_s0 + $0xb8] sm:$0xff]  ;;  %3715 = vst [vmem:[#allocation5 + $0x30] sm:$0x3] %v16008_v46 }
  0xbf   :  { %v188_v25 = vld [vmem:[%s17743_s0 + $0xc0] sm:$0xff]  ;;  %v189_v26 = vld [vmem:[%s17743_s0 + $0xc8] sm:$0xff]  ;;  %v190_v27 = vld [vmem:[%s17743_s0 + $0xd0] sm:$0xff]  ;;  %3770 = vst [vmem:[#allocation5 + $0x5e] sm:$0x3] %v16008_v46 }
  0xc0   :  { %v191_v28 = vld [vmem:[%s17743_s0 + $0xd8] sm:$0xff]  ;;  %v192_v29 = vld [vmem:[%s17743_s0 + $0xe0] sm:$0xff]  ;;  %v193_v30 = vld [vmem:[%s17743_s0 + $0xe8] sm:$0xff] }
  0xc1   :  { %14181 = vmatmul.mubr.msk.f32.gmra.mrb[4].mxu0 %vm272_vm1, %v169_v6  ;;  %v194_v31 = vld [vmem:[%s17743_s0 + $0xf0] sm:$0xff]  ;;  %v195_v32 = vld [vmem:[%s17743_s0 + $0xf8] sm:$0xff]  ;;  %v196_v33 = vld [vmem:[%s17743_s0 + $0x100] sm:$0xff] }
  0xc2   :  { %14183 = vmatprep.mubr.msk.f32.mxu0 %vm272_vm1, %v170_v7  ;;  %v197_v34 = vld [vmem:[%s17743_s0 + $0x108] sm:$0xff]  ;;  %v198_v35 = vld [vmem:[%s17743_s0 + $0x110] sm:$0xff]  ;;  %v199_v36 = vld [vmem:[%s17743_s0 + $0x118] sm:$0xff] }
  0xc3   :  { %v200_v37 = vld [vmem:[%s17743_s0 + $0x120] sm:$0xff]  ;;  %v201_v38 = vld [vmem:[%s17743_s0 + $0x128] sm:$0xff]  ;;  %v202_v39 = vld [vmem:[%s17743_s0 + $0x130] sm:$0xff] }
  0xc4   :  { %v203_v40 = vld [vmem:[%s17743_s0 + $0x138] sm:$0xff]  ;;  %v204_v41 = vld [vmem:[%s17743_s0 + $0x140] sm:$0xff]  ;;  %v205_v42 = vld [vmem:[%s17743_s0 + $0x148] sm:$0xff] }
  0xc5   :  { %14184 = vmatmul.mubr.msk.f32.gmra.mrb[6].mxu0 %vm272_vm1, %v171_v8  ;;  %v206_v43 = vld [vmem:[%s17743_s0 + $0x150] sm:$0xff]  ;;  %v207_v45 = vld [vmem:[%s17743_s0 + $0x158] sm:$0xff]  ;;  %v208_v47 = vld [vmem:[%s17743_s0 + $0x160] sm:$0xff] }
  0xc6   :  { %14186 = vmatprep.mubr.msk.f32.mxu0 %vm272_vm1, %v172_v9  ;;  %v14985_v44 = vld [vmem:[#allocation13 + $0x80] sm:$0xff]   ;;  %v14987_v48 = vld [vmem:[#allocation13 + $0x88] sm:$0xff]   ;;  %v209_v49 = vld [vmem:[%s17743_s0 + $0x168] sm:$0xff] }
  0xc7   :  { %14493 = vmatpush3.bf16.msra.mxu0 %v14985_v44  ;;  %v210_v50 = vld [vmem:[%s17743_s0 + $0x170] sm:$0xff]  ;;  %v14989_v52 = vld [vmem:[#allocation13 + $0x90] sm:$0xff]   ;;  %v211_v53 = vld [vmem:[%s17743_s0 + $0x178] sm:$0xff] }
  0xc8   :  { %14494 = vmatprep.subr.bf16.mxu0 %v16008_v46  ;;  %v14984_v51 = vld [vmem:[#allocation13] sm:$0xff]   ;;  %v212_v54 = vld [vmem:[%s17743_s0 + $0x180] sm:$0xff]  ;;  %v213_v56 = vld [vmem:[%s17743_s0 + $0x188] sm:$0xff] }
  0xc9   :  { %14187 = vmatmul.mubr.msk.f32.gmra.mrb[8].mxu0 %vm272_vm1, %v173_v10  ;;  %14325 = vmatpush3.bf16.msra.mxu1 %v14984_v51  ;;  %v14986_v55 = vld [vmem:[#allocation13 + $0x8] sm:$0xff]   ;;  %v214_v57 = vld [vmem:[%s17743_s0 + $0x190] sm:$0xff]  ;;  %v14988_v59 = vld [vmem:[#allocation13 + $0x10] sm:$0xff]  }
  0xca   :  { %14189 = vmatprep.mubr.msk.f32.mxu0 %vm272_vm1, %v174_v11  ;;  %14326 = vmatprep.subr.bf16.mxu1 %v16008_v46  ;;  %v14991_v58 = vld [vmem:[#allocation13 + $0x98] sm:$0xff]   ;;  %v215_v60 = vld [vmem:[%s17743_s0 + $0x198] sm:$0xff]  ;;  %v216_v61 = vld [vmem:[%s17743_s0 + $0x1a0] sm:$0xff] }
  0xcb   :  { %14495 = vmatpush3.bf16.msra.mxu0 %v14987_v48  ;;  %v14993_v62 = vld [vmem:[#allocation13 + $0xa0] sm:$0xff]   ;;  %v217_v63 = vld [vmem:[%s17743_s0 + $0x1a8] sm:$0xff]  ;;  %v14995_v2 = vld [vmem:[#allocation13 + $0xa8] sm:$0xff]  }
  0xcc   :  { %14496 = vmatprep.subr.bf16.mxu0 %v16008_v46  ;;  %v218_v0 = vld [vmem:[%s17743_s0 + $0x1b0] sm:$0xff]  ;;  %v219_v3 = vld [vmem:[%s17743_s0 + $0x1b8] sm:$0xff]  ;;  %v220_v4 = vld [vmem:[%s17743_s0 + $0x1c0] sm:$0xff] }
  0xcd   :  { %14190 = vmatmul.mubr.msk.f32.gmra.mrb[10].mxu0 %vm272_vm1, %v175_v12  ;;  %14327 = vmatpush3.bf16.msra.mxu1 %v14986_v55  ;;  %v14990_v1 = vld [vmem:[#allocation13 + $0x18] sm:$0xff]   ;;  %v14992_v5 = vld [vmem:[#allocation13 + $0x20] sm:$0xff]   ;;  %v14997_v6 = vld [vmem:[#allocation13 + $0xb0] sm:$0xff]  }
  0xce   :  { %14192 = vmatprep.mubr.msk.f32.mxu0 %vm272_vm1, %v176_v13  ;;  %14328 = vmatprep.subr.bf16.mxu1 %v16008_v46  ;;  %v221_v7 = vld [vmem:[%s17743_s0 + $0x1c8] sm:$0xff]  ;;  %v222_v8 = vld [vmem:[%s17743_s0 + $0x1d0] sm:$0xff]  ;;  %v14994_v9 = vld [vmem:[#allocation13 + $0x28] sm:$0xff]  }
  0xcf   :  { %14497 = vmatpush3.bf16.msra.mxu0 %v14989_v52  ;;  %v14999_v10 = vld [vmem:[#allocation13 + $0xb8] sm:$0xff]   ;;  %v223_v11 = vld [vmem:[%s17743_s0 + $0x1d8] sm:$0xff]  ;;  %v224_v12 = vld [vmem:[%s17743_s0 + $0x1e0] sm:$0xff] }
  0xd0   :  { %14498 = vmatprep.subr.bf16.mxu0 %v16008_v46  ;;  %v14996_v13 = vld [vmem:[#allocation13 + $0x30] sm:$0xff]   ;;  %v254_v44 = vld [vmem:[%s17743_s0 + $0x2d0] sm:$0xff] }
  0xd1   :  { %14193 = vmatmul.mubr.msk.f32.gmra.mrb[12].mxu0 %vm272_vm1, %v177_v14  ;;  %14329 = vmatpush3.bf16.msra.mxu1 %v14988_v59  ;;  %v225_v14 = vld [vmem:[%s17743_s0 + $0x1e8] sm:$0xff]  ;;  %v260_v51 = vld [vmem:[%s17743_s0 + $0x300] sm:$0xff]  ;;  %v16642_v55 = vld [vmem:[#allocation11] ss:$0 sm:$0xff] }
  0xd2   :  { %14195 = vmatprep.mubr.msk.f32.mxu0 %vm272_vm1, %v178_v15  ;;  %14330 = vmatprep.subr.bf16.mxu1 %v16008_v46  ;;  %v226_v15 = vld [vmem:[%s17743_s0 + $0x1f0] sm:$0xff]  ;;  %v257_v48 = vld [vmem:[%s17743_s0 + $0x2e8] sm:$0xff] }
  0xd3   :  { %14499 = vmatpush3.bf16.msra.mxu0 %v14991_v58  ;;  %v261_v52 = vld [vmem:[%s17743_s0 + $0x308] sm:$0xff] }
  0xd4   :  { %14500 = vmatprep.subr.bf16.mxu0 %v16008_v46 }
  0xd5   :  { %14196 = vmatmul.mubr.msk.f32.gmra.mrb[14].mxu0 %vm272_vm1, %v179_v16  ;;  %14331 = vmatpush3.bf16.msra.mxu1 %v14990_v1  ;;  %v14998_v16 = vld [vmem:[#allocation13 + $0x38] sm:$0xff]  }
  0xd6   :  { %14198 = vmatprep.mubr.msk.f32.mxu0 %vm272_vm1, %v180_v17  ;;  %14332 = vmatprep.subr.bf16.mxu1 %v16008_v46  ;;  %v227_v17 = vld [vmem:[%s17743_s0 + $0x1f8] sm:$0xff] }
  0xd7   :  { %14501 = vmatpush3.bf16.msra.mxu0 %v14993_v62 }
  0xd8   :  { %14502 = vmatprep.subr.bf16.mxu0 %v16008_v46 }
  0xd9   :  { %14199 = vmatmul.mubr.msk.f32.gmra.mrb[16].mxu0 %vm272_vm1, %v181_v18  ;;  %14333 = vmatpush3.bf16.msra.mxu1 %v14992_v5  ;;  %v228_v18 = vld [vmem:[%s17743_s0 + $0x200] sm:$0xff] }
  0xda   :  { %14201 = vmatprep.mubr.msk.f32.mxu0 %vm272_vm1, %v182_v19  ;;  %14334 = vmatprep.subr.bf16.mxu1 %v16008_v46  ;;  %v229_v19 = vld [vmem:[%s17743_s0 + $0x208] sm:$0xff] }
  0xdb   :  { %14503 = vmatpush3.bf16.msra.mxu0 %v14995_v2 }
  0xdc   :  { %14504 = vmatprep.subr.bf16.mxu0 %v16008_v46 }
  0xdd   :  { %14202 = vmatmul.mubr.msk.f32.gmra.mrb[18].mxu0 %vm272_vm1, %v183_v20  ;;  %14335 = vmatpush3.bf16.msra.mxu1 %v14994_v9  ;;  %v230_v20 = vld [vmem:[%s17743_s0 + $0x210] sm:$0xff] }
  0xde   :  { %14204 = vmatprep.mubr.msk.f32.mxu0 %vm272_vm1, %v184_v21  ;;  %14336 = vmatprep.subr.bf16.mxu1 %v16008_v46  ;;  %v231_v21 = vld [vmem:[%s17743_s0 + $0x218] sm:$0xff] }
  0xdf   :  { %14505 = vmatpush3.bf16.msra.mxu0 %v14997_v6 }
  0xe0   :  { %14506 = vmatprep.subr.bf16.mxu0 %v16008_v46 }
  0xe1   :  { %14205 = vmatmul.mubr.msk.f32.gmra.mrb[20].mxu0 %vm272_vm1, %v185_v22  ;;  %14337 = vmatpush3.bf16.msra.mxu1 %v14996_v13  ;;  %v232_v22 = vld [vmem:[%s17743_s0 + $0x220] sm:$0xff] }
  0xe2   :  { %14207 = vmatprep.mubr.msk.f32.mxu0 %vm272_vm1, %v186_v23  ;;  %14338 = vmatprep.subr.bf16.mxu1 %v16008_v46  ;;  %v233_v23 = vld [vmem:[%s17743_s0 + $0x228] sm:$0xff] }
  0xe3   :  { %14507 = vmatpush3.bf16.msra.mxu0 %v14999_v10 }
  0xe4   :  { %14660 = vmatprep.subr.bf16.mxu0 %v16008_v46 }
  0xe5   :  { %14208 = vmatmul.mubr.msk.f32.gmra.mrb[22].mxu0 %vm272_vm1, %v187_v24  ;;  %14339 = vmatpush3.bf16.msra.mxu1 %v14998_v16  ;;  %v234_v24 = vld [vmem:[%s17743_s0 + $0x230] sm:$0xff] }
  0xe6   :  { %14210 = vmatprep.mubr.msk.f32.mxu0 %vm272_vm1, %v188_v25  ;;  %14408 = vmatprep.subr.bf16.mxu1 %v16008_v46  ;;  %v235_v25 = vld [vmem:[%s17743_s0 + $0x238] sm:$0xff] }
  0xe9   :  { %14211 = vmatmul.mubr.msk.f32.gmra.mrb[24].mxu0 %vm272_vm1, %v189_v26  ;;  %v236_v26 = vld [vmem:[%s17743_s0 + $0x240] sm:$0xff] }
  0xea   :  { %14213 = vmatprep.mubr.msk.f32.mxu0 %vm272_vm1, %v190_v27  ;;  %v237_v27 = vld [vmem:[%s17743_s0 + $0x248] sm:$0xff] }
  0xed   :  { %14214 = vmatmul.mubr.msk.f32.gmra.mrb[26].mxu0 %vm272_vm1, %v191_v28  ;;  %v238_v28 = vld [vmem:[%s17743_s0 + $0x250] sm:$0xff] }
  0xee   :  { %14216 = vmatprep.mubr.msk.f32.mxu0 %vm272_vm1, %v192_v29  ;;  %v239_v29 = vld [vmem:[%s17743_s0 + $0x258] sm:$0xff] }
  0xf1   :  { %14217 = vmatmul.mubr.msk.f32.gmra.mrb[28].mxu0 %vm272_vm1, %v193_v30  ;;  %v240_v30 = vld [vmem:[%s17743_s0 + $0x260] sm:$0xff] }
  0xf2   :  { %14219 = vmatprep.mubr.msk.f32.mxu0 %vm272_vm1, %v194_v31  ;;  %v241_v31 = vld [vmem:[%s17743_s0 + $0x268] sm:$0xff] }
  0xf5   :  { %14220 = vmatmul.mubr.msk.f32.gmra.mrb[30].mxu0 %vm272_vm1, %v195_v32  ;;  %v242_v32 = vld [vmem:[%s17743_s0 + $0x270] sm:$0xff] }
  0xf6   :  { %14222 = vmatprep.mubr.msk.f32.mxu0 %vm272_vm1, %v196_v33  ;;  %v243_v33 = vld [vmem:[%s17743_s0 + $0x278] sm:$0xff] }
  0xf9   :  { %14223 = vmatmul.mubr.msk.f32.gmra.mrb[32].mxu0 %vm272_vm1, %v197_v34  ;;  %v244_v34 = vld [vmem:[%s17743_s0 + $0x280] sm:$0xff] }
  0xfa   :  { %14225 = vmatprep.mubr.msk.f32.mxu0 %vm272_vm1, %v198_v35  ;;  %v245_v35 = vld [vmem:[%s17743_s0 + $0x288] sm:$0xff] }
  0xfd   :  { %14226 = vmatmul.mubr.msk.f32.gmra.mrb[34].mxu0 %vm272_vm1, %v199_v36  ;;  %v246_v36 = vld [vmem:[%s17743_s0 + $0x290] sm:$0xff] }
  0xfe   :  { %14228 = vmatprep.mubr.msk.f32.mxu0 %vm272_vm1, %v200_v37  ;;  %v247_v37 = vld [vmem:[%s17743_s0 + $0x298] sm:$0xff] }
 0x101   :  { %14229 = vmatmul.mubr.msk.f32.gmra.mrb[36].mxu0 %vm272_vm1, %v201_v38  ;;  %v248_v38 = vld [vmem:[%s17743_s0 + $0x2a0] sm:$0xff] }
 0x102   :  { %14231 = vmatprep.mubr.msk.f32.mxu0 %vm272_vm1, %v202_v39  ;;  %v249_v39 = vld [vmem:[%s17743_s0 + $0x2a8] sm:$0xff] }
 0x105   :  { %14232 = vmatmul.mubr.msk.f32.gmra.mrb[38].mxu0 %vm272_vm1, %v203_v40  ;;  %v250_v40 = vld [vmem:[%s17743_s0 + $0x2b0] sm:$0xff] }
 0x106   :  { %14234 = vmatprep.mubr.msk.f32.mxu0 %vm272_vm1, %v204_v41  ;;  %v251_v41 = vld [vmem:[%s17743_s0 + $0x2b8] sm:$0xff] }
 0x109   :  { %14235 = vmatmul.mubr.msk.f32.gmra.mrb[40].mxu0 %vm272_vm1, %v205_v42  ;;  %v252_v42 = vld [vmem:[%s17743_s0 + $0x2c0] sm:$0xff] }
 0x10a   :  { %14237 = vmatprep.mubr.msk.f32.mxu0 %vm272_vm1, %v206_v43  ;;  %v253_v43 = vld [vmem:[%s17743_s0 + $0x2c8] sm:$0xff] }
 0x10d   :  { %14238 = vmatmul.mubr.msk.f32.gmra.mrb[42].mxu0 %vm272_vm1, %v207_v45  ;;  %v255_v45 = vld [vmem:[%s17743_s0 + $0x2d8] sm:$0xff] }
 0x10e   :  { %14240 = vmatprep.mubr.msk.f32.mxu0 %vm272_vm1, %v208_v47  ;;  %v256_v47 = vld [vmem:[%s17743_s0 + $0x2e0] sm:$0xff] }
 0x111   :  { %14241 = vmatmul.mubr.msk.f32.gmra.mrb[44].mxu0 %vm272_vm1, %v209_v49  ;;  %v258_v49 = vld [vmem:[%s17743_s0 + $0x2f0] sm:$0xff] }
 0x112   :  { %14243 = vmatprep.mubr.msk.f32.mxu0 %vm272_vm1, %v210_v50  ;;  %v259_v50 = vld [vmem:[%s17743_s0 + $0x2f8] sm:$0xff] }
 0x115   :  { %14244 = vmatmul.mubr.msk.f32.gmra.mrb[46].mxu0 %vm272_vm1, %v211_v53  ;;  %v262_v53 = vld [vmem:[%s17743_s0 + $0x310] sm:$0xff] }
 0x116   :  { %14246 = vmatprep.mubr.msk.f32.mxu0 %vm272_vm1, %v212_v54  ;;  %v263_v54 = vld [vmem:[%s17743_s0 + $0x318] sm:$0xff]  ;;  %s16012_s0 = smov [#allocation25]  }
 0x117   :  { %s12718_s5 = sshll.u32 %s16012_s0, 4  ;;  %s12719_s5 = int_to_ptr.vmem [resolvable:$true] %s12718_s5 }
 0x118   :  { %s15957_s9 = scalar_lea.vmem %s12719_s5, 512  ;;  %p15962_p11 = scmp.lt.s32.totalorder %s12719_s5, %s12719_s5 }
 0x119   :  { %14247 = vmatmul.mubr.msk.f32.gmra.mrb[48].mxu0 %vm272_vm1, %v213_v56  ;;  %p15958_p10 = scmp.ne.s32.totalorder %s12719_s5, %s15957_s9  ;;  %p15963_p12 = scmp.lt.s32.totalorder %s15957_s9, %s15957_s9 }
 0x11a   :  { %14249 = vmatprep.mubr.msk.f32.mxu0 %vm272_vm1, %v214_v57 }
 0x11b   :  { %p15964_p13 = por %p15963_p12, %p15962_p11 }
 0x11d   :  { %14250 = vmatmul.mubr.msk.f32.gmra.mrb[50].mxu0 %vm272_vm1, %v215_v60  ;;  %p15965_p0 = pnand %p15964_p13, %p15958_p10 }
 0x11e   :  { %14252 = vmatprep.mubr.msk.f32.mxu0 %vm272_vm1, %v216_v61 }
 0x121   :  { %14253 = vmatmul.mubr.msk.f32.gmra.mrb[52].mxu0 %vm272_vm1, %v217_v63 }
 0x122   :  { %14255 = vmatprep.mubr.msk.f32.mxu0 %vm272_vm1, %v218_v0 }
 0x125   :  { %14256 = vmatmul.mubr.msk.f32.gmra.mrb[54].mxu0 %vm272_vm1, %v219_v3 }
 0x126   :  { %14258 = vmatprep.mubr.msk.f32.mxu0 %vm272_vm1, %v220_v4 }
 0x129   :  { %14259 = vmatmul.mubr.msk.f32.gmra.mrb[56].mxu0 %vm272_vm1, %v221_v7 }
 0x12a   :  { %14261 = vmatprep.mubr.msk.f32.mxu0 %vm272_vm1, %v222_v8 }
 0x12d   :  { %14262 = vmatmul.mubr.msk.f32.gmra.mrb[58].mxu0 %vm272_vm1, %v223_v11 }
 0x12e   :  { %14264 = vmatprep.mubr.msk.f32.mxu0 %vm272_vm1, %v224_v12 }
 0x131   :  { %14265 = vmatmul.mubr.msk.f32.gmra.mrb[60].mxu0 %vm272_vm1, %v225_v14 }
 0x132   :  { %14267 = vmatprep.mubr.msk.f32.mxu0 %vm272_vm1, %v226_v15 }
 0x135   :  { %14268 = vmatmul.mubr.msk.f32.gmra.mrb[62].mxu0 %vm272_vm1, %v227_v17 }
 0x136   :  { %14270 = vmatprep.mubr.msk.f32.mxu0 %vm272_vm1, %v228_v18 }
 0x139   :  { %14271 = vmatmul.mubr.msk.f32.gmra.mrb[64].mxu0 %vm272_vm1, %v229_v19 }
 0x13a   :  { %14273 = vmatprep.mubr.msk.f32.mxu0 %vm272_vm1, %v230_v20 }
 0x13d   :  { %14274 = vmatmul.mubr.msk.f32.gmra.mrb[66].mxu0 %vm272_vm1, %v231_v21 }
 0x13e   :  { %14276 = vmatprep.mubr.msk.f32.mxu0 %vm272_vm1, %v232_v22 }
 0x141   :  { %14277 = vmatmul.mubr.msk.f32.gmra.mrb[68].mxu0 %vm272_vm1, %v233_v23 }
 0x142   :  { %14279 = vmatprep.mubr.msk.f32.mxu0 %vm272_vm1, %v234_v24 }
 0x145   :  { %14280 = vmatmul.mubr.msk.f32.gmra.mrb[70].mxu0 %vm272_vm1, %v235_v25 }
 0x146   :  { %14282 = vmatprep.mubr.msk.f32.mxu0 %vm272_vm1, %v236_v26 }
 0x149   :  { %14283 = vmatmul.mubr.msk.f32.gmra.mrb[72].mxu0 %vm272_vm1, %v237_v27 }
 0x14a   :  { %14285 = vmatprep.mubr.msk.f32.mxu0 %vm272_vm1, %v238_v28 }
 0x14d   :  { %14286 = vmatmul.mubr.msk.f32.gmra.mrb[74].mxu0 %vm272_vm1, %v239_v29 }
 0x14e   :  { %14288 = vmatprep.mubr.msk.f32.mxu0 %vm272_vm1, %v240_v30 }
 0x151   :  { %14289 = vmatmul.mubr.msk.f32.gmra.mrb[76].mxu0 %vm272_vm1, %v241_v31 }
 0x152   :  { %14291 = vmatprep.mubr.msk.f32.mxu0 %vm272_vm1, %v242_v32 }
 0x155   :  { %14292 = vmatmul.mubr.msk.f32.gmra.mrb[78].mxu0 %vm272_vm1, %v243_v33 }
 0x156   :  { %14294 = vmatprep.mubr.msk.f32.mxu0 %vm272_vm1, %v244_v34 }
 0x159   :  { %14295 = vmatmul.mubr.msk.f32.gmra.mrb[80].mxu0 %vm272_vm1, %v245_v35 }
 0x15a   :  { %14297 = vmatprep.mubr.msk.f32.mxu0 %vm272_vm1, %v246_v36 }
 0x15d   :  { %14298 = vmatmul.mubr.msk.f32.gmra.mrb[82].mxu0 %vm272_vm1, %v247_v37 }
 0x15e   :  { %14300 = vmatprep.mubr.msk.f32.mxu0 %vm272_vm1, %v248_v38 }
 0x161   :  { %14301 = vmatmul.mubr.msk.f32.gmra.mrb[84].mxu0 %vm272_vm1, %v249_v39 }
 0x162   :  { %14303 = vmatprep.mubr.msk.f32.mxu0 %vm272_vm1, %v250_v40 }
 0x165   :  { %14304 = vmatmul.mubr.msk.f32.gmra.mrb[86].mxu0 %vm272_vm1, %v251_v41 }
 0x166   :  { %14306 = vmatprep.mubr.msk.f32.mxu0 %vm272_vm1, %v252_v42 }
 0x169   :  { %14307 = vmatmul.mubr.msk.f32.gmra.mrb[88].mxu0 %vm272_vm1, %v253_v43 }
 0x16a   :  { %14309 = vmatprep.mubr.msk.f32.mxu0 %vm272_vm1, %v254_v44 }
 0x16d   :  { %14310 = vmatmul.mubr.msk.f32.gmra.mrb[90].mxu0 %vm272_vm1, %v255_v45 }
 0x16e   :  { %14312 = vmatprep.mubr.msk.f32.mxu0 %vm272_vm1, %v256_v47 }
 0x171   :  { %14313 = vmatmul.mubr.msk.f32.gmra.mrb[92].mxu0 %vm272_vm1, %v257_v48 }
 0x172   :  { %14315 = vmatprep.mubr.msk.f32.mxu0 %vm272_vm1, %v258_v49 }
 0x175   :  { %14316 = vmatmul.mubr.msk.f32.gmra.mrb[94].mxu0 %vm272_vm1, %v259_v50 }
 0x176   :  { %14318 = vmatprep.mubr.msk.f32.mxu0 %vm272_vm1, %v260_v51 }
 0x179   :  { %14319 = vmatmul.mubr.msk.f32.gmra.mrb[96].mxu0 %vm272_vm1, %v261_v52 }
 0x17a   :  { %14321 = vmatprep.mubr.msk.f32.mxu0 %vm272_vm1, %v262_v53 }
 0x17d   :  { %14322 = vmatmul.mubr.msk.f32.gmra.mrb[98].mxu0 %vm272_vm1, %v263_v54 }
 0x17e   :  { %14508 = vmatprep.mubr.msk.bf16.mxu0 %vm16009_vm2, %v16008_v46 }
 0x18c   :  { %v14176_v56 = vpop.f32.mrb[0].mxu0 }
 0x18d   :  { %v649_v57 = vadd.f32 %v14176_v56, %v16642_v55  ;;  %v643_v58 = vpop.f32.mrb[1].mxu0 }
 0x18e   :  { %v644_v59 = vadd.f32 %v16642_v55, %v643_v58 }
 0x18f   :  { %v1143_v60 = vmax.f32 %v649_v57, 0.0  ;;  %v15000_v57 = vld [vmem:[#allocation13 + $0x40] sm:$0xff]  }
 0x190   :  { %v1142_v61 = vmax.f32 %v644_v59, 0.0  ;;  %v14179_v62 = vpop.f32.mrb[2].mxu0 }
 0x191   :  { %1243 = vst [vmem:[#allocation2 + $0x8] sm:$0xff] %v1143_v60  ;;  %v659_v63 = vadd.f32 %v14179_v62, %v16642_v55  ;;  %v653_v0 = vpop.f32.mrb[3].mxu0 }
 0x192   :  { %1242 = vst [vmem:[#allocation2] sm:$0xff] %v1142_v61  ;;  %v654_v1 = vadd.f32 %v16642_v55, %v653_v0 }
 0x193   :  { %v1145_v2 = vmax.f32 %v659_v63, 0.0 }
 0x194   :  { %v1144_v3 = vmax.f32 %v654_v1, 0.0  ;;  %v14182_v4 = vpop.f32.mrb[4].mxu0 }
 0x195   :  { %1245 = vst [vmem:[#allocation2 + $0x18] sm:$0xff] %v1145_v2  ;;  %v669_v5 = vadd.f32 %v14182_v4, %v16642_v55  ;;  %v663_v6 = vpop.f32.mrb[5].mxu0 }
 0x196   :  { %1244 = vst [vmem:[#allocation2 + $0x10] sm:$0xff] %v1144_v3  ;;  %v664_v7 = vadd.f32 %v16642_v55, %v663_v6 }
 0x197   :  { %v1147_v8 = vmax.f32 %v669_v5, 0.0 }
 0x198   :  { %v1146_v9 = vmax.f32 %v664_v7, 0.0  ;;  %v14185_v10 = vpop.f32.mrb[6].mxu0 }
 0x199   :  { %1247 = vst [vmem:[#allocation2 + $0x28] sm:$0xff] %v1147_v8  ;;  %v679_v11 = vadd.f32 %v14185_v10, %v16642_v55  ;;  %v673_v12 = vpop.f32.mrb[7].mxu0 }
 0x19a   :  { %1246 = vst [vmem:[#allocation2 + $0x20] sm:$0xff] %v1146_v9  ;;  %v674_v13 = vadd.f32 %v16642_v55, %v673_v12  ;;  %v15001_v12 = vld [vmem:[#allocation13 + $0x48] sm:$0xff]  }
 0x19b   :  { %v1149_v14 = vmax.f32 %v679_v11, 0.0 }
 0x19c   :  { %v1148_v15 = vmax.f32 %v674_v13, 0.0  ;;  %v14188_v16 = vpop.f32.mrb[8].mxu0 }
 0x19d   :  { %v1343_v17 = vld [vmem:[#allocation2] ss:$3 sm:$0xff]  ;;  %v1377_v18 = vld [vmem:[#allocation2 + $0x1] ss:$3 sm:$0xff]  ;;  %1249 = vst [vmem:[#allocation2 + $0x38] sm:$0xff] %v1149_v14  ;;  %v689_v19 = vadd.f32 %v14188_v16, %v16642_v55  ;;  %v683_v22 = vpop.f32.mrb[9].mxu0 }
 0x19e   :  { %v1410_v20 = vmax.f32 %v1343_v17, %v1377_v18  ;;  %v1428_v21 = vld [vmem:[#allocation2 + $0x2] ss:$3 sm:$0xff]  ;;  %1248 = vst [vmem:[#allocation2 + $0x30] sm:$0xff] %v1148_v15  ;;  %v684_v24 = vadd.f32 %v16642_v55, %v683_v22 }
 0x19f   :  { %v1151_v23 = vmax.f32 %v689_v19, 0.0 }
 0x1a0   :  { %v14191_v25 = vpop.f32.mrb[10].mxu0  ;;  %v1461_v26 = vmax.f32 %v1410_v20, %v1428_v21  ;;  %v1150_v32 = vmax.f32 %v684_v24, 0.0  ;;  %v15002_v21 = vld [vmem:[#allocation13 + $0x50] sm:$0xff]  }
 0x1a1   :  { %v1345_v27 = vld [vmem:[#allocation2 + $0x18] ss:$3 sm:$0xff]  ;;  %v1379_v28 = vld [vmem:[#allocation2 + $0x19] ss:$3 sm:$0xff]  ;;  %v1430_v29 = vld [vmem:[#allocation2 + $0x1a] ss:$3 sm:$0xff]  ;;  %v699_v30 = vadd.f32 %v14191_v25, %v16642_v55 }
 0x1a2   :  { %1251 = vst [vmem:[#allocation2 + $0x48] sm:$0xff] %v1151_v23  ;;  %v1411_v31 = vmax.f32 %v1345_v27, %v1379_v28  ;;  %v693_v33 = vpop.f32.mrb[11].mxu0  ;;  %1478 = vst [vmem:[#allocation3 + $0x2] sm:$0xff] %v1461_v26 }
 0x1a3   :  { %v1153_v34 = vmax.f32 %v699_v30, 0.0  ;;  %v694_v35 = vadd.f32 %v16642_v55, %v693_v33  ;;  %1250 = vst [vmem:[#allocation2 + $0x40] sm:$0xff] %v1150_v32 }
 0x1a4   :  { %v14194_v36 = vpop.f32.mrb[12].mxu0  ;;  %v1462_v37 = vmax.f32 %v1411_v31, %v1430_v29 }
 0x1a5   :  { %1253 = vst [vmem:[#allocation2 + $0x58] sm:$0xff] %v1153_v34  ;;  %v1152_v38 = vmax.f32 %v694_v35, 0.0  ;;  %v709_v39 = vadd.f32 %v14194_v36, %v16642_v55  ;;  %v703_v40 = vpop.f32.mrb[13].mxu0 }
 0x1a6   :  { %v704_v41 = vadd.f32 %v16642_v55, %v703_v40  ;;  %1479 = vst [vmem:[#allocation3 + $0xa] sm:$0xff] %v1462_v37  ;;  %v2424_v42 = vpack.c.bf16 %v1462_v37, %v1461_v26  ;;  %v15003_v37 = vld [vmem:[#allocation13 + $0x58] sm:$0xff]  }
 0x1a7   :  { %1252 = vst [vmem:[#allocation2 + $0x50] sm:$0xff] %v1152_v38  ;;  %v1155_v43 = vmax.f32 %v709_v39, 0.0 }
 0x1a8   :  { %v1154_v44 = vmax.f32 %v704_v41, 0.0  ;;  %v14197_v45 = vpop.f32.mrb[14].mxu0  ;;  %14509 = vmatmul.mubr.bf16.vlgmr.msra.gmra.mrb[100].mxu0 %v2424_v42 }
 0x1a9   :  { %1255 = vst [vmem:[#allocation2 + $0x68] sm:$0xff] %v1155_v43  ;;  %v719_v47 = vadd.f32 %v14197_v45, %v16642_v55  ;;  %v713_v48 = vpop.f32.mrb[15].mxu0  ;;  %14512 = vmatprep.mubr.msk.bf16.mxu0 %vm16009_vm2, %v16008_v46  ;;  %v1651_v61 = vld [vmem:[#allocation3] sm:$0xff] }
 0x1aa   :  { %1254 = vst [vmem:[#allocation2 + $0x60] sm:$0xff] %v1154_v44  ;;  %v714_v49 = vadd.f32 %v16642_v55, %v713_v48  ;;  %v1347_v50 = vld [vmem:[#allocation2 + $0x30] ss:$3 sm:$0xff]  ;;  %v1381_v51 = vld [vmem:[#allocation2 + $0x31] ss:$3 sm:$0xff] }
 0x1ab   :  { %v1412_v52 = vmax.f32 %v1347_v50, %v1381_v51  ;;  %v1157_v53 = vmax.f32 %v719_v47, 0.0  ;;  %v1432_v58 = vld [vmem:[#allocation2 + $0x32] ss:$3 sm:$0xff] }
 0x1ac   :  { %v1156_v54 = vmax.f32 %v714_v49, 0.0  ;;  %v14200_v56 = vpop.f32.mrb[16].mxu0  ;;  %v15004_v50 = vld [vmem:[#allocation13 + $0x60] sm:$0xff]  }
 0x1ad   :  { %v729_v59 = vadd.f32 %v14200_v56, %v16642_v55  ;;  %v723_v60 = vpop.f32.mrb[17].mxu0  ;;  %v1652_v62 = vld [vmem:[#allocation3 + $0x8] sm:$0xff]  ;;  %1257 = vst [vmem:[#allocation2 + $0x78] sm:$0xff] %v1157_v53  ;;  %v1463_v3 = vmax.f32 %v1412_v52, %v1432_v58 }
 0x1ae   :  { %v1349_v63 = vld [vmem:[#allocation2 + $0x48] ss:$3 sm:$0xff]  ;;  %v1383_v0 = vld [vmem:[#allocation2 + $0x49] ss:$3 sm:$0xff]  ;;  %1256 = vst [vmem:[#allocation2 + $0x70] sm:$0xff] %v1156_v54  ;;  %v724_v1 = vadd.f32 %v16642_v55, %v723_v60  ;;  %v1685_v2 = vpack.c.bf16 %v1652_v62, %v1651_v61 }
 0x1af   :  { %v1413_v4 = vmax.f32 %v1349_v63, %v1383_v0  ;;  %v1159_v5 = vmax.f32 %v729_v59, 0.0  ;;  %v1434_v6 = vld [vmem:[#allocation2 + $0x4a] ss:$3 sm:$0xff]  ;;  %1480 = vst [vmem:[#allocation3 + $0x12] sm:$0xff] %v1463_v3 }
 0x1b0   :  { %v1158_v7 = vmax.f32 %v724_v1, 0.0  ;;  %v14203_v8 = vpop.f32.mrb[18].mxu0  ;;  %14341 = vmatmul.mubr.bf16.vlgmr.msra.gmra.mrb[0].mxu1 %v1685_v2 }
 0x1b1   :  { %1259 = vst [vmem:[#allocation2 + $0x88] sm:$0xff] %v1159_v5  ;;  %v739_v9 = vadd.f32 %v14203_v8, %v16642_v55  ;;  %v733_v10 = vpop.f32.mrb[19].mxu0  ;;  %14344 = vmatprep.mubr.msk.bf16.mxu1 %vm16009_vm2, %v16008_v46  ;;  %v1464_v11 = vmax.f32 %v1413_v4, %v1434_v6  ;;  %14409 = vmatpush3.bf16.msra.mxu1 %v15000_v57 }
 0x1b2   :  { %1258 = vst [vmem:[#allocation2 + $0x80] sm:$0xff] %v1158_v7  ;;  %v734_v13 = vadd.f32 %v16642_v55, %v733_v10  ;;  %14410 = vmatprep.subr.bf16.mxu1 %v16008_v46 }
 0x1b3   :  { %v1161_v14 = vmax.f32 %v739_v9, 0.0  ;;  %1481 = vst [vmem:[#allocation3 + $0x1a] sm:$0xff] %v1464_v11  ;;  %v2425_v15 = vpack.c.bf16 %v1464_v11, %v1463_v3 }
 0x1b4   :  { %v1160_v16 = vmax.f32 %v734_v13, 0.0  ;;  %v14206_v17 = vpop.f32.mrb[20].mxu0 }
 0x1b5   :  { %v1351_v18 = vld [vmem:[#allocation2 + $0x60] ss:$3 sm:$0xff]  ;;  %v1385_v19 = vld [vmem:[#allocation2 + $0x61] ss:$3 sm:$0xff]  ;;  %1261 = vst [vmem:[#allocation2 + $0x98] sm:$0xff] %v1161_v14  ;;  %v749_v20 = vadd.f32 %v14206_v17, %v16642_v55  ;;  %14513 = vmatmul.mubr.bf16.gmra.mrb[104].mxu0 %v2425_v15  ;;  %14411 = vmatpush3.bf16.msra.mxu1 %v15001_v12  ;;  %v743_v23 = vpop.f32.mrb[21].mxu0 }
 0x1b6   :  { %v1414_v22 = vmax.f32 %v1351_v18, %v1385_v19  ;;  %1260 = vst [vmem:[#allocation2 + $0x90] sm:$0xff] %v1160_v16  ;;  %14516 = vmatprep.mubr.msk.bf16.mxu0 %vm16009_vm2, %v16008_v46  ;;  %14412 = vmatprep.subr.bf16.mxu1 %v16008_v46  ;;  %v1436_v24 = vld [vmem:[#allocation2 + $0x62] ss:$3 sm:$0xff]  ;;  %v744_v26 = vadd.f32 %v16642_v55, %v743_v23 }
 0x1b7   :  { %v1163_v25 = vmax.f32 %v749_v20, 0.0  ;;  %v1653_v35 = vld [vmem:[#allocation3 + $0x10] sm:$0xff] }
 0x1b8   :  { %v14209_v27 = vpop.f32.mrb[22].mxu0  ;;  %v1465_v28 = vmax.f32 %v1414_v22, %v1436_v24  ;;  %v1162_v33 = vmax.f32 %v744_v26, 0.0 }
 0x1b9   :  { %v1353_v29 = vld [vmem:[#allocation2 + $0x78] ss:$3 sm:$0xff]  ;;  %v1387_v30 = vld [vmem:[#allocation2 + $0x79] ss:$3 sm:$0xff]  ;;  %1263 = vst [vmem:[#allocation2 + $0xa8] sm:$0xff] %v1163_v25  ;;  %v759_v31 = vadd.f32 %v14209_v27, %v16642_v55  ;;  %14413 = vmatpush3.bf16.msra.mxu1 %v15002_v21  ;;  %v753_v34 = vpop.f32.mrb[23].mxu0 }
 0x1ba   :  { %v1415_v32 = vmax.f32 %v1353_v29, %v1387_v30  ;;  %v1654_v36 = vld [vmem:[#allocation3 + $0x18] sm:$0xff]  ;;  %1482 = vst [vmem:[#allocation3 + $0x22] sm:$0xff] %v1465_v28  ;;  %14414 = vmatprep.subr.bf16.mxu1 %v16008_v46  ;;  %v754_v40 = vadd.f32 %v16642_v55, %v753_v34  ;;  %1262 = vst [vmem:[#allocation2 + $0xa0] sm:$0xff] %v1162_v33 }
 0x1bb   :  { %v1438_v38 = vld [vmem:[#allocation2 + $0x7a] ss:$3 sm:$0xff]  ;;  %v1165_v39 = vmax.f32 %v759_v31, 0.0  ;;  %v1686_v41 = vpack.c.bf16 %v1654_v36, %v1653_v35 }
 0x1bc   :  { %v14212_v42 = vpop.f32.mrb[24].mxu0  ;;  %v1466_v43 = vmax.f32 %v1415_v32, %v1438_v38  ;;  %v1164_v44 = vmax.f32 %v754_v40, 0.0 }
 0x1bd   :  { %1265 = vst [vmem:[#allocation2 + $0xb8] sm:$0xff] %v1165_v39  ;;  %v769_v45 = vadd.f32 %v14212_v42, %v16642_v55  ;;  %14345 = vmatmul.mubr.bf16.gmra.mrb[4].mxu1 %v1686_v41  ;;  %v763_v47 = vpop.f32.mrb[25].mxu0 }
 0x1be   :  { %v764_v48 = vadd.f32 %v16642_v55, %v763_v47  ;;  %14348 = vmatprep.mubr.msk.bf16.mxu1 %vm16009_vm2, %v16008_v46  ;;  %1483 = vst [vmem:[#allocation3 + $0x2a] sm:$0xff] %v1466_v43  ;;  %v2426_v49 = vpack.c.bf16 %v1466_v43, %v1465_v28  ;;  %14415 = vmatpush3.bf16.msra.mxu1 %v15003_v37  ;;  %1264 = vst [vmem:[#allocation2 + $0xb0] sm:$0xff] %v1164_v44 }
 0x1bf   :  { %v1167_v51 = vmax.f32 %v769_v45, 0.0  ;;  %14416 = vmatprep.subr.bf16.mxu1 %v16008_v46  ;;  %v15005_v45 = vld [vmem:[#allocation13 + $0x68] sm:$0xff]  }
 0x1c0   :  { %v1166_v52 = vmax.f32 %v764_v48, 0.0  ;;  %v14215_v53 = vpop.f32.mrb[26].mxu0  ;;  %14517 = vmatmul.mubr.bf16.gmra.mrb[108].mxu0 %v2426_v49 }
 0x1c1   :  { %1267 = vst [vmem:[#allocation2 + $0xc8] sm:$0xff] %v1167_v51  ;;  %v779_v54 = vadd.f32 %v14215_v53, %v16642_v55  ;;  %v773_v56 = vpop.f32.mrb[27].mxu0  ;;  %14520 = vmatprep.mubr.msk.bf16.mxu0 %vm16009_vm2, %v16008_v46  ;;  %v1355_v58 = vld [vmem:[#allocation2 + $0x90] ss:$3 sm:$0xff]  ;;  %v1389_v59 = vld [vmem:[#allocation2 + $0x91] ss:$3 sm:$0xff] }
 0x1c2   :  { %1266 = vst [vmem:[#allocation2 + $0xc0] sm:$0xff] %v1166_v52  ;;  %v774_v57 = vadd.f32 %v16642_v55, %v773_v56  ;;  %14417 = vmatpush3.bf16.msra.mxu1 %v15004_v50  ;;  %v1416_v60 = vmax.f32 %v1355_v58, %v1389_v59  ;;  %v1440_v0 = vld [vmem:[#allocation2 + $0x92] ss:$3 sm:$0xff] }
 0x1c3   :  { %14418 = vmatprep.subr.bf16.mxu1 %v16008_v46  ;;  %v1169_v61 = vmax.f32 %v779_v54, 0.0  ;;  %v1655_v3 = vld [vmem:[#allocation3 + $0x20] sm:$0xff]  ;;  %v15007_v54 = vld [vmem:[#allocation13 + $0x100] sm:$0xff]  }
 0x1c4   :  { %v1168_v62 = vmax.f32 %v774_v57, 0.0  ;;  %v14218_v63 = vpop.f32.mrb[28].mxu0  ;;  %v1467_v9 = vmax.f32 %v1416_v60, %v1440_v0  ;;  %14661 = vmatpush3.bf16.msra.mxu0 %v15007_v54 }
 0x1c5   :  { %v789_v1 = vadd.f32 %v14218_v63, %v16642_v55  ;;  %v783_v2 = vpop.f32.mrb[29].mxu0  ;;  %v1656_v4 = vld [vmem:[#allocation3 + $0x28] sm:$0xff]  ;;  %1269 = vst [vmem:[#allocation2 + $0xd8] sm:$0xff] %v1169_v61  ;;  %14662 = vmatprep.subr.bf16.mxu0 %v16008_v46 }
 0x1c6   :  { %v1357_v5 = vld [vmem:[#allocation2 + $0xa8] ss:$3 sm:$0xff]  ;;  %v1391_v6 = vld [vmem:[#allocation2 + $0xa9] ss:$3 sm:$0xff]  ;;  %1268 = vst [vmem:[#allocation2 + $0xd0] sm:$0xff] %v1168_v62  ;;  %v784_v7 = vadd.f32 %v16642_v55, %v783_v2  ;;  %v1687_v8 = vpack.c.bf16 %v1656_v4, %v1655_v3  ;;  %1484 = vst [vmem:[#allocation3 + $0x32] sm:$0xff] %v1467_v9  ;;  %14419 = vmatpush3.bf16.msra.mxu1 %v15005_v45 }
 0x1c7   :  { %v1417_v10 = vmax.f32 %v1357_v5, %v1391_v6  ;;  %v1171_v11 = vmax.f32 %v789_v1, 0.0  ;;  %v1442_v12 = vld [vmem:[#allocation2 + $0xaa] ss:$3 sm:$0xff]  ;;  %14420 = vmatprep.subr.bf16.mxu1 %v16008_v46 }
 0x1c8   :  { %v1170_v13 = vmax.f32 %v784_v7, 0.0  ;;  %v14221_v14 = vpop.f32.mrb[30].mxu0  ;;  %14349 = vmatmul.mubr.bf16.gmra.mrb[8].mxu1 %v1687_v8  ;;  %v15008_v62 = vld [vmem:[#allocation13 + $0x108] sm:$0xff]  }
 0x1c9   :  { %1271 = vst [vmem:[#allocation2 + $0xe8] sm:$0xff] %v1171_v11  ;;  %v799_v15 = vadd.f32 %v14221_v14, %v16642_v55  ;;  %v793_v16 = vpop.f32.mrb[31].mxu0  ;;  %14352 = vmatprep.mubr.msk.bf16.mxu1 %vm16009_vm2, %v16008_v46  ;;  %v1468_v17 = vmax.f32 %v1417_v10, %v1442_v12  ;;  %14663 = vmatpush3.bf16.msra.mxu0 %v15008_v62 }
 0x1ca   :  { %1270 = vst [vmem:[#allocation2 + $0xe0] sm:$0xff] %v1170_v13  ;;  %v794_v18 = vadd.f32 %v16642_v55, %v793_v16  ;;  %14664 = vmatprep.subr.bf16.mxu0 %v16008_v46 }
 0x1cb   :  { %v1173_v19 = vmax.f32 %v799_v15, 0.0  ;;  %1485 = vst [vmem:[#allocation3 + $0x3a] sm:$0xff] %v1468_v17  ;;  %v2427_v20 = vpack.c.bf16 %v1468_v17, %v1467_v9  ;;  %v15009_v17 = vld [vmem:[#allocation13 + $0x110] sm:$0xff]  }
 0x1cc   :  { %v1172_v21 = vmax.f32 %v794_v18, 0.0  ;;  %v14224_v22 = vpop.f32.mrb[32].mxu0 }
 0x1cd   :  { %v1359_v23 = vld [vmem:[#allocation2 + $0xc0] ss:$3 sm:$0xff]  ;;  %v1393_v24 = vld [vmem:[#allocation2 + $0xc1] ss:$3 sm:$0xff]  ;;  %1273 = vst [vmem:[#allocation2 + $0xf8] sm:$0xff] %v1173_v19  ;;  %v809_v25 = vadd.f32 %v14224_v22, %v16642_v55  ;;  %14521 = vmatmul.mubr.bf16.gmra.mrb[112].mxu0 %v2427_v20  ;;  %v803_v27 = vpop.f32.mrb[33].mxu0 }
 0x1ce   :  { %v1418_v26 = vmax.f32 %v1359_v23, %v1393_v24  ;;  %1272 = vst [vmem:[#allocation2 + $0xf0] sm:$0xff] %v1172_v21  ;;  %14524 = vmatprep.mubr.msk.bf16.mxu0 %vm16009_vm2, %v16008_v46  ;;  %v1444_v28 = vld [vmem:[#allocation2 + $0xc2] ss:$3 sm:$0xff]  ;;  %v804_v30 = vadd.f32 %v16642_v55, %v803_v27  ;;  %14665 = vmatpush3.bf16.msra.mxu0 %v15009_v17 }
 0x1cf   :  { %v1175_v29 = vmax.f32 %v809_v25, 0.0  ;;  %v1657_v39 = vld [vmem:[#allocation3 + $0x30] sm:$0xff]  ;;  %v15006_v25 = vld [vmem:[#allocation13 + $0x70] sm:$0xff]   ;;  %14666 = vmatprep.subr.bf16.mxu0 %v16008_v46 }
 0x1d0   :  { %v14227_v31 = vpop.f32.mrb[34].mxu0  ;;  %v1469_v32 = vmax.f32 %v1418_v26, %v1444_v28  ;;  %v1174_v37 = vmax.f32 %v804_v30, 0.0  ;;  %v15010_v26 = vld [vmem:[#allocation13 + $0x118] sm:$0xff]   ;;  %14421 = vmatpush3.bf16.msra.mxu1 %v15006_v25 }
 0x1d1   :  { %v1361_v33 = vld [vmem:[#allocation2 + $0xd8] ss:$3 sm:$0xff]  ;;  %v1395_v34 = vld [vmem:[#allocation2 + $0xd9] ss:$3 sm:$0xff]  ;;  %1275 = vst [vmem:[#allocation2 + $0x108] sm:$0xff] %v1175_v29  ;;  %v819_v35 = vadd.f32 %v14227_v31, %v16642_v55  ;;  %v813_v38 = vpop.f32.mrb[35].mxu0  ;;  %14422 = vmatprep.subr.bf16.mxu1 %v16008_v46 }
 0x1d2   :  { %v1419_v36 = vmax.f32 %v1361_v33, %v1395_v34  ;;  %v1658_v40 = vld [vmem:[#allocation3 + $0x38] sm:$0xff]  ;;  %1486 = vst [vmem:[#allocation3 + $0x42] sm:$0xff] %v1469_v32  ;;  %v814_v43 = vadd.f32 %v16642_v55, %v813_v38  ;;  %1274 = vst [vmem:[#allocation2 + $0x100] sm:$0xff] %v1174_v37  ;;  %v15011_v31 = vld [vmem:[#allocation13 + $0x78] sm:$0xff]   ;;  %14667 = vmatpush3.bf16.msra.mxu0 %v15010_v26 }
 0x1d3   :  { %v1446_v41 = vld [vmem:[#allocation2 + $0xda] ss:$3 sm:$0xff]  ;;  %v1177_v42 = vmax.f32 %v819_v35, 0.0  ;;  %v1688_v44 = vpack.c.bf16 %v1658_v40, %v1657_v39  ;;  %14668 = vmatprep.subr.bf16.mxu0 %v16008_v46 }
 0x1d4   :  { %v14230_v47 = vpop.f32.mrb[36].mxu0  ;;  %v1470_v48 = vmax.f32 %v1419_v36, %v1446_v41  ;;  %v1176_v49 = vmax.f32 %v814_v43, 0.0  ;;  %v15012_v37 = vld [vmem:[#allocation13 + $0x120] sm:$0xff]   ;;  %14423 = vmatpush3.bf16.msra.mxu1 %v15011_v31 }
 0x1d5   :  { %1277 = vst [vmem:[#allocation2 + $0x118] sm:$0xff] %v1177_v42  ;;  %v829_v50 = vadd.f32 %v14230_v47, %v16642_v55  ;;  %14353 = vmatmul.mubr.bf16.gmra.mrb[12].mxu1 %v1688_v44  ;;  %v823_v51 = vpop.f32.mrb[37].mxu0  ;;  %14576 = vmatprep.subr.bf16.mxu1 %v16008_v46 }
 0x1d6   :  { %v824_v52 = vadd.f32 %v16642_v55, %v823_v51  ;;  %14356 = vmatprep.mubr.msk.bf16.mxu1 %vm16009_vm2, %v16008_v46  ;;  %1487 = vst [vmem:[#allocation3 + $0x4a] sm:$0xff] %v1470_v48  ;;  %v2428_v53 = vpack.c.bf16 %v1470_v48, %v1469_v32  ;;  %1276 = vst [vmem:[#allocation2 + $0x110] sm:$0xff] %v1176_v49  ;;  %14669 = vmatpush3.bf16.msra.mxu0 %v15012_v37 }
 0x1d7   :  { %v1179_v56 = vmax.f32 %v829_v50, 0.0  ;;  %14670 = vmatprep.subr.bf16.mxu0 %v16008_v46 }
 0x1d8   :  { %v1178_v57 = vmax.f32 %v824_v52, 0.0  ;;  %v14233_v58 = vpop.f32.mrb[38].mxu0  ;;  %14525 = vmatmul.mubr.bf16.gmra.mrb[116].mxu0 %v2428_v53  ;;  %v15013_v52 = vld [vmem:[#allocation13 + $0x128] sm:$0xff]  }
 0x1d9   :  { %1279 = vst [vmem:[#allocation2 + $0x128] sm:$0xff] %v1179_v56  ;;  %v839_v59 = vadd.f32 %v14233_v58, %v16642_v55  ;;  %v833_v60 = vpop.f32.mrb[39].mxu0  ;;  %14528 = vmatprep.mubr.msk.bf16.mxu0 %vm16009_vm2, %v16008_v46  ;;  %v1363_v63 = vld [vmem:[#allocation2 + $0xf0] ss:$3 sm:$0xff]  ;;  %v1397_v0 = vld [vmem:[#allocation2 + $0xf1] ss:$3 sm:$0xff] }
 0x1da   :  { %1278 = vst [vmem:[#allocation2 + $0x120] sm:$0xff] %v1178_v57  ;;  %v834_v61 = vadd.f32 %v16642_v55, %v833_v60  ;;  %v1420_v1 = vmax.f32 %v1363_v63, %v1397_v0  ;;  %v1448_v5 = vld [vmem:[#allocation2 + $0xf2] ss:$3 sm:$0xff]  ;;  %14671 = vmatpush3.bf16.msra.mxu0 %v15013_v52 }
 0x1db   :  { %v1181_v2 = vmax.f32 %v839_v59, 0.0  ;;  %v1659_v8 = vld [vmem:[#allocation3 + $0x40] sm:$0xff]  ;;  %14672 = vmatprep.subr.bf16.mxu0 %v16008_v46 }
 0x1dc   :  { %v1180_v3 = vmax.f32 %v834_v61, 0.0  ;;  %v14236_v4 = vpop.f32.mrb[40].mxu0  ;;  %v1471_v14 = vmax.f32 %v1420_v1, %v1448_v5  ;;  %v15014_v1 = vld [vmem:[#allocation13 + $0x130] sm:$0xff]  }
 0x1dd   :  { %v849_v6 = vadd.f32 %v14236_v4, %v16642_v55  ;;  %v843_v7 = vpop.f32.mrb[41].mxu0  ;;  %v1660_v9 = vld [vmem:[#allocation3 + $0x48] sm:$0xff]  ;;  %1281 = vst [vmem:[#allocation2 + $0x138] sm:$0xff] %v1181_v2 }
 0x1de   :  { %v1365_v10 = vld [vmem:[#allocation2 + $0x108] ss:$3 sm:$0xff]  ;;  %v1399_v11 = vld [vmem:[#allocation2 + $0x109] ss:$3 sm:$0xff]  ;;  %1280 = vst [vmem:[#allocation2 + $0x130] sm:$0xff] %v1180_v3  ;;  %v844_v12 = vadd.f32 %v16642_v55, %v843_v7  ;;  %v1689_v13 = vpack.c.bf16 %v1660_v9, %v1659_v8  ;;  %1488 = vst [vmem:[#allocation3 + $0x52] sm:$0xff] %v1471_v14  ;;  %14673 = vmatpush3.bf16.msra.mxu0 %v15014_v1 }
 0x1df   :  { %v1421_v15 = vmax.f32 %v1365_v10, %v1399_v11  ;;  %v1183_v16 = vmax.f32 %v849_v6, 0.0  ;;  %v1450_v18 = vld [vmem:[#allocation2 + $0x10a] ss:$3 sm:$0xff]  ;;  %14674 = vmatprep.subr.bf16.mxu0 %v16008_v46 }
 0x1e0   :  { %v1182_v19 = vmax.f32 %v844_v12, 0.0  ;;  %v14239_v20 = vpop.f32.mrb[42].mxu0  ;;  %14357 = vmatmul.mubr.bf16.gmra.mrb[16].mxu1 %v1689_v13  ;;  %v15015_v8 = vld [vmem:[#allocation13 + $0x138] sm:$0xff]  }
 0x1e1   :  { %1283 = vst [vmem:[#allocation2 + $0x148] sm:$0xff] %v1183_v16  ;;  %v859_v21 = vadd.f32 %v14239_v20, %v16642_v55  ;;  %v853_v22 = vpop.f32.mrb[43].mxu0  ;;  %14360 = vmatprep.mubr.msk.bf16.mxu1 %vm16009_vm2, %v16008_v46  ;;  %v1472_v23 = vmax.f32 %v1421_v15, %v1450_v18 }
 0x1e2   :  { %1282 = vst [vmem:[#allocation2 + $0x140] sm:$0xff] %v1182_v19  ;;  %v854_v24 = vadd.f32 %v16642_v55, %v853_v22  ;;  %14675 = vmatpush3.bf16.msra.mxu0 %v15015_v8 }
 0x1e3   :  { %v1185_v27 = vmax.f32 %v859_v21, 0.0  ;;  %1489 = vst [vmem:[#allocation3 + $0x5a] sm:$0xff] %v1472_v23  ;;  %v2429_v28 = vpack.c.bf16 %v1472_v23, %v1471_v14 }
 0x1e4   :  { %v1184_v29 = vmax.f32 %v854_v24, 0.0  ;;  %v14242_v30 = vpop.f32.mrb[44].mxu0 }
 0x1e5   :  { %v1367_v32 = vld [vmem:[#allocation2 + $0x120] ss:$3 sm:$0xff]  ;;  %v1401_v33 = vld [vmem:[#allocation2 + $0x121] ss:$3 sm:$0xff]  ;;  %1285 = vst [vmem:[#allocation2 + $0x158] sm:$0xff] %v1185_v27  ;;  %v869_v34 = vadd.f32 %v14242_v30, %v16642_v55  ;;  %14529 = vmatmul.mubr.bf16.gmra.mrb[120].mxu0 %v2429_v28  ;;  %v863_v36 = vpop.f32.mrb[45].mxu0 }
 0x1e6   :  { %v1422_v35 = vmax.f32 %v1367_v32, %v1401_v33  ;;  %1284 = vst [vmem:[#allocation2 + $0x150] sm:$0xff] %v1184_v29  ;;  %14532 = vmatprep.mubr.msk.bf16.mxu0 %vm16009_vm2, %v16008_v46  ;;  %v1452_v38 = vld [vmem:[#allocation2 + $0x122] ss:$3 sm:$0xff]  ;;  %v864_v40 = vadd.f32 %v16642_v55, %v863_v36 }
 0x1e7   :  { %v1187_v39 = vmax.f32 %v869_v34, 0.0  ;;  %v1661_v50 = vld [vmem:[#allocation3 + $0x50] sm:$0xff] }
 0x1e8   :  { %v14245_v41 = vpop.f32.mrb[46].mxu0  ;;  %v1473_v42 = vmax.f32 %v1422_v35, %v1452_v38  ;;  %v1186_v48 = vmax.f32 %v864_v40, 0.0  ;;  %v16739_v32 = vld [vmem:[#allocation11] ss:$0 sm:$0xff] }
 0x1e9   :  { %v1369_v43 = vld [vmem:[#allocation2 + $0x138] ss:$3 sm:$0xff]  ;;  %v1403_v44 = vld [vmem:[#allocation2 + $0x139] ss:$3 sm:$0xff]  ;;  %1287 = vst [vmem:[#allocation2 + $0x168] sm:$0xff] %v1187_v39  ;;  %v879_v45 = vadd.f32 %v14245_v41, %v16642_v55  ;;  %v873_v49 = vpop.f32.mrb[47].mxu0 }
 0x1ea   :  { %v1423_v47 = vmax.f32 %v1369_v43, %v1403_v44  ;;  %v1662_v51 = vld [vmem:[#allocation3 + $0x58] sm:$0xff]  ;;  %1490 = vst [vmem:[#allocation3 + $0x62] sm:$0xff] %v1473_v42  ;;  %v874_v56 = vadd.f32 %v16642_v55, %v873_v49  ;;  %1286 = vst [vmem:[#allocation2 + $0x160] sm:$0xff] %v1186_v48 }
 0x1eb   :  { %v1454_v53 = vld [vmem:[#allocation2 + $0x13a] ss:$3 sm:$0xff]  ;;  %v1189_v54 = vmax.f32 %v879_v45, 0.0  ;;  %v1690_v57 = vpack.c.bf16 %v1662_v51, %v1661_v50 }
 0x1ec   :  { %v14248_v58 = vpop.f32.mrb[48].mxu0  ;;  %v1474_v59 = vmax.f32 %v1423_v47, %v1454_v53  ;;  %v1188_v60 = vmax.f32 %v874_v56, 0.0 }
 0x1ed   :  { %1289 = vst [vmem:[#allocation2 + $0x178] sm:$0xff] %v1189_v54  ;;  %v889_v61 = vadd.f32 %v14248_v58, %v16642_v55  ;;  %14361 = vmatmul.mubr.bf16.gmra.mrb[20].mxu1 %v1690_v57  ;;  %v883_v62 = vpop.f32.mrb[49].mxu0 }
 0x1ee   :  { %v884_v63 = vadd.f32 %v16642_v55, %v883_v62  ;;  %14364 = vmatprep.mubr.msk.bf16.mxu1 %vm16009_vm2, %v16008_v46  ;;  %1491 = vst [vmem:[#allocation3 + $0x6a] sm:$0xff] %v1474_v59  ;;  %v2430_v0 = vpack.c.bf16 %v1474_v59, %v1473_v42  ;;  %1288 = vst [vmem:[#allocation2 + $0x170] sm:$0xff] %v1188_v60 }
 0x1ef   :  { %v1191_v2 = vmax.f32 %v889_v61, 0.0 }
 0x1f0   :  { %v1190_v3 = vmax.f32 %v884_v63, 0.0  ;;  %v14251_v4 = vpop.f32.mrb[50].mxu0  ;;  %14533 = vmatmul.mubr.bf16.gmra.mrb[124].mxu0 %v2430_v0 }
 0x1f1   :  { %1291 = vst [vmem:[#allocation2 + $0x188] sm:$0xff] %v1191_v2  ;;  %v899_v5 = vadd.f32 %v14251_v4, %v16642_v55  ;;  %v893_v6 = vpop.f32.mrb[51].mxu0  ;;  %14536 = vmatprep.mubr.msk.bf16.mxu0 %vm16009_vm2, %v16008_v46  ;;  %v1371_v9 = vld [vmem:[#allocation2 + $0x150] ss:$3 sm:$0xff]  ;;  %v1405_v10 = vld [vmem:[#allocation2 + $0x151] ss:$3 sm:$0xff] }
 0x1f2   :  { %1290 = vst [vmem:[#allocation2 + $0x180] sm:$0xff] %v1190_v3  ;;  %v894_v7 = vadd.f32 %v16642_v55, %v893_v6  ;;  %v1424_v14 = vmax.f32 %v1371_v9, %v1405_v10  ;;  %v1663_v17 = vld [vmem:[#allocation3 + $0x60] sm:$0xff] }
 0x1f3   :  { %v1193_v11 = vmax.f32 %v899_v5, 0.0  ;;  %v1456_v19 = vld [vmem:[#allocation2 + $0x152] ss:$3 sm:$0xff] }
 0x1f4   :  { %v1192_v12 = vmax.f32 %v894_v7, 0.0  ;;  %v14254_v13 = vpop.f32.mrb[52].mxu0  ;;  %v1475_v24 = vmax.f32 %v1424_v14, %v1456_v19 }
 0x1f5   :  { %1293 = vst [vmem:[#allocation2 + $0x198] sm:$0xff] %v1193_v11  ;;  %v909_v15 = vadd.f32 %v14254_v13, %v16642_v55  ;;  %v903_v16 = vpop.f32.mrb[53].mxu0  ;;  %v1664_v18 = vld [vmem:[#allocation3 + $0x68] sm:$0xff] }
 0x1f6   :  { %v1373_v20 = vld [vmem:[#allocation2 + $0x168] ss:$3 sm:$0xff]  ;;  %v1407_v21 = vld [vmem:[#allocation2 + $0x169] ss:$3 sm:$0xff]  ;;  %1292 = vst [vmem:[#allocation2 + $0x190] sm:$0xff] %v1192_v12  ;;  %v904_v22 = vadd.f32 %v16642_v55, %v903_v16  ;;  %v1691_v23 = vpack.c.bf16 %v1664_v18, %v1663_v17  ;;  %1492 = vst [vmem:[#allocation3 + $0x72] sm:$0xff] %v1475_v24 }
 0x1f7   :  { %v1195_v25 = vmax.f32 %v909_v15, 0.0  ;;  %v1425_v26 = vmax.f32 %v1373_v20, %v1407_v21  ;;  %v1458_v29 = vld [vmem:[#allocation2 + $0x16a] ss:$3 sm:$0xff] }
 0x1f8   :  { %v1194_v27 = vmax.f32 %v904_v22, 0.0  ;;  %v14257_v28 = vpop.f32.mrb[54].mxu0  ;;  %14365 = vmatmul.mubr.bf16.gmra.mrb[24].mxu1 %v1691_v23 }
 0x1f9   :  { %v1375_v30 = vld [vmem:[#allocation2 + $0x180] ss:$3 sm:$0x1f]  ;;  %v1409_v31 = vld [vmem:[#allocation2 + $0x181] ss:$3 sm:$0x1f]  ;;  %v919_v33 = vadd.f32 %v16739_v32, %v14257_v28  ;;  %14368 = vmatprep.mubr.msk.bf16.mxu1 %vm16009_vm2, %v16008_v46  ;;  %v1476_v55 = vmax.f32 %v1425_v26, %v1458_v29 }
 0x1fa   :  { %1295 = vst [vmem:[#allocation2 + $0x1a8] sm:$0xff] %v1195_v25  ;;  %1294 = vst [vmem:[#allocation2 + $0x1a0] sm:$0xff] %v1194_v27  ;;  %v913_v34 = vpop.f32.mrb[55].mxu0  ;;  %v1426_v35 = vmax.f32 %v1375_v30, %v1409_v31  ;;  %v1460_v39 = vld [vmem:[#allocation2 + $0x182] ss:$3 sm:$0x1f] }
 0x1fb   :  { %v1197_v36 = vmax.f32 %v919_v33, 0.0  ;;  %v914_v37 = vadd.f32 %v16739_v32, %v913_v34  ;;  %1493 = vst [vmem:[#allocation3 + $0x7a] sm:$0xff] %v1476_v55  ;;  %v2431_v38 = vpack.c.bf16 %v1476_v55, %v1475_v24 }
 0x1fc   :  { %v14260_v40 = vpop.f32.mrb[56].mxu0  ;;  %v1477_v41 = vmax.f32 %v1426_v35, %v1460_v39 }
 0x1fd   :  { %1297 = vst [vmem:[#allocation2 + $0x1b8] sm:$0xff] %v1197_v36  ;;  %v1196_v42 = vmax.f32 %v914_v37, 0.0  ;;  %v929_v43 = vadd.f32 %v16739_v32, %v14260_v40  ;;  %v923_v44 = vpop.f32.mrb[57].mxu0  ;;  %14537 = vmatmul.mubr.bf16.gmra.mrb[128].mxu0 %v2431_v38  ;;  %v1665_v56 = vld [vmem:[#allocation3 + $0x70] sm:$0xff] }
 0x1fe   :  { %v924_v45 = vadd.f32 %v16739_v32, %v923_v44  ;;  %14540 = vmatprep.mubr.msk.bf16.mxu0 %vm16009_vm2, %v16008_v46  ;;  %1494 = vst [vmem:[#allocation3 + $0x82] sm:$0x1f] %v1477_v41 }
 0x1ff   :  { %1296 = vst [vmem:[#allocation2 + $0x1b0] sm:$0xff] %v1196_v42  ;;  %v1199_v47 = vmax.f32 %v929_v43, 0.0 }
 0x200   :  { %v1198_v48 = vmax.f32 %v924_v45, 0.0  ;;  %v14263_v49 = vpop.f32.mrb[58].mxu0 }
 0x201   :  { %v1498_v50 = vld [vmem:[#allocation2 + $0x190] ss:$3 sm:$0xff]  ;;  %v1532_v51 = vld [vmem:[#allocation2 + $0x191] ss:$3 sm:$0xff]  ;;  %1299 = vst [vmem:[#allocation2 + $0x1c8] sm:$0xff] %v1199_v47  ;;  %v939_v52 = vadd.f32 %v16739_v32, %v14263_v49  ;;  %v933_v53 = vpop.f32.mrb[59].mxu0 }
 0x202   :  { %1298 = vst [vmem:[#allocation2 + $0x1c0] sm:$0xff] %v1198_v48  ;;  %v934_v54 = vadd.f32 %v16739_v32, %v933_v53  ;;  %v1666_v57 = vld [vmem:[#allocation3 + $0x78] sm:$0xff]  ;;  %v1565_v58 = vmax.f32 %v1498_v50, %v1532_v51 }
 0x203   :  { %v1201_v59 = vmax.f32 %v939_v52, 0.0  ;;  %v1692_v60 = vpack.c.bf16 %v1666_v57, %v1665_v56  ;;  %v1583_v61 = vld [vmem:[#allocation2 + $0x192] ss:$3 sm:$0xff] }
 0x204   :  { %v1200_v62 = vmax.f32 %v934_v54, 0.0  ;;  %v14266_v63 = vpop.f32.mrb[60].mxu0  ;;  %v1616_v0 = vmax.f32 %v1565_v58, %v1583_v61 }
 0x205   :  { %1301 = vst [vmem:[#allocation2 + $0x1d8] sm:$0xff] %v1201_v59  ;;  %v949_v1 = vadd.f32 %v16739_v32, %v14266_v63  ;;  %14369 = vmatmul.mubr.bf16.gmra.mrb[28].mxu1 %v1692_v60  ;;  %v943_v2 = vpop.f32.mrb[61].mxu0  ;;  %v1667_v18 = vld [vmem:[#allocation3 + $0x80] sm:$0xff] }
 0x206   :  { %v1500_v3 = vld [vmem:[#allocation2 + $0x1a8] ss:$3 sm:$0xff]  ;;  %v1534_v4 = vld [vmem:[#allocation2 + $0x1a9] ss:$3 sm:$0xff]  ;;  %1300 = vst [vmem:[#allocation2 + $0x1d0] sm:$0xff] %v1200_v62  ;;  %v944_v5 = vadd.f32 %v16739_v32, %v943_v2  ;;  %14372 = vmatprep.mubr.msk.bf16.mxu1 %vm16009_vm2, %v16008_v46  ;;  %1633 = vst [vmem:[#allocation3 + $0x8b] sm:$0xff] %v1616_v0 }
 0x207   :  { %v1203_v6 = vmax.f32 %v949_v1, 0.0  ;;  %v1566_v7 = vmax.f32 %v1500_v3, %v1534_v4  ;;  %v1585_v10 = vld [vmem:[#allocation2 + $0x1aa] ss:$3 sm:$0xff]  ;;  %v2406_v26 = vld [vmem:[#allocation3 + $0x82] sm:$0xff] }
 0x208   :  { %v1202_v8 = vmax.f32 %v944_v5, 0.0  ;;  %v14269_v9 = vpop.f32.mrb[62].mxu0 }
 0x209   :  { %1303 = vst [vmem:[#allocation2 + $0x1e8] sm:$0xff] %v1203_v6  ;;  %v959_v11 = vadd.f32 %v16739_v32, %v14269_v9  ;;  %v953_v12 = vpop.f32.mrb[63].mxu0  ;;  %v1617_v13 = vmax.f32 %v1566_v7, %v1585_v10 }
 0x20a   :  { %1302 = vst [vmem:[#allocation2 + $0x1e0] sm:$0xff] %v1202_v8  ;;  %v954_v14 = vadd.f32 %v16739_v32, %v953_v12 }
 0x20b   :  { %v1205_v15 = vmax.f32 %v959_v11, 0.0  ;;  %1634 = vst [vmem:[#allocation3 + $0x93] sm:$0xff] %v1617_v13 }
 0x20c   :  { %v1204_v16 = vmax.f32 %v954_v14, 0.0  ;;  %v14272_v17 = vpop.f32.mrb[64].mxu0 }
 0x20d   :  { %v1502_v19 = vld [vmem:[#allocation2 + $0x1c0] ss:$3 sm:$0xff]  ;;  %v1536_v20 = vld [vmem:[#allocation2 + $0x1c1] ss:$3 sm:$0xff]  ;;  %1305 = vst [vmem:[#allocation2 + $0x1f8] sm:$0xff] %v1205_v15  ;;  %v969_v21 = vadd.f32 %v16739_v32, %v14272_v17  ;;  %v963_v22 = vpop.f32.mrb[65].mxu0 }
 0x20e   :  { %v1668_v23 = vld [vmem:[#allocation3 + $0x88] sm:$0xff]  ;;  %1304 = vst [vmem:[#allocation2 + $0x1f0] sm:$0xff] %v1204_v16  ;;  %v964_v24 = vadd.f32 %v16739_v32, %v963_v22  ;;  %v1567_v28 = vmax.f32 %v1502_v19, %v1536_v20 }
 0x20f   :  { %v1693_v25 = vpack.c.bf16 %v1668_v23, %v1667_v18  ;;  %v2407_v27 = vld [vmem:[#allocation3 + $0x8a] sm:$0xff]  ;;  %v1207_v29 = vmax.f32 %v969_v21, 0.0 }
 0x210   :  { %v2432_v30 = vpack.c.bf16 %v2407_v27, %v2406_v26  ;;  %v1587_v31 = vld [vmem:[#allocation2 + $0x1c2] ss:$3 sm:$0xff]  ;;  %v1206_v33 = vmax.f32 %v964_v24, 0.0  ;;  %v14275_v55 = vpop.f32.mrb[66].mxu0 }
 0x211   :  { %14373 = vmatmul.mubr.bf16.gmra.mrb[32].mxu1 %v1693_v25  ;;  %v1618_v34 = vmax.f32 %v1567_v28, %v1587_v31  ;;  %v1504_v35 = vld [vmem:[#allocation2 + $0x1d8] ss:$3 sm:$0xff]  ;;  %v1538_v36 = vld [vmem:[#allocation2 + $0x1d9] ss:$3 sm:$0xff]  ;;  %1307 = vst [vmem:[#allocation2 + $0x208] sm:$0xff] %v1207_v29  ;;  %v979_v37 = vadd.f32 %v16739_v32, %v14275_v55  ;;  %v973_v39 = vpop.f32.mrb[67].mxu0 }
 0x212   :  { %14541 = vmatmul.mubr.bf16.gmra.mrb[132].mxu0 %v2432_v30  ;;  %14376 = vmatprep.mubr.msk.bf16.mxu1 %vm16009_vm2, %v16008_v46  ;;  %v1568_v38 = vmax.f32 %v1504_v35, %v1538_v36  ;;  %1306 = vst [vmem:[#allocation2 + $0x200] sm:$0xff] %v1206_v33  ;;  %v1589_v40 = vld [vmem:[#allocation2 + $0x1da] ss:$3 sm:$0xff]  ;;  %v974_v42 = vadd.f32 %v16739_v32, %v973_v39  ;;  %v1669_v57 = vld [vmem:[#allocation3 + $0x90] sm:$0xff] }
 0x213   :  { %14544 = vmatprep.mubr.msk.bf16.mxu0 %vm16009_vm2, %v16008_v46  ;;  %1635 = vst [vmem:[#allocation3 + $0x9b] sm:$0xff] %v1618_v34  ;;  %v1209_v41 = vmax.f32 %v979_v37, 0.0  ;;  %v2408_v61 = vld [vmem:[#allocation3 + $0x92] sm:$0xff] }
 0x214   :  { %v1619_v43 = vmax.f32 %v1568_v38, %v1589_v40  ;;  %v14278_v44 = vpop.f32.mrb[68].mxu0  ;;  %v1208_v45 = vmax.f32 %v974_v42, 0.0 }
 0x215   :  { %1309 = vst [vmem:[#allocation2 + $0x218] sm:$0xff] %v1209_v41  ;;  %v989_v47 = vadd.f32 %v16739_v32, %v14278_v44  ;;  %v983_v48 = vpop.f32.mrb[69].mxu0 }
 0x216   :  { %1636 = vst [vmem:[#allocation3 + $0xa3] sm:$0xff] %v1619_v43  ;;  %v984_v49 = vadd.f32 %v16739_v32, %v983_v48  ;;  %1308 = vst [vmem:[#allocation2 + $0x210] sm:$0xff] %v1208_v45 }
 0x217   :  { %v1211_v50 = vmax.f32 %v989_v47, 0.0 }
 0x218   :  { %v1210_v51 = vmax.f32 %v984_v49, 0.0  ;;  %v14281_v52 = vpop.f32.mrb[70].mxu0 }
 0x219   :  { %v1506_v53 = vld [vmem:[#allocation2 + $0x1f0] ss:$3 sm:$0xff]  ;;  %v1540_v54 = vld [vmem:[#allocation2 + $0x1f1] ss:$3 sm:$0xff]  ;;  %1311 = vst [vmem:[#allocation2 + $0x228] sm:$0xff] %v1211_v50  ;;  %v999_v56 = vadd.f32 %v16739_v32, %v14281_v52  ;;  %v993_v59 = vpop.f32.mrb[71].mxu0 }
 0x21a   :  { %v1569_v58 = vmax.f32 %v1506_v53, %v1540_v54  ;;  %1310 = vst [vmem:[#allocation2 + $0x220] sm:$0xff] %v1210_v51  ;;  %v1670_v60 = vld [vmem:[#allocation3 + $0x98] sm:$0xff]  ;;  %v994_v1 = vadd.f32 %v16739_v32, %v993_v59 }
 0x21b   :  { %v2409_v62 = vld [vmem:[#allocation3 + $0x9a] sm:$0xff]  ;;  %v1213_v0 = vmax.f32 %v999_v56, 0.0  ;;  %v1694_v2 = vpack.c.bf16 %v1670_v60, %v1669_v57 }
 0x21c   :  { %v1591_v63 = vld [vmem:[#allocation2 + $0x1f2] ss:$3 sm:$0xff]  ;;  %v2433_v3 = vpack.c.bf16 %v2409_v62, %v2408_v61  ;;  %v14284_v5 = vpop.f32.mrb[72].mxu0  ;;  %v1212_v6 = vmax.f32 %v994_v1, 0.0 }
 0x21d   :  { %v1620_v4 = vmax.f32 %v1569_v58, %v1591_v63  ;;  %1313 = vst [vmem:[#allocation2 + $0x238] sm:$0xff] %v1213_v0  ;;  %v1009_v7 = vadd.f32 %v16739_v32, %v14284_v5  ;;  %14377 = vmatmul.mubr.bf16.gmra.mrb[36].mxu1 %v1694_v2  ;;  %v1003_v8 = vpop.f32.mrb[73].mxu0  ;;  %v1508_v9 = vld [vmem:[#allocation2 + $0x208] ss:$3 sm:$0xff]  ;;  %v1542_v10 = vld [vmem:[#allocation2 + $0x209] ss:$3 sm:$0xff] }
 0x21e   :  { %14545 = vmatmul.mubr.bf16.gmra.mrb[136].mxu0 %v2433_v3  ;;  %v1004_v11 = vadd.f32 %v16739_v32, %v1003_v8  ;;  %14380 = vmatprep.mubr.msk.bf16.mxu1 %vm16009_vm2, %v16008_v46  ;;  %v1570_v12 = vmax.f32 %v1508_v9, %v1542_v10  ;;  %1312 = vst [vmem:[#allocation2 + $0x230] sm:$0xff] %v1212_v6  ;;  %v1593_v14 = vld [vmem:[#allocation2 + $0x20a] ss:$3 sm:$0xff]  ;;  %v1671_v24 = vld [vmem:[#allocation3 + $0xa0] sm:$0xff] }
 0x21f   :  { %1637 = vst [vmem:[#allocation3 + $0xab] sm:$0xff] %v1620_v4  ;;  %14548 = vmatprep.mubr.msk.bf16.mxu0 %vm16009_vm2, %v16008_v46  ;;  %v1215_v13 = vmax.f32 %v1009_v7, 0.0  ;;  %v2410_v28 = vld [vmem:[#allocation3 + $0xa2] sm:$0xff] }
 0x220   :  { %v1214_v15 = vmax.f32 %v1004_v11, 0.0  ;;  %v14287_v16 = vpop.f32.mrb[74].mxu0  ;;  %v1621_v17 = vmax.f32 %v1570_v12, %v1593_v14 }
 0x221   :  { %1315 = vst [vmem:[#allocation2 + $0x248] sm:$0xff] %v1215_v13  ;;  %v1019_v18 = vadd.f32 %v16739_v32, %v14287_v16  ;;  %v1013_v19 = vpop.f32.mrb[75].mxu0 }
 0x222   :  { %1314 = vst [vmem:[#allocation2 + $0x240] sm:$0xff] %v1214_v15  ;;  %v1014_v20 = vadd.f32 %v16739_v32, %v1013_v19  ;;  %1638 = vst [vmem:[#allocation3 + $0xb3] sm:$0xff] %v1621_v17 }
 0x223   :  { %v1217_v21 = vmax.f32 %v1019_v18, 0.0 }
 0x224   :  { %v1216_v22 = vmax.f32 %v1014_v20, 0.0  ;;  %v14290_v23 = vpop.f32.mrb[76].mxu0 }
 0x225   :  { %1317 = vst [vmem:[#allocation2 + $0x258] sm:$0xff] %v1217_v21  ;;  %v1029_v25 = vadd.f32 %v16739_v32, %v14290_v23  ;;  %v1023_v26 = vpop.f32.mrb[77].mxu0  ;;  %v1510_v30 = vld [vmem:[#allocation2 + $0x220] ss:$3 sm:$0xff]  ;;  %v1544_v31 = vld [vmem:[#allocation2 + $0x221] ss:$3 sm:$0xff] }
 0x226   :  { %v1672_v27 = vld [vmem:[#allocation3 + $0xa8] sm:$0xff]  ;;  %1316 = vst [vmem:[#allocation2 + $0x250] sm:$0xff] %v1216_v22  ;;  %v1024_v33 = vadd.f32 %v16739_v32, %v1023_v26  ;;  %v1571_v35 = vmax.f32 %v1510_v30, %v1544_v31 }
 0x227   :  { %v2411_v29 = vld [vmem:[#allocation3 + $0xaa] sm:$0xff]  ;;  %v1695_v55 = vpack.c.bf16 %v1672_v27, %v1671_v24  ;;  %v1219_v36 = vmax.f32 %v1029_v25, 0.0 }
 0x228   :  { %v2434_v34 = vpack.c.bf16 %v2411_v29, %v2410_v28  ;;  %v1595_v37 = vld [vmem:[#allocation2 + $0x222] ss:$3 sm:$0xff]  ;;  %v1218_v38 = vmax.f32 %v1024_v33, 0.0  ;;  %v14293_v39 = vpop.f32.mrb[78].mxu0 }
 0x229   :  { %14381 = vmatmul.mubr.bf16.gmra.mrb[40].mxu1 %v1695_v55  ;;  %v1622_v40 = vmax.f32 %v1571_v35, %v1595_v37  ;;  %v1512_v41 = vld [vmem:[#allocation2 + $0x238] ss:$3 sm:$0xff]  ;;  %v1546_v42 = vld [vmem:[#allocation2 + $0x239] ss:$3 sm:$0xff]  ;;  %1319 = vst [vmem:[#allocation2 + $0x268] sm:$0xff] %v1219_v36  ;;  %v1039_v43 = vadd.f32 %v16739_v32, %v14293_v39  ;;  %v1033_v45 = vpop.f32.mrb[79].mxu0 }
 0x22a   :  { %14549 = vmatmul.mubr.bf16.gmra.mrb[140].mxu0 %v2434_v34  ;;  %14384 = vmatprep.mubr.msk.bf16.mxu1 %vm16009_vm2, %v16008_v46  ;;  %v1572_v44 = vmax.f32 %v1512_v41, %v1546_v42  ;;  %1318 = vst [vmem:[#allocation2 + $0x260] sm:$0xff] %v1218_v38  ;;  %v1597_v47 = vld [vmem:[#allocation2 + $0x23a] ss:$3 sm:$0xff]  ;;  %v1034_v49 = vadd.f32 %v16739_v32, %v1033_v45  ;;  %v1673_v63 = vld [vmem:[#allocation3 + $0xb0] sm:$0xff] }
 0x22b   :  { %14552 = vmatprep.mubr.msk.bf16.mxu0 %vm16009_vm2, %v16008_v46  ;;  %1639 = vst [vmem:[#allocation3 + $0xbb] sm:$0xff] %v1622_v40  ;;  %v1221_v48 = vmax.f32 %v1039_v43, 0.0  ;;  %v2412_v3 = vld [vmem:[#allocation3 + $0xb2] sm:$0xff] }
 0x22c   :  { %v1623_v50 = vmax.f32 %v1572_v44, %v1597_v47  ;;  %v14296_v51 = vpop.f32.mrb[80].mxu0  ;;  %v1220_v52 = vmax.f32 %v1034_v49, 0.0 }
 0x22d   :  { %1321 = vst [vmem:[#allocation2 + $0x278] sm:$0xff] %v1221_v48  ;;  %v1049_v53 = vadd.f32 %v16739_v32, %v14296_v51  ;;  %v1043_v54 = vpop.f32.mrb[81].mxu0 }
 0x22e   :  { %1640 = vst [vmem:[#allocation3 + $0xc3] sm:$0xff] %v1623_v50  ;;  %v1044_v56 = vadd.f32 %v16739_v32, %v1043_v54  ;;  %1320 = vst [vmem:[#allocation2 + $0x270] sm:$0xff] %v1220_v52 }
 0x22f   :  { %v1223_v57 = vmax.f32 %v1049_v53, 0.0 }
 0x230   :  { %v1222_v58 = vmax.f32 %v1044_v56, 0.0  ;;  %v14299_v59 = vpop.f32.mrb[82].mxu0 }
 0x231   :  { %v1514_v60 = vld [vmem:[#allocation2 + $0x250] ss:$3 sm:$0xff]  ;;  %v1548_v61 = vld [vmem:[#allocation2 + $0x251] ss:$3 sm:$0xff]  ;;  %1323 = vst [vmem:[#allocation2 + $0x288] sm:$0xff] %v1223_v57  ;;  %v1059_v62 = vadd.f32 %v16739_v32, %v14299_v59  ;;  %v1053_v1 = vpop.f32.mrb[83].mxu0 }
 0x232   :  { %v1573_v0 = vmax.f32 %v1514_v60, %v1548_v61  ;;  %1322 = vst [vmem:[#allocation2 + $0x280] sm:$0xff] %v1222_v58  ;;  %v1674_v2 = vld [vmem:[#allocation3 + $0xb8] sm:$0xff]  ;;  %v1054_v7 = vadd.f32 %v16739_v32, %v1053_v1 }
 0x233   :  { %v2413_v4 = vld [vmem:[#allocation3 + $0xba] sm:$0xff]  ;;  %v1225_v6 = vmax.f32 %v1059_v62, 0.0  ;;  %v1696_v8 = vpack.c.bf16 %v1674_v2, %v1673_v63 }
 0x234   :  { %v1599_v5 = vld [vmem:[#allocation2 + $0x252] ss:$3 sm:$0xff]  ;;  %v2435_v9 = vpack.c.bf16 %v2413_v4, %v2412_v3  ;;  %v14302_v11 = vpop.f32.mrb[84].mxu0  ;;  %v1224_v12 = vmax.f32 %v1054_v7, 0.0 }
 0x235   :  { %v1624_v10 = vmax.f32 %v1573_v0, %v1599_v5  ;;  %1325 = vst [vmem:[#allocation2 + $0x298] sm:$0xff] %v1225_v6  ;;  %v1069_v13 = vadd.f32 %v16739_v32, %v14302_v11  ;;  %14385 = vmatmul.mubr.bf16.gmra.mrb[44].mxu1 %v1696_v8  ;;  %v1063_v14 = vpop.f32.mrb[85].mxu0  ;;  %v1516_v15 = vld [vmem:[#allocation2 + $0x268] ss:$3 sm:$0xff]  ;;  %v1550_v16 = vld [vmem:[#allocation2 + $0x269] ss:$3 sm:$0xff] }
 0x236   :  { %14553 = vmatmul.mubr.bf16.gmra.mrb[144].mxu0 %v2435_v9  ;;  %v1064_v17 = vadd.f32 %v16739_v32, %v1063_v14  ;;  %14388 = vmatprep.mubr.msk.bf16.mxu1 %vm16009_vm2, %v16008_v46  ;;  %v1574_v18 = vmax.f32 %v1516_v15, %v1550_v16  ;;  %1324 = vst [vmem:[#allocation2 + $0x290] sm:$0xff] %v1224_v12  ;;  %v1601_v20 = vld [vmem:[#allocation2 + $0x26a] ss:$3 sm:$0xff]  ;;  %v1675_v30 = vld [vmem:[#allocation3 + $0xc0] sm:$0xff] }
 0x237   :  { %1641 = vst [vmem:[#allocation3 + $0xcb] sm:$0xff] %v1624_v10  ;;  %14556 = vmatprep.mubr.msk.bf16.mxu0 %vm16009_vm2, %v16008_v46  ;;  %v1227_v19 = vmax.f32 %v1069_v13, 0.0  ;;  %v2414_v34 = vld [vmem:[#allocation3 + $0xc2] sm:$0xff] }
 0x238   :  { %v1226_v21 = vmax.f32 %v1064_v17, 0.0  ;;  %v14305_v22 = vpop.f32.mrb[86].mxu0  ;;  %v1625_v23 = vmax.f32 %v1574_v18, %v1601_v20 }
 0x239   :  { %1327 = vst [vmem:[#allocation2 + $0x2a8] sm:$0xff] %v1227_v19  ;;  %v1079_v24 = vadd.f32 %v16739_v32, %v14305_v22  ;;  %v1073_v25 = vpop.f32.mrb[87].mxu0 }
 0x23a   :  { %1326 = vst [vmem:[#allocation2 + $0x2a0] sm:$0xff] %v1226_v21  ;;  %v1074_v26 = vadd.f32 %v16739_v32, %v1073_v25  ;;  %1642 = vst [vmem:[#allocation3 + $0xd3] sm:$0xff] %v1625_v23 }
 0x23b   :  { %v1229_v27 = vmax.f32 %v1079_v24, 0.0 }
 0x23c   :  { %v1228_v28 = vmax.f32 %v1074_v26, 0.0  ;;  %v14308_v29 = vpop.f32.mrb[88].mxu0 }
 0x23d   :  { %1329 = vst [vmem:[#allocation2 + $0x2b8] sm:$0xff] %v1229_v27  ;;  %v1089_v31 = vadd.f32 %v16739_v32, %v14308_v29  ;;  %v1083_v33 = vpop.f32.mrb[89].mxu0  ;;  %v1518_v36 = vld [vmem:[#allocation2 + $0x280] ss:$3 sm:$0xff]  ;;  %v1552_v37 = vld [vmem:[#allocation2 + $0x281] ss:$3 sm:$0xff] }
 0x23e   :  { %v1676_v55 = vld [vmem:[#allocation3 + $0xc8] sm:$0xff]  ;;  %1328 = vst [vmem:[#allocation2 + $0x2b0] sm:$0xff] %v1228_v28  ;;  %v1084_v38 = vadd.f32 %v16739_v32, %v1083_v33  ;;  %v1575_v41 = vmax.f32 %v1518_v36, %v1552_v37 }
 0x23f   :  { %v2415_v35 = vld [vmem:[#allocation3 + $0xca] sm:$0xff]  ;;  %v1697_v39 = vpack.c.bf16 %v1676_v55, %v1675_v30  ;;  %v1231_v42 = vmax.f32 %v1089_v31, 0.0 }
 0x240   :  { %v2436_v40 = vpack.c.bf16 %v2415_v35, %v2414_v34  ;;  %v1603_v43 = vld [vmem:[#allocation2 + $0x282] ss:$3 sm:$0xff]  ;;  %v1230_v44 = vmax.f32 %v1084_v38, 0.0  ;;  %v14311_v45 = vpop.f32.mrb[90].mxu0 }
 0x241   :  { %14389 = vmatmul.mubr.bf16.gmra.mrb[48].mxu1 %v1697_v39  ;;  %v1626_v47 = vmax.f32 %v1575_v41, %v1603_v43  ;;  %v1520_v48 = vld [vmem:[#allocation2 + $0x298] ss:$3 sm:$0xff]  ;;  %v1554_v49 = vld [vmem:[#allocation2 + $0x299] ss:$3 sm:$0xff]  ;;  %1331 = vst [vmem:[#allocation2 + $0x2c8] sm:$0xff] %v1231_v42  ;;  %v1099_v50 = vadd.f32 %v16739_v32, %v14311_v45  ;;  %v1093_v52 = vpop.f32.mrb[91].mxu0 }
 0x242   :  { %14557 = vmatmul.mubr.bf16.gmra.mrb[148].mxu0 %v2436_v40  ;;  %14392 = vmatprep.mubr.msk.bf16.mxu1 %vm16009_vm2, %v16008_v46  ;;  %v1576_v51 = vmax.f32 %v1520_v48, %v1554_v49  ;;  %1330 = vst [vmem:[#allocation2 + $0x2c0] sm:$0xff] %v1230_v44  ;;  %v1605_v53 = vld [vmem:[#allocation2 + $0x29a] ss:$3 sm:$0xff]  ;;  %v1094_v56 = vadd.f32 %v16739_v32, %v1093_v52  ;;  %v1677_v5 = vld [vmem:[#allocation3 + $0xd0] sm:$0xff] }
 0x243   :  { %14560 = vmatprep.mubr.msk.bf16.mxu0 %vm16009_vm2, %v16008_v46  ;;  %1643 = vst [vmem:[#allocation3 + $0xdb] sm:$0xff] %v1626_v47  ;;  %v1233_v54 = vmax.f32 %v1099_v50, 0.0  ;;  %v2416_v9 = vld [vmem:[#allocation3 + $0xd2] sm:$0xff] }
 0x244   :  { %v1627_v57 = vmax.f32 %v1576_v51, %v1605_v53  ;;  %v14314_v58 = vpop.f32.mrb[92].mxu0  ;;  %v1232_v59 = vmax.f32 %v1094_v56, 0.0 }
 0x245   :  { %1333 = vst [vmem:[#allocation2 + $0x2d8] sm:$0xff] %v1233_v54  ;;  %v1109_v60 = vadd.f32 %v16739_v32, %v14314_v58  ;;  %v1103_v61 = vpop.f32.mrb[93].mxu0 }
 0x246   :  { %1644 = vst [vmem:[#allocation3 + $0xe3] sm:$0xff] %v1627_v57  ;;  %v1104_v62 = vadd.f32 %v16739_v32, %v1103_v61  ;;  %1332 = vst [vmem:[#allocation2 + $0x2d0] sm:$0xff] %v1232_v59 }
 0x247   :  { %v1235_v63 = vmax.f32 %v1109_v60, 0.0 }
 0x248   :  { %v1234_v0 = vmax.f32 %v1104_v62, 0.0  ;;  %v14317_v1 = vpop.f32.mrb[94].mxu0 }
 0x249   :  { %v1522_v2 = vld [vmem:[#allocation2 + $0x2b0] ss:$3 sm:$0xff]  ;;  %v1556_v3 = vld [vmem:[#allocation2 + $0x2b1] ss:$3 sm:$0xff]  ;;  %1335 = vst [vmem:[#allocation2 + $0x2e8] sm:$0xff] %v1235_v63  ;;  %v1119_v4 = vadd.f32 %v16739_v32, %v14317_v1  ;;  %v1113_v7 = vpop.f32.mrb[95].mxu0 }
 0x24a   :  { %v1577_v6 = vmax.f32 %v1522_v2, %v1556_v3  ;;  %1334 = vst [vmem:[#allocation2 + $0x2e0] sm:$0xff] %v1234_v0  ;;  %v1678_v8 = vld [vmem:[#allocation3 + $0xd8] sm:$0xff]  ;;  %v1114_v13 = vadd.f32 %v16739_v32, %v1113_v7  ;;  %v2003_v7 = vld [vmem:[#allocation3 + $0x1] sm:$0xff] }
 0x24b   :  { %v2417_v10 = vld [vmem:[#allocation3 + $0xda] sm:$0xff]  ;;  %v1237_v12 = vmax.f32 %v1119_v4, 0.0  ;;  %v1698_v14 = vpack.c.bf16 %v1678_v8, %v1677_v5  ;;  %v2004_v5 = vld [vmem:[#allocation3 + $0x9] sm:$0xff] }
 0x24c   :  { %v1607_v11 = vld [vmem:[#allocation2 + $0x2b2] ss:$3 sm:$0xff]  ;;  %v2437_v15 = vpack.c.bf16 %v2417_v10, %v2416_v9  ;;  %v14320_v17 = vpop.f32.mrb[96].mxu0  ;;  %v1236_v18 = vmax.f32 %v1114_v13, 0.0  ;;  %v2037_v10 = vpack.c.bf16 %v2004_v5, %v2003_v7 }
 0x24d   :  { %v1628_v16 = vmax.f32 %v1577_v6, %v1607_v11  ;;  %1337 = vst [vmem:[#allocation2 + $0x2f8] sm:$0xff] %v1237_v12  ;;  %v1129_v19 = vadd.f32 %v16739_v32, %v14320_v17  ;;  %14393 = vmatmul.mubr.bf16.gmra.mrb[52].mxu1 %v1698_v14  ;;  %v1123_v20 = vpop.f32.mrb[97].mxu0  ;;  %v1524_v21 = vld [vmem:[#allocation2 + $0x2c8] ss:$3 sm:$0xff]  ;;  %v1558_v22 = vld [vmem:[#allocation2 + $0x2c9] ss:$3 sm:$0xff] }
 0x24e   :  { %14561 = vmatmul.mubr.bf16.gmra.mrb[152].mxu0 %v2437_v15  ;;  %v1124_v23 = vadd.f32 %v16739_v32, %v1123_v20  ;;  %14396 = vmatprep.mubr.msk.bf16.mxu1 %vm16009_vm2, %v16008_v46  ;;  %v1578_v24 = vmax.f32 %v1524_v21, %v1558_v22  ;;  %1336 = vst [vmem:[#allocation2 + $0x2f0] sm:$0xff] %v1236_v18  ;;  %v1609_v26 = vld [vmem:[#allocation2 + $0x2ca] ss:$3 sm:$0xff]  ;;  %v1679_v35 = vld [vmem:[#allocation3 + $0xe0] sm:$0xff] }
 0x24f   :  { %1645 = vst [vmem:[#allocation3 + $0xeb] sm:$0xff] %v1628_v16  ;;  %14564 = vmatprep.mubr.msk.bf16.mxu0 %vm16009_vm2, %v16008_v46  ;;  %v1239_v25 = vmax.f32 %v1129_v19, 0.0  ;;  %v2418_v37 = vld [vmem:[#allocation3 + $0xe2] sm:$0xff]  ;;  %v3165_v6 = vld [vmem:[#allocation3 + $0xc] sm:$0xff]  ;;  %v15016_v8 = vld [vmem:[#allocation13 + $0xc0] sm:$0xff]  }
 0x250   :  { %v1238_v27 = vmax.f32 %v1124_v23, 0.0  ;;  %v14323_v28 = vpop.f32.mrb[98].mxu0  ;;  %v1629_v29 = vmax.f32 %v1578_v24, %v1609_v26  ;;  %v3164_v9 = vld [vmem:[#allocation3 + $0x4] sm:$0xff]  ;;  %v2006_v13 = vld [vmem:[#allocation3 + $0x19] sm:$0xff]  ;;  %v2005_v15 = vld [vmem:[#allocation3 + $0x11] sm:$0xff] }
 0x251   :  { %1339 = vst [vmem:[#allocation2 + $0x308] sm:$0xff] %v1239_v25  ;;  %v1139_v30 = vadd.f32 %v16739_v32, %v14323_v28  ;;  %v1133_v31 = vpop.f32.mrb[99].mxu0  ;;  %v3198_v11 = vpack.c.bf16 %v3165_v6, %v3164_v9  ;;  %v15017_v12 = vld [vmem:[#allocation13 + $0xc8] sm:$0xff]   ;;  %v3166_v16 = vld [vmem:[#allocation3 + $0x14] sm:$0xff]  ;;  %v2038_v17 = vpack.c.bf16 %v2006_v13, %v2005_v15  ;;  %v15018_v20 = vld [vmem:[#allocation13 + $0xd0] sm:$0xff]  }
 0x252   :  { %1338 = vst [vmem:[#allocation2 + $0x300] sm:$0xff] %v1238_v27  ;;  %v1134_v33 = vadd.f32 %v16739_v32, %v1133_v31  ;;  %1646 = vst [vmem:[#allocation3 + $0xf3] sm:$0xff] %v1629_v29  ;;  %v3167_v14 = vld [vmem:[#allocation3 + $0x1c] sm:$0xff]  ;;  %v15019_v24 = vld [vmem:[#allocation13 + $0xd8] sm:$0xff]  }
 0x253   :  { %v1241_v55 = vmax.f32 %v1139_v30, 0.0  ;;  %v3199_v18 = vpack.c.bf16 %v3167_v14, %v3166_v16  ;;  %v2008_v25 = vld [vmem:[#allocation3 + $0x29] sm:$0xff]  ;;  %v2007_v27 = vld [vmem:[#allocation3 + $0x21] sm:$0xff] }
 0x254   :  { %v1240_v34 = vmax.f32 %v1134_v33, 0.0  ;;  %v3169_v26 = vld [vmem:[#allocation3 + $0x2c] sm:$0xff]  ;;  %v3168_v28 = vld [vmem:[#allocation3 + $0x24] sm:$0xff]  ;;  %v2039_v30 = vpack.c.bf16 %v2008_v25, %v2007_v27  ;;  %v15020_v33 = vld [vmem:[#allocation13 + $0xe0] sm:$0xff]  }
 0x255   :  { %1341 = vst [vmem:[#allocation2 + $0x318] sm:$0xff] %v1241_v55  ;;  %v1526_v39 = vld [vmem:[#allocation2 + $0x2e0] ss:$3 sm:$0xff]  ;;  %v1560_v40 = vld [vmem:[#allocation2 + $0x2e1] ss:$3 sm:$0xff]  ;;  %v3200_v31 = vpack.c.bf16 %v3169_v26, %v3168_v28 }
 0x256   :  { %v1680_v36 = vld [vmem:[#allocation3 + $0xe8] sm:$0xff]  ;;  %1340 = vst [vmem:[#allocation2 + $0x310] sm:$0xff] %v1240_v34  ;;  %v1579_v43 = vmax.f32 %v1526_v39, %v1560_v40  ;;  %v2017_v27 = vld [vmem:[#allocation3 + $0x71] sm:$0xff] }
 0x257   :  { %v2419_v38 = vld [vmem:[#allocation3 + $0xea] sm:$0xff]  ;;  %v1699_v41 = vpack.c.bf16 %v1680_v36, %v1679_v35  ;;  %v15021_v36 = vld [vmem:[#allocation13 + $0xe8] sm:$0xff]   ;;  %v3178_v28 = vld [vmem:[#allocation3 + $0x74] sm:$0xff] }
 0x258   :  { %v2438_v42 = vpack.c.bf16 %v2419_v38, %v2418_v37  ;;  %v1611_v44 = vld [vmem:[#allocation2 + $0x2e2] ss:$3 sm:$0xff]  ;;  %v2010_v37 = vld [vmem:[#allocation3 + $0x39] sm:$0xff] }
 0x259   :  { %14397 = vmatmul.mubr.bf16.gmra.mrb[56].mxu1 %v1699_v41  ;;  %v1630_v45 = vmax.f32 %v1579_v43, %v1611_v44  ;;  %v1528_v47 = vld [vmem:[#allocation2 + $0x2f8] ss:$3 sm:$0xff]  ;;  %v1562_v32 = vld [vmem:[#allocation2 + $0x2f9] ss:$3 sm:$0xff]  ;;  %v1613_v49 = vld [vmem:[#allocation2 + $0x2fa] ss:$3 sm:$0xff] }
 0x25a   :  { %14565 = vmatmul.mubr.bf16.gmra.mrb[156].mxu0 %v2438_v42  ;;  %14400 = vmatprep.mubr.msk.bf16.mxu1 %vm16009_vm2, %v16008_v46  ;;  %v1580_v48 = vmax.f32 %v1528_v47, %v1562_v32  ;;  %v1681_v57 = vld [vmem:[#allocation3 + $0xf0] sm:$0xff]  ;;  %v3171_v38 = vld [vmem:[#allocation3 + $0x3c] sm:$0xff]  ;;  %v15022_v32 = vld [vmem:[#allocation13 + $0xf0] sm:$0xff]  }
 0x25b   :  { %14568 = vmatprep.mubr.msk.bf16.mxu0 %vm16009_vm2, %v16008_v46  ;;  %1647 = vst [vmem:[#allocation3 + $0xfb] sm:$0xff] %v1630_v45  ;;  %v2420_v59 = vld [vmem:[#allocation3 + $0xf2] sm:$0xff]  ;;  %v2015_v14 = vld [vmem:[#allocation3 + $0x61] sm:$0xff] }
 0x25c   :  { %v1631_v50 = vmax.f32 %v1580_v48, %v1613_v49  ;;  %v2009_v41 = vld [vmem:[#allocation3 + $0x31] sm:$0xff]  ;;  %v3176_v15 = vld [vmem:[#allocation3 + $0x64] sm:$0xff] }
 0x25d   :  { %v1530_v51 = vld [vmem:[#allocation2 + $0x310] ss:$3 sm:$0x1f]  ;;  %v1564_v52 = vld [vmem:[#allocation2 + $0x311] ss:$3 sm:$0x1f]  ;;  %v2040_v44 = vpack.c.bf16 %v2010_v37, %v2009_v41 }
 0x25e   :  { %1648 = vst [vmem:[#allocation3 + $0x103] sm:$0xff] %v1631_v50  ;;  %v1581_v53 = vmax.f32 %v1530_v51, %v1564_v52  ;;  %v1615_v54 = vld [vmem:[#allocation2 + $0x312] ss:$3 sm:$0x1f]  ;;  %v2012_v50 = vld [vmem:[#allocation3 + $0x49] sm:$0xff]  ;;  %v2019_v41 = vld [vmem:[#allocation3 + $0x81] sm:$0xff] }
 0x25f   :  { %v3170_v42 = vld [vmem:[#allocation3 + $0x34] sm:$0xff]  ;;  %v3173_v51 = vld [vmem:[#allocation3 + $0x4c] sm:$0xff] }
 0x260   :  { %v1632_v56 = vmax.f32 %v1581_v53, %v1615_v54  ;;  %v3201_v45 = vpack.c.bf16 %v3171_v38, %v3170_v42  ;;  %v15023_v48 = vld [vmem:[#allocation13 + $0xf8] sm:$0xff]   ;;  %v2011_v54 = vld [vmem:[#allocation3 + $0x41] sm:$0xff] }
 0x261   :  { %v2020_v38 = vld [vmem:[#allocation3 + $0x89] sm:$0xff] }
 0x262   :  { %1649 = vst [vmem:[#allocation3 + $0x10b] sm:$0x1f] %v1632_v56  ;;  %v1682_v58 = vld [vmem:[#allocation3 + $0xf8] sm:$0xff]  ;;  %v3172_v56 = vld [vmem:[#allocation3 + $0x44] sm:$0xff] }
 0x263   :  { %v2421_v60 = vld [vmem:[#allocation3 + $0xfa] sm:$0xff]  ;;  %v1700_v61 = vpack.c.bf16 %v1682_v58, %v1681_v57  ;;  %v2041_v58 = vpack.c.bf16 %v2012_v50, %v2011_v54  ;;  %v3180_v42 = vld [vmem:[#allocation3 + $0x84] sm:$0xff] }
 0x264   :  { %v2439_v62 = vpack.c.bf16 %v2421_v60, %v2420_v59  ;;  %v3202_v59 = vpack.c.bf16 %v3173_v51, %v3172_v56  ;;  %v2022_v51 = vld [vmem:[#allocation3 + $0x99] sm:$0xff] }
 0x265   :  { %14401 = vmatmul.mubr.bf16.gmra.mrb[60].mxu1 %v1700_v61  ;;  %v1683_v63 = vld [vmem:[#allocation3 + $0x100] sm:$0xff] }
 0x266   :  { %14569 = vmatmul.mubr.bf16.gmra.mrb[160].mxu0 %v2439_v62  ;;  %14404 = vmatprep.mubr.msk.bf16.mxu1 %vm16009_vm2, %v16008_v46  ;;  %v2422_v1 = vld [vmem:[#allocation3 + $0x102] sm:$0xff] }
 0x267   :  { %14572 = vmatprep.mubr.msk.bf16.mxu0 %vm16009_vm2, %v16008_v46 }
 0x269   :  { %v1684_v0 = vld [vmem:[#allocation3 + $0x108] sm:$0x3f] }
 0x26a   :  { %v2423_v2 = vld [vmem:[#allocation3 + $0x10a] sm:$0x3f]  ;;  %v1701_v3 = vpack.c.bf16 %v1684_v0, %v1683_v63  ;;  %v2014_v0 = vld [vmem:[#allocation3 + $0x59] sm:$0xff] }
 0x26b   :  { %v2440_v4 = vpack.c.bf16 %v2423_v2, %v2422_v1  ;;  %v3175_v1 = vld [vmem:[#allocation3 + $0x5c] sm:$0xff]  ;;  %v2013_v2 = vld [vmem:[#allocation3 + $0x51] sm:$0xff] }
 0x26c   :  { %v2042_v5 = vpack.c.bf16 %v2014_v0, %v2013_v2  ;;  %v2024_v2 = vld [vmem:[#allocation3 + $0xa9] sm:$0xff] }
 0x26d   :  { %14405 = vmatmul.mubr.bf16.gmra.mrb[64].mxu1 %v1701_v3  ;;  %v3174_v3 = vld [vmem:[#allocation3 + $0x54] sm:$0xff] }
 0x26e   :  { %14573 = vmatmul.mubr.bf16.gmra.mrb[164].mxu0 %v2440_v4  ;;  %14424 = vmatprep.mubr.msk.bf16.mxu1 %vm16009_vm2, %v16008_v46  ;;  %v3203_v6 = vpack.c.bf16 %v3175_v1, %v3174_v3  ;;  %v3185_v3 = vld [vmem:[#allocation3 + $0xac] sm:$0xff] }
 0x26f   :  { %14676 = vmatprep.mubr.msk.bf16.mxu0 %vm16009_vm2, %v16008_v46 }
 0x275   :  { %14425 = vmatmul.mubr.bf16.vlgmr.msra.gmra.mrb[68].mxu1 %v2037_v10  ;;  %v2016_v10 = vld [vmem:[#allocation3 + $0x69] sm:$0xff] }
 0x276   :  { %14677 = vmatmul.mubr.bf16.vlgmr.msra.gmra.mrb[168].mxu0 %v3198_v11  ;;  %14577 = vmatpush3.bf16.msra.mxu1 %v15016_v8  ;;  %v3177_v11 = vld [vmem:[#allocation3 + $0x6c] sm:$0xff] }
 0x277   :  { %14428 = vmatprep.mubr.msk.bf16.mxu1 %vm16009_vm2, %v16008_v46  ;;  %14680 = vmatprep.mubr.msk.bf16.mxu0 %vm16009_vm2, %v16008_v46 }
 0x278   :  { %14578 = vmatprep.subr.bf16.mxu1 %v16008_v46 }
 0x27a   :  { %14579 = vmatpush3.bf16.msra.mxu1 %v15017_v12 }
 0x27b   :  { %v16834_v19 = vpop.f32.mrb[100].mxu0  ;;  %14580 = vmatprep.subr.bf16.mxu1 %v16008_v46 }
 0x27c   :  { %v14510_v21 = vpop.f32.mrb[101].mxu0 }
 0x27d   :  { %14429 = vmatmul.mubr.bf16.gmra.mrb[72].mxu1 %v2038_v17  ;;  %v16837_v22 = vpop.f32.mrb[102].mxu0  ;;  %v2043_v17 = vpack.c.bf16 %v2016_v10, %v2015_v14 }
 0x27e   :  { %14681 = vmatmul.mubr.bf16.gmra.mrb[172].mxu0 %v3199_v18  ;;  %14432 = vmatprep.mubr.msk.bf16.mxu1 %vm16009_vm2, %v16008_v46  ;;  %v14511_v23 = vpop.f32.mrb[103].mxu0  ;;  %v3204_v18 = vpack.c.bf16 %v3177_v11, %v3176_v15 }
 0x27f   :  { %14684 = vmatprep.mubr.msk.bf16.mxu0 %vm16009_vm2, %v16008_v46  ;;  %14581 = vmatpush3.bf16.msra.mxu1 %v15018_v20  ;;  %v2018_v23 = vld [vmem:[#allocation3 + $0x79] sm:$0xff] }
 0x280   :  { %14582 = vmatprep.subr.bf16.mxu1 %v16008_v46 }
 0x283   :  { %v16844_v29 = vpop.f32.mrb[0].mxu1  ;;  %14583 = vmatpush3.bf16.msra.mxu1 %v15019_v24  ;;  %v3179_v24 = vld [vmem:[#allocation3 + $0x7c] sm:$0xff] }
 0x284   :  { %v14342_v55 = vpop.f32.mrb[1].mxu1  ;;  %14584 = vmatprep.subr.bf16.mxu1 %v16008_v46 }
 0x285   :  { %14433 = vmatmul.mubr.bf16.gmra.mrb[76].mxu1 %v2039_v30  ;;  %v16847_v34 = vpop.f32.mrb[2].mxu1 }
 0x286   :  { %14685 = vmatmul.mubr.bf16.gmra.mrb[176].mxu0 %v3200_v31  ;;  %v14343_v35 = vpop.f32.mrb[3].mxu1  ;;  %14436 = vmatprep.mubr.msk.bf16.mxu1 %vm16009_vm2, %v16008_v46  ;;  %v2044_v31 = vpack.c.bf16 %v2018_v23, %v2017_v27  ;;  %v3187_v23 = vld [vmem:[#allocation3 + $0xbc] sm:$0xff] }
 0x287   :  { %14688 = vmatprep.mubr.msk.bf16.mxu0 %vm16009_vm2, %v16008_v46  ;;  %14585 = vmatpush3.bf16.msra.mxu1 %v15020_v33  ;;  %v3205_v33 = vpack.c.bf16 %v3179_v24, %v3178_v28  ;;  %v2025_v24 = vld [vmem:[#allocation3 + $0xb1] sm:$0xff] }
 0x288   :  { %v16853_v39 = vpop.f32.mrb[104].mxu0  ;;  %14586 = vmatprep.subr.bf16.mxu1 %v16008_v46 }
 0x289   :  { %v14514_v40 = vpop.f32.mrb[105].mxu0 }
 0x28a   :  { %v16856_v43 = vpop.f32.mrb[106].mxu0  ;;  %v3181_v40 = vld [vmem:[#allocation3 + $0x8c] sm:$0xff] }
 0x28b   :  { %v14515_v47 = vpop.f32.mrb[107].mxu0  ;;  %14587 = vmatpush3.bf16.msra.mxu1 %v15021_v36 }
 0x28c   :  { %14588 = vmatprep.subr.bf16.mxu1 %v16008_v46  ;;  %v3206_v47 = vpack.c.bf16 %v3181_v40, %v3180_v42  ;;  %v2027_v42 = vld [vmem:[#allocation3 + $0xc1] sm:$0xff] }
 0x28d   :  { %14437 = vmatmul.mubr.bf16.gmra.mrb[80].mxu1 %v2040_v44 }
 0x28e   :  { %14689 = vmatmul.mubr.bf16.gmra.mrb[180].mxu0 %v3201_v45  ;;  %14440 = vmatprep.mubr.msk.bf16.mxu1 %vm16009_vm2, %v16008_v46  ;;  %v2045_v45 = vpack.c.bf16 %v2020_v38, %v2019_v41  ;;  %v3189_v38 = vld [vmem:[#allocation3 + $0xcc] sm:$0xff] }
 0x28f   :  { %14692 = vmatprep.mubr.msk.bf16.mxu0 %vm16009_vm2, %v16008_v46  ;;  %14589 = vmatpush3.bf16.msra.mxu1 %v15022_v32 }
 0x290   :  { %v16863_v49 = vpop.f32.mrb[4].mxu1  ;;  %14590 = vmatprep.subr.bf16.mxu1 %v16008_v46 }
 0x291   :  { %v14346_v52 = vpop.f32.mrb[5].mxu1 }
 0x292   :  { %v16866_v53 = vpop.f32.mrb[6].mxu1  ;;  %v3183_v52 = vld [vmem:[#allocation3 + $0x9c] sm:$0xff] }
 0x293   :  { %v14347_v57 = vpop.f32.mrb[7].mxu1  ;;  %v16868_v60 = vpop.f32.mrb[108].mxu0  ;;  %14591 = vmatpush3.bf16.msra.mxu1 %v15023_v48 }
 0x294   :  { %v14518_v61 = vpop.f32.mrb[109].mxu0  ;;  %v2021_v57 = vld [vmem:[#allocation3 + $0x91] sm:$0xff] }
 0x295   :  { %14441 = vmatmul.mubr.bf16.gmra.mrb[84].mxu1 %v2041_v58  ;;  %v16870_v62 = vpop.f32.mrb[110].mxu0  ;;  %v3182_v58 = vld [vmem:[#allocation3 + $0x94] sm:$0xff]  ;;  %v2046_v61 = vpack.c.bf16 %v2022_v51, %v2021_v57  ;;  %v3191_v57 = vld [vmem:[#allocation3 + $0xdc] sm:$0xff] }
 0x296   :  { %14693 = vmatmul.mubr.bf16.gmra.mrb[184].mxu0 %v3202_v59  ;;  %14444 = vmatprep.mubr.msk.bf16.mxu1 %vm16009_vm2, %v16008_v46  ;;  %v14519_v63 = vpop.f32.mrb[111].mxu0 }
 0x297   :  { %14696 = vmatprep.mubr.msk.bf16.mxu0 %vm16009_vm2, %v16008_v46  ;;  %v3207_v63 = vpack.c.bf16 %v3183_v52, %v3182_v58 }
 0x29b   :  { %v16876_v4 = vpop.f32.mrb[8].mxu1 }
 0x29c   :  { %v14350_v7 = vpop.f32.mrb[9].mxu1 }
 0x29d   :  { %14445 = vmatmul.mubr.bf16.gmra.mrb[88].mxu1 %v2042_v5  ;;  %v16878_v8 = vpop.f32.mrb[10].mxu1  ;;  %v2023_v7 = vld [vmem:[#allocation3 + $0xa1] sm:$0xff] }
 0x29e   :  { %14697 = vmatmul.mubr.bf16.gmra.mrb[188].mxu0 %v3203_v6  ;;  %v14351_v9 = vpop.f32.mrb[11].mxu1  ;;  %14448 = vmatprep.mubr.msk.bf16.mxu1 %vm16009_vm2, %v16008_v46  ;;  %v2047_v11 = vpack.c.bf16 %v2024_v2, %v2023_v7  ;;  %v2032_v7 = vld [vmem:[#allocation3 + $0xe9] sm:$0xff] }
 0x29f   :  { %14700 = vmatprep.mubr.msk.bf16.mxu0 %vm16009_vm2, %v16008_v46  ;;  %v3184_v9 = vld [vmem:[#allocation3 + $0xa4] sm:$0xff] }
 0x2a0   :  { %v16884_v12 = vpop.f32.mrb[112].mxu0 }
 0x2a1   :  { %v14522_v13 = vpop.f32.mrb[113].mxu0 }
 0x2a2   :  { %v16886_v16 = vpop.f32.mrb[114].mxu0  ;;  %v3208_v13 = vpack.c.bf16 %v3185_v3, %v3184_v9  ;;  %v3193_v9 = vld [vmem:[#allocation3 + $0xec] sm:$0xff] }
 0x2a3   :  { %v14523_v20 = vpop.f32.mrb[115].mxu0 }
 0x2a4   :  { %v2026_v20 = vld [vmem:[#allocation3 + $0xb9] sm:$0xff] }
 0x2a5   :  { %14449 = vmatmul.mubr.bf16.gmra.mrb[92].mxu1 %v2043_v17  ;;  %v2048_v28 = vpack.c.bf16 %v2026_v20, %v2025_v24 }
 0x2a6   :  { %14701 = vmatmul.mubr.bf16.gmra.mrb[192].mxu0 %v3204_v18  ;;  %14452 = vmatprep.mubr.msk.bf16.mxu1 %vm16009_vm2, %v16008_v46 }
 0x2a7   :  { %14704 = vmatprep.mubr.msk.bf16.mxu0 %vm16009_vm2, %v16008_v46 }
 0x2a8   :  { %v16892_v21 = vpop.f32.mrb[12].mxu1 }
 0x2a9   :  { %v14354_v25 = vpop.f32.mrb[13].mxu1 }
 0x2aa   :  { %v16894_v26 = vpop.f32.mrb[14].mxu1  ;;  %v3186_v25 = vld [vmem:[#allocation3 + $0xb4] sm:$0xff] }
 0x2ab   :  { %v14355_v30 = vpop.f32.mrb[15].mxu1  ;;  %v16896_v55 = vpop.f32.mrb[116].mxu0 }
 0x2ac   :  { %v14526_v35 = vpop.f32.mrb[117].mxu0  ;;  %v3209_v30 = vpack.c.bf16 %v3187_v23, %v3186_v25 }
 0x2ad   :  { %14453 = vmatmul.mubr.bf16.gmra.mrb[96].mxu1 %v2044_v31  ;;  %v16898_v36 = vpop.f32.mrb[118].mxu0 }
 0x2ae   :  { %14705 = vmatmul.mubr.bf16.gmra.mrb[196].mxu0 %v3205_v33  ;;  %14456 = vmatprep.mubr.msk.bf16.mxu1 %vm16009_vm2, %v16008_v46  ;;  %v14527_v37 = vpop.f32.mrb[119].mxu0 }
 0x2af   :  { %14708 = vmatprep.mubr.msk.bf16.mxu0 %vm16009_vm2, %v16008_v46  ;;  %v2028_v37 = vld [vmem:[#allocation3 + $0xc9] sm:$0xff] }
 0x2b3   :  { %v16904_v44 = vpop.f32.mrb[16].mxu1 }
 0x2b4   :  { %v14358_v32 = vpop.f32.mrb[17].mxu1 }
 0x2b5   :  { %14457 = vmatmul.mubr.bf16.gmra.mrb[100].mxu1 %v2045_v45  ;;  %v16906_v48 = vpop.f32.mrb[18].mxu1  ;;  %v3188_v45 = vld [vmem:[#allocation3 + $0xc4] sm:$0xff]  ;;  %v2049_v32 = vpack.c.bf16 %v2028_v37, %v2027_v42  ;;  %v3195_v37 = vld [vmem:[#allocation3 + $0xfc] sm:$0xff] }
 0x2b6   :  { %14709 = vmatmul.mubr.bf16.gmra.mrb[200].mxu0 %v3206_v47  ;;  %v14359_v50 = vpop.f32.mrb[19].mxu1  ;;  %14460 = vmatprep.mubr.msk.bf16.mxu1 %vm16009_vm2, %v16008_v46 }
 0x2b7   :  { %14712 = vmatprep.mubr.msk.bf16.mxu0 %vm16009_vm2, %v16008_v46  ;;  %v3210_v50 = vpack.c.bf16 %v3189_v38, %v3188_v45  ;;  %v2033_v38 = vld [vmem:[#allocation3 + $0xf1] sm:$0xff] }
 0x2b8   :  { %v16912_v54 = vpop.f32.mrb[120].mxu0 }
 0x2b9   :  { %v14530_v56 = vpop.f32.mrb[121].mxu0 }
 0x2ba   :  { %v16914_v59 = vpop.f32.mrb[122].mxu0  ;;  %v2030_v56 = vld [vmem:[#allocation3 + $0xd9] sm:$0xff] }
 0x2bb   :  { %v14531_v0 = vpop.f32.mrb[123].mxu0 }
 0x2bc   :  { %v3190_v0 = vld [vmem:[#allocation3 + $0xd4] sm:$0xff] }
 0x2bd   :  { %14461 = vmatmul.mubr.bf16.gmra.mrb[104].mxu1 %v2046_v61 }
 0x2be   :  { %14713 = vmatmul.mubr.bf16.gmra.mrb[204].mxu0 %v3207_v63  ;;  %14464 = vmatprep.mubr.msk.bf16.mxu1 %vm16009_vm2, %v16008_v46  ;;  %v2029_v63 = vld [vmem:[#allocation3 + $0xd1] sm:$0xff] }
 0x2bf   :  { %14716 = vmatprep.mubr.msk.bf16.mxu0 %vm16009_vm2, %v16008_v46  ;;  %v2050_v3 = vpack.c.bf16 %v2030_v56, %v2029_v63  ;;  %v3196_v56 = vld [vmem:[#allocation3 + $0x104] sm:$0xff] }
 0x2c0   :  { %v16920_v1 = vpop.f32.mrb[20].mxu1 }
 0x2c1   :  { %v14362_v5 = vpop.f32.mrb[21].mxu1 }
 0x2c2   :  { %v16922_v6 = vpop.f32.mrb[22].mxu1  ;;  %v3211_v5 = vpack.c.bf16 %v3191_v57, %v3190_v0  ;;  %v3197_v57 = vld [vmem:[#allocation3 + $0x10c] sm:$0x3f] }
 0x2c3   :  { %v14363_v10 = vpop.f32.mrb[23].mxu1  ;;  %v16924_v14 = vpop.f32.mrb[124].mxu0 }
 0x2c4   :  { %v14534_v15 = vpop.f32.mrb[125].mxu0  ;;  %v2031_v10 = vld [vmem:[#allocation3 + $0xe1] sm:$0xff] }
 0x2c5   :  { %14465 = vmatmul.mubr.bf16.gmra.mrb[108].mxu1 %v2047_v11  ;;  %v16926_v17 = vpop.f32.mrb[126].mxu0  ;;  %v3192_v11 = vld [vmem:[#allocation3 + $0xe4] sm:$0xff]  ;;  %v2051_v15 = vpack.c.bf16 %v2032_v7, %v2031_v10  ;;  %v3214_v10 = vpack.c.bf16 %v3197_v57, %v3196_v56 }
 0x2c6   :  { %14717 = vmatmul.mubr.bf16.gmra.mrb[208].mxu0 %v3208_v13  ;;  %14468 = vmatprep.mubr.msk.bf16.mxu1 %vm16009_vm2, %v16008_v46  ;;  %v14535_v18 = vpop.f32.mrb[127].mxu0 }
 0x2c7   :  { %14720 = vmatprep.mubr.msk.bf16.mxu0 %vm16009_vm2, %v16008_v46  ;;  %v3212_v18 = vpack.c.bf16 %v3193_v9, %v3192_v11  ;;  %v2778_v11 = vld [vmem:[#allocation3 + $0xb] sm:$0xff] }
 0x2cb   :  { %v16932_v27 = vpop.f32.mrb[24].mxu1 }
 0x2cc   :  { %v14366_v31 = vpop.f32.mrb[25].mxu1 }
 0x2cd   :  { %14469 = vmatmul.mubr.bf16.gmra.mrb[112].mxu1 %v2048_v28  ;;  %v16934_v33 = vpop.f32.mrb[26].mxu1 }
 0x2ce   :  { %14721 = vmatmul.mubr.bf16.gmra.mrb[212].mxu0 %v3209_v30  ;;  %v14367_v35 = vpop.f32.mrb[27].mxu1  ;;  %14472 = vmatprep.mubr.msk.bf16.mxu1 %vm16009_vm2, %v16008_v46 }
 0x2cf   :  { %14724 = vmatprep.mubr.msk.bf16.mxu0 %vm16009_vm2, %v16008_v46  ;;  %v2034_v35 = vld [vmem:[#allocation3 + $0xf9] sm:$0xff] }
 0x2d0   :  { %v16940_v40 = vpop.f32.mrb[128].mxu0  ;;  %v2052_v42 = vpack.c.bf16 %v2034_v35, %v2033_v38 }
 0x2d1   :  { %v14538_v41 = vpop.f32.mrb[129].mxu0 }
 0x2d2   :  { %v16942_v47 = vpop.f32.mrb[130].mxu0  ;;  %v3194_v41 = vld [vmem:[#allocation3 + $0xf4] sm:$0xff] }
 0x2d3   :  { %v14539_v51 = vpop.f32.mrb[131].mxu0  ;;  %v3213_v45 = vpack.c.bf16 %v3195_v37, %v3194_v41 }
 0x2d5   :  { %14473 = vmatmul.mubr.bf16.gmra.mrb[116].mxu1 %v2049_v32  ;;  %v2036_v32 = vld [vmem:[#allocation3 + $0x109] sm:$0x3f] }
 0x2d6   :  { %14725 = vmatmul.mubr.bf16.gmra.mrb[216].mxu0 %v3210_v50  ;;  %14476 = vmatprep.mubr.msk.bf16.mxu1 %vm16009_vm2, %v16008_v46 }
 0x2d7   :  { %14728 = vmatprep.mubr.msk.bf16.mxu0 %vm16009_vm2, %v16008_v46 }
 0x2d8   :  { %v16948_v52 = vpop.f32.mrb[28].mxu1 }
 0x2d9   :  { %v14370_v58 = vpop.f32.mrb[29].mxu1 }
 0x2da   :  { %v16950_v61 = vpop.f32.mrb[30].mxu1 }
 0x2db   :  { %v14371_v2 = vpop.f32.mrb[31].mxu1 }
 0x2dd   :  { %14477 = vmatmul.mubr.bf16.gmra.mrb[120].mxu1 %v2050_v3  ;;  %v2035_v3 = vld [vmem:[#allocation3 + $0x101] sm:$0xff] }
 0x2de   :  { %14729 = vmatmul.mubr.bf16.gmra.mrb[220].mxu0 %v3211_v5  ;;  %14480 = vmatprep.mubr.msk.bf16.mxu1 %vm16009_vm2, %v16008_v46  ;;  %v2053_v9 = vpack.c.bf16 %v2036_v32, %v2035_v3 }
 0x2df   :  { %14732 = vmatprep.mubr.msk.bf16.mxu0 %vm16009_vm2, %v16008_v46 }
 0x2e4   :  { %v16956_v13 = vpop.f32.mrb[32].mxu1 }
 0x2e5   :  { %v16958_v20 = vpop.f32.mrb[132].mxu0  ;;  %v14374_v23 = vpop.f32.mrb[33].mxu1  ;;  %14481 = vmatmul.mubr.bf16.gmra.mrb[124].mxu1 %v2051_v15  ;;  %v2777_v15 = vld [vmem:[#allocation3 + $0x3] sm:$0xff] }
 0x2e6   :  { %v14542_v24 = vpop.f32.mrb[133].mxu0  ;;  %14733 = vmatmul.mubr.bf16.gmra.mrb[224].mxu0 %v3212_v18  ;;  %v16960_v25 = vpop.f32.mrb[34].mxu1  ;;  %14484 = vmatprep.mubr.msk.bf16.mxu1 %vm16009_vm2, %v16008_v46 }
 0x2e7   :  { %v16962_v28 = vpop.f32.mrb[134].mxu0  ;;  %v14375_v30 = vpop.f32.mrb[35].mxu1  ;;  %14736 = vmatprep.mubr.msk.bf16.mxu0 %vm16009_vm2, %v16008_v46  ;;  %v2811_v24 = vpack.c.bf16 %v2778_v11, %v2777_v15 }
 0x2e8   :  { %v14543_v31 = vpop.f32.mrb[135].mxu0 }
 0x2ed   :  { %14485 = vmatmul.mubr.bf16.gmra.mrb[128].mxu1 %v2052_v42  ;;  %v2780_v42 = vld [vmem:[#allocation3 + $0x1b] sm:$0xff] }
 0x2ee   :  { %14737 = vmatmul.mubr.bf16.gmra.mrb[228].mxu0 %v3213_v45  ;;  %14488 = vmatprep.mubr.msk.bf16.mxu1 %vm16009_vm2, %v16008_v46  ;;  %v2779_v45 = vld [vmem:[#allocation3 + $0x13] sm:$0xff] }
 0x2ef   :  { %14740 = vmatprep.mubr.msk.bf16.mxu0 %vm16009_vm2, %v16008_v46  ;;  %v2812_v32 = vpack.c.bf16 %v2780_v42, %v2779_v45 }
 0x2f0   :  { %v16972_v50 = vpop.f32.mrb[36].mxu1 }
 0x2f1   :  { %v16974_v51 = vpop.f32.mrb[136].mxu0  ;;  %v14378_v58 = vpop.f32.mrb[37].mxu1 }
 0x2f2   :  { %v14546_v63 = vpop.f32.mrb[137].mxu0  ;;  %v16976_v0 = vpop.f32.mrb[38].mxu1  ;;  %v2782_v58 = vld [vmem:[#allocation3 + $0x2b] sm:$0xff] }
 0x2f3   :  { %v16978_v2 = vpop.f32.mrb[138].mxu0  ;;  %v14379_v5 = vpop.f32.mrb[39].mxu1 }
 0x2f4   :  { %v14547_v7 = vpop.f32.mrb[139].mxu0 }
 0x2f5   :  { %14489 = vmatmul.mubr.bf16.gmra.mrb[132].mxu1 %v2053_v9  ;;  %v2781_v9 = vld [vmem:[#allocation3 + $0x23] sm:$0xff] }
 0x2f6   :  { %14741 = vmatmul.mubr.bf16.gmra.mrb[232].mxu0 %v3214_v10  ;;  %14592 = vmatprep.mubr.msk.bf16.mxu1 %vm16009_vm2, %v16008_v46  ;;  %v2813_v15 = vpack.c.bf16 %v2782_v58, %v2781_v9  ;;  %v2786_v9 = vld [vmem:[#allocation3 + $0x4b] sm:$0xff] }
 0x2fc   :  { %v16982_v18 = vpop.f32.mrb[40].mxu1 }
 0x2fd   :  { %v16984_v23 = vpop.f32.mrb[140].mxu0  ;;  %v14382_v30 = vpop.f32.mrb[41].mxu1  ;;  %14593 = vmatmul.mubr.bf16.vlgmr.msra.gmra.mrb[136].mxu1 %v2811_v24  ;;  %v2784_v24 = vld [vmem:[#allocation3 + $0x3b] sm:$0xff] }
 0x2fe   :  { %v14550_v31 = vpop.f32.mrb[141].mxu0  ;;  %v16986_v35 = vpop.f32.mrb[42].mxu1  ;;  %14596 = vmatprep.mubr.msk.bf16.mxu1 %vm16009_vm2, %v16008_v46  ;;  %v2783_v30 = vld [vmem:[#allocation3 + $0x33] sm:$0xff] }
 0x2ff   :  { %v16988_v37 = vpop.f32.mrb[142].mxu0  ;;  %v14383_v38 = vpop.f32.mrb[43].mxu1 }
 0x300   :  { %v14551_v41 = vpop.f32.mrb[143].mxu0 }
 0x301   :  { %v2814_v41 = vpack.c.bf16 %v2784_v24, %v2783_v30  ;;  %v2788_v30 = vld [vmem:[#allocation3 + $0x5b] sm:$0xff] }
 0x305   :  { %14597 = vmatmul.mubr.bf16.gmra.mrb[140].mxu1 %v2812_v32 }
 0x306   :  { %14600 = vmatprep.mubr.msk.bf16.mxu1 %vm16009_vm2, %v16008_v46 }
 0x308   :  { %v16994_v56 = vpop.f32.mrb[44].mxu1 }
 0x309   :  { %v16996_v57 = vpop.f32.mrb[144].mxu0  ;;  %v14386_v63 = vpop.f32.mrb[45].mxu1 }
 0x30a   :  { %v14554_v3 = vpop.f32.mrb[145].mxu0  ;;  %v16998_v5 = vpop.f32.mrb[46].mxu1 }
 0x30b   :  { %v17000_v7 = vpop.f32.mrb[146].mxu0  ;;  %v14387_v10 = vpop.f32.mrb[47].mxu1 }
 0x30c   :  { %v14555_v11 = vpop.f32.mrb[147].mxu0  ;;  %v2785_v10 = vld [vmem:[#allocation3 + $0x43] sm:$0xff] }
 0x30d   :  { %14601 = vmatmul.mubr.bf16.gmra.mrb[144].mxu1 %v2813_v15  ;;  %v2815_v11 = vpack.c.bf16 %v2786_v9, %v2785_v10  ;;  %v2790_v9 = vld [vmem:[#allocation3 + $0x6b] sm:$0xff]  ;;  %v2789_v10 = vld [vmem:[#allocation3 + $0x63] sm:$0xff] }
 0x30e   :  { %14604 = vmatprep.mubr.msk.bf16.mxu1 %vm16009_vm2, %v16008_v46 }
 0x314   :  { %v17004_v31 = vpop.f32.mrb[48].mxu1 }
 0x315   :  { %17755 = vst [vmem:[#allocation33_spill] sm:$0xff] %v17004_v31  ;;  %v17006_v38 = vpop.f32.mrb[148].mxu0  ;;  %v14390_v42 = vpop.f32.mrb[49].mxu1  ;;  %14605 = vmatmul.mubr.bf16.gmra.mrb[148].mxu1 %v2814_v41 }
 0x316   :  { %17756 = vst [vmem:[#allocation34_spill] sm:$0xff] %v17006_v38  ;;  %v14558_v45 = vpop.f32.mrb[149].mxu0  ;;  %v17008_v32 = vpop.f32.mrb[50].mxu1  ;;  %14608 = vmatprep.mubr.msk.bf16.mxu1 %vm16009_vm2, %v16008_v46 }
 0x317   :  { %17757 = vst [vmem:[#allocation35_spill] sm:$0xff] %v17008_v32  ;;  %v17010_v63 = vpop.f32.mrb[150].mxu0  ;;  %v14391_v3 = vpop.f32.mrb[51].mxu1 }
 0x318   :  { %17758 = vst [vmem:[#allocation36_spill] sm:$0xff] %v17010_v63  ;;  %v14559_v58 = vpop.f32.mrb[151].mxu0 }
 0x319   :  { %v2787_v58 = vld [vmem:[#allocation3 + $0x53] sm:$0xff] }
 0x31a   :  { %v2816_v32 = vpack.c.bf16 %v2788_v30, %v2787_v58  ;;  %v2791_v30 = vld [vmem:[#allocation3 + $0x73] sm:$0xff] }
 0x31d   :  { %14609 = vmatmul.mubr.bf16.gmra.mrb[152].mxu1 %v2815_v11 }
 0x31e   :  { %14612 = vmatprep.mubr.msk.bf16.mxu1 %vm16009_vm2, %v16008_v46 }
 0x320   :  { %v17016_v15 = vpop.f32.mrb[52].mxu1 }
 0x321   :  { %17759 = vst [vmem:[#allocation37_spill] sm:$0xff] %v17016_v15  ;;  %v17018_v24 = vpop.f32.mrb[152].mxu0  ;;  %v14394_v41 = vpop.f32.mrb[53].mxu1 }
 0x322   :  { %17760 = vst [vmem:[#allocation38_spill] sm:$0xff] %v17018_v24  ;;  %v14562_v42 = vpop.f32.mrb[153].mxu0  ;;  %v17020_v45 = vpop.f32.mrb[54].mxu1  ;;  %v2817_v41 = vpack.c.bf16 %v2790_v9, %v2789_v10  ;;  %v2794_v10 = vld [vmem:[#allocation3 + $0x8b] sm:$0xff] }
 0x323   :  { %17761 = vst [vmem:[#allocation39_spill] sm:$0xff] %v17020_v45  ;;  %v17022_v3 = vpop.f32.mrb[154].mxu0  ;;  %v14395_v63 = vpop.f32.mrb[55].mxu1 }
 0x324   :  { %17762 = vst [vmem:[#allocation40_spill] sm:$0xff] %v17022_v3  ;;  %v14563_v38 = vpop.f32.mrb[155].mxu0 }
 0x325   :  { %14613 = vmatmul.mubr.bf16.gmra.mrb[156].mxu1 %v2816_v32  ;;  %v2792_v32 = vld [vmem:[#allocation3 + $0x7b] sm:$0xff] }
 0x326   :  { %14616 = vmatprep.mubr.msk.bf16.mxu1 %vm16009_vm2, %v16008_v46  ;;  %v2818_v58 = vpack.c.bf16 %v2792_v32, %v2791_v30 }
 0x32c   :  { %v17026_v11 = vpop.f32.mrb[56].mxu1 }
 0x32d   :  { %17763 = vst [vmem:[#allocation41_spill] sm:$0xff] %v17026_v11  ;;  %v17028_v24 = vpop.f32.mrb[156].mxu0  ;;  %v14398_v42 = vpop.f32.mrb[57].mxu1  ;;  %14617 = vmatmul.mubr.bf16.gmra.mrb[160].mxu1 %v2817_v41 }
 0x32e   :  { %17764 = vst [vmem:[#allocation42_spill] sm:$0xff] %v17028_v24  ;;  %v14566_v15 = vpop.f32.mrb[157].mxu0  ;;  %v17030_v45 = vpop.f32.mrb[58].mxu1  ;;  %14620 = vmatprep.mubr.msk.bf16.mxu1 %vm16009_vm2, %v16008_v46 }
 0x32f   :  { %17765 = vst [vmem:[#allocation43_spill] sm:$0xff] %v17030_v45  ;;  %v17032_v3 = vpop.f32.mrb[158].mxu0  ;;  %v14399_v38 = vpop.f32.mrb[59].mxu1 }
 0x330   :  { %17766 = vst [vmem:[#allocation44_spill] sm:$0xff] %v17032_v3  ;;  %v14567_v63 = vpop.f32.mrb[159].mxu0 }
 0x331   :  { %v2793_v63 = vld [vmem:[#allocation3 + $0x83] sm:$0xff] }
 0x332   :  { %v2819_v11 = vpack.c.bf16 %v2794_v10, %v2793_v63  ;;  %v2798_v63 = vld [vmem:[#allocation3 + $0xab] sm:$0xff] }
 0x335   :  { %14621 = vmatmul.mubr.bf16.gmra.mrb[164].mxu1 %v2818_v58  ;;  %v2796_v58 = vld [vmem:[#allocation3 + $0x9b] sm:$0xff] }
 0x336   :  { %14624 = vmatprep.mubr.msk.bf16.mxu1 %vm16009_vm2, %v16008_v46 }
 0x338   :  { %v17038_v9 = vpop.f32.mrb[60].mxu1 }
 0x339   :  { %17767 = vst [vmem:[#allocation45_spill] sm:$0xff] %v17038_v9  ;;  %v17040_v15 = vpop.f32.mrb[160].mxu0  ;;  %v14402_v41 = vpop.f32.mrb[61].mxu1 }
 0x33a   :  { %17768 = vst [vmem:[#allocation46_spill] sm:$0xff] %v17040_v15  ;;  %v14570_v42 = vpop.f32.mrb[161].mxu0  ;;  %v17042_v3 = vpop.f32.mrb[62].mxu1 }
 0x33b   :  { %17769 = vst [vmem:[#allocation47_spill] sm:$0xff] %v17042_v3  ;;  %v17044_v38 = vpop.f32.mrb[162].mxu0  ;;  %v14403_v24 = vpop.f32.mrb[63].mxu1  ;;  %v2795_v3 = vld [vmem:[#allocation3 + $0x93] sm:$0xff] }
 0x33c   :  { %17770 = vst [vmem:[#allocation48_spill] sm:$0xff] %v17044_v38  ;;  %v14571_v45 = vpop.f32.mrb[163].mxu0 }
 0x33d   :  { %14625 = vmatmul.mubr.bf16.gmra.mrb[168].mxu1 %v2819_v11  ;;  %v2820_v45 = vpack.c.bf16 %v2796_v58, %v2795_v3 }
 0x33e   :  { %14628 = vmatprep.mubr.msk.bf16.mxu1 %vm16009_vm2, %v16008_v46 }
 0x340   :  { %v17048_v32 = vpop.f32.mrb[64].mxu1 }
 0x341   :  { %17771 = vst [vmem:[#allocation49_spill] sm:$0xff] %v17048_v32  ;;  %v17050_v30 = vpop.f32.mrb[164].mxu0  ;;  %v14406_v15 = vpop.f32.mrb[65].mxu1 }
 0x342   :  { %17772 = vst [vmem:[#allocation50_spill] sm:$0xff] %v17050_v30  ;;  %v14574_v41 = vpop.f32.mrb[165].mxu0  ;;  %v1931_v42 = vpop.f32.mrb[66].mxu1 }
 0x343   :  { %v17052_v9 = vpop.f32.mrb[166].mxu0  ;;  %1968 = vst [vmem:[#allocation4 + $0x108] sm:$0x3f] %v1931_v42  ;;  %v14407_v38 = vpop.f32.mrb[67].mxu1 }
 0x344   :  { %17773 = vst [vmem:[#allocation51_spill] sm:$0xff] %v17052_v9  ;;  %v14575_v24 = vpop.f32.mrb[167].mxu0  ;;  %v2797_v9 = vld [vmem:[#allocation3 + $0xa3] sm:$0xff] }
 0x345   :  { %14629 = vmatmul.mubr.bf16.gmra.mrb[172].mxu1 %v2820_v45  ;;  %v2821_v58 = vpack.c.bf16 %v2798_v63, %v2797_v9 }
 0x346   :  { %14632 = vmatprep.mubr.msk.bf16.mxu1 %vm16009_vm2, %v16008_v46 }
 0x348   :  { %v2153_v11 = vpop.f32.mrb[68].mxu1 }
 0x349   :  { %v17056_v10 = vpop.f32.mrb[168].mxu0  ;;  %v2288_v30 = vadd.f32 %v2153_v11, %v16844_v29  ;;  %v14426_v15 = vpop.f32.mrb[69].mxu1 }
 0x34a   :  { %v14678_v41 = vpop.f32.mrb[169].mxu0  ;;  %v2156_v32 = vpop.f32.mrb[70].mxu1  ;;  %v2800_v15 = vld [vmem:[#allocation3 + $0xbb] sm:$0xff] }
 0x34b   :  { %v17059_v31 = vpop.f32.mrb[170].mxu0  ;;  %v2289_v38 = vadd.f32 %v2156_v32, %v16847_v34  ;;  %v14427_v42 = vpop.f32.mrb[71].mxu1  ;;  %v17063_v24 = vadd.f32 %v16834_v19, %v2288_v30  ;;  %v2799_v19 = vld [vmem:[#allocation3 + $0xb3] sm:$0xff] }
 0x34c   :  { %v14679_v3 = vpop.f32.mrb[171].mxu0 }
 0x34d   :  { %14633 = vmatmul.mubr.bf16.gmra.mrb[176].mxu1 %v2821_v58  ;;  %v17066_v45 = vadd.f32 %v16837_v22, %v2289_v38  ;;  %v2822_v38 = vpack.c.bf16 %v2800_v15, %v2799_v19 }
 0x34e   :  { %14636 = vmatprep.mubr.msk.bf16.mxu1 %vm16009_vm2, %v16008_v46 }
 0x350   :  { %v2161_v29 = vpop.f32.mrb[72].mxu1 }
 0x351   :  { %v17070_v11 = vpop.f32.mrb[172].mxu0  ;;  %v2290_v41 = vadd.f32 %v2161_v29, %v16863_v49  ;;  %v14430_v34 = vpop.f32.mrb[73].mxu1 }
 0x352   :  { %v14682_v32 = vpop.f32.mrb[173].mxu0  ;;  %v2164_v42 = vpop.f32.mrb[74].mxu1  ;;  %v2802_v34 = vld [vmem:[#allocation3 + $0xcb] sm:$0xff] }
 0x353   :  { %v17073_v9 = vpop.f32.mrb[174].mxu0  ;;  %v2291_v30 = vadd.f32 %v2164_v42, %v16866_v53  ;;  %v14431_v63 = vpop.f32.mrb[75].mxu1  ;;  %v17077_v3 = vadd.f32 %v16853_v39, %v2290_v41  ;;  %v2801_v39 = vld [vmem:[#allocation3 + $0xc3] sm:$0xff] }
 0x354   :  { %v14683_v22 = vpop.f32.mrb[175].mxu0 }
 0x355   :  { %14637 = vmatmul.mubr.bf16.gmra.mrb[180].mxu1 %v2822_v38  ;;  %v17080_v58 = vadd.f32 %v16856_v43, %v2291_v30  ;;  %v2823_v30 = vpack.c.bf16 %v2802_v34, %v2801_v39 }
 0x356   :  { %14640 = vmatprep.mubr.msk.bf16.mxu1 %vm16009_vm2, %v16008_v46 }
 0x358   :  { %v2169_v49 = vpop.f32.mrb[76].mxu1 }
 0x359   :  { %v17084_v29 = vpop.f32.mrb[176].mxu0  ;;  %v2292_v32 = vadd.f32 %v2169_v49, %v16876_v4  ;;  %v14434_v53 = vpop.f32.mrb[77].mxu1 }
 0x35a   :  { %v14686_v42 = vpop.f32.mrb[177].mxu0  ;;  %v2172_v63 = vpop.f32.mrb[78].mxu1  ;;  %v2804_v53 = vld [vmem:[#allocation3 + $0xdb] sm:$0xff] }
 0x35b   :  { %v17087_v15 = vpop.f32.mrb[178].mxu0  ;;  %v2293_v41 = vadd.f32 %v2172_v63, %v16878_v8  ;;  %v14435_v19 = vpop.f32.mrb[79].mxu1  ;;  %v17091_v22 = vadd.f32 %v16868_v60, %v2292_v32  ;;  %v2803_v60 = vld [vmem:[#allocation3 + $0xd3] sm:$0xff] }
 0x35c   :  { %v14687_v43 = vpop.f32.mrb[179].mxu0 }
 0x35d   :  { %14641 = vmatmul.mubr.bf16.gmra.mrb[184].mxu1 %v2823_v30  ;;  %v17094_v38 = vadd.f32 %v16870_v62, %v2293_v41  ;;  %v2824_v41 = vpack.c.bf16 %v2804_v53, %v2803_v60 }
 0x35e   :  { %14644 = vmatprep.mubr.msk.bf16.mxu1 %vm16009_vm2, %v16008_v46 }
 0x360   :  { %v2177_v4 = vpop.f32.mrb[80].mxu1 }
 0x361   :  { %v17098_v49 = vpop.f32.mrb[180].mxu0  ;;  %v2294_v42 = vadd.f32 %v2177_v4, %v16892_v21  ;;  %v14438_v8 = vpop.f32.mrb[81].mxu1 }
 0x362   :  { %v14690_v63 = vpop.f32.mrb[181].mxu0  ;;  %v2180_v19 = vpop.f32.mrb[82].mxu1  ;;  %v2806_v8 = vld [vmem:[#allocation3 + $0xeb] sm:$0xff] }
 0x363   :  { %v17101_v34 = vpop.f32.mrb[182].mxu0  ;;  %v2295_v32 = vadd.f32 %v2180_v19, %v16894_v26  ;;  %v14439_v39 = vpop.f32.mrb[83].mxu1  ;;  %v17105_v43 = vadd.f32 %v16884_v12, %v2294_v42  ;;  %v2805_v12 = vld [vmem:[#allocation3 + $0xe3] sm:$0xff] }
 0x364   :  { %v14691_v62 = vpop.f32.mrb[183].mxu0  ;;  %v15024_v39 = vld [vmem:[#allocation16] sm:$0xff]  }
 0x365   :  { %14645 = vmatmul.mubr.bf16.gmra.mrb[188].mxu1 %v2824_v41  ;;  %v17108_v30 = vadd.f32 %v16886_v16, %v2295_v32  ;;  %v2825_v62 = vpack.c.bf16 %v2806_v8, %v2805_v12  ;;  %14744 = vmatprep.subr.bf16.mxu1 %v15024_v39 }
 0x366   :  { %14648 = vmatprep.mubr.msk.bf16.mxu1 %vm16009_vm2, %v16008_v46  ;;  %14745 = vmatpush3.bf16.msra.mxu1 %v15024_v39 }
 0x368   :  { %v2185_v21 = vpop.f32.mrb[84].mxu1 }
 0x369   :  { %v17112_v4 = vpop.f32.mrb[184].mxu0  ;;  %v2296_v63 = vadd.f32 %v2185_v21, %v16904_v44  ;;  %v14442_v26 = vpop.f32.mrb[85].mxu1 }
 0x36a   :  { %v14694_v19 = vpop.f32.mrb[185].mxu0  ;;  %v2188_v53 = vpop.f32.mrb[86].mxu1 }
 0x36b   :  { %v17115_v60 = vpop.f32.mrb[186].mxu0  ;;  %v2297_v42 = vadd.f32 %v2188_v53, %v16906_v48  ;;  %v14443_v16 = vpop.f32.mrb[87].mxu1  ;;  %v17119_v41 = vadd.f32 %v16896_v55, %v2296_v63  ;;  %v2808_v19 = vld [vmem:[#allocation3 + $0xfb] sm:$0xff]  ;;  %v2807_v55 = vld [vmem:[#allocation3 + $0xf3] sm:$0xff] }
 0x36c   :  { %v14695_v32 = vpop.f32.mrb[187].mxu0 }
 0x36d   :  { %14649 = vmatmul.mubr.bf16.gmra.mrb[192].mxu1 %v2825_v62  ;;  %v17122_v44 = vadd.f32 %v16898_v36, %v2297_v42  ;;  %v2826_v42 = vpack.c.bf16 %v2808_v19, %v2807_v55 }
 0x36e   :  { %14652 = vmatprep.mubr.msk.bf16.mxu1 %vm16009_vm2, %v16008_v46 }
 0x370   :  { %v2193_v21 = vpop.f32.mrb[88].mxu1 }
 0x371   :  { %v17126_v26 = vpop.f32.mrb[188].mxu0  ;;  %v2298_v48 = vadd.f32 %v2193_v21, %v16920_v1  ;;  %v14446_v53 = vpop.f32.mrb[89].mxu1 }
 0x372   :  { %v14698_v8 = vpop.f32.mrb[189].mxu0  ;;  %v2196_v12 = vpop.f32.mrb[90].mxu1  ;;  %v2810_v53 = vld [vmem:[#allocation3 + $0x10b] sm:$0x3f] }
 0x373   :  { %v17129_v16 = vpop.f32.mrb[190].mxu0  ;;  %v2299_v63 = vadd.f32 %v2196_v12, %v16922_v6  ;;  %v14447_v39 = vpop.f32.mrb[91].mxu1  ;;  %v17133_v32 = vadd.f32 %v16912_v54, %v2298_v48  ;;  %v2809_v54 = vld [vmem:[#allocation3 + $0x103] sm:$0xff] }
 0x374   :  { %v14699_v36 = vpop.f32.mrb[191].mxu0 }
 0x375   :  { %14653 = vmatmul.mubr.bf16.gmra.mrb[196].mxu1 %v2826_v42  ;;  %v17136_v62 = vadd.f32 %v16914_v59, %v2299_v63  ;;  %v2827_v63 = vpack.c.bf16 %v2810_v53, %v2809_v54 }
 0x376   :  { %14656 = vmatprep.mubr.msk.bf16.mxu1 %vm16009_vm2, %v16008_v46  ;;  %v15025_v46 = vld [vmem:[#allocation16 + $0x8] sm:$0xff]  }
 0x377   :  { %14746 = vmatprep.subr.bf16.mxu1 %v15025_v46 }
 0x378   :  { %v2201_v1 = vpop.f32.mrb[92].mxu1  ;;  %14747 = vmatpush3.bf16.msra.mxu1 %v15025_v46 }
 0x379   :  { %v17140_v21 = vpop.f32.mrb[192].mxu0  ;;  %v2300_v8 = vadd.f32 %v2201_v1, %v16932_v27  ;;  %v14450_v6 = vpop.f32.mrb[93].mxu1 }
 0x37a   :  { %v14702_v12 = vpop.f32.mrb[193].mxu0  ;;  %v2204_v39 = vpop.f32.mrb[94].mxu1 }
 0x37b   :  { %v17143_v19 = vpop.f32.mrb[194].mxu0  ;;  %v2301_v48 = vadd.f32 %v2204_v39, %v16934_v33  ;;  %v14451_v55 = vpop.f32.mrb[95].mxu1  ;;  %v17147_v36 = vadd.f32 %v16924_v14, %v2300_v8  ;;  %v15026_v39 = vld [vmem:[#allocation16 + $0x10] sm:$0xff]  }
 0x37c   :  { %v14703_v59 = vpop.f32.mrb[195].mxu0  ;;  %14748 = vmatprep.subr.bf16.mxu1 %v15026_v39 }
 0x37d   :  { %14657 = vmatmul.mubr.bf16.gmra.mrb[200].mxu1 %v2827_v63  ;;  %v17150_v42 = vadd.f32 %v16926_v17, %v2301_v48  ;;  %v15027_v59 = vld [vmem:[#allocation16 + $0x18] sm:$0xff]  }
 0x37e   :  { %14749 = vmatpush3.bf16.msra.mxu1 %v15026_v39 }
 0x37f   :  { %14750 = vmatprep.subr.bf16.mxu1 %v15027_v59 }
 0x380   :  { %v2209_v27 = vpop.f32.mrb[96].mxu1 }
 0x381   :  { %v17152_v1 = vpop.f32.mrb[196].mxu0  ;;  %v2302_v6 = vadd.f32 %v2209_v27, %v16948_v52  ;;  %v14454_v12 = vpop.f32.mrb[97].mxu1 }
 0x382   :  { %v14706_v33 = vpop.f32.mrb[197].mxu0  ;;  %v2212_v55 = vpop.f32.mrb[98].mxu1  ;;  %14751 = vmatpush3.bf16.msra.mxu1 %v15027_v59  ;;  %v15028_v12 = vld [vmem:[#allocation16 + $0x20] sm:$0xff]  }
 0x383   :  { %v17155_v53 = vpop.f32.mrb[198].mxu0  ;;  %v2303_v14 = vadd.f32 %v2212_v55, %v16950_v61  ;;  %v14455_v8 = vpop.f32.mrb[99].mxu1  ;;  %v17159_v17 = vadd.f32 %v16940_v40, %v2302_v6  ;;  %14752 = vmatprep.subr.bf16.mxu1 %v15028_v12 }
 0x384   :  { %v14707_v54 = vpop.f32.mrb[199].mxu0  ;;  %v15029_v8 = vld [vmem:[#allocation16 + $0x28] sm:$0xff]  }
 0x385   :  { %v17162_v48 = vadd.f32 %v16942_v47, %v2303_v14 }
 0x386   :  { %14753 = vmatpush3.bf16.msra.mxu1 %v15028_v12 }
 0x387   :  { %14754 = vmatprep.subr.bf16.mxu1 %v15029_v8 }
 0x388   :  { %v2217_v52 = vpop.f32.mrb[100].mxu1 }
 0x389   :  { %v17164_v63 = vpop.f32.mrb[200].mxu0  ;;  %v2304_v46 = vadd.f32 %v2217_v52, %v16956_v13  ;;  %v14458_v27 = vpop.f32.mrb[101].mxu1 }
 0x38a   :  { %v14710_v61 = vpop.f32.mrb[201].mxu0  ;;  %v2220_v33 = vpop.f32.mrb[102].mxu1  ;;  %14755 = vmatpush3.bf16.msra.mxu1 %v15029_v8  ;;  %v15030_v27 = vld [vmem:[#allocation16 + $0x30] sm:$0xff]  }
 0x38b   :  { %v17167_v55 = vpop.f32.mrb[202].mxu0  ;;  %v2305_v40 = vadd.f32 %v2220_v33, %v16960_v25  ;;  %v14459_v6 = vpop.f32.mrb[103].mxu1  ;;  %v17171_v47 = vadd.f32 %v16958_v20, %v2304_v46  ;;  %14756 = vmatprep.subr.bf16.mxu1 %v15030_v27 }
 0x38c   :  { %v14711_v39 = vpop.f32.mrb[203].mxu0  ;;  %v15031_v6 = vld [vmem:[#allocation16 + $0x38] sm:$0xff]  }
 0x38d   :  { %v17174_v14 = vadd.f32 %v16962_v28, %v2305_v40 }
 0x38e   :  { %14757 = vmatpush3.bf16.msra.mxu1 %v15030_v27 }
 0x38f   :  { %14758 = vmatprep.subr.bf16.mxu1 %v15031_v6 }
 0x390   :  { %v2225_v13 = vpop.f32.mrb[104].mxu1 }
 0x391   :  { %v17176_v54 = vpop.f32.mrb[204].mxu0  ;;  %v2306_v59 = vadd.f32 %v2225_v13, %v16972_v50  ;;  %v14462_v52 = vpop.f32.mrb[105].mxu1 }
 0x392   :  { %v14714_v25 = vpop.f32.mrb[205].mxu0  ;;  %v2228_v61 = vpop.f32.mrb[106].mxu1  ;;  %14759 = vmatpush3.bf16.msra.mxu1 %v15031_v6 }
 0x393   :  { %v17179_v33 = vpop.f32.mrb[206].mxu0  ;;  %v2307_v20 = vadd.f32 %v2228_v61, %v16976_v0  ;;  %v14463_v46 = vpop.f32.mrb[107].mxu1  ;;  %v17183_v28 = vadd.f32 %v16974_v51, %v2306_v59 }
 0x394   :  { %v14715_v12 = vpop.f32.mrb[207].mxu0 }
 0x395   :  { %v17186_v40 = vadd.f32 %v16978_v2, %v2307_v20 }
 0x398   :  { %v2233_v50 = vpop.f32.mrb[108].mxu1 }
 0x399   :  { %v17188_v39 = vpop.f32.mrb[208].mxu0  ;;  %v2308_v8 = vadd.f32 %v2233_v50, %v16982_v18  ;;  %v14466_v13 = vpop.f32.mrb[109].mxu1 }
 0x39a   :  { %v14718_v0 = vpop.f32.mrb[209].mxu0  ;;  %v2236_v52 = vpop.f32.mrb[110].mxu1 }
 0x39b   :  { %v17191_v25 = vpop.f32.mrb[210].mxu0  ;;  %v2309_v51 = vadd.f32 %v2236_v52, %v16986_v35  ;;  %v14467_v59 = vpop.f32.mrb[111].mxu1  ;;  %v17195_v2 = vadd.f32 %v16984_v23, %v2308_v8 }
 0x39c   :  { %v14719_v27 = vpop.f32.mrb[211].mxu0  ;;  %v17778_v59 = vld [vmem:[#allocation33_spill] sm:$0xff] }
 0x39d   :  { %v17198_v61 = vadd.f32 %v16988_v37, %v2309_v51 }
 0x3a0   :  { %v2241_v20 = vpop.f32.mrb[112].mxu1 }
 0x3a1   :  { %v17200_v46 = vpop.f32.mrb[212].mxu0  ;;  %v2310_v18 = vadd.f32 %v2241_v20, %v16994_v56  ;;  %v14470_v12 = vpop.f32.mrb[113].mxu1 }
 0x3a2   :  { %17774 = vst [vmem:[#allocation52_spill] sm:$0xff] %v17200_v46  ;;  %v14722_v6 = vpop.f32.mrb[213].mxu0  ;;  %v2244_v50 = vpop.f32.mrb[114].mxu1 }
 0x3a3   :  { %v17203_v13 = vpop.f32.mrb[214].mxu0  ;;  %v2311_v35 = vadd.f32 %v2244_v50, %v16998_v5  ;;  %v14471_v0 = vpop.f32.mrb[115].mxu1  ;;  %v17207_v23 = vadd.f32 %v16996_v57, %v2310_v18  ;;  %v17782_v18 = vld [vmem:[#allocation36_spill] sm:$0xff] }
 0x3a4   :  { %17775 = vst [vmem:[#allocation53_spill] sm:$0xff] %v17203_v13  ;;  %v14723_v52 = vpop.f32.mrb[215].mxu0  ;;  %v17780_v13 = vld [vmem:[#allocation35_spill] sm:$0xff] }
 0x3a5   :  { %v17210_v37 = vadd.f32 %v17000_v7, %v2311_v35  ;;  %v17781_v52 = vld [vmem:[#allocation34_spill] sm:$0xff] }
 0x3a7   :  { %17776 = vst [vmem:[#allocation54_spill] sm:$0xff] %v17210_v37 }
 0x3a8   :  { %v2249_v8 = vpop.f32.mrb[116].mxu1 }
 0x3a9   :  { %v17212_v51 = vpop.f32.mrb[216].mxu0  ;;  %v2312_v56 = vadd.f32 %v2249_v8, %v17778_v59  ;;  %v14474_v27 = vpop.f32.mrb[117].mxu1 }
 0x3aa   :  { %17777 = vst [vmem:[#allocation55_spill] sm:$0xff] %v17212_v51  ;;  %v14726_v20 = vpop.f32.mrb[217].mxu0  ;;  %v2252_v12 = vpop.f32.mrb[118].mxu1  ;;  %v17785_v51 = vld [vmem:[#allocation37_spill] sm:$0xff] }
 0x3ab   :  { %v17215_v6 = vpop.f32.mrb[218].mxu0  ;;  %v2313_v5 = vadd.f32 %v2252_v12, %v17780_v13  ;;  %v14475_v50 = vpop.f32.mrb[119].mxu1  ;;  %v17219_v57 = vadd.f32 %v17781_v52, %v2312_v56  ;;  %v17787_v13 = vld [vmem:[#allocation39_spill] sm:$0xff] }
 0x3ac   :  { %17779 = vst [vmem:[#allocation33_spill] sm:$0xff] %v17215_v6  ;;  %v14727_v0 = vpop.f32.mrb[219].mxu0 }
 0x3ad   :  { %v17222_v7 = vadd.f32 %v17782_v18, %v2313_v5  ;;  %v17789_v5 = vld [vmem:[#allocation41_spill] sm:$0xff] }
 0x3af   :  { %17783 = vst [vmem:[#allocation35_spill] sm:$0xff] %v17222_v7 }
 0x3b0   :  { %v2257_v35 = vpop.f32.mrb[120].mxu1 }
 0x3b1   :  { %v17224_v37 = vpop.f32.mrb[220].mxu0  ;;  %v2314_v8 = vadd.f32 %v2257_v35, %v17785_v51  ;;  %v14478_v59 = vpop.f32.mrb[121].mxu1  ;;  %v17791_v35 = vld [vmem:[#allocation43_spill] sm:$0xff] }
 0x3b2   :  { %17784 = vst [vmem:[#allocation34_spill] sm:$0xff] %v17224_v37  ;;  %v14730_v27 = vpop.f32.mrb[221].mxu0  ;;  %v2260_v20 = vpop.f32.mrb[122].mxu1 }
 0x3b3   :  { %v17227_v46 = vpop.f32.mrb[222].mxu0  ;;  %2348 = vst [vmem:[#allocation4 + $0xd0] sm:$0xff] %v2314_v8  ;;  %v2315_v12 = vadd.f32 %v2260_v20, %v17787_v13  ;;  %v14479_v50 = vpop.f32.mrb[123].mxu1 }
 0x3b4   :  { %17786 = vst [vmem:[#allocation36_spill] sm:$0xff] %v17227_v46  ;;  %v14731_v0 = vpop.f32.mrb[223].mxu0 }
 0x3b5   :  { %2349 = vst [vmem:[#allocation4 + $0xd8] sm:$0xff] %v2315_v12  ;;  %v17793_v12 = vld [vmem:[#allocation45_spill] sm:$0xff] }
 0x3b8   :  { %v2265_v56 = vpop.f32.mrb[124].mxu1 }
 0x3b9   :  { %v17230_v52 = vpop.f32.mrb[224].mxu0  ;;  %v2316_v18 = vadd.f32 %v2265_v56, %v17789_v5  ;;  %v14482_v6 = vpop.f32.mrb[125].mxu1 }
 0x3ba   :  { %17788 = vst [vmem:[#allocation37_spill] sm:$0xff] %v17230_v52  ;;  %v14734_v37 = vpop.f32.mrb[225].mxu0  ;;  %v2268_v7 = vpop.f32.mrb[126].mxu1 }
 0x3bb   :  { %v17233_v51 = vpop.f32.mrb[226].mxu0  ;;  %2350 = vst [vmem:[#allocation4 + $0xe0] sm:$0xff] %v2316_v18  ;;  %v2317_v59 = vadd.f32 %v2268_v7, %v17791_v35  ;;  %v14483_v27 = vpop.f32.mrb[127].mxu1  ;;  %v17794_v37 = vld [vmem:[#allocation47_spill] sm:$0xff] }
 0x3bc   :  { %17790 = vst [vmem:[#allocation39_spill] sm:$0xff] %v17233_v51  ;;  %v14735_v8 = vpop.f32.mrb[227].mxu0  ;;  %v2002_v51 = vld [vmem:[#allocation4 + $0x108] sm:$0x3f] }
 0x3bd   :  { %2351 = vst [vmem:[#allocation4 + $0xe8] sm:$0xff] %v2317_v59  ;;  %v17796_v59 = vld [vmem:[#allocation49_spill] sm:$0xff] }
 0x3c0   :  { %v2273_v20 = vpop.f32.mrb[128].mxu1 }
 0x3c1   :  { %v17236_v13 = vpop.f32.mrb[228].mxu0  ;;  %v2318_v50 = vadd.f32 %v2273_v20, %v17793_v12  ;;  %v14486_v0 = vpop.f32.mrb[129].mxu1 }
 0x3c2   :  { %17792 = vst [vmem:[#allocation41_spill] sm:$0xff] %v17236_v13  ;;  %v14738_v52 = vpop.f32.mrb[229].mxu0  ;;  %v2276_v46 = vpop.f32.mrb[130].mxu1 }
 0x3c3   :  { %v17239_v56 = vpop.f32.mrb[230].mxu0  ;;  %2352 = vst [vmem:[#allocation4 + $0xf0] sm:$0xff] %v2318_v50  ;;  %v2319_v6 = vadd.f32 %v2276_v46, %v17794_v37  ;;  %v14487_v5 = vpop.f32.mrb[131].mxu1 }
 0x3c4   :  { %v14739_v18 = vpop.f32.mrb[231].mxu0  ;;  %v17248_v5 = vld [vmem:[#allocation14] ss:$0 sm:$0xff] }
 0x3c5   :  { %2353 = vst [vmem:[#allocation4 + $0xf8] sm:$0xff] %v2319_v6 }
 0x3c8   :  { %v2281_v7 = vpop.f32.mrb[132].mxu1 }
 0x3c9   :  { %v17242_v35 = vpop.f32.mrb[232].mxu0  ;;  %v2320_v27 = vadd.f32 %v2281_v7, %v17796_v59  ;;  %v14490_v8 = vpop.f32.mrb[133].mxu1 }
 0x3ca   :  { %17795 = vst [vmem:[#allocation43_spill] sm:$0xff] %v17242_v35  ;;  %v14742_v13 = vpop.f32.mrb[233].mxu0  ;;  %v2284_v20 = vpop.f32.mrb[134].mxu1  ;;  %v17798_v35 = vld [vmem:[#allocation51_spill] sm:$0xff] }
 0x3cb   :  { %v17245_v12 = vpop.f32.mrb[234].mxu0  ;;  %2354 = vst [vmem:[#allocation4 + $0x100] sm:$0xff] %v2320_v27  ;;  %v2321_v52 = vadd.f32 %v2284_v20, %v2002_v51  ;;  %v14491_v0 = vpop.f32.mrb[135].mxu1 }
 0x3cc   :  { %17797 = vst [vmem:[#allocation45_spill] sm:$0xff] %v17245_v12  ;;  %v14743_v50 = vpop.f32.mrb[235].mxu0 }
 0x3cd   :  { %2355 = vst [vmem:[#allocation4 + $0x108] sm:$0x3f] %v2321_v52 }
 0x3d0   :  { %v2927_v46 = vpop.f32.mrb[136].mxu1 }
 0x3d1   :  { %v3062_v37 = vadd.f32 %v2927_v46, %v17063_v24  ;;  %v14594_v6 = vpop.f32.mrb[137].mxu1 }
 0x3d2   :  { %v2930_v18 = vpop.f32.mrb[138].mxu1 }
 0x3d3   :  { %v3449_v7 = vadd.f32 %v17056_v10, %v3062_v37  ;;  %v3063_v13 = vadd.f32 %v2930_v18, %v17066_v45  ;;  %v14595_v59 = vpop.f32.mrb[139].mxu1 }
 0x3d4   :  { %v2389_v8 = vld [vmem:[#allocation4 + $0x108] sm:$0x3f] }
 0x3d5   :  { %v2708_v12 = vadd.f32 %v17798_v35, %v2389_v8  ;;  %v3558_v51 = vadd.f32 %v17248_v5, %v3449_v7  ;;  %v3450_v27 = vadd.f32 %v17059_v31, %v3063_v13 }
 0x3d7   :  { %2742 = vst [vmem:[#allocation4 + $0x108] sm:$0x3f] %v2708_v12  ;;  %v3592_v20 = vmax.f32 %v3558_v51, 0.0  ;;  %v3559_v24 = vadd.f32 %v17248_v5, %v3450_v27 }
 0x3d8   :  { %v2935_v52 = vpop.f32.mrb[140].mxu1 }
 0x3d9   :  { %3626 = vst [vmem:[#allocation4] sm:$0xff] %v3592_v20  ;;  %v3593_v0 = vmax.f32 %v3559_v24, 0.0  ;;  %v3064_v50 = vadd.f32 %v2935_v52, %v17077_v3  ;;  %v14598_v10 = vpop.f32.mrb[141].mxu1 }
 0x3da   :  { %v2938_v46 = vpop.f32.mrb[142].mxu1  ;;  %v17268_v10 = vld [vmem:[#allocation16 + $0x40] sm:$0xff]  }
 0x3db   :  { %3627 = vst [vmem:[#allocation4 + $0x8] sm:$0xff] %v3593_v0  ;;  %v3451_v45 = vadd.f32 %v17070_v11, %v3064_v50  ;;  %v3065_v35 = vadd.f32 %v2938_v46, %v17080_v58  ;;  %v14599_v37 = vpop.f32.mrb[143].mxu1  ;;  %14772 = vmatprep.subr.bf16.mxu1 %v17268_v10 }
 0x3dd   :  { %v3560_v6 = vadd.f32 %v17248_v5, %v3451_v45  ;;  %v3452_v31 = vadd.f32 %v17073_v9, %v3065_v35 }
 0x3df   :  { %v3594_v12 = vmax.f32 %v3560_v6, 0.0  ;;  %v3561_v18 = vadd.f32 %v17248_v5, %v3452_v31 }
 0x3e0   :  { %v2943_v7 = vpop.f32.mrb[144].mxu1 }
 0x3e1   :  { %3628 = vst [vmem:[#allocation4 + $0x10] sm:$0xff] %v3594_v12  ;;  %v3595_v13 = vmax.f32 %v3561_v18, 0.0  ;;  %v3066_v3 = vadd.f32 %v2943_v7, %v17091_v22  ;;  %v14602_v59 = vpop.f32.mrb[145].mxu1 }
 0x3e2   :  { %v2946_v8 = vpop.f32.mrb[146].mxu1 }
 0x3e3   :  { %3629 = vst [vmem:[#allocation4 + $0x18] sm:$0xff] %v3595_v13  ;;  %v3453_v11 = vadd.f32 %v17084_v29, %v3066_v3  ;;  %v3067_v58 = vadd.f32 %v2946_v8, %v17094_v38  ;;  %v14603_v51 = vpop.f32.mrb[147].mxu1 }
 0x3e5   :  { %v3562_v27 = vadd.f32 %v17248_v5, %v3453_v11  ;;  %v3454_v9 = vadd.f32 %v17087_v15, %v3067_v58 }
 0x3e7   :  { %v3596_v20 = vmax.f32 %v3562_v27, 0.0  ;;  %v3563_v24 = vadd.f32 %v17248_v5, %v3454_v9 }
 0x3e8   :  { %v2951_v52 = vpop.f32.mrb[148].mxu1  ;;  %v3661_v0 = vld [vmem:[#allocation4] ss:$3 sm:$0xff]  ;;  %v3673_v50 = vld [vmem:[#allocation4 + $0x1] ss:$3 sm:$0xff] }
 0x3e9   :  { %3630 = vst [vmem:[#allocation4 + $0x20] sm:$0xff] %v3596_v20  ;;  %v3597_v22 = vmax.f32 %v3563_v24, 0.0  ;;  %v3068_v46 = vadd.f32 %v2951_v52, %v17105_v43  ;;  %v14606_v29 = vpop.f32.mrb[149].mxu1  ;;  %v3684_v45 = vmax.f32 %v3661_v0, %v3673_v50  ;;  %v3691_v35 = vld [vmem:[#allocation4 + $0x2] ss:$3 sm:$0xff] }
 0x3ea   :  { %v2954_v38 = vpop.f32.mrb[150].mxu1 }
 0x3eb   :  { %3631 = vst [vmem:[#allocation4 + $0x28] sm:$0xff] %v3597_v22  ;;  %v3455_v15 = vadd.f32 %v17098_v49, %v3068_v46  ;;  %v3069_v37 = vadd.f32 %v2954_v38, %v17108_v30  ;;  %v14607_v6 = vpop.f32.mrb[151].mxu1  ;;  %v17274_v31 = vmax.f32 %v3684_v45, %v3691_v35 }
 0x3ed   :  { %v3564_v12 = vadd.f32 %v17248_v5, %v3455_v15  ;;  %v3456_v18 = vadd.f32 %v17101_v34, %v3069_v37  ;;  %3708 = vst [vmem:[#allocation5 + $0x2] sm:$0xff] %v17274_v31 }
 0x3ef   :  { %v3598_v43 = vmax.f32 %v3564_v12, 0.0  ;;  %v3565_v7 = vadd.f32 %v17248_v5, %v3456_v18 }
 0x3f0   :  { %v2959_v13 = vpop.f32.mrb[152].mxu1 }
 0x3f1   :  { %3632 = vst [vmem:[#allocation4 + $0x30] sm:$0xff] %v3598_v43  ;;  %v3599_v3 = vmax.f32 %v3565_v7, 0.0  ;;  %v3070_v59 = vadd.f32 %v2959_v13, %v17119_v41  ;;  %v14610_v49 = vpop.f32.mrb[153].mxu1 }
 0x3f2   :  { %v2962_v8 = vpop.f32.mrb[154].mxu1  ;;  %v3663_v30 = vld [vmem:[#allocation4 + $0x18] ss:$3 sm:$0xff]  ;;  %v3675_v11 = vld [vmem:[#allocation4 + $0x19] ss:$3 sm:$0xff] }
 0x3f3   :  { %3633 = vst [vmem:[#allocation4 + $0x38] sm:$0xff] %v3599_v3  ;;  %v3457_v58 = vadd.f32 %v17112_v4, %v3070_v59  ;;  %v3071_v51 = vadd.f32 %v2962_v8, %v17122_v44  ;;  %v14611_v34 = vpop.f32.mrb[155].mxu1  ;;  %v3685_v27 = vmax.f32 %v3663_v30, %v3675_v11  ;;  %v3693_v9 = vld [vmem:[#allocation4 + $0x1a] ss:$3 sm:$0xff] }
 0x3f4   :  { %v3771_v37 = vld [vmem:[#allocation5] sm:$0xff] }
 0x3f5   :  { %v3566_v20 = vadd.f32 %v17248_v5, %v3457_v58  ;;  %v3458_v24 = vadd.f32 %v17115_v60, %v3071_v51  ;;  %v17285_v52 = vmax.f32 %v3685_v27, %v3693_v9 }
 0x3f7   :  { %v3600_v0 = vmax.f32 %v3566_v20, 0.0  ;;  %v3567_v41 = vadd.f32 %v17248_v5, %v3458_v24  ;;  %3709 = vst [vmem:[#allocation5 + $0xa] sm:$0xff] %v17285_v52  ;;  %v4170_v50 = vpack.c.bf16 %v17285_v52, %v17274_v31  ;;  %v15050_v31 = vld [vmem:[#allocation16 + $0xd0] sm:$0xff]   ;;  %v15051_v52 = vld [vmem:[#allocation16 + $0xd8] sm:$0xff]  }
 0x3f8   :  { %v2967_v4 = vpop.f32.mrb[156].mxu1 }
 0x3f9   :  { %3634 = vst [vmem:[#allocation4 + $0x40] sm:$0xff] %v3600_v0  ;;  %v3601_v44 = vmax.f32 %v3567_v41, 0.0  ;;  %v3072_v22 = vadd.f32 %v2967_v4, %v17133_v32  ;;  %v14614_v46 = vpop.f32.mrb[157].mxu1 }
 0x3fa   :  { %v2970_v29 = vpop.f32.mrb[158].mxu1 }
 0x3fb   :  { %3635 = vst [vmem:[#allocation4 + $0x48] sm:$0xff] %v3601_v44  ;;  %v3459_v60 = vadd.f32 %v17126_v26, %v3072_v22  ;;  %v3073_v45 = vadd.f32 %v2970_v29, %v17136_v62  ;;  %v14615_v38 = vpop.f32.mrb[159].mxu1 }
 0x3fd   :  { %v3568_v35 = vadd.f32 %v17248_v5, %v3459_v60  ;;  %v3460_v15 = vadd.f32 %v17129_v16, %v3073_v45 }
 0x3fe   :  { %v3772_v6 = vld [vmem:[#allocation5 + $0x8] sm:$0xff] }
 0x3ff   :  { %v3602_v12 = vmax.f32 %v3568_v35, 0.0  ;;  %v3569_v18 = vadd.f32 %v17248_v5, %v3460_v15  ;;  %v3783_v43 = vpack.c.bf16 %v3772_v6, %v3771_v37 }
 0x400   :  { %v3665_v7 = vld [vmem:[#allocation4 + $0x30] ss:$3 sm:$0xff]  ;;  %v3677_v32 = vld [vmem:[#allocation4 + $0x31] ss:$3 sm:$0xff]  ;;  %v2975_v59 = vpop.f32.mrb[160].mxu1 }
 0x401   :  { %v3686_v13 = vmax.f32 %v3665_v7, %v3677_v32  ;;  %3636 = vst [vmem:[#allocation4 + $0x50] sm:$0xff] %v3602_v12  ;;  %v3603_v3 = vmax.f32 %v3569_v18, 0.0  ;;  %14760 = vmatprep.mubr.bf16.mxu1 %v3783_v43  ;;  %v3695_v26 = vld [vmem:[#allocation4 + $0x32] ss:$3 sm:$0xff]  ;;  %v3074_v62 = vadd.f32 %v2975_v59, %v17147_v36  ;;  %v14618_v49 = vpop.f32.mrb[161].mxu1 }
 0x402   :  { %v2978_v16 = vpop.f32.mrb[162].mxu1 }
 0x403   :  { %v3704_v8 = vmax.f32 %v3686_v13, %v3695_v26  ;;  %3637 = vst [vmem:[#allocation4 + $0x58] sm:$0xff] %v3603_v3  ;;  %v3461_v30 = vadd.f32 %v17140_v21, %v3074_v62  ;;  %v3075_v11 = vadd.f32 %v2978_v16, %v17150_v42  ;;  %v14619_v58 = vpop.f32.mrb[163].mxu1 }
 0x405   :  { %3710 = vst [vmem:[#allocation5 + $0x12] sm:$0xff] %v3704_v8  ;;  %v3570_v51 = vadd.f32 %v17248_v5, %v3461_v30  ;;  %v3462_v34 = vadd.f32 %v17143_v19, %v3075_v11 }
 0x407   :  { %v3604_v27 = vmax.f32 %v3570_v51, 0.0  ;;  %v3571_v9 = vadd.f32 %v17248_v5, %v3462_v34 }
 0x408   :  { %v2983_v20 = vpop.f32.mrb[164].mxu1 }
 0x409   :  { %v3076_v36 = vadd.f32 %v2983_v20, %v17159_v17  ;;  %v14622_v24 = vpop.f32.mrb[165].mxu1  ;;  %3638 = vst [vmem:[#allocation4 + $0x60] sm:$0xff] %v3604_v27  ;;  %v3605_v21 = vmax.f32 %v3571_v9, 0.0  ;;  %v15034_v27 = vld [vmem:[#allocation16 + $0x50] sm:$0xff]  }
 0x40a   :  { %v3667_v0 = vld [vmem:[#allocation4 + $0x48] ss:$3 sm:$0xff]  ;;  %v3679_v41 = vld [vmem:[#allocation4 + $0x49] ss:$3 sm:$0xff]  ;;  %v2986_v44 = vpop.f32.mrb[166].mxu1 }
 0x40b   :  { %v3687_v4 = vmax.f32 %v3667_v0, %v3679_v41  ;;  %v3463_v42 = vadd.f32 %v17152_v1, %v3076_v36  ;;  %v3697_v22 = vld [vmem:[#allocation4 + $0x4a] ss:$3 sm:$0xff]  ;;  %v3077_v46 = vadd.f32 %v2986_v44, %v17162_v48  ;;  %v14623_v29 = vpop.f32.mrb[167].mxu1  ;;  %3639 = vst [vmem:[#allocation4 + $0x68] sm:$0xff] %v3605_v21 }
 0x40c   :  { %v3773_v7 = vld [vmem:[#allocation5 + $0x10] sm:$0xff]  ;;  %v15035_v36 = vld [vmem:[#allocation16 + $0x58] sm:$0xff]   ;;  %v15036_v29 = vld [vmem:[#allocation16 + $0x60] sm:$0xff]  }
 0x40d   :  { %v3705_v19 = vmax.f32 %v3687_v4, %v3697_v22  ;;  %v3572_v60 = vadd.f32 %v17248_v5, %v3463_v42  ;;  %v3464_v45 = vadd.f32 %v17155_v53, %v3077_v46 }
 0x40f   :  { %3711 = vst [vmem:[#allocation5 + $0x1a] sm:$0xff] %v3705_v19  ;;  %v3606_v17 = vmax.f32 %v3572_v60, 0.0  ;;  %v3573_v38 = vadd.f32 %v17248_v5, %v3464_v45 }
 0x410   :  { %v2991_v35 = vpop.f32.mrb[168].mxu1 }
 0x411   :  { %3640 = vst [vmem:[#allocation4 + $0x70] sm:$0xff] %v3606_v17  ;;  %v3078_v15 = vadd.f32 %v2991_v35, %v17171_v47  ;;  %v14626_v1 = vpop.f32.mrb[169].mxu1  ;;  %v3607_v37 = vmax.f32 %v3573_v38, 0.0  ;;  %v15033_v47 = vld [vmem:[#allocation16 + $0x48] sm:$0xff]  }
 0x412   :  { %v2994_v6 = vpop.f32.mrb[170].mxu1  ;;  %v15037_v38 = vld [vmem:[#allocation16 + $0x68] sm:$0xff]  }
 0x413   :  { %v3465_v48 = vadd.f32 %v17164_v63, %v3078_v15  ;;  %v3079_v12 = vadd.f32 %v2994_v6, %v17174_v14  ;;  %v14627_v18 = vpop.f32.mrb[171].mxu1  ;;  %3641 = vst [vmem:[#allocation4 + $0x78] sm:$0xff] %v3607_v37  ;;  %v17799_v37 = vld [vmem:[#allocation52_spill] sm:$0xff] }
 0x414   :  { %v15038_v18 = vld [vmem:[#allocation16 + $0x70] sm:$0xff]  }
 0x415   :  { %v3574_v43 = vadd.f32 %v17248_v5, %v3465_v48  ;;  %v3466_v53 = vadd.f32 %v17167_v55, %v3079_v12  ;;  %v17800_v48 = vld [vmem:[#allocation54_spill] sm:$0xff] }
 0x416   :  { %v3774_v32 = vld [vmem:[#allocation5 + $0x18] sm:$0xff] }
 0x417   :  { %v3608_v13 = vmax.f32 %v3574_v43, 0.0  ;;  %v3575_v3 = vadd.f32 %v17248_v5, %v3466_v53  ;;  %v3784_v59 = vpack.c.bf16 %v3774_v32, %v3773_v7  ;;  %v17801_v32 = vld [vmem:[#allocation53_spill] sm:$0xff] }
 0x418   :  { %v2999_v26 = vpop.f32.mrb[172].mxu1  ;;  %v3669_v62 = vld [vmem:[#allocation4 + $0x60] ss:$3 sm:$0xff]  ;;  %v3681_v49 = vld [vmem:[#allocation4 + $0x61] ss:$3 sm:$0xff] }
 0x419   :  { %3642 = vst [vmem:[#allocation4 + $0x80] sm:$0xff] %v3608_v13  ;;  %v3609_v63 = vmax.f32 %v3575_v3, 0.0  ;;  %v3080_v14 = vadd.f32 %v2999_v26, %v17183_v28  ;;  %v14630_v8 = vpop.f32.mrb[173].mxu1  ;;  %14761 = vmatmul.mubr.bf16.vlgmr.msra.gmra.mrb[204].mxu1 %v3784_v59  ;;  %v3688_v16 = vmax.f32 %v3669_v62, %v3681_v49  ;;  %v3699_v11 = vld [vmem:[#allocation4 + $0x62] ss:$3 sm:$0xff]  ;;  %v15039_v49 = vld [vmem:[#allocation16 + $0x78] sm:$0xff]  }
 0x41a   :  { %v3002_v30 = vpop.f32.mrb[174].mxu1  ;;  %14773 = vmatpush3.bf16.msra.mxu1 %v17268_v10 }
 0x41b   :  { %3643 = vst [vmem:[#allocation4 + $0x88] sm:$0xff] %v3609_v63  ;;  %v3467_v55 = vadd.f32 %v17176_v54, %v3080_v14  ;;  %v3081_v58 = vadd.f32 %v3002_v30, %v17186_v40  ;;  %v14631_v51 = vpop.f32.mrb[175].mxu1  ;;  %v17319_v34 = vmax.f32 %v3688_v16, %v3699_v11  ;;  %14774 = vmatprep.subr.bf16.mxu1 %v15033_v47 }
 0x41d   :  { %v3576_v9 = vadd.f32 %v17248_v5, %v3467_v55  ;;  %v3468_v28 = vadd.f32 %v17179_v33, %v3081_v58  ;;  %3712 = vst [vmem:[#allocation5 + $0x22] sm:$0xff] %v17319_v34  ;;  %v17802_v58 = vld [vmem:[#allocation55_spill] sm:$0xff] }
 0x41e   :  { %14775 = vmatpush3.bf16.msra.mxu1 %v15033_v47 }
 0x41f   :  { %v3610_v20 = vmax.f32 %v3576_v9, 0.0  ;;  %v3577_v10 = vadd.f32 %v17248_v5, %v3468_v28  ;;  %14776 = vmatprep.subr.bf16.mxu1 %v15034_v27 }
 0x420   :  { %v3007_v54 = vpop.f32.mrb[176].mxu1  ;;  %v3671_v24 = vld [vmem:[#allocation4 + $0x78] ss:$3 sm:$0xf] }
 0x421   :  { %3644 = vst [vmem:[#allocation4 + $0x90] sm:$0xff] %v3610_v20  ;;  %v3611_v40 = vmax.f32 %v3577_v10, 0.0  ;;  %v3082_v0 = vadd.f32 %v3007_v54, %v17195_v2  ;;  %v14634_v41 = vpop.f32.mrb[177].mxu1  ;;  %v3683_v4 = vld [vmem:[#allocation4 + $0x79] ss:$3 sm:$0xf] }
 0x422   :  { %v3010_v21 = vpop.f32.mrb[178].mxu1  ;;  %v3689_v42 = vmax.f32 %v3671_v24, %v3683_v4  ;;  %14777 = vmatpush3.bf16.msra.mxu1 %v15034_v27  ;;  %v3701_v46 = vld [vmem:[#allocation4 + $0x7a] ss:$3 sm:$0xf]  ;;  %v17803_v27 = vld [vmem:[#allocation35_spill] sm:$0xff]  ;;  %v2382_v10 = vld [vmem:[#allocation4 + $0xd0] sm:$0xff] }
 0x423   :  { %3645 = vst [vmem:[#allocation4 + $0x98] sm:$0xff] %v3611_v40  ;;  %v3469_v33 = vadd.f32 %v17188_v39, %v3082_v0  ;;  %v3083_v44 = vadd.f32 %v3010_v21, %v17198_v61  ;;  %v14635_v22 = vpop.f32.mrb[179].mxu1  ;;  %14778 = vmatprep.subr.bf16.mxu1 %v15035_v36  ;;  %v17343_v20 = vld [vmem:[#allocation16 + $0x80] sm:$0xff]   ;;  %v2383_v24 = vld [vmem:[#allocation4 + $0xd8] sm:$0xff] }
 0x424   :  { %v3707_v19 = vmax.f32 %v3689_v42, %v3701_v46  ;;  %v3775_v3 = vld [vmem:[#allocation5 + $0x20] sm:$0xff] }
 0x425   :  { %v3578_v60 = vadd.f32 %v17248_v5, %v3469_v33  ;;  %v3470_v45 = vadd.f32 %v17191_v25, %v3083_v44  ;;  %v17805_v41 = vld [vmem:[#allocation38_spill] sm:$0xff] }
 0x426   :  { %3713 = vst [vmem:[#allocation5 + $0x2a] sm:$0xf] %v3707_v19  ;;  %14779 = vmatpush3.bf16.msra.mxu1 %v15035_v36  ;;  %v2701_v4 = vadd.f32 %v17805_v41, %v2382_v10 }
 0x427   :  { %v3612_v2 = vmax.f32 %v3578_v60, 0.0  ;;  %v3579_v17 = vadd.f32 %v17248_v5, %v3470_v45  ;;  %14780 = vmatprep.subr.bf16.mxu1 %v15036_v29 }
 0x428   :  { %v3015_v35 = vpop.f32.mrb[180].mxu1 }
 0x429   :  { %3646 = vst [vmem:[#allocation4 + $0xa0] sm:$0xff] %v3612_v2  ;;  %v3613_v39 = vmax.f32 %v3579_v17, 0.0  ;;  %v3084_v61 = vadd.f32 %v3015_v35, %v17207_v23  ;;  %v14638_v15 = vpop.f32.mrb[181].mxu1  ;;  %v17807_v17 = vld [vmem:[#allocation34_spill] sm:$0xff] }
 0x42a   :  { %v3018_v1 = vpop.f32.mrb[182].mxu1  ;;  %14781 = vmatpush3.bf16.msra.mxu1 %v15036_v29  ;;  %v3717_v43 = vld [vmem:[#allocation4 + $0x89] ss:$3 sm:$0xff]  ;;  %v3729_v53 = vld [vmem:[#allocation4 + $0x8a] ss:$3 sm:$0xff]  ;;  %v2384_v15 = vld [vmem:[#allocation4 + $0xe0] sm:$0xff] }
 0x42b   :  { %3647 = vst [vmem:[#allocation4 + $0xa8] sm:$0xff] %v3613_v39  ;;  %v3471_v6 = vadd.f32 %v17799_v37, %v3084_v61  ;;  %v3085_v25 = vadd.f32 %v3018_v1, %v17800_v48  ;;  %v14639_v12 = vpop.f32.mrb[183].mxu1  ;;  %14782 = vmatprep.subr.bf16.mxu1 %v15037_v38  ;;  %v3740_v62 = vmax.f32 %v3717_v43, %v3729_v53  ;;  %v17806_v29 = vld [vmem:[#allocation40_spill] sm:$0xff]  ;;  %v17809_v43 = vld [vmem:[#allocation42_spill] sm:$0xff] }
 0x42c   :  { %v2702_v19 = vadd.f32 %v17806_v29, %v2383_v24  ;;  %v17808_v37 = vld [vmem:[#allocation36_spill] sm:$0xff]  ;;  %v2703_v53 = vadd.f32 %v17809_v43, %v2384_v15 }
 0x42d   :  { %v3580_v7 = vadd.f32 %v17248_v5, %v3471_v6  ;;  %v3472_v13 = vadd.f32 %v17801_v32, %v3085_v25  ;;  %v3776_v59 = vld [vmem:[#allocation5 + $0x28] sm:$0xff]  ;;  %v2385_v25 = vld [vmem:[#allocation4 + $0xe8] sm:$0xff] }
 0x42e   :  { %v3785_v23 = vpack.c.bf16 %v3776_v59, %v3775_v3  ;;  %14783 = vmatpush3.bf16.msra.mxu1 %v15037_v38  ;;  %v17810_v59 = vld [vmem:[#allocation44_spill] sm:$0xff] }
 0x42f   :  { %v3614_v47 = vmax.f32 %v3580_v7, 0.0  ;;  %v3581_v26 = vadd.f32 %v17248_v5, %v3472_v13  ;;  %14784 = vmatprep.subr.bf16.mxu1 %v15038_v18 }
 0x430   :  { %v3023_v63 = vpop.f32.mrb[184].mxu1  ;;  %14764 = vmatprep.mubr.bf16.mxu1 %v3785_v23  ;;  %v3747_v14 = vld [vmem:[#allocation4 + $0x8b] ss:$3 sm:$0xff]  ;;  %v2704_v23 = vadd.f32 %v17810_v59, %v2385_v25 }
 0x431   :  { %3648 = vst [vmem:[#allocation4 + $0xb0] sm:$0xff] %v3614_v47  ;;  %v3615_v8 = vmax.f32 %v3581_v26, 0.0  ;;  %v3086_v16 = vadd.f32 %v3023_v63, %v17219_v57  ;;  %v14642_v30 = vpop.f32.mrb[185].mxu1  ;;  %v17338_v11 = vmax.f32 %v3740_v62, %v3747_v14  ;;  %v17804_v57 = vld [vmem:[#allocation33_spill] sm:$0xff] }
 0x432   :  { %v3026_v55 = vpop.f32.mrb[186].mxu1  ;;  %14785 = vmatpush3.bf16.msra.mxu1 %v15038_v18  ;;  %v17811_v26 = vld [vmem:[#allocation37_spill] sm:$0xff] }
 0x433   :  { %3649 = vst [vmem:[#allocation4 + $0xb8] sm:$0xff] %v3615_v8  ;;  %v3473_v51 = vadd.f32 %v17802_v58, %v3086_v16  ;;  %v3087_v9 = vadd.f32 %v3026_v55, %v17803_v27  ;;  %v14643_v28 = vpop.f32.mrb[187].mxu1  ;;  %3764 = vst [vmem:[#allocation5 + $0x32] sm:$0xff] %v17338_v11  ;;  %14786 = vmatprep.subr.bf16.mxu1 %v15039_v49  ;;  %v2386_v14 = vld [vmem:[#allocation4 + $0xf0] sm:$0xff] }
 0x434   :  { %v2387_v28 = vld [vmem:[#allocation4 + $0xf8] sm:$0xff] }
 0x435   :  { %v3582_v36 = vadd.f32 %v17248_v5, %v3473_v51  ;;  %v3474_v54 = vadd.f32 %v17804_v57, %v3087_v9  ;;  %v17812_v51 = vld [vmem:[#allocation39_spill] sm:$0xff]  ;;  %v17813_v57 = vld [vmem:[#allocation46_spill] sm:$0xff] }
 0x436   :  { %14787 = vmatpush3.bf16.msra.mxu1 %v15039_v49 }
 0x437   :  { %v3616_v40 = vmax.f32 %v3582_v36, 0.0  ;;  %v3583_v0 = vadd.f32 %v17248_v5, %v3474_v54  ;;  %14800 = vmatprep.subr.bf16.mxu1 %v17343_v20  ;;  %v2705_v54 = vadd.f32 %v17813_v57, %v2386_v14 }
 0x438   :  { %v3031_v21 = vpop.f32.mrb[188].mxu1  ;;  %v3719_v42 = vld [vmem:[#allocation4 + $0xa1] ss:$3 sm:$0xff]  ;;  %v3731_v33 = vld [vmem:[#allocation4 + $0xa2] ss:$3 sm:$0xff] }
 0x439   :  { %3650 = vst [vmem:[#allocation4 + $0xc0] sm:$0xff] %v3616_v40  ;;  %v3617_v44 = vmax.f32 %v3583_v0, 0.0  ;;  %v3088_v22 = vadd.f32 %v3031_v21, %v2701_v4  ;;  %v14646_v46 = vpop.f32.mrb[189].mxu1  ;;  %v3741_v60 = vmax.f32 %v3719_v42, %v3731_v33  ;;  %v17814_v42 = vld [vmem:[#allocation48_spill] sm:$0xff] }
 0x43a   :  { %v3034_v45 = vpop.f32.mrb[190].mxu1  ;;  %v3749_v2 = vld [vmem:[#allocation4 + $0xa3] ss:$3 sm:$0xff]  ;;  %v2706_v33 = vadd.f32 %v17814_v42, %v2387_v28 }
 0x43b   :  { %3651 = vst [vmem:[#allocation4 + $0xc8] sm:$0xff] %v3617_v44  ;;  %v3475_v38 = vadd.f32 %v17807_v17, %v3088_v22  ;;  %v3089_v35 = vadd.f32 %v3034_v45, %v2702_v19  ;;  %v14647_v39 = vpop.f32.mrb[191].mxu1  ;;  %v17352_v61 = vmax.f32 %v3741_v60, %v3749_v2  ;;  %v3777_v8 = vld [vmem:[#allocation5 + $0x30] sm:$0xff]  ;;  %v17815_v46 = vld [vmem:[#allocation41_spill] sm:$0xff]  ;;  %v2388_v45 = vld [vmem:[#allocation4 + $0x100] sm:$0xff] }
 0x43c   :  { %v17816_v39 = vld [vmem:[#allocation50_spill] sm:$0xff] }
 0x43d   :  { %v3584_v1 = vadd.f32 %v17248_v5, %v3475_v38  ;;  %v3476_v6 = vadd.f32 %v17808_v37, %v3089_v35  ;;  %3765 = vst [vmem:[#allocation5 + $0x3a] sm:$0xff] %v17352_v61  ;;  %v4173_v48 = vpack.c.bf16 %v17352_v61, %v17338_v11  ;;  %v2707_v15 = vadd.f32 %v17816_v39, %v2388_v45  ;;  %v15041_v45 = vld [vmem:[#allocation16 + $0x88] sm:$0xff]   ;;  %v15054_v11 = vld [vmem:[#allocation16 + $0xf0] sm:$0xff]   ;;  %v15055_v61 = vld [vmem:[#allocation16 + $0xf8] sm:$0xff]  }
 0x43e   :  { %v3964_v39 = vld [vmem:[#allocation5 + $0x31] sm:$0xff] }
 0x43f   :  { %v3618_v12 = vmax.f32 %v3584_v1, 0.0  ;;  %v3585_v18 = vadd.f32 %v17248_v5, %v3476_v6 }
 0x440   :  { %v3039_v7 = vpop.f32.mrb[192].mxu1 }
 0x441   :  { %3652 = vst [vmem:[#allocation4 + $0xd0] sm:$0xff] %v3618_v12  ;;  %v3619_v32 = vmax.f32 %v3585_v18, 0.0  ;;  %v3090_v13 = vadd.f32 %v3039_v7, %v2703_v53  ;;  %v14650_v3 = vpop.f32.mrb[193].mxu1  ;;  %v2776_v53 = vld [vmem:[#allocation4 + $0x108] sm:$0x3f] }
 0x442   :  { %v3042_v47 = vpop.f32.mrb[194].mxu1  ;;  %v3721_v30 = vld [vmem:[#allocation4 + $0xb9] ss:$3 sm:$0xff]  ;;  %v3733_v55 = vld [vmem:[#allocation4 + $0xba] ss:$3 sm:$0xff] }
 0x443   :  { %3653 = vst [vmem:[#allocation4 + $0xd8] sm:$0xff] %v3619_v32  ;;  %v3477_v62 = vadd.f32 %v17811_v26, %v3090_v13  ;;  %v3091_v49 = vadd.f32 %v3042_v47, %v2704_v23  ;;  %v14651_v63 = vpop.f32.mrb[195].mxu1  ;;  %v3742_v24 = vmax.f32 %v3721_v30, %v3733_v55  ;;  %v17817_v13 = vld [vmem:[#allocation43_spill] sm:$0xff]  ;;  %v17818_v30 = vld [vmem:[#allocation45_spill] sm:$0xff] }
 0x444   :  { %v3778_v16 = vld [vmem:[#allocation5 + $0x38] sm:$0xff] }
 0x445   :  { %v3586_v58 = vadd.f32 %v17248_v5, %v3477_v62  ;;  %v3478_v27 = vadd.f32 %v17812_v51, %v3091_v49  ;;  %v3786_v9 = vpack.c.bf16 %v3778_v16, %v3777_v8 }
 0x447   :  { %v3620_v10 = vmax.f32 %v3586_v58, 0.0  ;;  %v3587_v36 = vadd.f32 %v17248_v5, %v3478_v27  ;;  %14765 = vmatmul.mubr.bf16.gmra.mrb[208].mxu1 %v3786_v9 }
 0x448   :  { %v3047_v40 = vpop.f32.mrb[196].mxu1  ;;  %v3751_v0 = vld [vmem:[#allocation4 + $0xbb] ss:$3 sm:$0xff] }
 0x449   :  { %3654 = vst [vmem:[#allocation4 + $0xe0] sm:$0xff] %v3620_v10  ;;  %v3621_v41 = vmax.f32 %v3587_v36, 0.0  ;;  %v3092_v4 = vadd.f32 %v3047_v40, %v2705_v54  ;;  %v14654_v21 = vpop.f32.mrb[197].mxu1  ;;  %v17368_v44 = vmax.f32 %v3742_v24, %v3751_v0 }
 0x44a   :  { %v3050_v22 = vpop.f32.mrb[198].mxu1 }
 0x44b   :  { %3655 = vst [vmem:[#allocation4 + $0xe8] sm:$0xff] %v3621_v41  ;;  %v3479_v29 = vadd.f32 %v17815_v46, %v3092_v4  ;;  %v3093_v19 = vadd.f32 %v3050_v22, %v2706_v33  ;;  %v14655_v60 = vpop.f32.mrb[199].mxu1  ;;  %3766 = vst [vmem:[#allocation5 + $0x42] sm:$0xff] %v17368_v44  ;;  %v3959_v41 = vld [vmem:[#allocation5 + $0x9] sm:$0xff]  ;;  %v3958_v33 = vld [vmem:[#allocation5 + $0x1] sm:$0xff] }
 0x44c   :  { %v3970_v22 = vpack.c.bf16 %v3959_v41, %v3958_v33  ;;  %v3961_v46 = vld [vmem:[#allocation5 + $0x19] sm:$0xff]  ;;  %v3962_v60 = vld [vmem:[#allocation5 + $0x21] sm:$0xff]  ;;  %v15061_v33 = vld [vmem:[#allocation16 + $0x128] sm:$0xff]  }
 0x44d   :  { %v3588_v2 = vadd.f32 %v17248_v5, %v3479_v29  ;;  %v3480_v17 = vadd.f32 %v17239_v56, %v3093_v19  ;;  %v3963_v29 = vld [vmem:[#allocation5 + $0x29] sm:$0xff]  ;;  %v3960_v19 = vld [vmem:[#allocation5 + $0x11] sm:$0xff] }
 0x44f   :  { %v3622_v38 = vmax.f32 %v3588_v2, 0.0  ;;  %v3589_v35 = vadd.f32 %v17248_v5, %v3480_v17  ;;  %v3972_v2 = vpack.c.bf16 %v3963_v29, %v3962_v60  ;;  %v15042_v17 = vld [vmem:[#allocation16 + $0x90] sm:$0xff]  }
 0x450   :  { %v3055_v1 = vpop.f32.mrb[200].mxu1  ;;  %v3723_v37 = vld [vmem:[#allocation4 + $0xd1] ss:$3 sm:$0xff]  ;;  %v3735_v6 = vld [vmem:[#allocation4 + $0xd2] ss:$3 sm:$0xff] }
 0x451   :  { %3656 = vst [vmem:[#allocation4 + $0xf0] sm:$0xff] %v3622_v38  ;;  %v3623_v25 = vmax.f32 %v3589_v35, 0.0  ;;  %v3094_v12 = vadd.f32 %v3055_v1, %v2707_v15  ;;  %v14658_v18 = vpop.f32.mrb[201].mxu1  ;;  %v3743_v43 = vmax.f32 %v3723_v37, %v3735_v6  ;;  %v3965_v38 = vld [vmem:[#allocation5 + $0x39] sm:$0xff] }
 0x452   :  { %v3058_v7 = vpop.f32.mrb[202].mxu1  ;;  %v3753_v32 = vld [vmem:[#allocation4 + $0xd3] ss:$3 sm:$0xff]  ;;  %v3973_v15 = vpack.c.bf16 %v3965_v38, %v3964_v39 }
 0x453   :  { %3657 = vst [vmem:[#allocation4 + $0xf8] sm:$0xff] %v3623_v25  ;;  %v3481_v3 = vadd.f32 %v17817_v13, %v3094_v12  ;;  %v3095_v56 = vadd.f32 %v3058_v7, %v2776_v53  ;;  %v14659_v59 = vpop.f32.mrb[203].mxu1  ;;  %v17377_v23 = vmax.f32 %v3743_v43, %v3753_v32  ;;  %v3779_v49 = vld [vmem:[#allocation5 + $0x40] sm:$0xff]  ;;  %v15044_v25 = vld [vmem:[#allocation16 + $0xa0] sm:$0xff]   ;;  %v15045_v43 = vld [vmem:[#allocation16 + $0xa8] sm:$0xff]  }
 0x454   :  { %v3966_v1 = vld [vmem:[#allocation5 + $0x41] sm:$0xff]  ;;  %v15046_v53 = vld [vmem:[#allocation16 + $0xb0] sm:$0xff]  }
 0x455   :  { %v3590_v47 = vadd.f32 %v17248_v5, %v3481_v3  ;;  %3129 = vst [vmem:[#allocation4 + $0x108] sm:$0x3f] %v3095_v56  ;;  %3767 = vst [vmem:[#allocation5 + $0x4a] sm:$0xff] %v17377_v23  ;;  %v4174_v26 = vpack.c.bf16 %v17377_v23, %v17368_v44  ;;  %v15043_v37 = vld [vmem:[#allocation16 + $0x98] sm:$0xff]   ;;  %v15048_v32 = vld [vmem:[#allocation16 + $0xc0] sm:$0xff]  }
 0x456   :  { %v15047_v7 = vld [vmem:[#allocation16 + $0xb8] sm:$0xff]   ;;  %v4163_v3 = vld [vmem:[#allocation5 + $0x2a] sm:$0xff]  ;;  %v4160_v56 = vld [vmem:[#allocation5 + $0x12] sm:$0xff] }
 0x457   :  { %v3624_v62 = vmax.f32 %v3590_v47, 0.0  ;;  %v4161_v13 = vld [vmem:[#allocation5 + $0x1a] sm:$0xff]  ;;  %v15049_v47 = vld [vmem:[#allocation16 + $0xc8] sm:$0xff]   ;;  %v4562_v38 = vld [vmem:[#allocation5 + $0x24] sm:$0xff] }
 0x458   :  { %v4171_v59 = vpack.c.bf16 %v4161_v13, %v4160_v56  ;;  %v4361_v44 = vld [vmem:[#allocation5 + $0x1b] sm:$0xff]  ;;  %v4363_v23 = vld [vmem:[#allocation5 + $0x2b] sm:$0xff] }
 0x459   :  { %3658 = vst [vmem:[#allocation4 + $0x100] sm:$0xff] %v3624_v62  ;;  %v4172_v62 = vpack.c.bf16 %v4163_v3, %v17319_v34  ;;  %v4561_v60 = vld [vmem:[#allocation5 + $0x1c] sm:$0xff] }
 0x45a   :  { %v3725_v63 = vld [vmem:[#allocation4 + $0xe9] ss:$3 sm:$0xff]  ;;  %v3737_v16 = vld [vmem:[#allocation4 + $0xea] ss:$3 sm:$0xff] }
 0x45b   :  { %v3744_v51 = vmax.f32 %v3725_v63, %v3737_v16  ;;  %v4565_v39 = vld [vmem:[#allocation5 + $0x3c] sm:$0xff] }
 0x45c   :  { %v3163_v14 = vld [vmem:[#allocation4 + $0x108] sm:$0x3f]  ;;  %v3780_v8 = vld [vmem:[#allocation5 + $0x48] sm:$0xff] }
 0x45d   :  { %v3482_v55 = vadd.f32 %v17818_v30, %v3163_v14  ;;  %v3787_v58 = vpack.c.bf16 %v3780_v8, %v3779_v49  ;;  %v3967_v35 = vld [vmem:[#allocation5 + $0x49] sm:$0xff] }
 0x45e   :  { %v3974_v6 = vpack.c.bf16 %v3967_v35, %v3966_v1  ;;  %v4359_v49 = vld [vmem:[#allocation5 + $0xb] sm:$0xff]  ;;  %v4358_v14 = vld [vmem:[#allocation5 + $0x3] sm:$0xff]  ;;  %v4564_v1 = vld [vmem:[#allocation5 + $0x34] sm:$0xff] }
 0x45f   :  { %3516 = vst [vmem:[#allocation4 + $0x108] sm:$0x3f] %v3482_v55  ;;  %14768 = vmatprep.mubr.bf16.mxu1 %v3787_v58  ;;  %v15053_v8 = vld [vmem:[#allocation16 + $0xe8] sm:$0xff]   ;;  %v4370_v16 = vpack.c.bf16 %v4359_v49, %v4358_v14  ;;  %v4362_v55 = vld [vmem:[#allocation5 + $0x23] sm:$0xff] }
 0x460   :  { %v3755_v27 = vld [vmem:[#allocation4 + $0xeb] ss:$3 sm:$0xff] }
 0x461   :  { %v17384_v9 = vmax.f32 %v3744_v51, %v3755_v27  ;;  %v15057_v58 = vld [vmem:[#allocation16 + $0x108] sm:$0xff]   ;;  %v4372_v51 = vpack.c.bf16 %v4363_v23, %v4362_v55  ;;  %v15058_v27 = vld [vmem:[#allocation16 + $0x110] sm:$0xff]  }
 0x462   :  { %v15073_v13 = vld [vmem:[#allocation19 + $0x160] ss:$16 sps:$4 sm:$0xff]   ;;  %v15075_v3 = vld [vmem:[#allocation19 + $0x164] ss:$16 sps:$4 sm:$0xff]  }
 0x463   :  { %3768 = vst [vmem:[#allocation5 + $0x52] sm:$0xff] %v17384_v9  ;;  %v15076_v56 = vld [vmem:[#allocation19 + $0x180] ss:$16 sps:$4 sm:$0xff]   ;;  %v15093_v49 = vld [vmem:[#allocation19 + $0x244] ss:$16 sps:$4 sm:$0xff]  }
 0x464   :  { %v15100_v23 = vld [vmem:[#allocation19 + $0x280] ss:$16 sps:$4 sm:$0xff]   ;;  %v15084_v55 = vld [vmem:[#allocation19 + $0x1c4] ss:$16 sps:$4 sm:$0xff]  }
 0x466   :  { %v3550_v28 = vld [vmem:[#allocation4 + $0x108] sm:$0x3f] }
 0x467   :  { %v3591_v10 = vadd.f32 %v17248_v5, %v3550_v28  ;;  %v3971_v5 = vpack.c.bf16 %v3961_v46, %v3960_v19  ;;  %v15066_v46 = vld [vmem:[#allocation19 + $0x104] ss:$16 sps:$4 sm:$0xff]  }
 0x468   :  { %5066 = vmatprep.subr.bf16.mxu0 %v15066_v46  ;;  %v15062_v19 = vld [vmem:[#allocation16 + $0x130] sm:$0xff]  }
 0x469   :  { %v3625_v36 = vmax.f32 %v3591_v10, 0.0  ;;  %v4364_v10 = vld [vmem:[#allocation5 + $0x33] sm:$0xff] }
 0x46a   :  { %v3781_v4 = vld [vmem:[#allocation5 + $0x50] sm:$0xff] }
 0x46b   :  { %3659 = vst [vmem:[#allocation4 + $0x108] sm:$0x3f] %v3625_v36  ;;  %v4367_v28 = vld [vmem:[#allocation5 + $0x4b] sm:$0xff] }
 0x472   :  { %v3727_v57 = vld [vmem:[#allocation4 + $0x101] ss:$3 sm:$0xf]  ;;  %v3739_v54 = vld [vmem:[#allocation4 + $0x102] ss:$3 sm:$0xf] }
 0x473   :  { %v3745_v24 = vmax.f32 %v3727_v57, %v3739_v54  ;;  %v3757_v40 = vld [vmem:[#allocation4 + $0x103] ss:$3 sm:$0xf]  ;;  %v4366_v57 = vld [vmem:[#allocation5 + $0x43] sm:$0xff] }
 0x474   :  { %v15059_v54 = vld [vmem:[#allocation16 + $0x118] sm:$0xff]  }
 0x475   :  { %v3763_v0 = vmax.f32 %v3745_v24, %v3757_v40  ;;  %v4374_v24 = vpack.c.bf16 %v4367_v28, %v4366_v57  ;;  %v15060_v40 = vld [vmem:[#allocation16 + $0x120] sm:$0xff]  }
 0x476   :  { %v15111_v28 = vld [vmem:[#allocation19 + $0x2e4] ss:$16 sps:$4 sm:$0xff]   ;;  %v15114_v57 = vld [vmem:[#allocation19 + $0x10c] ss:$16 sps:$4 sm:$0xff]  }
 0x477   :  { %3769 = vst [vmem:[#allocation5 + $0x5a] sm:$0xf] %v3763_v0 }
 0x47e   :  { %v3782_v21 = vld [vmem:[#allocation5 + $0x58] sm:$0xf] }
 0x47f   :  { %v3788_v42 = vpack.c.bf16 %v3782_v21, %v3781_v4  ;;  %v3969_v12 = vld [vmem:[#allocation5 + $0x59] sm:$0xf]  ;;  %v4559_v4 = vld [vmem:[#allocation5 + $0xc] sm:$0xff]  ;;  %v4558_v21 = vld [vmem:[#allocation5 + $0x4] sm:$0xff] }
 0x480   :  { %v4169_v34 = vld [vmem:[#allocation5 + $0x5a] sm:$0xf]  ;;  %v4570_v29 = vpack.c.bf16 %v4559_v4, %v4558_v21 }
 0x481   :  { %14769 = vmatmul.mubr.bf16.gmra.mrb[212].mxu1 %v3788_v42  ;;  %v4175_v63 = vpack.c.bf16 %v4169_v34, %v17384_v9  ;;  %v4365_v9 = vld [vmem:[#allocation5 + $0x3b] sm:$0xff]  ;;  %v4368_v0 = vld [vmem:[#allocation5 + $0x53] sm:$0xff] }
 0x482   :  { %14788 = vmatprep.mubr.bf16.mxu1 %v3970_v22  ;;  %v4373_v36 = vpack.c.bf16 %v4365_v9, %v4364_v10  ;;  %v4369_v41 = vld [vmem:[#allocation5 + $0x5b] sm:$0xf] }
 0x483   :  { %v4375_v42 = vpack.c.bf16 %v4369_v41, %v4368_v0  ;;  %v15064_v22 = vld [vmem:[#allocation19 + $0x100] ss:$16 sps:$4 sm:$0xff]   ;;  %v15099_v9 = vld [vmem:[#allocation19 + $0x1e4] ss:$16 sps:$4 sm:$0xff]  }
 0x484   :  { %5067 = vmatpush1.bf16.msra.mxu0 %v15064_v22  ;;  %v15088_v34 = vld [vmem:[#allocation19 + $0x220] ss:$16 sps:$4 sm:$0xff]  }
 0x485   :  { %v15097_v10 = vld [vmem:[#allocation19 + $0x1e0] ss:$16 sps:$4 sm:$0xff]  }
 0x489   :  { %14789 = vmatmul.mubr.bf16.vlgmr.msra.gmra.mrb[204].mxu1 %v3971_v5  ;;  %v15063_v5 = vld [vmem:[#allocation16 + $0x138] sm:$0xff]  }
 0x48a   :  { %14801 = vmatpush3.bf16.msra.mxu1 %v17343_v20  ;;  %14792 = vmatprep.mubr.bf16.mxu1 %v3972_v2  ;;  %v3968_v20 = vld [vmem:[#allocation5 + $0x51] sm:$0xff] }
 0x48b   :  { %14802 = vmatprep.subr.bf16.mxu1 %v15041_v45  ;;  %v3975_v18 = vpack.c.bf16 %v3969_v12, %v3968_v20  ;;  %v4560_v2 = vld [vmem:[#allocation5 + $0x14] sm:$0xff]  ;;  %v15069_v20 = vld [vmem:[#allocation19 + $0x124] ss:$16 sps:$4 sm:$0xff]  }
 0x48c   :  { %v15067_v12 = vld [vmem:[#allocation19 + $0x120] ss:$16 sps:$4 sm:$0xff]   ;;  %5068 = vmatprep.subr.bf16.mxu0 %v15069_v20 }
 0x48d   :  { %5069 = vmatpush1.bf16.msra.mxu0 %v15067_v12 }
 0x48e   :  { %14803 = vmatpush3.bf16.msra.mxu1 %v15041_v45  ;;  %v4563_v45 = vld [vmem:[#allocation5 + $0x2c] sm:$0xff] }
 0x48f   :  { %14804 = vmatprep.subr.bf16.mxu1 %v15042_v17  ;;  %v4572_v35 = vpack.c.bf16 %v4563_v45, %v4562_v38 }
 0x491   :  { %14793 = vmatmul.mubr.bf16.gmra.mrb[208].mxu1 %v3973_v15  ;;  %v4567_v15 = vld [vmem:[#allocation5 + $0x4c] sm:$0xff] }
 0x492   :  { %14805 = vmatpush3.bf16.msra.mxu1 %v15042_v17  ;;  %14796 = vmatprep.mubr.bf16.mxu1 %v3974_v6  ;;  %v4571_v17 = vpack.c.bf16 %v4561_v60, %v4560_v2  ;;  %v4566_v6 = vld [vmem:[#allocation5 + $0x44] sm:$0xff] }
 0x493   :  { %14806 = vmatprep.subr.bf16.mxu1 %v15043_v37 }
 0x496   :  { %14807 = vmatpush3.bf16.msra.mxu1 %v15043_v37  ;;  %v4573_v37 = vpack.c.bf16 %v4565_v39, %v4564_v1 }
 0x497   :  { %14808 = vmatprep.subr.bf16.mxu1 %v15044_v25 }
 0x499   :  { %14797 = vmatmul.mubr.bf16.gmra.mrb[216].mxu1 %v3975_v18  ;;  %v15072_v18 = vld [vmem:[#allocation19 + $0x144] ss:$16 sps:$4 sm:$0xff]  }
 0x49a   :  { %14809 = vmatpush3.bf16.msra.mxu1 %v15044_v25  ;;  %14816 = vmatprep.mubr.bf16.mxu1 %v4170_v50  ;;  %v15052_v50 = vld [vmem:[#allocation16 + $0xe0] sm:$0xff]   ;;  %v4574_v25 = vpack.c.bf16 %v4567_v15, %v4566_v6 }
 0x49b   :  { %14810 = vmatprep.subr.bf16.mxu1 %v15045_v43  ;;  %5070 = vmatprep.subr.bf16.mxu0 %v15072_v18 }
 0x49e   :  { %14811 = vmatpush3.bf16.msra.mxu1 %v15045_v43  ;;  %v4568_v43 = vld [vmem:[#allocation5 + $0x54] sm:$0xff] }
 0x49f   :  { %14812 = vmatprep.subr.bf16.mxu1 %v15046_v53 }
 0x4a2   :  { %14813 = vmatpush3.bf16.msra.mxu1 %v15046_v53  ;;  %v4569_v53 = vld [vmem:[#allocation5 + $0x5c] sm:$0xf] }
 0x4a3   :  { %14814 = vmatprep.subr.bf16.mxu1 %v15047_v7 }
 0x4a6   :  { %14815 = vmatpush3.bf16.msra.mxu1 %v15047_v7  ;;  %v15070_v7 = vld [vmem:[#allocation19 + $0x140] ss:$16 sps:$4 sm:$0xff]  }
 0x4a7   :  { %14828 = vmatprep.subr.bf16.mxu1 %v15048_v32  ;;  %5071 = vmatpush1.bf16.msra.mxu0 %v15070_v7 }
 0x4a8   :  { %5072 = vmatprep.subr.bf16.mxu0 %v15075_v3 }
 0x4a9   :  { %14817 = vmatmul.mubr.bf16.vlgmr.msra.gmra.mrb[204].mxu1 %v4171_v59  ;;  %v15078_v59 = vld [vmem:[#allocation19 + $0x184] ss:$16 sps:$4 sm:$0xff]  }
 0x4aa   :  { %14820 = vmatprep.mubr.bf16.mxu1 %v4172_v62  ;;  %14829 = vmatpush3.bf16.msra.mxu1 %v15048_v32  ;;  %v4575_v32 = vpack.c.bf16 %v4569_v53, %v4568_v43  ;;  %v15081_v62 = vld [vmem:[#allocation19 + $0x1a4] ss:$16 sps:$4 sm:$0xff]   ;;  %v17402_v43 = vld [vmem:[#allocation17] ss:$0 sm:$0xff] }
 0x4ab   :  { %14830 = vmatprep.subr.bf16.mxu1 %v15049_v47  ;;  %5073 = vmatpush1.bf16.msra.mxu0 %v15073_v13 }
 0x4ac   :  { %5074 = vmatprep.subr.bf16.mxu0 %v15078_v59 }
 0x4ae   :  { %14831 = vmatpush3.bf16.msra.mxu1 %v15049_v47  ;;  %v15079_v47 = vld [vmem:[#allocation19 + $0x1a0] ss:$16 sps:$4 sm:$0xff]  }
 0x4af   :  { %14832 = vmatprep.subr.bf16.mxu1 %v15050_v31  ;;  %5075 = vmatpush1.bf16.msra.mxu0 %v15076_v56 }
 0x4b0   :  { %5076 = vmatprep.subr.bf16.mxu0 %v15081_v62 }
 0x4b1   :  { %14821 = vmatmul.mubr.bf16.gmra.mrb[208].mxu1 %v4173_v48  ;;  %v15056_v48 = vld [vmem:[#allocation16 + $0x100] sm:$0xff]  }
 0x4b2   :  { %14824 = vmatprep.mubr.bf16.mxu1 %v4174_v26  ;;  %14833 = vmatpush3.bf16.msra.mxu1 %v15050_v31  ;;  %v4360_v26 = vld [vmem:[#allocation5 + $0x13] sm:$0xff]  ;;  %v15087_v31 = vld [vmem:[#allocation19 + $0x204] ss:$16 sps:$4 sm:$0xff]  }
 0x4b3   :  { %14834 = vmatprep.subr.bf16.mxu1 %v15051_v52  ;;  %v4371_v30 = vpack.c.bf16 %v4361_v44, %v4360_v26  ;;  %5077 = vmatpush1.bf16.msra.mxu0 %v15079_v47  ;;  %v15102_v44 = vld [vmem:[#allocation19 + $0x284] ss:$16 sps:$4 sm:$0xff]  }
 0x4b4   :  { %v15105_v26 = vld [vmem:[#allocation19 + $0x2a4] ss:$16 sps:$4 sm:$0xff]   ;;  %5078 = vmatprep.subr.bf16.mxu0 %v15084_v55 }
 0x4b6   :  { %14835 = vmatpush3.bf16.msra.mxu1 %v15051_v52  ;;  %v15085_v52 = vld [vmem:[#allocation19 + $0x200] ss:$16 sps:$4 sm:$0xff]  }
 0x4b7   :  { %14836 = vmatprep.subr.bf16.mxu1 %v15052_v50 }
 0x4b9   :  { %14825 = vmatmul.mubr.bf16.gmra.mrb[220].mxu1 %v4175_v63  ;;  %v15091_v63 = vld [vmem:[#allocation19 + $0x240] ss:$16 sps:$4 sm:$0xff]  }
 0x4ba   :  { %14837 = vmatpush3.bf16.msra.mxu1 %v15052_v50  ;;  %14844 = vmatprep.mubr.bf16.mxu1 %v4370_v16  ;;  %v15090_v50 = vld [vmem:[#allocation19 + $0x224] ss:$16 sps:$4 sm:$0xff]  }
 0x4bb   :  { %14838 = vmatprep.subr.bf16.mxu1 %v15053_v8 }
 0x4be   :  { %14839 = vmatpush3.bf16.msra.mxu1 %v15053_v8  ;;  %v15096_v8 = vld [vmem:[#allocation19 + $0x264] ss:$16 sps:$4 sm:$0xff]  }
 0x4bf   :  { %14840 = vmatprep.subr.bf16.mxu1 %v15054_v11 }
 0x4c2   :  { %14841 = vmatpush3.bf16.msra.mxu1 %v15054_v11  ;;  %v15094_v11 = vld [vmem:[#allocation19 + $0x260] ss:$16 sps:$4 sm:$0xff]  }
 0x4c3   :  { %14842 = vmatprep.subr.bf16.mxu1 %v15055_v61 }
 0x4c6   :  { %14843 = vmatpush3.bf16.msra.mxu1 %v15055_v61 }
 0x4c7   :  { %14856 = vmatprep.subr.bf16.mxu1 %v15056_v48 }
 0x4c9   :  { %14845 = vmatmul.mubr.bf16.vlgmr.msra.gmra.mrb[204].mxu1 %v4371_v30  ;;  %v15103_v30 = vld [vmem:[#allocation19 + $0x2a0] ss:$16 sps:$4 sm:$0xff]  }
 0x4ca   :  { %14848 = vmatprep.mubr.bf16.mxu1 %v4372_v51  ;;  %14857 = vmatpush3.bf16.msra.mxu1 %v15056_v48  ;;  %v15082_v51 = vld [vmem:[#allocation19 + $0x1c0] ss:$16 sps:$4 sm:$0xff]  }
 0x4cb   :  { %14858 = vmatprep.subr.bf16.mxu1 %v15057_v58  ;;  %5079 = vmatpush1.bf16.msra.mxu0 %v15082_v51 }
 0x4cc   :  { %5080 = vmatprep.subr.bf16.mxu0 %v15099_v9 }
 0x4ce   :  { %14859 = vmatpush3.bf16.msra.mxu1 %v15057_v58  ;;  %v15108_v58 = vld [vmem:[#allocation19 + $0x2c4] ss:$16 sps:$4 sm:$0xff]  }
 0x4cf   :  { %14860 = vmatprep.subr.bf16.mxu1 %v15058_v27  ;;  %5081 = vmatpush1.bf16.msra.mxu0 %v15097_v10 }
 0x4d0   :  { %5107 = vmatprep.subr.bf16.mxu0 %v15114_v57 }
 0x4d1   :  { %14849 = vmatmul.mubr.bf16.gmra.mrb[208].mxu1 %v4373_v36  ;;  %v15109_v36 = vld [vmem:[#allocation19 + $0x2e0] ss:$16 sps:$4 sm:$0xff]  }
 0x4d2   :  { %14852 = vmatprep.mubr.bf16.mxu1 %v4374_v24  ;;  %14861 = vmatpush3.bf16.msra.mxu1 %v15058_v27  ;;  %v15106_v27 = vld [vmem:[#allocation19 + $0x2c0] ss:$16 sps:$4 sm:$0xff]   ;;  %v16010_v24 = vmov 0  }
 0x4d3   :  { %14862 = vmatprep.subr.bf16.mxu1 %v15059_v54  ;;  %5098 = vmatprep.mubr.bf16.mxu0 %v16010_v24 }
 0x4d6   :  { %14863 = vmatpush3.bf16.msra.mxu1 %v15059_v54  ;;  %v15117_v54 = vld [vmem:[#allocation19 + $0x304] ss:$16 sps:$4 sm:$0xff]  }
 0x4d7   :  { %14864 = vmatprep.subr.bf16.mxu1 %v15060_v40 }
 0x4d9   :  { %14853 = vmatmul.mubr.bf16.gmra.mrb[224].mxu1 %v4375_v42 }
 0x4da   :  { %14865 = vmatpush3.bf16.msra.mxu1 %v15060_v40  ;;  %14872 = vmatprep.mubr.bf16.mxu1 %v4570_v29 }
 0x4db   :  { %14866 = vmatprep.subr.bf16.mxu1 %v15061_v33 }
 0x4de   :  { %14867 = vmatpush3.bf16.msra.mxu1 %v15061_v33 }
 0x4df   :  { %14868 = vmatprep.subr.bf16.mxu1 %v15062_v19 }
 0x4e2   :  { %14869 = vmatpush3.bf16.msra.mxu1 %v15062_v19 }
 0x4e3   :  { %14870 = vmatprep.subr.bf16.mxu1 %v15063_v5 }
 0x4e6   :  { %14871 = vmatpush3.bf16.msra.mxu1 %v15063_v5 }
 0x4e7   :  { %5586 = vmatprep.subr.bf16.mxu1 %v15087_v31 }
 0x4e9   :  { %14873 = vmatmul.mubr.bf16.vlgmr.msra.gmra.mrb[204].mxu1 %v4571_v17 }
 0x4ea   :  { %14876 = vmatprep.mubr.bf16.mxu1 %v4572_v35  ;;  %5587 = vmatpush1.bf16.msra.mxu1 %v15085_v52 }
 0x4eb   :  { %5588 = vmatprep.subr.bf16.mxu1 %v15090_v50 }
 0x4ee   :  { %5589 = vmatpush1.bf16.msra.mxu1 %v15088_v34 }
 0x4ef   :  { %5590 = vmatprep.subr.bf16.mxu1 %v15093_v49 }
 0x4f1   :  { %14877 = vmatmul.mubr.bf16.gmra.mrb[208].mxu1 %v4573_v37 }
 0x4f2   :  { %14880 = vmatprep.mubr.bf16.mxu1 %v4574_v25  ;;  %5591 = vmatpush1.bf16.msra.mxu1 %v15091_v63 }
 0x4f3   :  { %5592 = vmatprep.subr.bf16.mxu1 %v15096_v8 }
 0x4f6   :  { %5593 = vmatpush1.bf16.msra.mxu1 %v15094_v11 }
 0x4f7   :  { %5594 = vmatprep.subr.bf16.mxu1 %v15102_v44 }
 0x4f9   :  { %14881 = vmatmul.mubr.bf16.gmra.mrb[228].mxu1 %v4575_v32 }
 0x4fa   :  { %5595 = vmatpush1.bf16.msra.mxu1 %v15100_v23  ;;  %5618 = vmatprep.mubr.bf16.mxu1 %v16010_v24 }
 0x4fb   :  { %5596 = vmatprep.subr.bf16.mxu1 %v15105_v26 }
 0x4fe   :  { %5597 = vmatpush1.bf16.msra.mxu1 %v15103_v30 }
 0x4ff   :  { %5598 = vmatprep.subr.bf16.mxu1 %v15108_v58 }
 0x502   :  { %5599 = vmatpush1.bf16.msra.mxu1 %v15106_v27 }
 0x503   :  { %5600 = vmatprep.subr.bf16.mxu1 %v15111_v28 }
 0x506   :  { %5601 = vmatpush1.bf16.msra.mxu1 %v15109_v36 }
 0x507   :  { %5868 = vmatprep.subr.bf16.mxu1 %v15117_v54 }
 0x554   :  { %v14770_v14 = vpop.f32.mrb[212].mxu1 }
 0x555   :  { %v3919_v16 = vpop.f32.mrb[213].mxu1 }
 0x556   :  { %v14771_v61 = vpop.f32.mrb[214].mxu1 }
 0x557   :  { %3945 = vst [vmem:[#allocation6 + $0x58] sm:$0xf] %v14771_v61  ;;  %v3922_v48 = vpop.f32.mrb[215].mxu1 }
 0x55e   :  { %v3957_v21 = vld [vmem:[#allocation6 + $0x58] sm:$0xf] }
 0x56c   :  { %v14798_v40 = vpop.f32.mrb[216].mxu1 }
 0x56d   :  { %v4132_v0 = vadd.f32 %v14798_v40, %v14770_v14  ;;  %v4107_v41 = vpop.f32.mrb[217].mxu1 }
 0x56e   :  { %v4130_v4 = vadd.f32 %v4107_v41, %v3919_v16  ;;  %v14799_v42 = vpop.f32.mrb[218].mxu1 }
 0x56f   :  { %v4133_v33 = vadd.f32 %v14799_v42, %v3957_v21  ;;  %v4110_v22 = vpop.f32.mrb[219].mxu1 }
 0x570   :  { %v4131_v46 = vadd.f32 %v4110_v22, %v3922_v48 }
 0x571   :  { %4145 = vst [vmem:[#allocation6 + $0x58] sm:$0xf] %v4133_v33 }
 0x578   :  { %v4157_v45 = vld [vmem:[#allocation6 + $0x58] sm:$0xf] }
 0x58c   :  { %v14826_v29 = vpop.f32.mrb[220].mxu1 }
 0x58d   :  { %v4332_v19 = vadd.f32 %v14826_v29, %v4132_v0  ;;  %v4307_v5 = vpop.f32.mrb[221].mxu1 }
 0x58e   :  { %v4330_v60 = vadd.f32 %v4307_v5, %v4130_v4  ;;  %v14827_v2 = vpop.f32.mrb[222].mxu1 }
 0x58f   :  { %v4333_v17 = vadd.f32 %v14827_v2, %v4157_v45  ;;  %v4310_v38 = vpop.f32.mrb[223].mxu1 }
 0x590   :  { %v4331_v35 = vadd.f32 %v4310_v38, %v4131_v46 }
 0x591   :  { %4345 = vst [vmem:[#allocation6 + $0x58] sm:$0xf] %v4333_v17 }
 0x598   :  { %v4357_v6 = vld [vmem:[#allocation6 + $0x58] sm:$0xf] }
 0x5ac   :  { %v14854_v39 = vpop.f32.mrb[224].mxu1 }
 0x5ad   :  { %v4532_v15 = vadd.f32 %v14854_v39, %v4332_v19  ;;  %v4507_v1 = vpop.f32.mrb[225].mxu1 }
 0x5ae   :  { %v4530_v37 = vadd.f32 %v4507_v1, %v4330_v60  ;;  %v14855_v25 = vpop.f32.mrb[226].mxu1 }
 0x5af   :  { %v4533_v12 = vadd.f32 %v14855_v25, %v4357_v6  ;;  %v4510_v20 = vpop.f32.mrb[227].mxu1 }
 0x5b0   :  { %v4531_v18 = vadd.f32 %v4510_v20, %v4331_v35 }
 0x5b1   :  { %4545 = vst [vmem:[#allocation6 + $0x58] sm:$0xf] %v4533_v12  ;;  %v15112_v12 = vld [vmem:[#allocation19 + $0x108] ss:$16 sps:$4 sm:$0xff]  }
 0x5b8   :  { %v4557_v57 = vld [vmem:[#allocation6 + $0x58] sm:$0xf] }
 0x5bc   :  { %v14874_v53 = vpop.f32.mrb[204].mxu1 }
 0x5bd   :  { %v4767_v7 = vadd.f32 %v14874_v53, %v17402_v43  ;;  %v4675_v32 = vpop.f32.mrb[205].mxu1  ;;  %v15115_v53 = vld [vmem:[#allocation19 + $0x300] ss:$16 sps:$4 sm:$0xff]  }
 0x5be   :  { %v4765_v13 = vadd.f32 %v17402_v43, %v4675_v32  ;;  %v14875_v3 = vpop.f32.mrb[206].mxu1 }
 0x5bf   :  { %v4779_v56 = vmax.f32 %v4767_v7, 0.0  ;;  %v4768_v59 = vadd.f32 %v14875_v3, %v17402_v43  ;;  %v4678_v47 = vpop.f32.mrb[207].mxu1 }
 0x5c0   :  { %v4777_v62 = vmax.f32 %v4765_v13, 0.0  ;;  %v4766_v31 = vadd.f32 %v17402_v43, %v4678_v47  ;;  %v15118_v47 = vld [vmem:[#allocation19 + $0x128] ss:$16 sps:$4 sm:$0xff]  }
 0x5c1   :  { %4791 = vst [vmem:[#allocation6 + $0x10] sm:$0xff] %v4779_v56  ;;  %v4780_v52 = vmax.f32 %v4768_v59, 0.0  ;;  %v15120_v56 = vld [vmem:[#allocation19 + $0x12c] ss:$16 sps:$4 sm:$0xff]   ;;  %v15123_v59 = vld [vmem:[#allocation19 + $0x324] ss:$16 sps:$4 sm:$0xff]  }
 0x5c2   :  { %4789 = vst [vmem:[#allocation6] sm:$0xff] %v4777_v62  ;;  %v4778_v50 = vmax.f32 %v4766_v31, 0.0  ;;  %v15121_v62 = vld [vmem:[#allocation19 + $0x320] ss:$16 sps:$4 sm:$0xff]   ;;  %v15126_v31 = vld [vmem:[#allocation19 + $0x14c] ss:$16 sps:$4 sm:$0xff]  }
 0x5c3   :  { %4792 = vst [vmem:[#allocation6 + $0x18] sm:$0xff] %v4780_v52  ;;  %v15129_v52 = vld [vmem:[#allocation19 + $0x344] ss:$16 sps:$4 sm:$0xff]  }
 0x5c4   :  { %4790 = vst [vmem:[#allocation6 + $0x8] sm:$0xff] %v4778_v50  ;;  %v14878_v34 = vpop.f32.mrb[208].mxu1  ;;  %v15124_v50 = vld [vmem:[#allocation19 + $0x148] ss:$16 sps:$4 sm:$0xff]  }
 0x5c5   :  { %v4771_v49 = vadd.f32 %v14878_v34, %v17402_v43  ;;  %v4691_v63 = vpop.f32.mrb[209].mxu1  ;;  %v15127_v34 = vld [vmem:[#allocation19 + $0x340] ss:$16 sps:$4 sm:$0xff]  }
 0x5c6   :  { %v4769_v14 = vadd.f32 %v17402_v43, %v4691_v63  ;;  %v14879_v8 = vpop.f32.mrb[210].mxu1  ;;  %v15135_v63 = vld [vmem:[#allocation19 + $0x364] ss:$16 sps:$4 sm:$0xff]  }
 0x5c7   :  { %v4783_v16 = vmax.f32 %v4771_v49, 0.0  ;;  %v4772_v11 = vadd.f32 %v14879_v8, %v17402_v43  ;;  %v4694_v61 = vpop.f32.mrb[211].mxu1  ;;  %v15132_v49 = vld [vmem:[#allocation19 + $0x16c] ss:$16 sps:$4 sm:$0xff]   ;;  %v15133_v8 = vld [vmem:[#allocation19 + $0x360] ss:$16 sps:$4 sm:$0xff]  }
 0x5c8   :  { %v4781_v48 = vmax.f32 %v4769_v14, 0.0  ;;  %v4770_v44 = vadd.f32 %v17402_v43, %v4694_v61  ;;  %v15130_v14 = vld [vmem:[#allocation19 + $0x168] ss:$16 sps:$4 sm:$0xff]  }
 0x5c9   :  { %4795 = vst [vmem:[#allocation6 + $0x30] sm:$0xff] %v4783_v16  ;;  %v4784_v23 = vmax.f32 %v4772_v11, 0.0  ;;  %v15138_v16 = vld [vmem:[#allocation19 + $0x18c] ss:$16 sps:$4 sm:$0xff]   ;;  %v15141_v11 = vld [vmem:[#allocation19 + $0x384] ss:$16 sps:$4 sm:$0xff]  }
 0x5ca   :  { %4793 = vst [vmem:[#allocation6 + $0x20] sm:$0xff] %v4781_v48  ;;  %v4782_v26 = vmax.f32 %v4770_v44, 0.0  ;;  %v15136_v61 = vld [vmem:[#allocation19 + $0x188] ss:$16 sps:$4 sm:$0xff]   ;;  %v15139_v48 = vld [vmem:[#allocation19 + $0x380] ss:$16 sps:$4 sm:$0xff]  }
 0x5cb   :  { %v4801_v30 = vld [vmem:[#allocation6] ss:$3 sm:$0xff]  ;;  %v4805_v55 = vld [vmem:[#allocation6 + $0x1] ss:$3 sm:$0xff]  ;;  %4796 = vst [vmem:[#allocation6 + $0x38] sm:$0xff] %v4784_v23 }
 0x5cc   :  { %v4808_v58 = vmax.f32 %v4801_v30, %v4805_v55  ;;  %4794 = vst [vmem:[#allocation6 + $0x28] sm:$0xff] %v4782_v26  ;;  %v14882_v51 = vpop.f32.mrb[228].mxu1  ;;  %v4811_v27 = vld [vmem:[#allocation6 + $0x2] ss:$3 sm:$0xff] }
 0x5cd   :  { %v4732_v9 = vadd.f32 %v14882_v51, %v4532_v15  ;;  %v4707_v28 = vpop.f32.mrb[229].mxu1  ;;  %v15144_v44 = vld [vmem:[#allocation19 + $0x1ac] ss:$16 sps:$4 sm:$0xff]   ;;  %v15147_v23 = vld [vmem:[#allocation19 + $0x3a4] ss:$16 sps:$4 sm:$0xff]  }
 0x5ce   :  { %v4814_v10 = vmax.f32 %v4808_v58, %v4811_v27  ;;  %v4730_v36 = vadd.f32 %v4707_v28, %v4530_v37  ;;  %v14883_v54 = vpop.f32.mrb[230].mxu1  ;;  %v15142_v26 = vld [vmem:[#allocation19 + $0x1a8] ss:$16 sps:$4 sm:$0xff]   ;;  %v15145_v30 = vld [vmem:[#allocation19 + $0x3a0] ss:$16 sps:$4 sm:$0xff]  }
 0x5cf   :  { %v4775_v40 = vadd.f32 %v17402_v43, %v4732_v9  ;;  %v4733_v0 = vadd.f32 %v14883_v54, %v4557_v57  ;;  %v4710_v41 = vpop.f32.mrb[231].mxu1  ;;  %v15150_v55 = vld [vmem:[#allocation19 + $0x1cc] ss:$16 sps:$4 sm:$0xff]   ;;  %v15153_v58 = vld [vmem:[#allocation19 + $0x3c4] ss:$16 sps:$4 sm:$0xff]  }
 0x5d0   :  { %4816 = vst [vmem:[#allocation7] sm:$0xff] %v4814_v10  ;;  %v4773_v4 = vadd.f32 %v17402_v43, %v4730_v36  ;;  %v4731_v21 = vadd.f32 %v4710_v41, %v4531_v18  ;;  %v15148_v51 = vld [vmem:[#allocation19 + $0x1c8] ss:$16 sps:$4 sm:$0xff]   ;;  %v15151_v27 = vld [vmem:[#allocation19 + $0x3c0] ss:$16 sps:$4 sm:$0xff]  }
 0x5d1   :  { %v4787_v42 = vmax.f32 %v4775_v40, 0.0  ;;  %4745 = vst [vmem:[#allocation6 + $0x58] sm:$0xf] %v4733_v0  ;;  %v4803_v46 = vld [vmem:[#allocation6 + $0x18] ss:$3 sm:$0x3f] }
 0x5d2   :  { %v4785_v33 = vmax.f32 %v4773_v4, 0.0  ;;  %v4774_v22 = vadd.f32 %v17402_v43, %v4731_v21  ;;  %v15156_v9 = vld [vmem:[#allocation19 + $0x1ec] ss:$16 sps:$4 sm:$0xff]   ;;  %v15159_v28 = vld [vmem:[#allocation19 + $0x3e4] ss:$16 sps:$4 sm:$0xff]  }
 0x5d3   :  { %v4807_v29 = vld [vmem:[#allocation6 + $0x19] ss:$3 sm:$0x3f]  ;;  %4799 = vst [vmem:[#allocation6 + $0x50] sm:$0xff] %v4787_v42 }
 0x5d4   :  { %v4809_v19 = vmax.f32 %v4803_v46, %v4807_v29  ;;  %4797 = vst [vmem:[#allocation6 + $0x40] sm:$0xff] %v4785_v33  ;;  %v4786_v5 = vmax.f32 %v4774_v22, 0.0  ;;  %v4813_v60 = vld [vmem:[#allocation6 + $0x1a] ss:$3 sm:$0x3f] }
 0x5d5   :  { %v15154_v10 = vld [vmem:[#allocation19 + $0x1e8] ss:$16 sps:$4 sm:$0xff]   ;;  %v15157_v36 = vld [vmem:[#allocation19 + $0x3e0] ss:$16 sps:$4 sm:$0xff]   ;;  %v15162_v57 = vld [vmem:[#allocation19 + $0x4] ss:$16 sps:$4 sm:$0xff]  }
 0x5d6   :  { %v4815_v45 = vmax.f32 %v4809_v19, %v4813_v60  ;;  %4798 = vst [vmem:[#allocation6 + $0x48] sm:$0xff] %v4786_v5  ;;  %v15165_v54 = vld [vmem:[#allocation19 + $0x404] ss:$16 sps:$4 sm:$0xff]   ;;  %v15160_v0 = vld [vmem:[#allocation19] ss:$16 sps:$4 sm:$0xff]  }
 0x5d7   :  { %v15163_v41 = vld [vmem:[#allocation19 + $0x400] ss:$16 sps:$4 sm:$0xff]   ;;  %v15168_v21 = vld [vmem:[#allocation19 + $0x24] ss:$16 sps:$4 sm:$0xff]  }
 0x5d8   :  { %4817 = vst [vmem:[#allocation7 + $0x8] sm:$0x3f] %v4815_v45  ;;  %v4757_v2 = vld [vmem:[#allocation6 + $0x58] sm:$0xf]  ;;  %v15171_v42 = vld [vmem:[#allocation19 + $0x424] ss:$16 sps:$4 sm:$0xff]  }
 0x5d9   :  { %v4776_v17 = vadd.f32 %v17402_v43, %v4757_v2  ;;  %v15166_v33 = vld [vmem:[#allocation19 + $0x20] ss:$16 sps:$4 sm:$0xff]   ;;  %v15174_v46 = vld [vmem:[#allocation19 + $0x44] ss:$16 sps:$4 sm:$0xff]  }
 0x5da   :  { %v15169_v22 = vld [vmem:[#allocation19 + $0x420] ss:$16 sps:$4 sm:$0xff]   ;;  %v15177_v29 = vld [vmem:[#allocation19 + $0x444] ss:$16 sps:$4 sm:$0xff]  }
 0x5db   :  { %v4819_v38 = vld [vmem:[#allocation6 + $0x30] ss:$3 sm:$0xff]  ;;  %v4823_v35 = vld [vmem:[#allocation6 + $0x31] ss:$3 sm:$0xff]  ;;  %v4788_v15 = vmax.f32 %v4776_v17, 0.0 }
 0x5dc   :  { %v4826_v39 = vmax.f32 %v4819_v38, %v4823_v35  ;;  %v4829_v1 = vld [vmem:[#allocation6 + $0x32] ss:$3 sm:$0xff] }
 0x5dd   :  { %4800 = vst [vmem:[#allocation6 + $0x58] sm:$0xf] %v4788_v15  ;;  %v4821_v6 = vld [vmem:[#allocation6 + $0x48] ss:$3 sm:$0x3f] }
 0x5de   :  { %v4832_v37 = vmax.f32 %v4826_v39, %v4829_v1  ;;  %v15172_v19 = vld [vmem:[#allocation19 + $0x40] ss:$16 sps:$4 sm:$0xff]   ;;  %v15180_v60 = vld [vmem:[#allocation19 + $0x64] ss:$16 sps:$4 sm:$0xff]  }
 0x5df   :  { %v15175_v5 = vld [vmem:[#allocation19 + $0x440] ss:$16 sps:$4 sm:$0xff]   ;;  %v15183_v45 = vld [vmem:[#allocation19 + $0x464] ss:$16 sps:$4 sm:$0xff]  }
 0x5e0   :  { %4834 = vst [vmem:[#allocation7 + $0xe] sm:$0xff] %v4832_v37  ;;  %v15178_v2 = vld [vmem:[#allocation19 + $0x60] ss:$16 sps:$4 sm:$0xff]   ;;  %v15186_v38 = vld [vmem:[#allocation19 + $0x84] ss:$16 sps:$4 sm:$0xff]  }
 0x5e1   :  { %v15181_v17 = vld [vmem:[#allocation19 + $0x460] ss:$16 sps:$4 sm:$0xff]   ;;  %v15189_v35 = vld [vmem:[#allocation19 + $0x484] ss:$16 sps:$4 sm:$0xff]  }
 0x5e2   :  { %v15184_v39 = vld [vmem:[#allocation19 + $0x80] ss:$16 sps:$4 sm:$0xff]   ;;  %v15192_v1 = vld [vmem:[#allocation19 + $0xa4] ss:$16 sps:$4 sm:$0xff]  }
 0x5e3   :  { %v15187_v15 = vld [vmem:[#allocation19 + $0x480] ss:$16 sps:$4 sm:$0xff]   ;;  %v15195_v37 = vld [vmem:[#allocation19 + $0x4a4] ss:$16 sps:$4 sm:$0xff]  }
 0x5e4   :  { %v4825_v25 = vld [vmem:[#allocation6 + $0x49] ss:$3 sm:$0x3f]  ;;  %v4831_v18 = vld [vmem:[#allocation6 + $0x4a] ss:$3 sm:$0x3f] }
 0x5e5   :  { %v4827_v20 = vmax.f32 %v4821_v6, %v4825_v25  ;;  %v15190_v6 = vld [vmem:[#allocation19 + $0xa0] ss:$16 sps:$4 sm:$0xff]  }
 0x5e6   :  { %v15193_v25 = vld [vmem:[#allocation19 + $0x4a0] ss:$16 sps:$4 sm:$0xff]  }
 0x5e7   :  { %v4871_v7 = vld [vmem:[#allocation7 + $0x1] ss:$14 sm:$0x3]  ;;  %v5391_v32 = vld [vmem:[#allocation7 + $0x2] ss:$14 sm:$0x3]  ;;  %v4833_v13 = vmax.f32 %v4827_v20, %v4831_v18 }
 0x5e8   :  { %v17416_v3 = vpack.c.bf16 %v4871_v7, %v4871_v7  ;;  %v17418_v43 = vpack.c.bf16 %v5391_v32, %v5391_v32  ;;  %v5673_v40 = vld [vmem:[#allocation7 + $0x3] ss:$14 sm:$0x3]  ;;  %v15196_v18 = vld [vmem:[#allocation19 + $0xc0] ss:$16 sps:$4 sm:$0xff]  }
 0x5e9   :  { %4835 = vst [vmem:[#allocation7 + $0x16] sm:$0x3f] %v4833_v13  ;;  %v17424_v4 = vpack.c.bf16 %v5673_v40, %v5673_v40  ;;  %v15201_v20 = vld [vmem:[#allocation19 + $0x4c4] ss:$16 sps:$4 sm:$0xff]   ;;  %v15202_v13 = vld [vmem:[#allocation19 + $0xe0] ss:$16 sps:$4 sm:$0xff]  }
 0x5ea   :  { %5099 = vmatmul.mubr.bf16.vlgmr.msra.gmra.mrb[236].mxu0 %v17416_v3  ;;  %5619 = vmatmul.mubr.bf16.vlgmr.msra.gmra.mrb[232].mxu1 %v17418_v43  ;;  %v15204_v7 = vld [vmem:[#allocation19 + $0xe4] ss:$16 sps:$4 sm:$0xff]   ;;  %v15244_v40 = vld [vmem:[#allocation19 + $0xc8] ss:$16 sps:$4 sm:$0xff]  }
 0x5eb   :  { %5108 = vmatpush1.bf16.msra.mxu0 %v15112_v12  ;;  %5869 = vmatpush1.bf16.msra.mxu1 %v15115_v53  ;;  %v15198_v12 = vld [vmem:[#allocation19 + $0xc4] ss:$16 sps:$4 sm:$0xff]   ;;  %v15199_v53 = vld [vmem:[#allocation19 + $0x4c0] ss:$16 sps:$4 sm:$0xff]  }
 0x5ec   :  { %5109 = vmatprep.subr.bf16.mxu0 %v15120_v56  ;;  %5870 = vmatprep.subr.bf16.mxu1 %v15123_v59  ;;  %v15207_v32 = vld [vmem:[#allocation19 + $0x4e4] ss:$16 sps:$4 sm:$0xff]   ;;  %v15210_v56 = vld [vmem:[#allocation19 + $0xc] ss:$16 sps:$4 sm:$0xff]  }
 0x5ed   :  { %5139 = vmatprep.mubr.bf16.mxu0 %v16010_v24  ;;  %5900 = vmatprep.mubr.bf16.mxu1 %v16010_v24  ;;  %v15213_v59 = vld [vmem:[#allocation19 + $0x504] ss:$16 sps:$4 sm:$0xff]  }
 0x5ef   :  { %5110 = vmatpush1.bf16.msra.mxu0 %v15118_v47  ;;  %5871 = vmatpush1.bf16.msra.mxu1 %v15121_v62  ;;  %v4836_v47 = vld [vmem:[#allocation7] ss:$14 sm:$0x3]  ;;  %v5955_v62 = vld [vmem:[#allocation7 + $0x4] ss:$14 sm:$0x3] }
 0x5f0   :  { %5111 = vmatprep.subr.bf16.mxu0 %v15126_v31  ;;  %5872 = vmatprep.subr.bf16.mxu1 %v15129_v52  ;;  %v15208_v31 = vld [vmem:[#allocation19 + $0x8] ss:$16 sps:$4 sm:$0xff]   ;;  %v15211_v52 = vld [vmem:[#allocation19 + $0x500] ss:$16 sps:$4 sm:$0xff]  }
 0x5f3   :  { %5112 = vmatpush1.bf16.msra.mxu0 %v15124_v50  ;;  %5873 = vmatpush1.bf16.msra.mxu1 %v15127_v34  ;;  %v17430_v50 = vpack.c.bf16 %v4836_v47, %v4836_v47  ;;  %v17432_v34 = vpack.c.bf16 %v5955_v62, %v5955_v62  ;;  %v15297_v47 = vld [vmem:[#allocation19 + $0x6c4] ss:$16 sps:$4 sm:$0xff]   ;;  %v15292_v62 = vld [vmem:[#allocation19 + $0x2c8] ss:$16 sps:$4 sm:$0xff]  }
 0x5f4   :  { %5113 = vmatprep.subr.bf16.mxu0 %v15132_v49  ;;  %5874 = vmatprep.subr.bf16.mxu1 %v15135_v63  ;;  %v15216_v49 = vld [vmem:[#allocation19 + $0x2c] ss:$16 sps:$4 sm:$0xff]   ;;  %v15219_v63 = vld [vmem:[#allocation19 + $0x524] ss:$16 sps:$4 sm:$0xff]  }
 0x5f7   :  { %5114 = vmatpush1.bf16.msra.mxu0 %v15130_v14  ;;  %5875 = vmatpush1.bf16.msra.mxu1 %v15133_v8  ;;  %v15214_v14 = vld [vmem:[#allocation19 + $0x28] ss:$16 sps:$4 sm:$0xff]   ;;  %v15217_v8 = vld [vmem:[#allocation19 + $0x520] ss:$16 sps:$4 sm:$0xff]  }
 0x5f8   :  { %5115 = vmatprep.subr.bf16.mxu0 %v15138_v16  ;;  %5876 = vmatprep.subr.bf16.mxu1 %v15141_v11  ;;  %v15222_v16 = vld [vmem:[#allocation19 + $0x4c] ss:$16 sps:$4 sm:$0xff]   ;;  %v15225_v11 = vld [vmem:[#allocation19 + $0x544] ss:$16 sps:$4 sm:$0xff]  }
 0x5fb   :  { %5116 = vmatpush1.bf16.msra.mxu0 %v15136_v61  ;;  %5877 = vmatpush1.bf16.msra.mxu1 %v15139_v48  ;;  %v15220_v61 = vld [vmem:[#allocation19 + $0x48] ss:$16 sps:$4 sm:$0xff]   ;;  %v15223_v48 = vld [vmem:[#allocation19 + $0x540] ss:$16 sps:$4 sm:$0xff]  }
 0x5fc   :  { %5117 = vmatprep.subr.bf16.mxu0 %v15144_v44  ;;  %5878 = vmatprep.subr.bf16.mxu1 %v15147_v23  ;;  %v15228_v44 = vld [vmem:[#allocation19 + $0x6c] ss:$16 sps:$4 sm:$0xff]   ;;  %v15231_v23 = vld [vmem:[#allocation19 + $0x564] ss:$16 sps:$4 sm:$0xff]  }
 0x5ff   :  { %5118 = vmatpush1.bf16.msra.mxu0 %v15142_v26  ;;  %5879 = vmatpush1.bf16.msra.mxu1 %v15145_v30  ;;  %v15226_v26 = vld [vmem:[#allocation19 + $0x68] ss:$16 sps:$4 sm:$0xff]   ;;  %v15229_v30 = vld [vmem:[#allocation19 + $0x560] ss:$16 sps:$4 sm:$0xff]  }
 0x600   :  { %5119 = vmatprep.subr.bf16.mxu0 %v15150_v55  ;;  %5880 = vmatprep.subr.bf16.mxu1 %v15153_v58  ;;  %v15234_v55 = vld [vmem:[#allocation19 + $0x8c] ss:$16 sps:$4 sm:$0xff]   ;;  %v15237_v58 = vld [vmem:[#allocation19 + $0x584] ss:$16 sps:$4 sm:$0xff]  }
 0x603   :  { %5120 = vmatpush1.bf16.msra.mxu0 %v15148_v51  ;;  %5881 = vmatpush1.bf16.msra.mxu1 %v15151_v27  ;;  %v15232_v51 = vld [vmem:[#allocation19 + $0x88] ss:$16 sps:$4 sm:$0xff]   ;;  %v15235_v27 = vld [vmem:[#allocation19 + $0x580] ss:$16 sps:$4 sm:$0xff]  }
 0x604   :  { %5121 = vmatprep.subr.bf16.mxu0 %v15156_v9  ;;  %5882 = vmatprep.subr.bf16.mxu1 %v15159_v28  ;;  %v15240_v9 = vld [vmem:[#allocation19 + $0xac] ss:$16 sps:$4 sm:$0xff]   ;;  %v15243_v28 = vld [vmem:[#allocation19 + $0x5a4] ss:$16 sps:$4 sm:$0xff]  }
 0x607   :  { %5122 = vmatpush1.bf16.msra.mxu0 %v15154_v10  ;;  %5883 = vmatpush1.bf16.msra.mxu1 %v15157_v36  ;;  %v15238_v10 = vld [vmem:[#allocation19 + $0xa8] ss:$16 sps:$4 sm:$0xff]   ;;  %v15241_v36 = vld [vmem:[#allocation19 + $0x5a0] ss:$16 sps:$4 sm:$0xff]  }
 0x608   :  { %5308 = vmatprep.subr.bf16.mxu0 %v15162_v57  ;;  %6150 = vmatprep.subr.bf16.mxu1 %v15165_v54  ;;  %v15246_v57 = vld [vmem:[#allocation19 + $0xcc] ss:$16 sps:$4 sm:$0xff]   ;;  %v15249_v54 = vld [vmem:[#allocation19 + $0x5c4] ss:$16 sps:$4 sm:$0xff]  }
 0x60a   :  { %5140 = vmatmul.mubr.bf16.vlgmr.msra.gmra.mrb[240].mxu0 %v17416_v3  ;;  %5901 = vmatmul.mubr.bf16.vlgmr.msra.gmra.mrb[236].mxu1 %v17424_v4  ;;  %v15205_v3 = vld [vmem:[#allocation19 + $0x4e0] ss:$16 sps:$4 sm:$0xff]  }
 0x60b   :  { %5309 = vmatpush1.bf16.msra.mxu0 %v15160_v0  ;;  %6151 = vmatpush1.bf16.msra.mxu1 %v15163_v41  ;;  %v15247_v0 = vld [vmem:[#allocation19 + $0x5c0] ss:$16 sps:$4 sm:$0xff]   ;;  %v15252_v41 = vld [vmem:[#allocation19 + $0xec] ss:$16 sps:$4 sm:$0xff]  }
 0x60c   :  { %5310 = vmatprep.subr.bf16.mxu0 %v15168_v21  ;;  %6152 = vmatprep.subr.bf16.mxu1 %v15171_v42  ;;  %v15255_v21 = vld [vmem:[#allocation19 + $0x5e4] ss:$16 sps:$4 sm:$0xff]   ;;  %v15250_v42 = vld [vmem:[#allocation19 + $0xe8] ss:$16 sps:$4 sm:$0xff]  }
 0x60d   :  { %5340 = vmatprep.mubr.bf16.mxu0 %v16010_v24  ;;  %6182 = vmatprep.mubr.bf16.mxu1 %v16010_v24 }
 0x60f   :  { %5311 = vmatpush1.bf16.msra.mxu0 %v15166_v33  ;;  %6153 = vmatpush1.bf16.msra.mxu1 %v15169_v22  ;;  %v15253_v33 = vld [vmem:[#allocation19 + $0x5e0] ss:$16 sps:$4 sm:$0xff]   ;;  %v15258_v22 = vld [vmem:[#allocation19 + $0x20c] ss:$16 sps:$4 sm:$0xff]  }
 0x610   :  { %5312 = vmatprep.subr.bf16.mxu0 %v15174_v46  ;;  %6154 = vmatprep.subr.bf16.mxu1 %v15177_v29  ;;  %v15261_v46 = vld [vmem:[#allocation19 + $0x604] ss:$16 sps:$4 sm:$0xff]   ;;  %v6237_v29 = vld [vmem:[#allocation7 + $0x5] ss:$14 sm:$0x3] }
 0x613   :  { %5313 = vmatpush1.bf16.msra.mxu0 %v15172_v19  ;;  %6155 = vmatpush1.bf16.msra.mxu1 %v15175_v5  ;;  %v15256_v19 = vld [vmem:[#allocation19 + $0x208] ss:$16 sps:$4 sm:$0xff]   ;;  %v15259_v5 = vld [vmem:[#allocation19 + $0x600] ss:$16 sps:$4 sm:$0xff]  }
 0x614   :  { %5314 = vmatprep.subr.bf16.mxu0 %v15180_v60  ;;  %6156 = vmatprep.subr.bf16.mxu1 %v15183_v45  ;;  %v17438_v60 = vpack.c.bf16 %v6237_v29, %v6237_v29  ;;  %v15264_v45 = vld [vmem:[#allocation19 + $0x22c] ss:$16 sps:$4 sm:$0xff]   ;;  %v15343_v29 = vld [vmem:[#allocation19 + $0x7c0] ss:$16 sps:$4 sm:$0xff]  }
 0x617   :  { %5315 = vmatpush1.bf16.msra.mxu0 %v15178_v2  ;;  %6157 = vmatpush1.bf16.msra.mxu1 %v15181_v17  ;;  %v15267_v2 = vld [vmem:[#allocation19 + $0x624] ss:$16 sps:$4 sm:$0xff]   ;;  %v15262_v17 = vld [vmem:[#allocation19 + $0x228] ss:$16 sps:$4 sm:$0xff]  }
 0x618   :  { %5316 = vmatprep.subr.bf16.mxu0 %v15186_v38  ;;  %6158 = vmatprep.subr.bf16.mxu1 %v15189_v35  ;;  %v15265_v38 = vld [vmem:[#allocation19 + $0x620] ss:$16 sps:$4 sm:$0xff]   ;;  %v15270_v35 = vld [vmem:[#allocation19 + $0x24c] ss:$16 sps:$4 sm:$0xff]  }
 0x61b   :  { %5317 = vmatpush1.bf16.msra.mxu0 %v15184_v39  ;;  %6159 = vmatpush1.bf16.msra.mxu1 %v15187_v15  ;;  %v15273_v39 = vld [vmem:[#allocation19 + $0x644] ss:$16 sps:$4 sm:$0xff]   ;;  %v15268_v15 = vld [vmem:[#allocation19 + $0x248] ss:$16 sps:$4 sm:$0xff]  }
 0x61c   :  { %5318 = vmatprep.subr.bf16.mxu0 %v15192_v1  ;;  %6160 = vmatprep.subr.bf16.mxu1 %v15195_v37  ;;  %v15271_v1 = vld [vmem:[#allocation19 + $0x640] ss:$16 sps:$4 sm:$0xff]   ;;  %v15276_v37 = vld [vmem:[#allocation19 + $0x26c] ss:$16 sps:$4 sm:$0xff]  }
 0x61f   :  { %5319 = vmatpush1.bf16.msra.mxu0 %v15190_v6  ;;  %6161 = vmatpush1.bf16.msra.mxu1 %v15193_v25  ;;  %v15279_v6 = vld [vmem:[#allocation19 + $0x664] ss:$16 sps:$4 sm:$0xff]   ;;  %v15274_v25 = vld [vmem:[#allocation19 + $0x268] ss:$16 sps:$4 sm:$0xff]  }
 0x620   :  { %5320 = vmatprep.subr.bf16.mxu0 %v15198_v12  ;;  %6162 = vmatprep.subr.bf16.mxu1 %v15201_v20  ;;  %v15277_v12 = vld [vmem:[#allocation19 + $0x660] ss:$16 sps:$4 sm:$0xff]   ;;  %v15282_v20 = vld [vmem:[#allocation19 + $0x28c] ss:$16 sps:$4 sm:$0xff]  }
 0x623   :  { %5321 = vmatpush1.bf16.msra.mxu0 %v15196_v18  ;;  %6163 = vmatpush1.bf16.msra.mxu1 %v15199_v53  ;;  %v15285_v18 = vld [vmem:[#allocation19 + $0x684] ss:$16 sps:$4 sm:$0xff]   ;;  %v15280_v53 = vld [vmem:[#allocation19 + $0x288] ss:$16 sps:$4 sm:$0xff]  }
 0x624   :  { %5322 = vmatprep.subr.bf16.mxu0 %v15204_v7  ;;  %6164 = vmatprep.subr.bf16.mxu1 %v15207_v32  ;;  %v15283_v7 = vld [vmem:[#allocation19 + $0x680] ss:$16 sps:$4 sm:$0xff]   ;;  %v15288_v32 = vld [vmem:[#allocation19 + $0x2ac] ss:$16 sps:$4 sm:$0xff]  }
 0x627   :  { %5323 = vmatpush1.bf16.msra.mxu0 %v15202_v13  ;;  %6165 = vmatpush1.bf16.msra.mxu1 %v15205_v3  ;;  %v15291_v13 = vld [vmem:[#allocation19 + $0x6a4] ss:$16 sps:$4 sm:$0xff]   ;;  %v15286_v3 = vld [vmem:[#allocation19 + $0x2a8] ss:$16 sps:$4 sm:$0xff]  }
 0x628   :  { %5349 = vmatprep.subr.bf16.mxu0 %v15210_v56  ;;  %6432 = vmatprep.subr.bf16.mxu1 %v15213_v59  ;;  %v15289_v56 = vld [vmem:[#allocation19 + $0x6a0] ss:$16 sps:$4 sm:$0xff]   ;;  %v15294_v59 = vld [vmem:[#allocation19 + $0x2cc] ss:$16 sps:$4 sm:$0xff]  }
 0x62a   :  { %5341 = vmatmul.mubr.bf16.vlgmr.msra.gmra.mrb[244].mxu0 %v17430_v50  ;;  %6183 = vmatmul.mubr.bf16.vlgmr.msra.gmra.mrb[240].mxu1 %v17432_v34 }
 0x62b   :  { %5350 = vmatpush1.bf16.msra.mxu0 %v15208_v31  ;;  %6433 = vmatpush1.bf16.msra.mxu1 %v15211_v52  ;;  %v15295_v31 = vld [vmem:[#allocation19 + $0x6c0] ss:$16 sps:$4 sm:$0xff]   ;;  %v15300_v52 = vld [vmem:[#allocation19 + $0x2ec] ss:$16 sps:$4 sm:$0xff]  }
 0x62c   :  { %5351 = vmatprep.subr.bf16.mxu0 %v15216_v49  ;;  %6434 = vmatprep.subr.bf16.mxu1 %v15219_v63  ;;  %v15298_v49 = vld [vmem:[#allocation19 + $0x2e8] ss:$16 sps:$4 sm:$0xff]   ;;  %v15301_v63 = vld [vmem:[#allocation19 + $0x6e0] ss:$16 sps:$4 sm:$0xff]  }
 0x62d   :  { %5381 = vmatprep.mubr.bf16.mxu0 %v16010_v24  ;;  %6464 = vmatprep.mubr.bf16.mxu1 %v16010_v24 }
 0x62f   :  { %5352 = vmatpush1.bf16.msra.mxu0 %v15214_v14  ;;  %6435 = vmatpush1.bf16.msra.mxu1 %v15217_v8  ;;  %v15306_v14 = vld [vmem:[#allocation19 + $0x30c] ss:$16 sps:$4 sm:$0xff]   ;;  %v15309_v8 = vld [vmem:[#allocation19 + $0x704] ss:$16 sps:$4 sm:$0xff]  }
 0x630   :  { %5353 = vmatprep.subr.bf16.mxu0 %v15222_v16  ;;  %6436 = vmatprep.subr.bf16.mxu1 %v15225_v11  ;;  %v6519_v16 = vld [vmem:[#allocation7 + $0x6] ss:$14 sm:$0x3] }
 0x631   :  { %v15304_v11 = vld [vmem:[#allocation19 + $0x308] ss:$16 sps:$4 sm:$0xff]  }
 0x633   :  { %5354 = vmatpush1.bf16.msra.mxu0 %v15220_v61  ;;  %6437 = vmatpush1.bf16.msra.mxu1 %v15223_v48  ;;  %v15307_v61 = vld [vmem:[#allocation19 + $0x700] ss:$16 sps:$4 sm:$0xff]   ;;  %v17444_v48 = vpack.c.bf16 %v6519_v16, %v6519_v16 }
 0x634   :  { %5355 = vmatprep.subr.bf16.mxu0 %v15228_v44  ;;  %6438 = vmatprep.subr.bf16.mxu1 %v15231_v23  ;;  %v15312_v44 = vld [vmem:[#allocation19 + $0x32c] ss:$16 sps:$4 sm:$0xff]   ;;  %v15315_v23 = vld [vmem:[#allocation19 + $0x724] ss:$16 sps:$4 sm:$0xff]   ;;  %v15391_v16 = vld [vmem:[#allocation19 + $0x8c0] ss:$16 sps:$4 sm:$0xff]  }
 0x637   :  { %5356 = vmatpush1.bf16.msra.mxu0 %v15226_v26  ;;  %6439 = vmatpush1.bf16.msra.mxu1 %v15229_v30  ;;  %v15310_v26 = vld [vmem:[#allocation19 + $0x328] ss:$16 sps:$4 sm:$0xff]   ;;  %v15313_v30 = vld [vmem:[#allocation19 + $0x720] ss:$16 sps:$4 sm:$0xff]  }
 0x638   :  { %5357 = vmatprep.subr.bf16.mxu0 %v15234_v55  ;;  %6440 = vmatprep.subr.bf16.mxu1 %v15237_v58  ;;  %v15318_v55 = vld [vmem:[#allocation19 + $0x34c] ss:$16 sps:$4 sm:$0xff]   ;;  %v15321_v58 = vld [vmem:[#allocation19 + $0x744] ss:$16 sps:$4 sm:$0xff]  }
 0x63b   :  { %5358 = vmatpush1.bf16.msra.mxu0 %v15232_v51  ;;  %6441 = vmatpush1.bf16.msra.mxu1 %v15235_v27  ;;  %v15316_v51 = vld [vmem:[#allocation19 + $0x348] ss:$16 sps:$4 sm:$0xff]   ;;  %v15319_v27 = vld [vmem:[#allocation19 + $0x740] ss:$16 sps:$4 sm:$0xff]  }
 0x63c   :  { %5359 = vmatprep.subr.bf16.mxu0 %v15240_v9  ;;  %6442 = vmatprep.subr.bf16.mxu1 %v15243_v28  ;;  %v15327_v9 = vld [vmem:[#allocation19 + $0x764] ss:$16 sps:$4 sm:$0xff]   ;;  %v15322_v28 = vld [vmem:[#allocation19 + $0x368] ss:$16 sps:$4 sm:$0xff]  }
 0x63f   :  { %5360 = vmatpush1.bf16.msra.mxu0 %v15238_v10  ;;  %6443 = vmatpush1.bf16.msra.mxu1 %v15241_v36  ;;  %v15325_v10 = vld [vmem:[#allocation19 + $0x760] ss:$16 sps:$4 sm:$0xff]   ;;  %v15330_v36 = vld [vmem:[#allocation19 + $0x38c] ss:$16 sps:$4 sm:$0xff]  }
 0x640   :  { %5361 = vmatprep.subr.bf16.mxu0 %v15246_v57  ;;  %6444 = vmatprep.subr.bf16.mxu1 %v15249_v54  ;;  %v15333_v57 = vld [vmem:[#allocation19 + $0x784] ss:$16 sps:$4 sm:$0xff]   ;;  %v15328_v54 = vld [vmem:[#allocation19 + $0x388] ss:$16 sps:$4 sm:$0xff]  }
 0x643   :  { %5362 = vmatpush1.bf16.msra.mxu0 %v15244_v40  ;;  %6445 = vmatpush1.bf16.msra.mxu1 %v15247_v0  ;;  %v15331_v40 = vld [vmem:[#allocation19 + $0x780] ss:$16 sps:$4 sm:$0xff]   ;;  %v15336_v0 = vld [vmem:[#allocation19 + $0x3ac] ss:$16 sps:$4 sm:$0xff]  }
 0x644   :  { %5363 = vmatprep.subr.bf16.mxu0 %v15252_v41  ;;  %6446 = vmatprep.subr.bf16.mxu1 %v15255_v21  ;;  %v15339_v41 = vld [vmem:[#allocation19 + $0x7a4] ss:$16 sps:$4 sm:$0xff]   ;;  %v15334_v21 = vld [vmem:[#allocation19 + $0x3a8] ss:$16 sps:$4 sm:$0xff]  }
 0x647   :  { %5364 = vmatpush1.bf16.msra.mxu0 %v15250_v42  ;;  %6447 = vmatpush1.bf16.msra.mxu1 %v15253_v33  ;;  %v15337_v42 = vld [vmem:[#allocation19 + $0x7a0] ss:$16 sps:$4 sm:$0xff]   ;;  %v15342_v33 = vld [vmem:[#allocation19 + $0x3cc] ss:$16 sps:$4 sm:$0xff]  }
 0x648   :  { %5627 = vmatprep.subr.bf16.mxu0 %v15258_v22  ;;  %6714 = vmatprep.subr.bf16.mxu1 %v15261_v46  ;;  %v15345_v22 = vld [vmem:[#allocation19 + $0x7c4] ss:$16 sps:$4 sm:$0xff]   ;;  %v15340_v46 = vld [vmem:[#allocation19 + $0x3c8] ss:$16 sps:$4 sm:$0xff]  }
 0x64a   :  { %5382 = vmatmul.mubr.bf16.vlgmr.msra.gmra.mrb[248].mxu0 %v17430_v50  ;;  %6465 = vmatmul.mubr.bf16.vlgmr.msra.gmra.mrb[244].mxu1 %v17438_v60  ;;  %v15303_v50 = vld [vmem:[#allocation19 + $0x6e4] ss:$16 sps:$4 sm:$0xff]  }
 0x64b   :  { %5628 = vmatpush1.bf16.msra.mxu0 %v15256_v19  ;;  %6715 = vmatpush1.bf16.msra.mxu1 %v15259_v5  ;;  %v15348_v19 = vld [vmem:[#allocation19 + $0x3ec] ss:$16 sps:$4 sm:$0xff]   ;;  %v15351_v5 = vld [vmem:[#allocation19 + $0x7e4] ss:$16 sps:$4 sm:$0xff]  }
 0x64c   :  { %5629 = vmatprep.subr.bf16.mxu0 %v15264_v45  ;;  %6716 = vmatprep.subr.bf16.mxu1 %v15267_v2  ;;  %v15346_v45 = vld [vmem:[#allocation19 + $0x3e8] ss:$16 sps:$4 sm:$0xff]   ;;  %v15349_v2 = vld [vmem:[#allocation19 + $0x7e0] ss:$16 sps:$4 sm:$0xff]  }
 0x64d   :  { %5659 = vmatprep.mubr.bf16.mxu0 %v16010_v24  ;;  %6746 = vmatprep.mubr.bf16.mxu1 %v16010_v24 }
 0x64f   :  { %5630 = vmatpush1.bf16.msra.mxu0 %v15262_v17  ;;  %6717 = vmatpush1.bf16.msra.mxu1 %v15265_v38  ;;  %v15354_v17 = vld [vmem:[#allocation19 + $0x40c] ss:$16 sps:$4 sm:$0xff]   ;;  %v15357_v38 = vld [vmem:[#allocation19 + $0x804] ss:$16 sps:$4 sm:$0xff]  }
 0x650   :  { %5631 = vmatprep.subr.bf16.mxu0 %v15270_v35  ;;  %6718 = vmatprep.subr.bf16.mxu1 %v15273_v39  ;;  %v6801_v35 = vld [vmem:[#allocation7 + $0x7] ss:$14 sm:$0x3] }
 0x651   :  { %v15352_v39 = vld [vmem:[#allocation19 + $0x408] ss:$16 sps:$4 sm:$0xff]  }
 0x653   :  { %5632 = vmatpush1.bf16.msra.mxu0 %v15268_v15  ;;  %6719 = vmatpush1.bf16.msra.mxu1 %v15271_v1  ;;  %v15355_v15 = vld [vmem:[#allocation19 + $0x800] ss:$16 sps:$4 sm:$0xff]   ;;  %v17450_v1 = vpack.c.bf16 %v6801_v35, %v6801_v35 }
 0x654   :  { %5633 = vmatprep.subr.bf16.mxu0 %v15276_v37  ;;  %6720 = vmatprep.subr.bf16.mxu1 %v15279_v6  ;;  %v15360_v37 = vld [vmem:[#allocation19 + $0x42c] ss:$16 sps:$4 sm:$0xff]   ;;  %v15363_v6 = vld [vmem:[#allocation19 + $0x824] ss:$16 sps:$4 sm:$0xff]  }
 0x657   :  { %5634 = vmatpush1.bf16.msra.mxu0 %v15274_v25  ;;  %6721 = vmatpush1.bf16.msra.mxu1 %v15277_v12  ;;  %v15358_v25 = vld [vmem:[#allocation19 + $0x428] ss:$16 sps:$4 sm:$0xff]   ;;  %v15361_v12 = vld [vmem:[#allocation19 + $0x820] ss:$16 sps:$4 sm:$0xff]  }
 0x658   :  { %5635 = vmatprep.subr.bf16.mxu0 %v15282_v20  ;;  %6722 = vmatprep.subr.bf16.mxu1 %v15285_v18  ;;  %v15366_v20 = vld [vmem:[#allocation19 + $0x44c] ss:$16 sps:$4 sm:$0xff]   ;;  %v15369_v18 = vld [vmem:[#allocation19 + $0x844] ss:$16 sps:$4 sm:$0xff]  }
 0x65b   :  { %5636 = vmatpush1.bf16.msra.mxu0 %v15280_v53  ;;  %6723 = vmatpush1.bf16.msra.mxu1 %v15283_v7  ;;  %v15364_v53 = vld [vmem:[#allocation19 + $0x448] ss:$16 sps:$4 sm:$0xff]   ;;  %v15367_v7 = vld [vmem:[#allocation19 + $0x840] ss:$16 sps:$4 sm:$0xff]  }
 0x65c   :  { %5637 = vmatprep.subr.bf16.mxu0 %v15288_v32  ;;  %6724 = vmatprep.subr.bf16.mxu1 %v15291_v13  ;;  %v15375_v32 = vld [vmem:[#allocation19 + $0x864] ss:$16 sps:$4 sm:$0xff]   ;;  %v15370_v13 = vld [vmem:[#allocation19 + $0x468] ss:$16 sps:$4 sm:$0xff]  }
 0x65f   :  { %5638 = vmatpush1.bf16.msra.mxu0 %v15286_v3  ;;  %6725 = vmatpush1.bf16.msra.mxu1 %v15289_v56  ;;  %v15373_v3 = vld [vmem:[#allocation19 + $0x860] ss:$16 sps:$4 sm:$0xff]   ;;  %v15378_v56 = vld [vmem:[#allocation19 + $0x48c] ss:$16 sps:$4 sm:$0xff]  }
 0x660   :  { %5639 = vmatprep.subr.bf16.mxu0 %v15294_v59  ;;  %6726 = vmatprep.subr.bf16.mxu1 %v15297_v47  ;;  %v15381_v59 = vld [vmem:[#allocation19 + $0x884] ss:$16 sps:$4 sm:$0xff]   ;;  %v15376_v47 = vld [vmem:[#allocation19 + $0x488] ss:$16 sps:$4 sm:$0xff]  }
 0x663   :  { %5640 = vmatpush1.bf16.msra.mxu0 %v15292_v62  ;;  %6727 = vmatpush1.bf16.msra.mxu1 %v15295_v31  ;;  %v15379_v62 = vld [vmem:[#allocation19 + $0x880] ss:$16 sps:$4 sm:$0xff]   ;;  %v15384_v31 = vld [vmem:[#allocation19 + $0x4ac] ss:$16 sps:$4 sm:$0xff]  }
 0x664   :  { %5641 = vmatprep.subr.bf16.mxu0 %v15300_v52  ;;  %6728 = vmatprep.subr.bf16.mxu1 %v15303_v50  ;;  %v15387_v52 = vld [vmem:[#allocation19 + $0x8a4] ss:$16 sps:$4 sm:$0xff]   ;;  %v15382_v50 = vld [vmem:[#allocation19 + $0x4a8] ss:$16 sps:$4 sm:$0xff]  }
 0x667   :  { %5642 = vmatpush1.bf16.msra.mxu0 %v15298_v49  ;;  %6729 = vmatpush1.bf16.msra.mxu1 %v15301_v63  ;;  %v15385_v49 = vld [vmem:[#allocation19 + $0x8a0] ss:$16 sps:$4 sm:$0xff]   ;;  %v15390_v63 = vld [vmem:[#allocation19 + $0x4cc] ss:$16 sps:$4 sm:$0xff]  }
 0x668   :  { %5909 = vmatprep.subr.bf16.mxu0 %v15306_v14  ;;  %6996 = vmatprep.subr.bf16.mxu1 %v15309_v8  ;;  %v15393_v14 = vld [vmem:[#allocation19 + $0x8c4] ss:$16 sps:$4 sm:$0xff]   ;;  %v15388_v8 = vld [vmem:[#allocation19 + $0x4c8] ss:$16 sps:$4 sm:$0xff]  }
 0x66a   :  { %5660 = vmatmul.mubr.bf16.vlgmr.msra.gmra.mrb[252].mxu0 %v17418_v43  ;;  %6747 = vmatmul.mubr.bf16.vlgmr.msra.gmra.mrb[248].mxu1 %v17444_v48  ;;  %v15324_v43 = vld [vmem:[#allocation19 + $0x36c] ss:$16 sps:$4 sm:$0xff]  }
 0x66b   :  { %5910 = vmatpush1.bf16.msra.mxu0 %v15304_v11  ;;  %6997 = vmatpush1.bf16.msra.mxu1 %v15307_v61  ;;  %v15396_v11 = vld [vmem:[#allocation19 + $0x4ec] ss:$16 sps:$4 sm:$0xff]   ;;  %v15399_v61 = vld [vmem:[#allocation19 + $0x8e4] ss:$16 sps:$4 sm:$0xff]  }
 0x66c   :  { %5911 = vmatprep.subr.bf16.mxu0 %v15312_v44  ;;  %6998 = vmatprep.subr.bf16.mxu1 %v15315_v23  ;;  %v15394_v44 = vld [vmem:[#allocation19 + $0x4e8] ss:$16 sps:$4 sm:$0xff]   ;;  %v15397_v23 = vld [vmem:[#allocation19 + $0x8e0] ss:$16 sps:$4 sm:$0xff]  }
 0x66d   :  { %5941 = vmatprep.mubr.bf16.mxu0 %v16010_v24  ;;  %7028 = vmatprep.mubr.bf16.mxu1 %v16010_v24 }
 0x66f   :  { %5912 = vmatpush1.bf16.msra.mxu0 %v15310_v26  ;;  %6999 = vmatpush1.bf16.msra.mxu1 %v15313_v30  ;;  %v15402_v26 = vld [vmem:[#allocation19 + $0x50c] ss:$16 sps:$4 sm:$0xff]   ;;  %v15405_v30 = vld [vmem:[#allocation19 + $0x904] ss:$16 sps:$4 sm:$0xff]  }
 0x670   :  { %5913 = vmatprep.subr.bf16.mxu0 %v15318_v55  ;;  %7000 = vmatprep.subr.bf16.mxu1 %v15321_v58  ;;  %v7083_v55 = vld [vmem:[#allocation7 + $0x8] ss:$14 sm:$0x3]  ;;  %v15400_v58 = vld [vmem:[#allocation19 + $0x508] ss:$16 sps:$4 sm:$0xff]  }
 0x673   :  { %5914 = vmatpush1.bf16.msra.mxu0 %v15316_v51  ;;  %7001 = vmatpush1.bf16.msra.mxu1 %v15319_v27  ;;  %v15403_v51 = vld [vmem:[#allocation19 + $0x900] ss:$16 sps:$4 sm:$0xff]   ;;  %v17456_v27 = vpack.c.bf16 %v7083_v55, %v7083_v55 }
 0x674   :  { %5915 = vmatprep.subr.bf16.mxu0 %v15324_v43  ;;  %7002 = vmatprep.subr.bf16.mxu1 %v15327_v9  ;;  %v15408_v43 = vld [vmem:[#allocation19 + $0x52c] ss:$16 sps:$4 sm:$0xff]   ;;  %v15411_v9 = vld [vmem:[#allocation19 + $0x924] ss:$16 sps:$4 sm:$0xff]   ;;  %v15475_v55 = vld [vmem:[#allocation19 + $0xa80] ss:$16 sps:$4 sm:$0xff]  }
 0x677   :  { %5916 = vmatpush1.bf16.msra.mxu0 %v15322_v28  ;;  %7003 = vmatpush1.bf16.msra.mxu1 %v15325_v10  ;;  %v15406_v28 = vld [vmem:[#allocation19 + $0x528] ss:$16 sps:$4 sm:$0xff]   ;;  %v15409_v10 = vld [vmem:[#allocation19 + $0x920] ss:$16 sps:$4 sm:$0xff]  }
 0x678   :  { %5917 = vmatprep.subr.bf16.mxu0 %v15330_v36  ;;  %7004 = vmatprep.subr.bf16.mxu1 %v15333_v57  ;;  %v15414_v36 = vld [vmem:[#allocation19 + $0x54c] ss:$16 sps:$4 sm:$0xff]   ;;  %v15417_v57 = vld [vmem:[#allocation19 + $0x944] ss:$16 sps:$4 sm:$0xff]  }
 0x67b   :  { %5918 = vmatpush1.bf16.msra.mxu0 %v15328_v54  ;;  %7005 = vmatpush1.bf16.msra.mxu1 %v15331_v40  ;;  %v15412_v54 = vld [vmem:[#allocation19 + $0x548] ss:$16 sps:$4 sm:$0xff]   ;;  %v15415_v40 = vld [vmem:[#allocation19 + $0x940] ss:$16 sps:$4 sm:$0xff]  }
 0x67c   :  { %5919 = vmatprep.subr.bf16.mxu0 %v15336_v0  ;;  %7006 = vmatprep.subr.bf16.mxu1 %v15339_v41  ;;  %v15423_v0 = vld [vmem:[#allocation19 + $0x964] ss:$16 sps:$4 sm:$0xff]   ;;  %v15418_v41 = vld [vmem:[#allocation19 + $0x568] ss:$16 sps:$4 sm:$0xff]  }
 0x67f   :  { %5920 = vmatpush1.bf16.msra.mxu0 %v15334_v21  ;;  %7007 = vmatpush1.bf16.msra.mxu1 %v15337_v42  ;;  %v15421_v21 = vld [vmem:[#allocation19 + $0x960] ss:$16 sps:$4 sm:$0xff]   ;;  %v15426_v42 = vld [vmem:[#allocation19 + $0x58c] ss:$16 sps:$4 sm:$0xff]  }
 0x680   :  { %5921 = vmatprep.subr.bf16.mxu0 %v15342_v33  ;;  %7008 = vmatprep.subr.bf16.mxu1 %v15345_v22  ;;  %v15429_v33 = vld [vmem:[#allocation19 + $0x984] ss:$16 sps:$4 sm:$0xff]   ;;  %v15424_v22 = vld [vmem:[#allocation19 + $0x588] ss:$16 sps:$4 sm:$0xff]  }
 0x683   :  { %5922 = vmatpush1.bf16.msra.mxu0 %v15340_v46  ;;  %7009 = vmatpush1.bf16.msra.mxu1 %v15343_v29  ;;  %v15427_v46 = vld [vmem:[#allocation19 + $0x980] ss:$16 sps:$4 sm:$0xff]   ;;  %v15432_v29 = vld [vmem:[#allocation19 + $0x5ac] ss:$16 sps:$4 sm:$0xff]  }
 0x684   :  { %5923 = vmatprep.subr.bf16.mxu0 %v15348_v19  ;;  %7010 = vmatprep.subr.bf16.mxu1 %v15351_v5  ;;  %v15435_v19 = vld [vmem:[#allocation19 + $0x9a4] ss:$16 sps:$4 sm:$0xff]   ;;  %v15430_v5 = vld [vmem:[#allocation19 + $0x5a8] ss:$16 sps:$4 sm:$0xff]  }
 0x687   :  { %5924 = vmatpush1.bf16.msra.mxu0 %v15346_v45  ;;  %7011 = vmatpush1.bf16.msra.mxu1 %v15349_v2  ;;  %v15433_v45 = vld [vmem:[#allocation19 + $0x9a0] ss:$16 sps:$4 sm:$0xff]   ;;  %v15438_v2 = vld [vmem:[#allocation19 + $0x5cc] ss:$16 sps:$4 sm:$0xff]  }
 0x688   :  { %6191 = vmatprep.subr.bf16.mxu0 %v15354_v17  ;;  %7278 = vmatprep.subr.bf16.mxu1 %v15357_v38  ;;  %v15441_v17 = vld [vmem:[#allocation19 + $0x9c4] ss:$16 sps:$4 sm:$0xff]  }
 0x68a   :  { %5942 = vmatmul.mubr.bf16.vlgmr.msra.gmra.mrb[0].mxu0 %v17424_v4  ;;  %7029 = vmatmul.mubr.bf16.vlgmr.msra.gmra.mrb[252].mxu1 %v17450_v1  ;;  %v15372_v4 = vld [vmem:[#allocation19 + $0x46c] ss:$16 sps:$4 sm:$0xff]  }
 0x68b   :  { %6192 = vmatpush1.bf16.msra.mxu0 %v15352_v39  ;;  %7279 = vmatpush1.bf16.msra.mxu1 %v15355_v15 }
 0x68c   :  { %6193 = vmatprep.subr.bf16.mxu0 %v15360_v37  ;;  %7280 = vmatprep.subr.bf16.mxu1 %v15363_v6 }
 0x68d   :  { %6223 = vmatprep.mubr.bf16.mxu0 %v16010_v24  ;;  %7310 = vmatprep.mubr.bf16.mxu1 %v16010_v24 }
 0x68f   :  { %6194 = vmatpush1.bf16.msra.mxu0 %v15358_v25  ;;  %7281 = vmatpush1.bf16.msra.mxu1 %v15361_v12  ;;  %v15436_v25 = vld [vmem:[#allocation19 + $0x5c8] ss:$16 sps:$4 sm:$0xff]   ;;  %v15439_v12 = vld [vmem:[#allocation19 + $0x9c0] ss:$16 sps:$4 sm:$0xff]  }
 0x690   :  { %6195 = vmatprep.subr.bf16.mxu0 %v15366_v20  ;;  %7282 = vmatprep.subr.bf16.mxu1 %v15369_v18 }
 0x693   :  { %6196 = vmatpush1.bf16.msra.mxu0 %v15364_v53  ;;  %7283 = vmatpush1.bf16.msra.mxu1 %v15367_v7  ;;  %v15444_v53 = vld [vmem:[#allocation19 + $0x5ec] ss:$16 sps:$4 sm:$0xff]   ;;  %v15447_v7 = vld [vmem:[#allocation19 + $0x9e4] ss:$16 sps:$4 sm:$0xff]  }
 0x694   :  { %6197 = vmatprep.subr.bf16.mxu0 %v15372_v4  ;;  %7284 = vmatprep.subr.bf16.mxu1 %v15375_v32  ;;  %v15442_v4 = vld [vmem:[#allocation19 + $0x5e8] ss:$16 sps:$4 sm:$0xff]   ;;  %v15445_v32 = vld [vmem:[#allocation19 + $0x9e0] ss:$16 sps:$4 sm:$0xff]  }
 0x697   :  { %6198 = vmatpush1.bf16.msra.mxu0 %v15370_v13  ;;  %7285 = vmatpush1.bf16.msra.mxu1 %v15373_v3  ;;  %v15450_v13 = vld [vmem:[#allocation19 + $0x60c] ss:$16 sps:$4 sm:$0xff]   ;;  %v15453_v3 = vld [vmem:[#allocation19 + $0xa04] ss:$16 sps:$4 sm:$0xff]  }
 0x698   :  { %6199 = vmatprep.subr.bf16.mxu0 %v15378_v56  ;;  %7286 = vmatprep.subr.bf16.mxu1 %v15381_v59  ;;  %v7365_v56 = vld [vmem:[#allocation7 + $0x9] ss:$14 sm:$0x3]  ;;  %v15448_v59 = vld [vmem:[#allocation19 + $0x608] ss:$16 sps:$4 sm:$0xff]  }
 0x69b   :  { %6200 = vmatpush1.bf16.msra.mxu0 %v15376_v47  ;;  %7287 = vmatpush1.bf16.msra.mxu1 %v15379_v62  ;;  %v15451_v47 = vld [vmem:[#allocation19 + $0xa00] ss:$16 sps:$4 sm:$0xff]   ;;  %v17470_v62 = vpack.c.bf16 %v7365_v56, %v7365_v56 }
 0x69c   :  { %6201 = vmatprep.subr.bf16.mxu0 %v15384_v31  ;;  %7288 = vmatprep.subr.bf16.mxu1 %v15387_v52  ;;  %v15456_v31 = vld [vmem:[#allocation19 + $0x62c] ss:$16 sps:$4 sm:$0xff]   ;;  %v15459_v52 = vld [vmem:[#allocation19 + $0xa24] ss:$16 sps:$4 sm:$0xff]   ;;  %v15517_v56 = vld [vmem:[#allocation19 + $0xb60] ss:$16 sps:$4 sm:$0xff]  }
 0x69f   :  { %6202 = vmatpush1.bf16.msra.mxu0 %v15382_v50  ;;  %7289 = vmatpush1.bf16.msra.mxu1 %v15385_v49  ;;  %v15454_v50 = vld [vmem:[#allocation19 + $0x628] ss:$16 sps:$4 sm:$0xff]   ;;  %v15457_v49 = vld [vmem:[#allocation19 + $0xa20] ss:$16 sps:$4 sm:$0xff]  }
 0x6a0   :  { %6203 = vmatprep.subr.bf16.mxu0 %v15390_v63  ;;  %7290 = vmatprep.subr.bf16.mxu1 %v15393_v14  ;;  %v15462_v63 = vld [vmem:[#allocation19 + $0x64c] ss:$16 sps:$4 sm:$0xff]   ;;  %v15465_v14 = vld [vmem:[#allocation19 + $0xa44] ss:$16 sps:$4 sm:$0xff]  }
 0x6a3   :  { %6204 = vmatpush1.bf16.msra.mxu0 %v15388_v8  ;;  %7291 = vmatpush1.bf16.msra.mxu1 %v15391_v16  ;;  %v15460_v8 = vld [vmem:[#allocation19 + $0x648] ss:$16 sps:$4 sm:$0xff]   ;;  %v15463_v16 = vld [vmem:[#allocation19 + $0xa40] ss:$16 sps:$4 sm:$0xff]  }
 0x6a4   :  { %6205 = vmatprep.subr.bf16.mxu0 %v15396_v11  ;;  %7292 = vmatprep.subr.bf16.mxu1 %v15399_v61  ;;  %v15471_v11 = vld [vmem:[#allocation19 + $0xa64] ss:$16 sps:$4 sm:$0xff]   ;;  %v15466_v61 = vld [vmem:[#allocation19 + $0x668] ss:$16 sps:$4 sm:$0xff]  }
 0x6a7   :  { %6206 = vmatpush1.bf16.msra.mxu0 %v15394_v44  ;;  %7293 = vmatpush1.bf16.msra.mxu1 %v15397_v23  ;;  %v15469_v44 = vld [vmem:[#allocation19 + $0xa60] ss:$16 sps:$4 sm:$0xff]   ;;  %v15474_v23 = vld [vmem:[#allocation19 + $0x68c] ss:$16 sps:$4 sm:$0xff]  }
 0x6a8   :  { %6473 = vmatprep.subr.bf16.mxu0 %v15402_v26  ;;  %7560 = vmatprep.subr.bf16.mxu1 %v15405_v30  ;;  %v15477_v26 = vld [vmem:[#allocation19 + $0xa84] ss:$16 sps:$4 sm:$0xff]   ;;  %v15472_v30 = vld [vmem:[#allocation19 + $0x688] ss:$16 sps:$4 sm:$0xff]  }
 0x6aa   :  { %6224 = vmatmul.mubr.bf16.vlgmr.msra.gmra.mrb[4].mxu0 %v17432_v34  ;;  %7311 = vmatmul.mubr.bf16.vlgmr.msra.gmra.mrb[0].mxu1 %v17456_v27  ;;  %v15420_v34 = vld [vmem:[#allocation19 + $0x56c] ss:$16 sps:$4 sm:$0xff]  }
 0x6ab   :  { %6474 = vmatpush1.bf16.msra.mxu0 %v15400_v58  ;;  %7561 = vmatpush1.bf16.msra.mxu1 %v15403_v51  ;;  %v15480_v58 = vld [vmem:[#allocation19 + $0x6ac] ss:$16 sps:$4 sm:$0xff]   ;;  %v15483_v51 = vld [vmem:[#allocation19 + $0xaa4] ss:$16 sps:$4 sm:$0xff]  }
 0x6ac   :  { %6475 = vmatprep.subr.bf16.mxu0 %v15408_v43  ;;  %7562 = vmatprep.subr.bf16.mxu1 %v15411_v9  ;;  %v15478_v43 = vld [vmem:[#allocation19 + $0x6a8] ss:$16 sps:$4 sm:$0xff]   ;;  %v15481_v9 = vld [vmem:[#allocation19 + $0xaa0] ss:$16 sps:$4 sm:$0xff]  }
 0x6ad   :  { %6505 = vmatprep.mubr.bf16.mxu0 %v16010_v24  ;;  %7592 = vmatprep.mubr.bf16.mxu1 %v16010_v24 }
 0x6af   :  { %6476 = vmatpush1.bf16.msra.mxu0 %v15406_v28  ;;  %7563 = vmatpush1.bf16.msra.mxu1 %v15409_v10  ;;  %v15486_v28 = vld [vmem:[#allocation19 + $0x6cc] ss:$16 sps:$4 sm:$0xff]   ;;  %v15489_v10 = vld [vmem:[#allocation19 + $0xac4] ss:$16 sps:$4 sm:$0xff]  }
 0x6b0   :  { %6477 = vmatprep.subr.bf16.mxu0 %v15414_v36  ;;  %7564 = vmatprep.subr.bf16.mxu1 %v15417_v57 }
 0x6b3   :  { %6478 = vmatpush1.bf16.msra.mxu0 %v15412_v54  ;;  %7565 = vmatpush1.bf16.msra.mxu1 %v15415_v40 }
 0x6b4   :  { %6479 = vmatprep.subr.bf16.mxu0 %v15420_v34  ;;  %7566 = vmatprep.subr.bf16.mxu1 %v15423_v0 }
 0x6b7   :  { %6480 = vmatpush1.bf16.msra.mxu0 %v15418_v41  ;;  %7567 = vmatpush1.bf16.msra.mxu1 %v15421_v21  ;;  %v15484_v41 = vld [vmem:[#allocation19 + $0x6c8] ss:$16 sps:$4 sm:$0xff]   ;;  %v15487_v21 = vld [vmem:[#allocation19 + $0xac0] ss:$16 sps:$4 sm:$0xff]  }
 0x6b8   :  { %6481 = vmatprep.subr.bf16.mxu0 %v15426_v42  ;;  %7568 = vmatprep.subr.bf16.mxu1 %v15429_v33 }
 0x6bb   :  { %6482 = vmatpush1.bf16.msra.mxu0 %v15424_v22  ;;  %7569 = vmatpush1.bf16.msra.mxu1 %v15427_v46  ;;  %v15492_v22 = vld [vmem:[#allocation19 + $0x6ec] ss:$16 sps:$4 sm:$0xff]   ;;  %v15495_v46 = vld [vmem:[#allocation19 + $0xae4] ss:$16 sps:$4 sm:$0xff]  }
 0x6bc   :  { %6483 = vmatprep.subr.bf16.mxu0 %v15432_v29  ;;  %7570 = vmatprep.subr.bf16.mxu1 %v15435_v19  ;;  %v15490_v29 = vld [vmem:[#allocation19 + $0x6e8] ss:$16 sps:$4 sm:$0xff]   ;;  %v15493_v19 = vld [vmem:[#allocation19 + $0xae0] ss:$16 sps:$4 sm:$0xff]  }
 0x6bd   :  { %v17462_v38 = vpop.f32.mrb[236].mxu0  ;;  %v17464_v35 = vpop.f32.mrb[232].mxu1 }
 0x6be   :  { %v17466_v39 = vpop.f32.mrb[237].mxu0  ;;  %v17468_v15 = vpop.f32.mrb[233].mxu1 }
 0x6bf   :  { %6484 = vmatpush1.bf16.msra.mxu0 %v15430_v5  ;;  %7571 = vmatpush1.bf16.msra.mxu1 %v15433_v45  ;;  %v5104_v37 = vpop.f32.mrb[238].mxu0  ;;  %v5624_v6 = vpop.f32.mrb[234].mxu1  ;;  %v15498_v5 = vld [vmem:[#allocation19 + $0x70c] ss:$16 sps:$4 sm:$0xff]   ;;  %v15501_v45 = vld [vmem:[#allocation19 + $0xb04] ss:$16 sps:$4 sm:$0xff]  }
 0x6c0   :  { %v5105_v20 = vpop.f32.mrb[239].mxu0  ;;  %v5625_v18 = vpop.f32.mrb[235].mxu1  ;;  %6485 = vmatprep.subr.bf16.mxu0 %v15438_v2  ;;  %7572 = vmatprep.subr.bf16.mxu1 %v15441_v17  ;;  %v7647_v2 = vld [vmem:[#allocation7 + $0xa] ss:$14 sm:$0x3] }
 0x6c1   :  { %v15496_v17 = vld [vmem:[#allocation19 + $0x708] ss:$16 sps:$4 sm:$0xff]   ;;  %v15499_v37 = vld [vmem:[#allocation19 + $0xb00] ss:$16 sps:$4 sm:$0xff]   ;;  %v17484_v6 = vpack.c.bf16 %v7647_v2, %v7647_v2  ;;  %v15558_v2 = vld [vmem:[#allocation19 + $0x84c] ss:$16 sps:$4 sm:$0xff]  }
 0x6c2   :  { %v15502_v20 = vld [vmem:[#allocation19 + $0x728] ss:$16 sps:$4 sm:$0xff]   ;;  %v15505_v18 = vld [vmem:[#allocation19 + $0xb20] ss:$16 sps:$4 sm:$0xff]  }
 0x6c3   :  { %6486 = vmatpush1.bf16.msra.mxu0 %v15436_v25  ;;  %7573 = vmatpush1.bf16.msra.mxu1 %v15439_v12  ;;  %v15504_v25 = vld [vmem:[#allocation19 + $0x72c] ss:$16 sps:$4 sm:$0xff]   ;;  %v15507_v12 = vld [vmem:[#allocation19 + $0xb24] ss:$16 sps:$4 sm:$0xff]  }
 0x6c4   :  { %6487 = vmatprep.subr.bf16.mxu0 %v15444_v53  ;;  %7574 = vmatprep.subr.bf16.mxu1 %v15447_v7  ;;  %v15510_v53 = vld [vmem:[#allocation19 + $0x74c] ss:$16 sps:$4 sm:$0xff]   ;;  %v15513_v7 = vld [vmem:[#allocation19 + $0xb44] ss:$16 sps:$4 sm:$0xff]  }
 0x6c7   :  { %6488 = vmatpush1.bf16.msra.mxu0 %v15442_v4  ;;  %7575 = vmatpush1.bf16.msra.mxu1 %v15445_v32  ;;  %v15508_v4 = vld [vmem:[#allocation19 + $0x748] ss:$16 sps:$4 sm:$0xff]   ;;  %v15511_v32 = vld [vmem:[#allocation19 + $0xb40] ss:$16 sps:$4 sm:$0xff]  }
 0x6c8   :  { %6755 = vmatprep.subr.bf16.mxu0 %v15450_v13  ;;  %7842 = vmatprep.subr.bf16.mxu1 %v15453_v3  ;;  %v15519_v13 = vld [vmem:[#allocation19 + $0xb64] ss:$16 sps:$4 sm:$0xff]   ;;  %v15514_v3 = vld [vmem:[#allocation19 + $0x768] ss:$16 sps:$4 sm:$0xff]  }
 0x6ca   :  { %6506 = vmatmul.mubr.bf16.vlgmr.msra.gmra.mrb[8].mxu0 %v17438_v60  ;;  %7593 = vmatmul.mubr.bf16.vlgmr.msra.gmra.mrb[4].mxu1 %v17470_v62  ;;  %v15468_v60 = vld [vmem:[#allocation19 + $0x66c] ss:$16 sps:$4 sm:$0xff]  }
 0x6cb   :  { %6756 = vmatpush1.bf16.msra.mxu0 %v15448_v59  ;;  %7843 = vmatpush1.bf16.msra.mxu1 %v15451_v47  ;;  %v15522_v59 = vld [vmem:[#allocation19 + $0x78c] ss:$16 sps:$4 sm:$0xff]   ;;  %v15525_v47 = vld [vmem:[#allocation19 + $0xb84] ss:$16 sps:$4 sm:$0xff]  }
 0x6cc   :  { %6757 = vmatprep.subr.bf16.mxu0 %v15456_v31  ;;  %7844 = vmatprep.subr.bf16.mxu1 %v15459_v52  ;;  %v15520_v31 = vld [vmem:[#allocation19 + $0x788] ss:$16 sps:$4 sm:$0xff]   ;;  %v15523_v52 = vld [vmem:[#allocation19 + $0xb80] ss:$16 sps:$4 sm:$0xff]  }
 0x6cd   :  { %6787 = vmatprep.mubr.bf16.mxu0 %v16010_v24  ;;  %7874 = vmatprep.mubr.bf16.mxu1 %v16010_v24 }
 0x6cf   :  { %6758 = vmatpush1.bf16.msra.mxu0 %v15454_v50  ;;  %7845 = vmatpush1.bf16.msra.mxu1 %v15457_v49  ;;  %v15528_v50 = vld [vmem:[#allocation19 + $0x7ac] ss:$16 sps:$4 sm:$0xff]   ;;  %v15531_v49 = vld [vmem:[#allocation19 + $0xba4] ss:$16 sps:$4 sm:$0xff]  }
 0x6d0   :  { %6759 = vmatprep.subr.bf16.mxu0 %v15462_v63  ;;  %7846 = vmatprep.subr.bf16.mxu1 %v15465_v14  ;;  %v15526_v63 = vld [vmem:[#allocation19 + $0x7a8] ss:$16 sps:$4 sm:$0xff]   ;;  %v15529_v14 = vld [vmem:[#allocation19 + $0xba0] ss:$16 sps:$4 sm:$0xff]  }
 0x6d3   :  { %6760 = vmatpush1.bf16.msra.mxu0 %v15460_v8  ;;  %7847 = vmatpush1.bf16.msra.mxu1 %v15463_v16  ;;  %v15534_v8 = vld [vmem:[#allocation19 + $0x7cc] ss:$16 sps:$4 sm:$0xff]   ;;  %v15537_v16 = vld [vmem:[#allocation19 + $0xbc4] ss:$16 sps:$4 sm:$0xff]  }
 0x6d4   :  { %6761 = vmatprep.subr.bf16.mxu0 %v15468_v60  ;;  %7848 = vmatprep.subr.bf16.mxu1 %v15471_v11 }
 0x6d7   :  { %6762 = vmatpush1.bf16.msra.mxu0 %v15466_v61  ;;  %7849 = vmatpush1.bf16.msra.mxu1 %v15469_v44 }
 0x6d8   :  { %6763 = vmatprep.subr.bf16.mxu0 %v15474_v23  ;;  %7850 = vmatprep.subr.bf16.mxu1 %v15477_v26 }
 0x6db   :  { %6764 = vmatpush1.bf16.msra.mxu0 %v15472_v30  ;;  %7851 = vmatpush1.bf16.msra.mxu1 %v15475_v55 }
 0x6dc   :  { %6765 = vmatprep.subr.bf16.mxu0 %v15480_v58  ;;  %7852 = vmatprep.subr.bf16.mxu1 %v15483_v51  ;;  %v15532_v58 = vld [vmem:[#allocation19 + $0x7c8] ss:$16 sps:$4 sm:$0xff]   ;;  %v15535_v51 = vld [vmem:[#allocation19 + $0xbc0] ss:$16 sps:$4 sm:$0xff]  }
 0x6dd   :  { %v17476_v36 = vpop.f32.mrb[240].mxu0  ;;  %v17478_v57 = vpop.f32.mrb[236].mxu1 }
 0x6de   :  { %v17480_v54 = vpop.f32.mrb[241].mxu0  ;;  %v17482_v40 = vpop.f32.mrb[237].mxu1 }
 0x6df   :  { %v5145_v34 = vpop.f32.mrb[242].mxu0  ;;  %v5906_v0 = vpop.f32.mrb[238].mxu1  ;;  %6766 = vmatpush1.bf16.msra.mxu0 %v15478_v43  ;;  %7853 = vmatpush1.bf16.msra.mxu1 %v15481_v9 }
 0x6e0   :  { %v5146_v42 = vpop.f32.mrb[243].mxu0  ;;  %v5907_v33 = vpop.f32.mrb[239].mxu1  ;;  %6767 = vmatprep.subr.bf16.mxu0 %v15486_v28  ;;  %7854 = vmatprep.subr.bf16.mxu1 %v15489_v10  ;;  %v15540_v10 = vld [vmem:[#allocation19 + $0x7ec] ss:$16 sps:$4 sm:$0xff]   ;;  %v15543_v34 = vld [vmem:[#allocation19 + $0xbe4] ss:$16 sps:$4 sm:$0xff]  }
 0x6e1   :  { %v15549_v33 = vld [vmem:[#allocation19 + $0xc04] ss:$16 sps:$4 sm:$0xff]  }
 0x6e3   :  { %6768 = vmatpush1.bf16.msra.mxu0 %v15484_v41  ;;  %7855 = vmatpush1.bf16.msra.mxu1 %v15487_v21  ;;  %v15538_v41 = vld [vmem:[#allocation19 + $0x7e8] ss:$16 sps:$4 sm:$0xff]   ;;  %v15541_v21 = vld [vmem:[#allocation19 + $0xbe0] ss:$16 sps:$4 sm:$0xff]  }
 0x6e4   :  { %6769 = vmatprep.subr.bf16.mxu0 %v15492_v22  ;;  %7856 = vmatprep.subr.bf16.mxu1 %v15495_v46  ;;  %v7929_v46 = vld [vmem:[#allocation7 + $0xb] ss:$14 sm:$0x3] }
 0x6e7   :  { %6770 = vmatpush1.bf16.msra.mxu0 %v15490_v29  ;;  %7857 = vmatpush1.bf16.msra.mxu1 %v15493_v19  ;;  %v15544_v29 = vld [vmem:[#allocation19 + $0x808] ss:$16 sps:$4 sm:$0xff]   ;;  %v15555_v19 = vld [vmem:[#allocation19 + $0xc24] ss:$16 sps:$4 sm:$0xff]  }
 0x6e8   :  { %7037 = vmatprep.subr.bf16.mxu0 %v15498_v5  ;;  %8124 = vmatprep.subr.bf16.mxu1 %v15501_v45  ;;  %v15550_v5 = vld [vmem:[#allocation19 + $0x828] ss:$16 sps:$4 sm:$0xff]   ;;  %v15553_v45 = vld [vmem:[#allocation19 + $0xc20] ss:$16 sps:$4 sm:$0xff]  }
 0x6ea   :  { %6788 = vmatmul.mubr.bf16.vlgmr.msra.gmra.mrb[12].mxu0 %v17444_v48  ;;  %7875 = vmatmul.mubr.bf16.vlgmr.msra.gmra.mrb[8].mxu1 %v17484_v6  ;;  %v15516_v48 = vld [vmem:[#allocation19 + $0x76c] ss:$16 sps:$4 sm:$0xff]  }
 0x6eb   :  { %7038 = vmatpush1.bf16.msra.mxu0 %v15496_v17  ;;  %8125 = vmatpush1.bf16.msra.mxu1 %v15499_v37  ;;  %v15561_v17 = vld [vmem:[#allocation19 + $0xc44] ss:$16 sps:$4 sm:$0xff]   ;;  %v15556_v37 = vld [vmem:[#allocation19 + $0x848] ss:$16 sps:$4 sm:$0xff]  }
 0x6ec   :  { %7039 = vmatprep.subr.bf16.mxu0 %v15504_v25  ;;  %8126 = vmatprep.subr.bf16.mxu1 %v15507_v12  ;;  %v15559_v25 = vld [vmem:[#allocation19 + $0xc40] ss:$16 sps:$4 sm:$0xff]   ;;  %v15567_v12 = vld [vmem:[#allocation19 + $0xc64] ss:$16 sps:$4 sm:$0xff]  }
 0x6ed   :  { %7069 = vmatprep.mubr.bf16.mxu0 %v16010_v24  ;;  %8156 = vmatprep.mubr.bf16.mxu1 %v16010_v24 }
 0x6ef   :  { %7040 = vmatpush1.bf16.msra.mxu0 %v15502_v20  ;;  %8127 = vmatpush1.bf16.msra.mxu1 %v15505_v18  ;;  %v15562_v20 = vld [vmem:[#allocation19 + $0x868] ss:$16 sps:$4 sm:$0xff]   ;;  %v15565_v18 = vld [vmem:[#allocation19 + $0xc60] ss:$16 sps:$4 sm:$0xff]  }
 0x6f0   :  { %7041 = vmatprep.subr.bf16.mxu0 %v15510_v53  ;;  %8128 = vmatprep.subr.bf16.mxu1 %v15513_v7  ;;  %v15570_v53 = vld [vmem:[#allocation19 + $0x88c] ss:$16 sps:$4 sm:$0xff]   ;;  %v15573_v7 = vld [vmem:[#allocation19 + $0xc84] ss:$16 sps:$4 sm:$0xff]  }
 0x6f3   :  { %7042 = vmatpush1.bf16.msra.mxu0 %v15508_v4  ;;  %8129 = vmatpush1.bf16.msra.mxu1 %v15511_v32  ;;  %v15568_v4 = vld [vmem:[#allocation19 + $0x888] ss:$16 sps:$4 sm:$0xff]   ;;  %v15571_v32 = vld [vmem:[#allocation19 + $0xc80] ss:$16 sps:$4 sm:$0xff]  }
 0x6f4   :  { %7043 = vmatprep.subr.bf16.mxu0 %v15516_v48  ;;  %8130 = vmatprep.subr.bf16.mxu1 %v15519_v13  ;;  %v15576_v48 = vld [vmem:[#allocation19 + $0x8ac] ss:$16 sps:$4 sm:$0xff]   ;;  %v15579_v13 = vld [vmem:[#allocation19 + $0xca4] ss:$16 sps:$4 sm:$0xff]  }
 0x6f7   :  { %7044 = vmatpush1.bf16.msra.mxu0 %v15514_v3  ;;  %8131 = vmatpush1.bf16.msra.mxu1 %v15517_v56  ;;  %v15574_v3 = vld [vmem:[#allocation19 + $0x8a8] ss:$16 sps:$4 sm:$0xff]   ;;  %v15577_v56 = vld [vmem:[#allocation19 + $0xca0] ss:$16 sps:$4 sm:$0xff]  }
 0x6f8   :  { %7045 = vmatprep.subr.bf16.mxu0 %v15522_v59  ;;  %8132 = vmatprep.subr.bf16.mxu1 %v15525_v47  ;;  %v15582_v59 = vld [vmem:[#allocation19 + $0x8cc] ss:$16 sps:$4 sm:$0xff]   ;;  %v15585_v47 = vld [vmem:[#allocation19 + $0xcc4] ss:$16 sps:$4 sm:$0xff]  }
 0x6fb   :  { %7046 = vmatpush1.bf16.msra.mxu0 %v15520_v31  ;;  %8133 = vmatpush1.bf16.msra.mxu1 %v15523_v52 }
 0x6fc   :  { %7047 = vmatprep.subr.bf16.mxu0 %v15528_v50  ;;  %8134 = vmatprep.subr.bf16.mxu1 %v15531_v49 }
 0x6fd   :  { %v5342_v60 = vpop.f32.mrb[244].mxu0  ;;  %v6184_v11 = vpop.f32.mrb[240].mxu1 }
 0x6fe   :  { %v5343_v61 = vadd.f32 %v5342_v60, %v17462_v38  ;;  %v5344_v44 = vpop.f32.mrb[245].mxu0  ;;  %v6186_v23 = vpop.f32.mrb[241].mxu1 }
 0x6ff   :  { %v5345_v26 = vadd.f32 %v5344_v44, %v17466_v39  ;;  %v5346_v30 = vpop.f32.mrb[246].mxu0  ;;  %v6188_v55 = vpop.f32.mrb[242].mxu1  ;;  %7048 = vmatpush1.bf16.msra.mxu0 %v15526_v63  ;;  %8135 = vmatpush1.bf16.msra.mxu1 %v15529_v14  ;;  %v15583_v44 = vld [vmem:[#allocation19 + $0xcc0] ss:$16 sps:$4 sm:$0xff]  }
 0x700   :  { %v5668_v43 = vadd.f32 %v17464_v35, %v5343_v61  ;;  %v5347_v9 = vpop.f32.mrb[247].mxu0  ;;  %v6189_v28 = vpop.f32.mrb[243].mxu1  ;;  %7049 = vmatprep.subr.bf16.mxu0 %v15534_v8  ;;  %8136 = vmatprep.subr.bf16.mxu1 %v15537_v16  ;;  %v15546_v35 = vld [vmem:[#allocation19 + $0x80c] ss:$16 sps:$4 sm:$0xff]   ;;  %v15580_v61 = vld [vmem:[#allocation19 + $0x8c8] ss:$16 sps:$4 sm:$0xff]  }
 0x701   :  { %v5669_v38 = vadd.f32 %v17468_v15, %v5345_v26  ;;  %v15547_v15 = vld [vmem:[#allocation19 + $0xc00] ss:$16 sps:$4 sm:$0xff]   ;;  %v15591_v30 = vld [vmem:[#allocation19 + $0xce4] ss:$16 sps:$4 sm:$0xff]   ;;  %v15586_v55 = vld [vmem:[#allocation19 + $0x8e8] ss:$16 sps:$4 sm:$0xff]  }
 0x702   :  { %v5950_v0 = vadd.f32 %v17478_v57, %v5668_v43  ;;  %v17498_v57 = vpack.c.bf16 %v7929_v46, %v7929_v46  ;;  %v8211_v43 = vld [vmem:[#allocation7 + $0xc] ss:$14 sm:$0x3]  ;;  %v15592_v9 = vld [vmem:[#allocation19 + $0x908] ss:$16 sps:$4 sm:$0xff]  }
 0x703   :  { %v5951_v39 = vadd.f32 %v17482_v40, %v5669_v38  ;;  %7050 = vmatpush1.bf16.msra.mxu0 %v15532_v58  ;;  %8137 = vmatpush1.bf16.msra.mxu1 %v15535_v51  ;;  %v15552_v40 = vld [vmem:[#allocation19 + $0x82c] ss:$16 sps:$4 sm:$0xff]   ;;  %v15589_v58 = vld [vmem:[#allocation19 + $0xce0] ss:$16 sps:$4 sm:$0xff]   ;;  %v15597_v51 = vld [vmem:[#allocation19 + $0xd04] ss:$16 sps:$4 sm:$0xff]  }
 0x704   :  { %v17496_v42 = vadd.f32 %v6184_v11, %v5950_v0  ;;  %7051 = vmatprep.subr.bf16.mxu0 %v15540_v10  ;;  %8138 = vmatprep.subr.bf16.mxu1 %v15543_v34  ;;  %v15595_v28 = vld [vmem:[#allocation19 + $0xd00] ss:$16 sps:$4 sm:$0xff]   ;;  %v17515_v10 = vpack.c.bf16 %v8211_v43, %v8211_v43  ;;  %v15600_v34 = vld [vmem:[#allocation19 + $0x92c] ss:$16 sps:$4 sm:$0xff]   ;;  %v15603_v38 = vld [vmem:[#allocation19 + $0xd24] ss:$16 sps:$4 sm:$0xff]  }
 0x705   :  { %v6233_v22 = vadd.f32 %v6186_v23, %v5951_v39  ;;  %v15598_v0 = vld [vmem:[#allocation19 + $0x928] ss:$16 sps:$4 sm:$0xff]   ;;  %v15601_v39 = vld [vmem:[#allocation19 + $0xd20] ss:$16 sps:$4 sm:$0xff]  }
 0x706   :  { %v15613_v46 = vld [vmem:[#allocation19 + $0xd60] ss:$16 sps:$4 sm:$0xff]  }
 0x707   :  { %7052 = vmatpush1.bf16.msra.mxu0 %v15538_v41  ;;  %8139 = vmatpush1.bf16.msra.mxu1 %v15541_v21  ;;  %v15606_v41 = vld [vmem:[#allocation19 + $0x94c] ss:$16 sps:$4 sm:$0xff]   ;;  %v15609_v21 = vld [vmem:[#allocation19 + $0xd44] ss:$16 sps:$4 sm:$0xff]  }
 0x708   :  { %7319 = vmatprep.subr.bf16.mxu0 %v15546_v35  ;;  %8406 = vmatprep.subr.bf16.mxu1 %v15549_v33  ;;  %v15607_v35 = vld [vmem:[#allocation19 + $0xd40] ss:$16 sps:$4 sm:$0xff]   ;;  %v15615_v33 = vld [vmem:[#allocation19 + $0xd64] ss:$16 sps:$4 sm:$0xff]  }
 0x70a   :  { %7070 = vmatmul.mubr.bf16.vlgmr.msra.gmra.mrb[16].mxu0 %v17450_v1  ;;  %8157 = vmatmul.mubr.bf16.vlgmr.msra.gmra.mrb[12].mxu1 %v17498_v57  ;;  %v15564_v1 = vld [vmem:[#allocation19 + $0x86c] ss:$16 sps:$4 sm:$0xff]  }
 0x70b   :  { %7320 = vmatpush1.bf16.msra.mxu0 %v15544_v29  ;;  %8407 = vmatpush1.bf16.msra.mxu1 %v15547_v15  ;;  %v15618_v29 = vld [vmem:[#allocation19 + $0x98c] ss:$16 sps:$4 sm:$0xff]   ;;  %v15621_v15 = vld [vmem:[#allocation19 + $0xd84] ss:$16 sps:$4 sm:$0xff]  }
 0x70c   :  { %7321 = vmatprep.subr.bf16.mxu0 %v15552_v40  ;;  %8408 = vmatprep.subr.bf16.mxu1 %v15555_v19  ;;  %v15616_v40 = vld [vmem:[#allocation19 + $0x988] ss:$16 sps:$4 sm:$0xff]   ;;  %v15619_v19 = vld [vmem:[#allocation19 + $0xd80] ss:$16 sps:$4 sm:$0xff]  }
 0x70d   :  { %7351 = vmatprep.mubr.bf16.mxu0 %v16010_v24  ;;  %8438 = vmatprep.mubr.bf16.mxu1 %v16010_v24 }
 0x70f   :  { %7322 = vmatpush1.bf16.msra.mxu0 %v15550_v5  ;;  %8409 = vmatpush1.bf16.msra.mxu1 %v15553_v45  ;;  %v15624_v5 = vld [vmem:[#allocation19 + $0x9ac] ss:$16 sps:$4 sm:$0xff]   ;;  %v15627_v45 = vld [vmem:[#allocation19 + $0xda4] ss:$16 sps:$4 sm:$0xff]  }
 0x710   :  { %7323 = vmatprep.subr.bf16.mxu0 %v15558_v2  ;;  %8410 = vmatprep.subr.bf16.mxu1 %v15561_v17  ;;  %v15622_v2 = vld [vmem:[#allocation19 + $0x9a8] ss:$16 sps:$4 sm:$0xff]   ;;  %v15625_v17 = vld [vmem:[#allocation19 + $0xda0] ss:$16 sps:$4 sm:$0xff]  }
 0x713   :  { %7324 = vmatpush1.bf16.msra.mxu0 %v15556_v37  ;;  %8411 = vmatpush1.bf16.msra.mxu1 %v15559_v25  ;;  %v15630_v37 = vld [vmem:[#allocation19 + $0x9cc] ss:$16 sps:$4 sm:$0xff]   ;;  %v15633_v25 = vld [vmem:[#allocation19 + $0xdc4] ss:$16 sps:$4 sm:$0xff]  }
 0x714   :  { %7325 = vmatprep.subr.bf16.mxu0 %v15564_v1  ;;  %8412 = vmatprep.subr.bf16.mxu1 %v15567_v12 }
 0x717   :  { %7326 = vmatpush1.bf16.msra.mxu0 %v15562_v20  ;;  %8413 = vmatpush1.bf16.msra.mxu1 %v15565_v18 }
 0x718   :  { %7327 = vmatprep.subr.bf16.mxu0 %v15570_v53  ;;  %8414 = vmatprep.subr.bf16.mxu1 %v15573_v7 }
 0x71b   :  { %7328 = vmatpush1.bf16.msra.mxu0 %v15568_v4  ;;  %8415 = vmatpush1.bf16.msra.mxu1 %v15571_v32 }
 0x71c   :  { %7329 = vmatprep.subr.bf16.mxu0 %v15576_v48  ;;  %8416 = vmatprep.subr.bf16.mxu1 %v15579_v13 }
 0x71d   :  { %v5383_v31 = vpop.f32.mrb[248].mxu0  ;;  %v6466_v52 = vpop.f32.mrb[244].mxu1 }
 0x71e   :  { %v17505_v50 = vadd.f32 %v5383_v31, %v17476_v36  ;;  %v17508_v49 = vadd.f32 %v6466_v52, %v17496_v42  ;;  %v5385_v63 = vpop.f32.mrb[249].mxu0  ;;  %v6468_v14 = vpop.f32.mrb[245].mxu1  ;;  %v15588_v36 = vld [vmem:[#allocation19 + $0x8ec] ss:$16 sps:$4 sm:$0xff]   ;;  %v15604_v42 = vld [vmem:[#allocation19 + $0x948] ss:$16 sps:$4 sm:$0xff]  }
 0x71f   :  { %v17511_v8 = vadd.f32 %v5385_v63, %v17480_v54  ;;  %v17513_v16 = vadd.f32 %v6468_v14, %v6233_v22  ;;  %v5387_v60 = vpop.f32.mrb[250].mxu0  ;;  %v6470_v11 = vpop.f32.mrb[246].mxu1  ;;  %7330 = vmatpush1.bf16.msra.mxu0 %v15574_v3  ;;  %8417 = vmatpush1.bf16.msra.mxu1 %v15577_v56  ;;  %v15594_v54 = vld [vmem:[#allocation19 + $0x90c] ss:$16 sps:$4 sm:$0xff]   ;;  %v15610_v22 = vld [vmem:[#allocation19 + $0x968] ss:$16 sps:$4 sm:$0xff]  }
 0x720   :  { %v5388_v23 = vpop.f32.mrb[251].mxu0  ;;  %v6471_v26 = vpop.f32.mrb[247].mxu1  ;;  %7331 = vmatprep.subr.bf16.mxu0 %v15582_v59  ;;  %8418 = vmatprep.subr.bf16.mxu1 %v15585_v47  ;;  %v15628_v3 = vld [vmem:[#allocation19 + $0x9c8] ss:$16 sps:$4 sm:$0xff]   ;;  %v15631_v56 = vld [vmem:[#allocation19 + $0xdc0] ss:$16 sps:$4 sm:$0xff]  }
 0x721   :  { %v15636_v31 = vld [vmem:[#allocation19 + $0x9ec] ss:$16 sps:$4 sm:$0xff]   ;;  %v15639_v52 = vld [vmem:[#allocation19 + $0xde4] ss:$16 sps:$4 sm:$0xff]   ;;  %v15643_v11 = vld [vmem:[#allocation19 + $0xa28] ss:$16 sps:$4 sm:$0xff]  }
 0x722   :  { %v15642_v63 = vld [vmem:[#allocation19 + $0xa0c] ss:$16 sps:$4 sm:$0xff]   ;;  %v8493_v14 = vld [vmem:[#allocation7 + $0xd] ss:$14 sm:$0x3] }
 0x723   :  { %7332 = vmatpush1.bf16.msra.mxu0 %v15580_v61  ;;  %8419 = vmatpush1.bf16.msra.mxu1 %v15583_v44  ;;  %v15645_v60 = vld [vmem:[#allocation19 + $0xa2c] ss:$16 sps:$4 sm:$0xff]   ;;  %v15646_v44 = vld [vmem:[#allocation19 + $0xa48] ss:$16 sps:$4 sm:$0xff]  }
 0x724   :  { %7333 = vmatprep.subr.bf16.mxu0 %v15588_v36  ;;  %8420 = vmatprep.subr.bf16.mxu1 %v15591_v30  ;;  %v15648_v61 = vld [vmem:[#allocation19 + $0xa4c] ss:$16 sps:$4 sm:$0xff]   ;;  %v15649_v26 = vld [vmem:[#allocation19 + $0xa68] ss:$16 sps:$4 sm:$0xff]  }
 0x725   :  { %v15651_v23 = vld [vmem:[#allocation19 + $0xa6c] ss:$16 sps:$4 sm:$0xff]   ;;  %v15652_v30 = vld [vmem:[#allocation19 + $0xa88] ss:$16 sps:$4 sm:$0xff]  }
 0x726   :  { %v15654_v36 = vld [vmem:[#allocation19 + $0xa8c] ss:$16 sps:$4 sm:$0xff]  }
 0x727   :  { %7334 = vmatpush1.bf16.msra.mxu0 %v15586_v55  ;;  %8421 = vmatpush1.bf16.msra.mxu1 %v15589_v58  ;;  %v15655_v55 = vld [vmem:[#allocation19 + $0xaa8] ss:$16 sps:$4 sm:$0xff]   ;;  %v15660_v58 = vld [vmem:[#allocation19 + $0xacc] ss:$16 sps:$4 sm:$0xff]  }
 0x728   :  { %7601 = vmatprep.subr.bf16.mxu0 %v15594_v54  ;;  %8688 = vmatprep.subr.bf16.mxu1 %v15597_v51 }
 0x72a   :  { %7352 = vmatmul.mubr.bf16.vlgmr.msra.gmra.mrb[20].mxu0 %v17456_v27  ;;  %8439 = vmatmul.mubr.bf16.vlgmr.msra.gmra.mrb[16].mxu1 %v17515_v10  ;;  %v15612_v27 = vld [vmem:[#allocation19 + $0x96c] ss:$16 sps:$4 sm:$0xff]  }
 0x72b   :  { %7602 = vmatpush1.bf16.msra.mxu0 %v15592_v9  ;;  %8689 = vmatpush1.bf16.msra.mxu1 %v15595_v28 }
 0x72c   :  { %7603 = vmatprep.subr.bf16.mxu0 %v15600_v34  ;;  %8690 = vmatprep.subr.bf16.mxu1 %v15603_v38 }
 0x72d   :  { %7633 = vmatprep.mubr.bf16.mxu0 %v16010_v24  ;;  %8720 = vmatprep.mubr.bf16.mxu1 %v16010_v24 }
 0x72f   :  { %7604 = vmatpush1.bf16.msra.mxu0 %v15598_v0  ;;  %8691 = vmatpush1.bf16.msra.mxu1 %v15601_v39 }
 0x730   :  { %7605 = vmatprep.subr.bf16.mxu0 %v15606_v41  ;;  %8692 = vmatprep.subr.bf16.mxu1 %v15609_v21  ;;  %v15658_v21 = vld [vmem:[#allocation19 + $0xac8] ss:$16 sps:$4 sm:$0xff]  }
 0x733   :  { %7606 = vmatpush1.bf16.msra.mxu0 %v15604_v42  ;;  %8693 = vmatpush1.bf16.msra.mxu1 %v15607_v35 }
 0x734   :  { %7607 = vmatprep.subr.bf16.mxu0 %v15612_v27  ;;  %8694 = vmatprep.subr.bf16.mxu1 %v15615_v33  ;;  %v15663_v27 = vld [vmem:[#allocation19 + $0xaec] ss:$16 sps:$4 sm:$0xff]   ;;  %v8808_v33 = vld [vmem:[#allocation22] sm:$0xff] }
 0x737   :  { %7608 = vmatpush1.bf16.msra.mxu0 %v15610_v22  ;;  %8695 = vmatpush1.bf16.msra.mxu1 %v15613_v46  ;;  %v8816_v22 = vld [vmem:[#allocation22 + $0x40] sm:$0xff] }
 0x738   :  { %7609 = vmatprep.subr.bf16.mxu0 %v15618_v29  ;;  %8696 = vmatprep.subr.bf16.mxu1 %v15621_v15  ;;  %v13364_v46 = vcombine.low %v8808_v33, %v8816_v22  ;;  %v13365_v29 = vcombine.high %v8808_v33, %v8816_v22  ;;  %v8824_v15 = vld [vmem:[#allocation22 + $0x80] sm:$0xff] }
 0x739   :  { %v15685_v22 = vld [vmem:[#allocation19 + $0xbe8] ss:$16 sps:$4 sm:$0xff]  }
 0x73b   :  { %7610 = vmatpush1.bf16.msra.mxu0 %v15616_v40  ;;  %8697 = vmatpush1.bf16.msra.mxu1 %v15619_v19  ;;  %v8832_v40 = vld [vmem:[#allocation22 + $0xc0] sm:$0xff] }
 0x73c   :  { %7611 = vmatprep.subr.bf16.mxu0 %v15624_v5  ;;  %8698 = vmatprep.subr.bf16.mxu1 %v15627_v45  ;;  %v13381_v19 = vcombine.high %v8824_v15, %v8832_v40  ;;  %v8840_v5 = vld [vmem:[#allocation22 + $0x100] sm:$0xff] }
 0x73d   :  { %v5661_v1 = vpop.f32.mrb[252].mxu0  ;;  %v6748_v12 = vpop.f32.mrb[248].mxu1  ;;  %v15661_v45 = vld [vmem:[#allocation19 + $0xae8] ss:$16 sps:$4 sm:$0xff]  }
 0x73e   :  { %v5670_v20 = vadd.f32 %v5661_v1, %v17505_v50  ;;  %v6796_v18 = vadd.f32 %v6748_v12, %v17508_v49  ;;  %v5663_v53 = vpop.f32.mrb[253].mxu0  ;;  %v6750_v7 = vpop.f32.mrb[249].mxu1  ;;  %v15634_v50 = vld [vmem:[#allocation19 + $0x9e8] ss:$16 sps:$4 sm:$0xff]   ;;  %v15637_v49 = vld [vmem:[#allocation19 + $0xde0] ss:$16 sps:$4 sm:$0xff]  }
 0x73f   :  { %v5671_v4 = vadd.f32 %v5663_v53, %v17511_v8  ;;  %v6797_v32 = vadd.f32 %v6750_v7, %v17513_v16  ;;  %v5665_v48 = vpop.f32.mrb[254].mxu0  ;;  %v6752_v13 = vpop.f32.mrb[250].mxu1  ;;  %7612 = vmatpush1.bf16.msra.mxu0 %v15622_v2  ;;  %8699 = vmatpush1.bf16.msra.mxu1 %v15625_v17  ;;  %v15640_v8 = vld [vmem:[#allocation19 + $0xa08] ss:$16 sps:$4 sm:$0xff]   ;;  %v17525_v16 = vpack.c.bf16 %v8493_v14, %v8493_v14  ;;  %v15666_v17 = vld [vmem:[#allocation19 + $0xb0c] ss:$16 sps:$4 sm:$0xff]  }
 0x740   :  { %v5666_v59 = vpop.f32.mrb[255].mxu0  ;;  %v6753_v47 = vpop.f32.mrb[251].mxu1  ;;  %7613 = vmatprep.subr.bf16.mxu0 %v15630_v37  ;;  %8700 = vmatprep.subr.bf16.mxu1 %v15633_v25  ;;  %v8848_v2 = vld [vmem:[#allocation22 + $0x140] sm:$0xff]  ;;  %v13380_v37 = vcombine.low %v8824_v15, %v8832_v40  ;;  %v15672_v13 = vld [vmem:[#allocation19 + $0xb4c] ss:$16 sps:$4 sm:$0xff]  }
 0x741   :  { %v13397_v25 = vcombine.high %v8840_v5, %v8848_v2  ;;  %v8856_v1 = vld [vmem:[#allocation22 + $0x180] sm:$0xff]  ;;  %v13396_v53 = vcombine.low %v8840_v5, %v8848_v2 }
 0x742   :  { %v8864_v12 = vld [vmem:[#allocation22 + $0x1c0] sm:$0xff] }
 0x743   :  { %7614 = vmatpush1.bf16.msra.mxu0 %v15628_v3  ;;  %8701 = vmatpush1.bf16.msra.mxu1 %v15631_v56  ;;  %v13413_v7 = vcombine.high %v8856_v1, %v8864_v12  ;;  %v15667_v48 = vld [vmem:[#allocation19 + $0xb28] ss:$16 sps:$4 sm:$0xff]   ;;  %v13412_v3 = vcombine.low %v8856_v1, %v8864_v12  ;;  %v15696_v12 = vld [vmem:[#allocation19 + $0xc4c] ss:$16 sps:$4 sm:$0xff]  }
 0x744   :  { %7615 = vmatprep.subr.bf16.mxu0 %v15636_v31  ;;  %8702 = vmatprep.subr.bf16.mxu1 %v15639_v52  ;;  %v8888_v59 = vld [vmem:[#allocation22 + $0x280] sm:$0xff]  ;;  %v15675_v52 = vld [vmem:[#allocation19 + $0xb6c] ss:$16 sps:$4 sm:$0xff]  }
 0x745   :  { %v8896_v47 = vld [vmem:[#allocation22 + $0x2c0] sm:$0xff] }
 0x746   :  { %v15670_v31 = vld [vmem:[#allocation19 + $0xb48] ss:$16 sps:$4 sm:$0xff]   ;;  %v13444_v14 = vcombine.low %v8888_v59, %v8896_v47 }
 0x747   :  { %7616 = vmatpush1.bf16.msra.mxu0 %v15634_v50  ;;  %8703 = vmatpush1.bf16.msra.mxu1 %v15637_v49  ;;  %v13445_v50 = vcombine.high %v8888_v59, %v8896_v47  ;;  %v15673_v49 = vld [vmem:[#allocation19 + $0xb68] ss:$16 sps:$4 sm:$0xff]   ;;  %v15702_v59 = vld [vmem:[#allocation19 + $0xc8c] ss:$16 sps:$4 sm:$0xff]  }
 0x748   :  { %7883 = vmatprep.subr.bf16.mxu0 %v15642_v63  ;;  %11964 = vmatprep.subr.bf16.mxu1 %v13365_v29  ;;  %v15678_v63 = vld [vmem:[#allocation19 + $0xb8c] ss:$16 sps:$4 sm:$0xff]   ;;  %v8952_v40 = vld [vmem:[#allocation22 + $0x480] sm:$0xff] }
 0x749   :  { %v15688_v5 = vld [vmem:[#allocation19 + $0xc08] ss:$16 sps:$4 sm:$0xff]  }
 0x74a   :  { %7634 = vmatmul.mubr.bf16.vlgmr.msra.gmra.mrb[24].mxu0 %v17470_v62  ;;  %8721 = vmatmul.mubr.bf16.vlgmr.msra.gmra.mrb[20].mxu1 %v17525_v16  ;;  %v15657_v62 = vld [vmem:[#allocation19 + $0xaac] ss:$16 sps:$4 sm:$0xff]   ;;  %v15691_v1 = vld [vmem:[#allocation19 + $0xc28] ss:$16 sps:$4 sm:$0xff]  }
 0x74b   :  { %7884 = vmatpush1.bf16.msra.mxu0 %v15640_v8  ;;  %7915 = vmatprep.mubr.bf16.mxu0 %v16010_v24  ;;  %v15676_v8 = vld [vmem:[#allocation19 + $0xb88] ss:$16 sps:$4 sm:$0xff]  }
 0x74c   :  { %7885 = vmatprep.subr.bf16.mxu0 %v15645_v60  ;;  %11965 = vmatpush1.bf16.msra.mxu1 %v13364_v46  ;;  %v15681_v60 = vld [vmem:[#allocation19 + $0xbac] ss:$16 sps:$4 sm:$0xff]  }
 0x74d   :  { %11966 = vmatprep.subr.bf16.mxu1 %v13381_v19  ;;  %v15690_v46 = vld [vmem:[#allocation19 + $0xc0c] ss:$16 sps:$4 sm:$0xff]   ;;  %v8960_v19 = vld [vmem:[#allocation22 + $0x4c0] sm:$0xff] }
 0x74f   :  { %7886 = vmatpush1.bf16.msra.mxu0 %v15643_v11  ;;  %v15679_v11 = vld [vmem:[#allocation19 + $0xba8] ss:$16 sps:$4 sm:$0xff]  }
 0x750   :  { %7887 = vmatprep.subr.bf16.mxu0 %v15648_v61  ;;  %11967 = vmatpush1.bf16.msra.mxu1 %v13380_v37  ;;  %v15684_v61 = vld [vmem:[#allocation19 + $0xbcc] ss:$16 sps:$4 sm:$0xff]   ;;  %v8968_v37 = vld [vmem:[#allocation22 + $0x500] sm:$0xff] }
 0x751   :  { %11968 = vmatprep.subr.bf16.mxu1 %v13397_v25  ;;  %v8976_v25 = vld [vmem:[#allocation22 + $0x540] sm:$0xff] }
 0x753   :  { %7888 = vmatpush1.bf16.msra.mxu0 %v15646_v44 }
 0x754   :  { %7889 = vmatprep.subr.bf16.mxu0 %v15651_v23  ;;  %11969 = vmatpush1.bf16.msra.mxu1 %v13396_v53  ;;  %v8984_v53 = vld [vmem:[#allocation22 + $0x580] sm:$0xff] }
 0x755   :  { %11970 = vmatprep.subr.bf16.mxu1 %v13413_v7  ;;  %v8992_v7 = vld [vmem:[#allocation22 + $0x5c0] sm:$0xff] }
 0x756   :  { %v13540_v47 = vcombine.low %v8984_v53, %v8992_v7 }
 0x757   :  { %7890 = vmatpush1.bf16.msra.mxu0 %v15649_v26 }
 0x758   :  { %7891 = vmatprep.subr.bf16.mxu0 %v15654_v36  ;;  %11971 = vmatpush1.bf16.msra.mxu1 %v13412_v3  ;;  %v9008_v3 = vld [vmem:[#allocation22 + $0x640] sm:$0xff] }
 0x75b   :  { %7892 = vmatpush1.bf16.msra.mxu0 %v15652_v30 }
 0x75c   :  { %7893 = vmatprep.subr.bf16.mxu0 %v15657_v62 }
 0x75d   :  { %v5943_v54 = vpop.f32.mrb[0].mxu0  ;;  %v7030_v51 = vpop.f32.mrb[252].mxu1 }
 0x75e   :  { %v17530_v43 = vadd.f32 %v5943_v54, %v5670_v20  ;;  %v17532_v9 = vadd.f32 %v7030_v51, %v6796_v18  ;;  %v5945_v28 = vpop.f32.mrb[1].mxu0  ;;  %v7032_v34 = vpop.f32.mrb[253].mxu1  ;;  %v15664_v20 = vld [vmem:[#allocation19 + $0xb08] ss:$16 sps:$4 sm:$0xff]   ;;  %v15669_v18 = vld [vmem:[#allocation19 + $0xb2c] ss:$16 sps:$4 sm:$0xff]  }
 0x75f   :  { %v17534_v38 = vadd.f32 %v5945_v28, %v5671_v4  ;;  %v17536_v0 = vadd.f32 %v7032_v34, %v6797_v32  ;;  %v5947_v39 = vpop.f32.mrb[2].mxu0  ;;  %v7034_v41 = vpop.f32.mrb[254].mxu1  ;;  %7894 = vmatpush1.bf16.msra.mxu0 %v15655_v55  ;;  %v8872_v4 = vld [vmem:[#allocation22 + $0x200] sm:$0xff] }
 0x760   :  { %v5948_v42 = vpop.f32.mrb[3].mxu0  ;;  %v7035_v35 = vpop.f32.mrb[255].mxu1  ;;  %7895 = vmatprep.subr.bf16.mxu0 %v15660_v58  ;;  %v8880_v32 = vld [vmem:[#allocation22 + $0x240] sm:$0xff] }
 0x761   :  { %v13429_v56 = vcombine.high %v8872_v4, %v8880_v32  ;;  %v15682_v28 = vld [vmem:[#allocation19 + $0xbc8] ss:$16 sps:$4 sm:$0xff]  }
 0x762   :  { %v8904_v41 = vld [vmem:[#allocation22 + $0x300] sm:$0xff] }
 0x763   :  { %7896 = vmatpush1.bf16.msra.mxu0 %v15658_v21  ;;  %11972 = vmatprep.subr.bf16.mxu1 %v13429_v56  ;;  %v8912_v21 = vld [vmem:[#allocation22 + $0x340] sm:$0xff] }
 0x764   :  { %7897 = vmatprep.subr.bf16.mxu0 %v15663_v27  ;;  %v13461_v42 = vcombine.high %v8904_v41, %v8912_v21  ;;  %v8920_v35 = vld [vmem:[#allocation22 + $0x380] sm:$0xff] }
 0x765   :  { %v8928_v27 = vld [vmem:[#allocation22 + $0x3c0] sm:$0xff] }
 0x766   :  { %v13477_v33 = vcombine.high %v8920_v35, %v8928_v27  ;;  %v13476_v29 = vcombine.low %v8920_v35, %v8928_v27  ;;  %v15697_v56 = vld [vmem:[#allocation19 + $0xc68] ss:$16 sps:$4 sm:$0xff]   ;;  %v15714_v27 = vld [vmem:[#allocation19 + $0xd0c] ss:$16 sps:$4 sm:$0xff]  }
 0x767   :  { %7898 = vmatpush1.bf16.msra.mxu0 %v15661_v45  ;;  %v15693_v45 = vld [vmem:[#allocation19 + $0xc2c] ss:$16 sps:$4 sm:$0xff]   ;;  %v9040_v35 = vld [vmem:[#allocation22 + $0x740] sm:$0xff] }
 0x768   :  { %8165 = vmatprep.subr.bf16.mxu0 %v15666_v17  ;;  %v13509_v17 = vcombine.high %v8952_v40, %v8960_v19 }
 0x76a   :  { %7916 = vmatmul.mubr.bf16.vlgmr.msra.gmra.mrb[28].mxu0 %v17484_v6  ;;  %v13428_v6 = vcombine.low %v8872_v4, %v8880_v32  ;;  %v15694_v4 = vld [vmem:[#allocation19 + $0xc48] ss:$16 sps:$4 sm:$0xff]   ;;  %v15699_v32 = vld [vmem:[#allocation19 + $0xc6c] ss:$16 sps:$4 sm:$0xff]  }
 0x76b   :  { %8166 = vmatpush1.bf16.msra.mxu0 %v15664_v20  ;;  %8197 = vmatprep.mubr.bf16.mxu0 %v16010_v24  ;;  %v13508_v20 = vcombine.low %v8952_v40, %v8960_v19  ;;  %v15718_v40 = vld [vmem:[#allocation19 + $0xd48] ss:$16 sps:$4 sm:$0xff]   ;;  %v15723_v19 = vld [vmem:[#allocation19 + $0xd6c] ss:$16 sps:$4 sm:$0xff]  }
 0x76c   :  { %8167 = vmatprep.subr.bf16.mxu0 %v15669_v18  ;;  %11973 = vmatpush1.bf16.msra.mxu1 %v13428_v6  ;;  %v13525_v18 = vcombine.high %v8968_v37, %v8976_v25  ;;  %v9024_v6 = vld [vmem:[#allocation22 + $0x6c0] sm:$0xff] }
 0x76d   :  { %11974 = vmatprep.subr.bf16.mxu1 %v13445_v50  ;;  %v15700_v50 = vld [vmem:[#allocation19 + $0xc88] ss:$16 sps:$4 sm:$0xff]  }
 0x76f   :  { %8168 = vmatpush1.bf16.msra.mxu0 %v15667_v48  ;;  %v13541_v48 = vcombine.high %v8984_v53, %v8992_v7 }
 0x770   :  { %8169 = vmatprep.subr.bf16.mxu0 %v15672_v13  ;;  %11975 = vmatpush1.bf16.msra.mxu1 %v13444_v14  ;;  %v9000_v13 = vld [vmem:[#allocation22 + $0x600] sm:$0xff] }
 0x771   :  { %11976 = vmatprep.subr.bf16.mxu1 %v13461_v42  ;;  %v9032_v42 = vld [vmem:[#allocation22 + $0x700] sm:$0xff] }
 0x773   :  { %8170 = vmatpush1.bf16.msra.mxu0 %v15670_v31  ;;  %v13557_v31 = vcombine.high %v9000_v13, %v9008_v3 }
 0x774   :  { %8171 = vmatprep.subr.bf16.mxu0 %v15675_v52  ;;  %v9016_v52 = vld [vmem:[#allocation22 + $0x680] sm:$0xff] }
 0x775   :  { %v13573_v14 = vcombine.high %v9016_v52, %v9024_v6 }
 0x777   :  { %8172 = vmatpush1.bf16.msra.mxu0 %v15673_v49  ;;  %v15705_v49 = vld [vmem:[#allocation19 + $0xcac] ss:$16 sps:$4 sm:$0xff]  }
 0x778   :  { %8173 = vmatprep.subr.bf16.mxu0 %v15678_v63  ;;  %v13556_v63 = vcombine.low %v9000_v13, %v9008_v3  ;;  %v15735_v3 = vld [vmem:[#allocation19 + $0xdec] ss:$16 sps:$4 sm:$0xff]  }
 0x77b   :  { %8174 = vmatpush1.bf16.msra.mxu0 %v15676_v8  ;;  %v15703_v8 = vld [vmem:[#allocation19 + $0xca8] ss:$16 sps:$4 sm:$0xff]  }
 0x77c   :  { %8175 = vmatprep.subr.bf16.mxu0 %v15681_v60  ;;  %v15708_v60 = vld [vmem:[#allocation19 + $0xccc] ss:$16 sps:$4 sm:$0xff]  }
 0x77d   :  { %v6225_v44 = vpop.f32.mrb[4].mxu0  ;;  %v7312_v23 = vpop.f32.mrb[0].mxu1 }
 0x77e   :  { %v17541_v26 = vadd.f32 %v6225_v44, %v17530_v43  ;;  %v17544_v36 = vadd.f32 %v7312_v23, %v17532_v9  ;;  %v6227_v30 = vpop.f32.mrb[5].mxu0  ;;  %v7314_v62 = vpop.f32.mrb[1].mxu1  ;;  %v15687_v43 = vld [vmem:[#allocation19 + $0xbec] ss:$16 sps:$4 sm:$0xff]   ;;  %v13460_v9 = vcombine.low %v8904_v41, %v8912_v21 }
 0x77f   :  { %v17547_v55 = vadd.f32 %v6227_v30, %v17534_v38  ;;  %v17550_v58 = vadd.f32 %v7314_v62, %v17536_v0  ;;  %v6229_v54 = vpop.f32.mrb[6].mxu0  ;;  %v7316_v51 = vpop.f32.mrb[2].mxu1  ;;  %8176 = vmatpush1.bf16.msra.mxu0 %v15679_v11  ;;  %v8936_v38 = vld [vmem:[#allocation22 + $0x400] sm:$0xff]  ;;  %v13572_v11 = vcombine.low %v9016_v52, %v9024_v6  ;;  %v8825_v52 = vld [vmem:[#allocation22 + $0x88] sm:$0xff] }
 0x780   :  { %v6230_v34 = vpop.f32.mrb[7].mxu0  ;;  %v7317_v39 = vpop.f32.mrb[3].mxu1  ;;  %8177 = vmatprep.subr.bf16.mxu0 %v15684_v61  ;;  %v8944_v0 = vld [vmem:[#allocation22 + $0x440] sm:$0xff]  ;;  %11977 = vmatpush1.bf16.msra.mxu1 %v13460_v9  ;;  %v15711_v9 = vld [vmem:[#allocation19 + $0xcec] ss:$16 sps:$4 sm:$0xff]  }
 0x781   :  { %11978 = vmatprep.subr.bf16.mxu1 %v13477_v33  ;;  %v13493_v15 = vcombine.high %v8936_v38, %v8944_v0  ;;  %v13492_v2 = vcombine.low %v8936_v38, %v8944_v0  ;;  %v13588_v33 = vcombine.low %v9032_v42, %v9040_v35  ;;  %v15712_v0 = vld [vmem:[#allocation19 + $0xd08] ss:$16 sps:$4 sm:$0xff]   ;;  %v8833_v6 = vld [vmem:[#allocation22 + $0xc8] sm:$0xff] }
 0x783   :  { %8178 = vmatpush1.bf16.msra.mxu0 %v15682_v28 }
 0x784   :  { %8179 = vmatprep.subr.bf16.mxu0 %v15687_v43  ;;  %11979 = vmatpush1.bf16.msra.mxu1 %v13476_v29  ;;  %v15706_v43 = vld [vmem:[#allocation19 + $0xcc8] ss:$16 sps:$4 sm:$0xff]  }
 0x785   :  { %11980 = vmatprep.subr.bf16.mxu1 %v13493_v15  ;;  %v15715_v29 = vld [vmem:[#allocation19 + $0xd28] ss:$16 sps:$4 sm:$0xff]   ;;  %v15720_v15 = vld [vmem:[#allocation19 + $0xd4c] ss:$16 sps:$4 sm:$0xff]  }
 0x787   :  { %8180 = vmatpush1.bf16.msra.mxu0 %v15685_v22 }
 0x788   :  { %8447 = vmatprep.subr.bf16.mxu0 %v15690_v46  ;;  %11981 = vmatpush1.bf16.msra.mxu1 %v13492_v2  ;;  %v15717_v46 = vld [vmem:[#allocation19 + $0xd2c] ss:$16 sps:$4 sm:$0xff]   ;;  %v15724_v2 = vld [vmem:[#allocation19 + $0xd88] ss:$16 sps:$4 sm:$0xff]  }
 0x789   :  { %11982 = vmatprep.subr.bf16.mxu1 %v13509_v17  ;;  %v15729_v17 = vld [vmem:[#allocation19 + $0xdac] ss:$16 sps:$4 sm:$0xff]  }
 0x78a   :  { %8198 = vmatmul.mubr.bf16.vlgmr.msra.gmra.mrb[32].mxu0 %v17498_v57  ;;  %v13524_v57 = vcombine.low %v8968_v37, %v8976_v25  ;;  %v15732_v37 = vld [vmem:[#allocation19 + $0xdcc] ss:$16 sps:$4 sm:$0xff]  }
 0x78b   :  { %8448 = vmatpush1.bf16.msra.mxu0 %v15688_v5  ;;  %8479 = vmatprep.mubr.bf16.mxu0 %v16010_v24  ;;  %v15721_v5 = vld [vmem:[#allocation19 + $0xd68] ss:$16 sps:$4 sm:$0xff]  }
 0x78c   :  { %8449 = vmatprep.subr.bf16.mxu0 %v15693_v45  ;;  %11983 = vmatpush1.bf16.msra.mxu1 %v13508_v20  ;;  %v15726_v45 = vld [vmem:[#allocation19 + $0xd8c] ss:$16 sps:$4 sm:$0xff]  }
 0x78d   :  { %11984 = vmatprep.subr.bf16.mxu1 %v13525_v18 }
 0x78f   :  { %8450 = vmatpush1.bf16.msra.mxu0 %v15691_v1 }
 0x790   :  { %8451 = vmatprep.subr.bf16.mxu0 %v15696_v12  ;;  %11985 = vmatpush1.bf16.msra.mxu1 %v13524_v57  ;;  %v15730_v57 = vld [vmem:[#allocation19 + $0xdc8] ss:$16 sps:$4 sm:$0xff]  }
 0x791   :  { %11986 = vmatprep.subr.bf16.mxu1 %v13541_v48 }
 0x793   :  { %8452 = vmatpush1.bf16.msra.mxu0 %v15694_v4 }
 0x794   :  { %8453 = vmatprep.subr.bf16.mxu0 %v15699_v32  ;;  %11987 = vmatpush1.bf16.msra.mxu1 %v13540_v47  ;;  %v15733_v47 = vld [vmem:[#allocation19 + $0xde8] ss:$16 sps:$4 sm:$0xff]  }
 0x795   :  { %11988 = vmatprep.subr.bf16.mxu1 %v13557_v31 }
 0x797   :  { %8454 = vmatpush1.bf16.msra.mxu0 %v15697_v56  ;;  %v8809_v56 = vld [vmem:[#allocation22 + $0x8] sm:$0xff] }
 0x798   :  { %8455 = vmatprep.subr.bf16.mxu0 %v15702_v59  ;;  %11989 = vmatpush1.bf16.msra.mxu1 %v13556_v63  ;;  %v8817_v59 = vld [vmem:[#allocation22 + $0x48] sm:$0xff] }
 0x799   :  { %11990 = vmatprep.subr.bf16.mxu1 %v13573_v14  ;;  %v13367_v31 = vcombine.high %v8809_v56, %v8817_v59  ;;  %v8841_v63 = vld [vmem:[#allocation22 + $0x108] sm:$0xff] }
 0x79a   :  { %v8849_v14 = vld [vmem:[#allocation22 + $0x148] sm:$0xff] }
 0x79b   :  { %8456 = vmatpush1.bf16.msra.mxu0 %v15700_v50  ;;  %v13366_v50 = vcombine.low %v8809_v56, %v8817_v59  ;;  %v9001_v56 = vld [vmem:[#allocation22 + $0x608] sm:$0xff] }
 0x79c   :  { %8457 = vmatprep.subr.bf16.mxu0 %v15705_v49  ;;  %11991 = vmatpush1.bf16.msra.mxu1 %v13572_v11  ;;  %v13383_v49 = vcombine.high %v8825_v52, %v8833_v6  ;;  %v8857_v11 = vld [vmem:[#allocation22 + $0x188] sm:$0xff] }
 0x79d   :  { %v6507_v61 = vpop.f32.mrb[8].mxu0  ;;  %v7594_v44 = vpop.f32.mrb[4].mxu1  ;;  %v9009_v59 = vld [vmem:[#allocation22 + $0x648] sm:$0xff] }
 0x79e   :  { %v6516_v23 = vadd.f32 %v6507_v61, %v17541_v26  ;;  %v7642_v30 = vadd.f32 %v7594_v44, %v17544_v36  ;;  %v6509_v62 = vpop.f32.mrb[9].mxu0  ;;  %v7596_v54 = vpop.f32.mrb[5].mxu1  ;;  %v15709_v26 = vld [vmem:[#allocation19 + $0xce8] ss:$16 sps:$4 sm:$0xff]   ;;  %v13589_v36 = vcombine.high %v9032_v42, %v9040_v35  ;;  %v8865_v61 = vld [vmem:[#allocation22 + $0x1c8] sm:$0xff]  ;;  %v13398_v44 = vcombine.low %v8841_v63, %v8849_v14 }
 0x79f   :  { %v6517_v51 = vadd.f32 %v6509_v62, %v17547_v55  ;;  %v7643_v28 = vadd.f32 %v7596_v54, %v17550_v58  ;;  %v6511_v34 = vpop.f32.mrb[10].mxu0  ;;  %v7598_v39 = vpop.f32.mrb[6].mxu1  ;;  %8458 = vmatpush1.bf16.msra.mxu0 %v15703_v8  ;;  %v9048_v55 = vld [vmem:[#allocation22 + $0x780] sm:$0xff]  ;;  %v13382_v8 = vcombine.low %v8825_v52, %v8833_v6  ;;  %v8881_v62 = vld [vmem:[#allocation22 + $0x248] sm:$0xff]  ;;  %v13414_v54 = vcombine.low %v8857_v11, %v8865_v61 }
 0x7a0   :  { %v6512_v41 = vpop.f32.mrb[11].mxu0  ;;  %v7599_v21 = vpop.f32.mrb[7].mxu1  ;;  %8459 = vmatprep.subr.bf16.mxu0 %v15708_v60  ;;  %11992 = vmatprep.subr.bf16.mxu1 %v13589_v36  ;;  %v9056_v58 = vld [vmem:[#allocation22 + $0x7c0] sm:$0xff]  ;;  %v13399_v60 = vcombine.high %v8841_v63, %v8849_v14  ;;  %v8897_v34 = vld [vmem:[#allocation22 + $0x2c8] sm:$0xff] }
 0x7a1   :  { %11993 = vmatpush1.bf16.msra.mxu1 %v13588_v33  ;;  %v13604_v38 = vcombine.low %v9048_v55, %v9056_v58  ;;  %v13605_v22 = vcombine.high %v9048_v55, %v9056_v58  ;;  %v8913_v41 = vld [vmem:[#allocation22 + $0x348] sm:$0xff] }
 0x7a2   :  { %v8929_v36 = vld [vmem:[#allocation22 + $0x3c8] sm:$0xff] }
 0x7a3   :  { %8460 = vmatpush1.bf16.msra.mxu0 %v15706_v43  ;;  %11994 = vmatprep.subr.bf16.mxu1 %v13605_v22  ;;  %v8905_v43 = vld [vmem:[#allocation22 + $0x308] sm:$0xff] }
 0x7a4   :  { %8461 = vmatprep.subr.bf16.mxu0 %v15711_v9  ;;  %v13463_v9 = vcombine.high %v8905_v43, %v8913_v41  ;;  %v9017_v52 = vld [vmem:[#allocation22 + $0x688] sm:$0xff] }
 0x7a5   :  { %11995 = vmatpush1.bf16.msra.mxu1 %v13604_v38  ;;  %v9025_v6 = vld [vmem:[#allocation22 + $0x6c8] sm:$0xff] }
 0x7a6   :  { %v9033_v63 = vld [vmem:[#allocation22 + $0x708] sm:$0xff] }
 0x7a7   :  { %8462 = vmatpush1.bf16.msra.mxu0 %v15709_v26  ;;  %v8921_v26 = vld [vmem:[#allocation22 + $0x388] sm:$0xff] }
 0x7a8   :  { %8729 = vmatprep.subr.bf16.mxu0 %v15714_v27  ;;  %v9041_v14 = vld [vmem:[#allocation22 + $0x748] sm:$0xff] }
 0x7aa   :  { %8480 = vmatmul.mubr.bf16.vlgmr.msra.gmra.mrb[36].mxu0 %v17515_v10  ;;  %v15727_v10 = vld [vmem:[#allocation19 + $0xda8] ss:$16 sps:$4 sm:$0xff]  }
 0x7ab   :  { %8730 = vmatpush1.bf16.msra.mxu0 %v15712_v0  ;;  %8761 = vmatprep.mubr.bf16.mxu0 %v16010_v24 }
 0x7ac   :  { %8731 = vmatprep.subr.bf16.mxu0 %v15717_v46 }
 0x7af   :  { %8732 = vmatpush1.bf16.msra.mxu0 %v15715_v29  ;;  %v13462_v29 = vcombine.low %v8905_v43, %v8913_v41  ;;  %v13590_v43 = vcombine.low %v9033_v63, %v9041_v14 }
 0x7b0   :  { %8733 = vmatprep.subr.bf16.mxu0 %v15720_v15 }
 0x7b3   :  { %8734 = vmatpush1.bf16.msra.mxu0 %v15718_v40 }
 0x7b4   :  { %8735 = vmatprep.subr.bf16.mxu0 %v15723_v19  ;;  %v13479_v19 = vcombine.high %v8921_v26, %v8929_v36 }
 0x7b7   :  { %8736 = vmatpush1.bf16.msra.mxu0 %v15721_v5  ;;  %v17569_v5 = vld [vmem:[#allocation22 + $0x800] sm:$0xff] }
 0x7b8   :  { %8737 = vmatprep.subr.bf16.mxu0 %v15726_v45  ;;  %v17571_v45 = vld [vmem:[#allocation22 + $0x840] sm:$0xff] }
 0x7bb   :  { %8738 = vmatpush1.bf16.msra.mxu0 %v15724_v2  ;;  %v8937_v2 = vld [vmem:[#allocation22 + $0x408] sm:$0xff] }
 0x7bc   :  { %8739 = vmatprep.subr.bf16.mxu0 %v15729_v17  ;;  %v8945_v17 = vld [vmem:[#allocation22 + $0x448] sm:$0xff] }
 0x7bd   :  { %v6789_v25 = vpop.f32.mrb[12].mxu0  ;;  %v7876_v24 = vpop.f32.mrb[8].mxu1 }
 0x7be   :  { %v6798_v1 = vadd.f32 %v6789_v25, %v6516_v23  ;;  %v7924_v12 = vadd.f32 %v7876_v24, %v7642_v30  ;;  %v6791_v20 = vpop.f32.mrb[13].mxu0  ;;  %v7878_v18 = vpop.f32.mrb[9].mxu1  ;;  %v13415_v23 = vcombine.high %v8857_v11, %v8865_v61  ;;  %v8873_v30 = vld [vmem:[#allocation22 + $0x208] sm:$0xff]  ;;  %v13478_v25 = vcombine.low %v8921_v26, %v8929_v36 }
 0x7bf   :  { %v6799_v53 = vadd.f32 %v6791_v20, %v6517_v51  ;;  %v7925_v7 = vadd.f32 %v7878_v18, %v7643_v28  ;;  %v6793_v4 = vpop.f32.mrb[14].mxu0  ;;  %v7880_v32 = vpop.f32.mrb[10].mxu1  ;;  %8740 = vmatpush1.bf16.msra.mxu0 %v15727_v10  ;;  %v13431_v51 = vcombine.high %v8873_v30, %v8881_v62  ;;  %v8889_v28 = vld [vmem:[#allocation22 + $0x288] sm:$0xff]  ;;  %v13620_v10 = vcombine.low %v17569_v5, %v17571_v45 }
 0x7c0   :  { %v6794_v48 = vpop.f32.mrb[15].mxu0  ;;  %v7881_v13 = vpop.f32.mrb[11].mxu1  ;;  %8741 = vmatprep.subr.bf16.mxu0 %v15732_v37  ;;  %v13447_v39 = vcombine.high %v8889_v28, %v8897_v34  ;;  %v13446_v21 = vcombine.low %v8889_v28, %v8897_v34  ;;  %v13621_v37 = vcombine.high %v17569_v5, %v17571_v45  ;;  %v13495_v24 = vcombine.high %v8937_v2, %v8945_v17 }
 0x7c1   :  { %v13494_v20 = vcombine.low %v8937_v2, %v8945_v17  ;;  %v8993_v48 = vld [vmem:[#allocation22 + $0x5c8] sm:$0xff] }
 0x7c2   :  { %12005 = vmatprep.subr.bf16.mxu1 %v13621_v37 }
 0x7c3   :  { %8742 = vmatpush1.bf16.msra.mxu0 %v15730_v57  ;;  %v8985_v57 = vld [vmem:[#allocation22 + $0x588] sm:$0xff] }
 0x7c4   :  { %8743 = vmatprep.subr.bf16.mxu0 %v15735_v3  ;;  %v13543_v3 = vcombine.high %v8985_v57, %v8993_v48 }
 0x7c7   :  { %8744 = vmatpush1.bf16.msra.mxu0 %v15733_v47  ;;  %v13542_v47 = vcombine.low %v8985_v57, %v8993_v48  ;;  %v9081_v57 = vld [vmem:[#allocation22 + $0x888] sm:$0xff] }
 0x7c8   :  { %12046 = vmatprep.subr.bf16.mxu0 %v13367_v31  ;;  %v13559_v31 = vcombine.high %v9001_v56, %v9009_v59  ;;  %v9089_v48 = vld [vmem:[#allocation22 + $0x8c8] sm:$0xff] }
 0x7ca   :  { %8762 = vmatmul.mubr.bf16.vlgmr.msra.gmra.mrb[40].mxu0 %v17525_v16  ;;  %v13430_v16 = vcombine.low %v8873_v30, %v8881_v62 }
 0x7cb   :  { %12047 = vmatpush1.bf16.msra.mxu0 %v13366_v50  ;;  %v13558_v50 = vcombine.low %v9001_v56, %v9009_v59  ;;  %v9096_v56 = vld [vmem:[#allocation22 + $0x900] sm:$0xff] }
 0x7cc   :  { %12048 = vmatprep.subr.bf16.mxu0 %v13383_v49  ;;  %v13575_v49 = vcombine.high %v9017_v52, %v9025_v6 }
 0x7cf   :  { %12049 = vmatpush1.bf16.msra.mxu0 %v13382_v8  ;;  %v13574_v8 = vcombine.low %v9017_v52, %v9025_v6  ;;  %v9104_v52 = vld [vmem:[#allocation22 + $0x940] sm:$0xff]  ;;  %v9097_v6 = vld [vmem:[#allocation22 + $0x908] sm:$0xff] }
 0x7d0   :  { %12050 = vmatprep.subr.bf16.mxu0 %v13399_v60  ;;  %v13591_v60 = vcombine.high %v9033_v63, %v9041_v14  ;;  %v17607_v63 = vld [vmem:[#allocation22 + $0x50] sm:$0xff]  ;;  %v17609_v14 = vld [vmem:[#allocation22 + $0x18] sm:$0xff] }
 0x7d3   :  { %12051 = vmatpush1.bf16.msra.mxu0 %v13398_v44  ;;  %v9049_v44 = vld [vmem:[#allocation22 + $0x788] sm:$0xff] }
 0x7d4   :  { %12052 = vmatprep.subr.bf16.mxu0 %v13415_v23  ;;  %v9057_v23 = vld [vmem:[#allocation22 + $0x7c8] sm:$0xff] }
 0x7d5   :  { %v13606_v26 = vcombine.low %v9049_v44, %v9057_v23 }
 0x7d7   :  { %12053 = vmatpush1.bf16.msra.mxu0 %v13414_v54 }
 0x7d8   :  { %12054 = vmatprep.subr.bf16.mxu0 %v13431_v51 }
 0x7db   :  { %12055 = vmatpush1.bf16.msra.mxu0 %v13430_v16 }
 0x7dc   :  { %12056 = vmatprep.subr.bf16.mxu0 %v13447_v39 }
 0x7dd   :  { %v7071_v42 = vpop.f32.mrb[16].mxu0  ;;  %v8158_v35 = vpop.f32.mrb[12].mxu1 }
 0x7de   :  { %v17561_v27 = vadd.f32 %v7071_v42, %v6798_v1  ;;  %v17563_v33 = vadd.f32 %v8158_v35, %v7924_v12  ;;  %v7073_v55 = vpop.f32.mrb[17].mxu0  ;;  %v8160_v58 = vpop.f32.mrb[13].mxu1  ;;  %v8953_v1 = vld [vmem:[#allocation22 + $0x488] sm:$0xff] }
 0x7df   :  { %v17565_v38 = vadd.f32 %v7073_v55, %v6799_v53  ;;  %v17567_v22 = vadd.f32 %v8160_v58, %v7925_v7  ;;  %v7075_v0 = vpop.f32.mrb[18].mxu0  ;;  %v8162_v46 = vpop.f32.mrb[14].mxu1  ;;  %12057 = vmatpush1.bf16.msra.mxu0 %v13446_v21  ;;  %v8961_v12 = vld [vmem:[#allocation22 + $0x4c8] sm:$0xff]  ;;  %v17586_v58 = vld [vmem:[#allocation20] sm:$0xf] }
 0x7e0   :  { %v7076_v15 = vpop.f32.mrb[19].mxu0  ;;  %v8163_v40 = vpop.f32.mrb[15].mxu1  ;;  %12058 = vmatprep.subr.bf16.mxu0 %v13463_v9  ;;  %v13511_v18 = vcombine.high %v8953_v1, %v8961_v12  ;;  %v8969_v53 = vld [vmem:[#allocation22 + $0x508] sm:$0xff]  ;;  %v13510_v4 = vcombine.low %v8953_v1, %v8961_v12  ;;  %v13607_v9 = vcombine.high %v9049_v44, %v9057_v23  ;;  %v13653_v23 = vcombine.high %v9096_v56, %v9104_v52 }
 0x7e1   :  { %v8977_v7 = vld [vmem:[#allocation22 + $0x548] sm:$0xff] }
 0x7e2   :  { %v13527_v32 = vcombine.high %v8969_v53, %v8977_v7  ;;  %v13526_v13 = vcombine.low %v8969_v53, %v8977_v7  ;;  %v9065_v42 = vld [vmem:[#allocation22 + $0x808] sm:$0xff]  ;;  %v9080_v7 = vld [vmem:[#allocation22 + $0x880] sm:$0xff] }
 0x7e3   :  { %12059 = vmatpush1.bf16.msra.mxu0 %v13462_v29  ;;  %v9073_v35 = vld [vmem:[#allocation22 + $0x848] sm:$0xff] }
 0x7e4   :  { %12060 = vmatprep.subr.bf16.mxu0 %v13479_v19  ;;  %v13623_v36 = vcombine.high %v9065_v42, %v9073_v35 }
 0x7e7   :  { %12061 = vmatpush1.bf16.msra.mxu0 %v13478_v25 }
 0x7e8   :  { %12062 = vmatprep.subr.bf16.mxu0 %v13495_v24 }
 0x7eb   :  { %12063 = vmatpush1.bf16.msra.mxu0 %v13494_v20 }
 0x7ec   :  { %12064 = vmatprep.subr.bf16.mxu0 %v13511_v18 }
 0x7ef   :  { %12065 = vmatpush1.bf16.msra.mxu0 %v13510_v4 }
 0x7f0   :  { %12066 = vmatprep.subr.bf16.mxu0 %v13527_v32  ;;  %v9088_v32 = vld [vmem:[#allocation22 + $0x8c0] sm:$0xff] }
 0x7f3   :  { %12067 = vmatpush1.bf16.msra.mxu0 %v13526_v13 }
 0x7f4   :  { %12068 = vmatprep.subr.bf16.mxu0 %v13543_v3  ;;  %v13622_v3 = vcombine.low %v9065_v42, %v9073_v35 }
 0x7f7   :  { %12069 = vmatpush1.bf16.msra.mxu0 %v13542_v47  ;;  %v13637_v47 = vcombine.high %v9080_v7, %v9088_v32 }
 0x7f8   :  { %12070 = vmatprep.subr.bf16.mxu0 %v13559_v31  ;;  %v13639_v31 = vcombine.high %v9081_v57, %v9089_v48 }
 0x7fb   :  { %12071 = vmatpush1.bf16.msra.mxu0 %v13558_v50  ;;  %v9105_v50 = vld [vmem:[#allocation22 + $0x948] sm:$0xff] }
 0x7fc   :  { %12072 = vmatprep.subr.bf16.mxu0 %v13575_v49  ;;  %v17605_v49 = vld [vmem:[#allocation22 + $0x10] sm:$0xff] }
 0x7fd   :  { %v7353_v11 = vpop.f32.mrb[20].mxu0  ;;  %v8440_v61 = vpop.f32.mrb[16].mxu1 }
 0x7fe   :  { %v7362_v30 = vadd.f32 %v7353_v11, %v17561_v27  ;;  %v8488_v62 = vadd.f32 %v8440_v61, %v17563_v33  ;;  %v7355_v54 = vpop.f32.mrb[21].mxu0  ;;  %v8442_v51 = vpop.f32.mrb[17].mxu1  ;;  %v8776_v27 = vlaneseq  ;;  %v13636_v11 = vcombine.low %v9080_v7, %v9088_v32  ;;  %v9177_v7 = vld [vmem:[#allocation22 + $0xb88] sm:$0xff] }
 0x7ff   :  { %v7363_v28 = vadd.f32 %v7355_v54, %v17565_v38  ;;  %v8489_v34 = vadd.f32 %v8442_v51, %v17567_v22  ;;  %v7357_v16 = vpop.f32.mrb[22].mxu0  ;;  %v8444_v39 = vpop.f32.mrb[18].mxu1  ;;  %12073 = vmatpush1.bf16.msra.mxu0 %v13574_v8  ;;  %v13368_v8 = vcombine.low %v17605_v49, %v17607_v63  ;;  %v13638_v61 = vcombine.low %v9081_v57, %v9089_v48  ;;  %v9120_v54 = vld [vmem:[#allocation22 + $0x9c0] sm:$0xff]  ;;  %v9113_v51 = vld [vmem:[#allocation22 + $0x988] sm:$0xff] }
 0x800   :  { %v7358_v41 = vpop.f32.mrb[23].mxu0  ;;  %v8445_v21 = vpop.f32.mrb[19].mxu1  ;;  %12074 = vmatprep.subr.bf16.mxu0 %v13591_v60  ;;  %v17581_v33 = vshrl.u32 %v8776_v27, 7  ;;  %v17615_v60 = vld [vmem:[#allocation22 + $0x58] sm:$0xff]  ;;  %v13654_v16 = vcombine.low %v9097_v6, %v9105_v50  ;;  %v9136_v39 = vld [vmem:[#allocation22 + $0xa40] sm:$0xff]  ;;  %v9145_v27 = vld [vmem:[#allocation22 + $0xa88] sm:$0xff] }
 0x801   :  { %v13370_v44 = vcombine.low %v17609_v14, %v17615_v60  ;;  %v9137_v41 = vld [vmem:[#allocation22 + $0xa48] sm:$0xff] }
 0x802   :  { %v17584_v55 = vsub.s32 0, %v17581_v33  ;;  %v17589_v38 = vsub.s32 1, %v17581_v33 }
 0x803   :  { %12075 = vmatpush1.bf16.msra.mxu0 %v13590_v43  ;;  %v9129_v43 = vld [vmem:[#allocation22 + $0xa08] sm:$0xff] }
 0x804   :  { %12076 = vmatprep.subr.bf16.mxu0 %v13607_v9  ;;  %v8779_v22 = vrot.slane %v17586_v58, %v17584_v55  ;;  %v8783_v29 = vrot.slane %v17586_v58, %v17589_v38  ;;  %v13687_v35 = vcombine.high %v9129_v43, %v9137_v41 }
 0x807   :  { %12077 = vmatpush1.bf16.msra.mxu0 %v13606_v26  ;;  %v9144_v26 = vld [vmem:[#allocation22 + $0xa80] sm:$0xff] }
 0x808   :  { %12087 = vmatprep.subr.bf16.mxu0 %v13623_v36  ;;  %v9152_v36 = vld [vmem:[#allocation22 + $0xac0] sm:$0xff] }
 0x81d   :  { %v7635_v0 = vpop.f32.mrb[24].mxu0  ;;  %v8722_v46 = vpop.f32.mrb[20].mxu1 }
 0x81e   :  { %v17595_v15 = vadd.f32 %v7635_v0, %v7362_v30  ;;  %v8770_v40 = vadd.f32 %v8722_v46, %v8488_v62  ;;  %v7637_v19 = vpop.f32.mrb[25].mxu0  ;;  %v8724_v2 = vpop.f32.mrb[21].mxu1  ;;  %v13655_v30 = vcombine.high %v9097_v6, %v9105_v50  ;;  %v9112_v62 = vld [vmem:[#allocation22 + $0x980] sm:$0xff]  ;;  %v13686_v46 = vcombine.low %v9129_v43, %v9137_v41 }
 0x81f   :  { %v17597_v17 = vadd.f32 %v7637_v19, %v7363_v28  ;;  %v8771_v37 = vadd.f32 %v8724_v2, %v8489_v34  ;;  %v7639_v25 = vpop.f32.mrb[26].mxu0  ;;  %v8726_v24 = vpop.f32.mrb[22].mxu1  ;;  %v9121_v28 = vld [vmem:[#allocation22 + $0x9c8] sm:$0xff]  ;;  %v13652_v34 = vcombine.low %v9096_v56, %v9104_v52  ;;  %v13669_v5 = vcombine.high %v9112_v62, %v9120_v54  ;;  %v9160_v19 = vld [vmem:[#allocation22 + $0xb00] sm:$0xff] }
 0x820   :  { %v8796_v1 = vadd.f32 %v8779_v22, %v8770_v40  ;;  %v7640_v12 = vpop.f32.mrb[27].mxu0  ;;  %v8727_v20 = vpop.f32.mrb[23].mxu1  ;;  %v13671_v45 = vcombine.high %v9113_v51, %v9121_v28  ;;  %v13668_v21 = vcombine.low %v9112_v62, %v9120_v54  ;;  %v13670_v9 = vcombine.low %v9113_v51, %v9121_v28  ;;  %v9153_v22 = vld [vmem:[#allocation22 + $0xac8] sm:$0xff]  ;;  %v9168_v2 = vld [vmem:[#allocation22 + $0xb40] sm:$0xff] }
 0x821   :  { %v8797_v18 = vadd.f32 %v8783_v29, %v8771_v37  ;;  %v13701_v29 = vcombine.high %v9144_v26, %v9152_v36  ;;  %v13703_v40 = vcombine.high %v9145_v27, %v9153_v22  ;;  %v9161_v37 = vld [vmem:[#allocation22 + $0xb08] sm:$0xff]  ;;  %v13700_v24 = vcombine.low %v9144_v26, %v9152_v36  ;;  %v9192_v52 = vld [vmem:[#allocation22 + $0xc00] sm:$0xff] }
 0x822   :  { %v8800_v53 = vmax.f32 %v8796_v1, 0.0  ;;  %v9169_v25 = vld [vmem:[#allocation22 + $0xb48] sm:$0xff]  ;;  %v13702_v1 = vcombine.low %v9145_v27, %v9153_v22  ;;  %v13717_v12 = vcombine.high %v9160_v19, %v9168_v2  ;;  %v13716_v57 = vcombine.low %v9160_v19, %v9168_v2  ;;  %v9208_v28 = vld [vmem:[#allocation22 + $0xc80] sm:$0xff] }
 0x823   :  { %v8801_v4 = vmax.f32 %v8797_v18, 0.0  ;;  %v13719_v20 = vcombine.high %v9161_v37, %v9169_v25  ;;  %v9176_v18 = vld [vmem:[#allocation22 + $0xb80] sm:$0xff]  ;;  %v13718_v48 = vcombine.low %v9161_v37, %v9169_v25 }
 0x824   :  { %v17601_v59 = vpack.c.bf16 %v8800_v53, %v8800_v53  ;;  %v9184_v53 = vld [vmem:[#allocation22 + $0xbc0] sm:$0xff] }
 0x825   :  { %v17599_v13 = vpack.c.bf16 %v8801_v4, %v8801_v4  ;;  %v9185_v4 = vld [vmem:[#allocation22 + $0xbc8] sm:$0xff]  ;;  %v13732_v62 = vcombine.low %v9176_v18, %v9184_v53  ;;  %v9224_v43 = vld [vmem:[#allocation22 + $0xd00] sm:$0xff] }
 0x826   :  { %v13734_v54 = vcombine.low %v9177_v7, %v9185_v4  ;;  %v9232_v41 = vld [vmem:[#allocation22 + $0xd40] sm:$0xff] }
 0x827   :  { %11996 = vmatprep.mubr.bf16.mxu1 %v17599_v13  ;;  %12078 = vmatprep.mubr.bf16.mxu0 %v17599_v13  ;;  %v13781_v26 = vcombine.high %v9224_v43, %v9232_v41  ;;  %v9240_v27 = vld [vmem:[#allocation22 + $0xd80] sm:$0xff] }
 0x828   :  { %11997 = vmatmul.mubr.bf16.vlgmr.msra.gmra.mrb[24].mxu1 %v17601_v59  ;;  %12079 = vmatmul.mubr.bf16.vlgmr.msra.gmra.mrb[44].mxu0 %v17601_v59  ;;  %v9248_v22 = vld [vmem:[#allocation22 + $0xdc0] sm:$0xff] }
 0x829   :  { %12006 = vmatpush1.bf16.msra.mxu1 %v13620_v10  ;;  %12088 = vmatpush1.bf16.msra.mxu0 %v13622_v3  ;;  %v9128_v10 = vld [vmem:[#allocation22 + $0xa00] sm:$0xff]  ;;  %v13797_v19 = vcombine.high %v9240_v27, %v9248_v22 }
 0x82a   :  { %12007 = vmatprep.subr.bf16.mxu1 %v13637_v47  ;;  %12089 = vmatprep.subr.bf16.mxu0 %v13639_v31  ;;  %v13685_v42 = vcombine.high %v9128_v10, %v9136_v39  ;;  %v13684_v0 = vcombine.low %v9128_v10, %v9136_v39  ;;  %v13733_v47 = vcombine.high %v9176_v18, %v9184_v53  ;;  %v9256_v37 = vld [vmem:[#allocation22 + $0xe00] sm:$0xff] }
 0x82b   :  { %v13735_v31 = vcombine.high %v9177_v7, %v9185_v4  ;;  %v9264_v25 = vld [vmem:[#allocation22 + $0xe40] sm:$0xff] }
 0x82c   :  { %v13813_v18 = vcombine.high %v9256_v37, %v9264_v25  ;;  %v9272_v7 = vld [vmem:[#allocation22 + $0xe80] sm:$0xff] }
 0x82d   :  { %12008 = vmatpush1.bf16.msra.mxu1 %v13636_v11  ;;  %12090 = vmatpush1.bf16.msra.mxu0 %v13638_v61  ;;  %v9200_v11 = vld [vmem:[#allocation22 + $0xc40] sm:$0xff]  ;;  %v9193_v61 = vld [vmem:[#allocation22 + $0xc08] sm:$0xff] }
 0x82e   :  { %12009 = vmatprep.subr.bf16.mxu1 %v13653_v23  ;;  %12091 = vmatprep.subr.bf16.mxu0 %v13655_v30  ;;  %v9201_v23 = vld [vmem:[#allocation22 + $0xc48] sm:$0xff]  ;;  %v9280_v4 = vld [vmem:[#allocation22 + $0xec0] sm:$0xff] }
 0x82f   :  { %v13751_v51 = vcombine.high %v9193_v61, %v9201_v23 }
 0x831   :  { %12010 = vmatpush1.bf16.msra.mxu1 %v13652_v34  ;;  %12092 = vmatpush1.bf16.msra.mxu0 %v13654_v16  ;;  %v9216_v34 = vld [vmem:[#allocation22 + $0xcc0] sm:$0xff]  ;;  %v9209_v16 = vld [vmem:[#allocation22 + $0xc88] sm:$0xff] }
 0x832   :  { %12011 = vmatprep.subr.bf16.mxu1 %v13669_v5  ;;  %12093 = vmatprep.subr.bf16.mxu0 %v13671_v45  ;;  %v9217_v5 = vld [vmem:[#allocation22 + $0xcc8] sm:$0xff]  ;;  %v13750_v45 = vcombine.low %v9193_v61, %v9201_v23  ;;  %v13765_v10 = vcombine.high %v9208_v28, %v9216_v34  ;;  %v13828_v23 = vcombine.low %v9272_v7, %v9280_v4 }
 0x833   :  { %v13767_v39 = vcombine.high %v9209_v16, %v9217_v5  ;;  %v9297_v61 = vld [vmem:[#allocation22 + $0xf48] sm:$0xff] }
 0x835   :  { %12012 = vmatpush1.bf16.msra.mxu1 %v13668_v21  ;;  %12094 = vmatpush1.bf16.msra.mxu0 %v13670_v9  ;;  %v9225_v21 = vld [vmem:[#allocation22 + $0xd08] sm:$0xff] }
 0x836   :  { %12013 = vmatprep.subr.bf16.mxu1 %v13685_v42  ;;  %12095 = vmatprep.subr.bf16.mxu0 %v13687_v35  ;;  %v9233_v9 = vld [vmem:[#allocation22 + $0xd48] sm:$0xff]  ;;  %v13764_v42 = vcombine.low %v9208_v28, %v9216_v34  ;;  %v13766_v35 = vcombine.low %v9209_v16, %v9217_v5 }
 0x837   :  { %v13783_v36 = vcombine.high %v9225_v21, %v9233_v9  ;;  %v9305_v28 = vld [vmem:[#allocation22 + $0xf88] sm:$0xff] }
 0x838   :  { %v9313_v34 = vld [vmem:[#allocation22 + $0xfc8] sm:$0xff] }
 0x839   :  { %12014 = vmatpush1.bf16.msra.mxu1 %v13684_v0  ;;  %12096 = vmatpush1.bf16.msra.mxu0 %v13686_v46  ;;  %v9241_v0 = vld [vmem:[#allocation22 + $0xd88] sm:$0xff] }
 0x83a   :  { %12015 = vmatprep.subr.bf16.mxu1 %v13701_v29  ;;  %12097 = vmatprep.subr.bf16.mxu0 %v13703_v40  ;;  %v9249_v46 = vld [vmem:[#allocation22 + $0xdc8] sm:$0xff]  ;;  %v13780_v29 = vcombine.low %v9224_v43, %v9232_v41  ;;  %v13782_v40 = vcombine.low %v9225_v21, %v9233_v9  ;;  %v13863_v43 = vcombine.high %v9305_v28, %v9313_v34 }
 0x83b   :  { %v13799_v2 = vcombine.high %v9241_v0, %v9249_v46 }
 0x83d   :  { %v7917_v32 = vpop.f32.mrb[28].mxu0  ;;  %12016 = vmatpush1.bf16.msra.mxu1 %v13700_v24  ;;  %12098 = vmatpush1.bf16.msra.mxu0 %v13702_v1  ;;  %v9257_v24 = vld [vmem:[#allocation22 + $0xe08] sm:$0xff] }
 0x83e   :  { %v17623_v3 = vadd.f32 %v7917_v32, %v17595_v15  ;;  %v7919_v56 = vpop.f32.mrb[29].mxu0  ;;  %12017 = vmatprep.subr.bf16.mxu1 %v13717_v12  ;;  %12099 = vmatprep.subr.bf16.mxu0 %v13719_v20  ;;  %v13749_v15 = vcombine.high %v9192_v52, %v9200_v11  ;;  %v9265_v1 = vld [vmem:[#allocation22 + $0xe48] sm:$0xff]  ;;  %v13796_v12 = vcombine.low %v9240_v27, %v9248_v22 }
 0x83f   :  { %v17626_v6 = vadd.f32 %v7919_v56, %v17597_v17  ;;  %v7921_v50 = vpop.f32.mrb[30].mxu0  ;;  %v13748_v17 = vcombine.low %v9192_v52, %v9200_v11  ;;  %v13798_v20 = vcombine.low %v9241_v0, %v9249_v46  ;;  %v13815_v53 = vcombine.high %v9257_v24, %v9265_v1  ;;  %v9273_v32 = vld [vmem:[#allocation22 + $0xe88] sm:$0xff]  ;;  %v9288_v52 = vld [vmem:[#allocation22 + $0xf00] sm:$0xff] }
 0x840   :  { %v7922_v30 = vpop.f32.mrb[31].mxu0  ;;  %v13814_v56 = vcombine.low %v9257_v24, %v9265_v1  ;;  %v9296_v50 = vld [vmem:[#allocation22 + $0xf40] sm:$0xff]  ;;  %v9289_v11 = vld [vmem:[#allocation22 + $0xf08] sm:$0xff] }
 0x841   :  { %12018 = vmatpush1.bf16.msra.mxu1 %v13716_v57  ;;  %12100 = vmatpush1.bf16.msra.mxu0 %v13718_v48  ;;  %v9281_v57 = vld [vmem:[#allocation22 + $0xec8] sm:$0xff]  ;;  %v13812_v48 = vcombine.low %v9256_v37, %v9264_v25  ;;  %v13844_v5 = vcombine.low %v9288_v52, %v9296_v50 }
 0x842   :  { %12019 = vmatprep.subr.bf16.mxu1 %v13733_v47  ;;  %12101 = vmatprep.subr.bf16.mxu0 %v13735_v31  ;;  %v13829_v47 = vcombine.high %v9272_v7, %v9280_v4  ;;  %v13831_v31 = vcombine.high %v9273_v32, %v9281_v57  ;;  %v13830_v30 = vcombine.low %v9273_v32, %v9281_v57  ;;  %v8826_v32 = vld [vmem:[#allocation22 + $0x90] sm:$0xff] }
 0x843   :  { %v8834_v57 = vld [vmem:[#allocation22 + $0xd0] sm:$0xff] }
 0x845   :  { %12020 = vmatpush1.bf16.msra.mxu1 %v13732_v62  ;;  %12102 = vmatpush1.bf16.msra.mxu0 %v13734_v54  ;;  %v13845_v62 = vcombine.high %v9288_v52, %v9296_v50  ;;  %v13847_v54 = vcombine.high %v9289_v11, %v9297_v61  ;;  %v8842_v52 = vld [vmem:[#allocation22 + $0x110] sm:$0xff] }
 0x846   :  { %12021 = vmatprep.subr.bf16.mxu1 %v13749_v15  ;;  %12103 = vmatprep.subr.bf16.mxu0 %v13751_v51  ;;  %v9304_v15 = vld [vmem:[#allocation22 + $0xf80] sm:$0xff] }
 0x847   :  { %v9312_v51 = vld [vmem:[#allocation22 + $0xfc0] sm:$0xff] }
 0x849   :  { %12022 = vmatpush1.bf16.msra.mxu1 %v13748_v17  ;;  %12104 = vmatpush1.bf16.msra.mxu0 %v13750_v45  ;;  %v13846_v17 = vcombine.low %v9289_v11, %v9297_v61  ;;  %v8850_v11 = vld [vmem:[#allocation22 + $0x150] sm:$0xff]  ;;  %v8843_v61 = vld [vmem:[#allocation22 + $0x118] sm:$0xff] }
 0x84a   :  { %12023 = vmatprep.subr.bf16.mxu1 %v13765_v10  ;;  %12105 = vmatprep.subr.bf16.mxu0 %v13767_v39  ;;  %v13861_v39 = vcombine.high %v9304_v15, %v9312_v51 }
 0x84d   :  { %12024 = vmatpush1.bf16.msra.mxu1 %v13764_v42  ;;  %12106 = vmatpush1.bf16.msra.mxu0 %v13766_v35  ;;  %v13860_v42 = vcombine.low %v9304_v15, %v9312_v51  ;;  %v13862_v35 = vcombine.low %v9305_v28, %v9313_v34  ;;  %v8858_v51 = vld [vmem:[#allocation22 + $0x190] sm:$0xff]  ;;  %v8859_v34 = vld [vmem:[#allocation22 + $0x198] sm:$0xff] }
 0x84e   :  { %12025 = vmatprep.subr.bf16.mxu1 %v13781_v26  ;;  %12107 = vmatprep.subr.bf16.mxu0 %v13783_v36  ;;  %v13369_v26 = vcombine.high %v17605_v49, %v17607_v63  ;;  %v8866_v28 = vld [vmem:[#allocation22 + $0x1d0] sm:$0xff]  ;;  %v13400_v49 = vcombine.low %v8842_v52, %v8850_v11 }
 0x851   :  { %12026 = vmatpush1.bf16.msra.mxu1 %v13780_v29  ;;  %12108 = vmatpush1.bf16.msra.mxu0 %v13782_v40  ;;  %v17635_v29 = vsub.s32 2, %v17581_v33  ;;  %v17638_v40 = vsub.s32 3, %v17581_v33 }
 0x852   :  { %12027 = vmatprep.subr.bf16.mxu1 %v13797_v19  ;;  %12109 = vmatprep.subr.bf16.mxu0 %v13799_v2 }
 0x853   :  { %v8787_v19 = vrot.slane %v17586_v58, %v17635_v29  ;;  %v8791_v37 = vrot.slane %v17586_v58, %v17638_v40  ;;  %v13385_v58 = vcombine.high %v8826_v32, %v8834_v57 }
 0x855   :  { %12028 = vmatpush1.bf16.msra.mxu1 %v13796_v12  ;;  %12110 = vmatpush1.bf16.msra.mxu0 %v13798_v20 }
 0x856   :  { %12029 = vmatprep.subr.bf16.mxu1 %v13813_v18  ;;  %12111 = vmatprep.subr.bf16.mxu0 %v13815_v53 }
 0x859   :  { %12030 = vmatpush1.bf16.msra.mxu1 %v13812_v48  ;;  %12112 = vmatpush1.bf16.msra.mxu0 %v13814_v56  ;;  %v8827_v48 = vld [vmem:[#allocation22 + $0x98] sm:$0xff] }
 0x85a   :  { %12031 = vmatprep.subr.bf16.mxu1 %v13829_v47  ;;  %12113 = vmatprep.subr.bf16.mxu0 %v13831_v31  ;;  %v8835_v56 = vld [vmem:[#allocation22 + $0xd8] sm:$0xff] }
 0x85b   :  { %v13387_v50 = vcombine.high %v8827_v48, %v8835_v56 }
 0x85d   :  { %v8199_v16 = vpop.f32.mrb[32].mxu0  ;;  %12032 = vmatpush1.bf16.msra.mxu1 %v13828_v23  ;;  %12114 = vmatpush1.bf16.msra.mxu0 %v13830_v30  ;;  %v8851_v23 = vld [vmem:[#allocation22 + $0x158] sm:$0xff]  ;;  %v13384_v30 = vcombine.low %v8826_v32, %v8834_v57  ;;  %v8946_v32 = vld [vmem:[#allocation22 + $0x450] sm:$0xff] }
 0x85e   :  { %v8208_v45 = vadd.f32 %v8199_v16, %v17623_v3  ;;  %v8201_v10 = vpop.f32.mrb[33].mxu0  ;;  %12033 = vmatprep.subr.bf16.mxu1 %v13845_v62  ;;  %12115 = vmatprep.subr.bf16.mxu0 %v13847_v54  ;;  %v13371_v3 = vcombine.high %v17609_v14, %v17615_v60  ;;  %v13386_v62 = vcombine.low %v8827_v48, %v8835_v56  ;;  %v8867_v16 = vld [vmem:[#allocation22 + $0x1d8] sm:$0xff]  ;;  %v8874_v60 = vld [vmem:[#allocation22 + $0x210] sm:$0xff] }
 0x85f   :  { %v8209_v41 = vadd.f32 %v8201_v10, %v17626_v6  ;;  %v8203_v21 = vpop.f32.mrb[34].mxu0  ;;  %v13401_v54 = vcombine.high %v8842_v52, %v8850_v11  ;;  %v13403_v15 = vcombine.high %v8843_v61, %v8851_v23  ;;  %v13402_v63 = vcombine.low %v8843_v61, %v8851_v23  ;;  %v8939_v57 = vld [vmem:[#allocation22 + $0x418] sm:$0xff]  ;;  %v8954_v11 = vld [vmem:[#allocation22 + $0x490] sm:$0xff] }
 0x860   :  { %v8204_v9 = vpop.f32.mrb[35].mxu0  ;;  %v13417_v14 = vcombine.high %v8858_v51, %v8866_v28  ;;  %v13418_v10 = vcombine.low %v8859_v34, %v8867_v16  ;;  %v8898_v21 = vld [vmem:[#allocation22 + $0x2d0] sm:$0xff]  ;;  %v8947_v48 = vld [vmem:[#allocation22 + $0x458] sm:$0xff] }
 0x861   :  { %12034 = vmatpush1.bf16.msra.mxu1 %v13844_v5  ;;  %12116 = vmatpush1.bf16.msra.mxu0 %v13846_v17  ;;  %v8875_v5 = vld [vmem:[#allocation22 + $0x218] sm:$0xff]  ;;  %v8962_v61 = vld [vmem:[#allocation22 + $0x4d0] sm:$0xff] }
 0x862   :  { %12035 = vmatprep.subr.bf16.mxu1 %v13861_v39  ;;  %12117 = vmatprep.subr.bf16.mxu0 %v13863_v43  ;;  %v8883_v17 = vld [vmem:[#allocation22 + $0x258] sm:$0xff] }
 0x863   :  { %v13435_v43 = vcombine.high %v8875_v5, %v8883_v17  ;;  %v8891_v9 = vld [vmem:[#allocation22 + $0x298] sm:$0xff] }
 0x864   :  { %v8955_v23 = vld [vmem:[#allocation22 + $0x498] sm:$0xff] }
 0x865   :  { %12036 = vmatpush1.bf16.msra.mxu1 %v13860_v42  ;;  %12118 = vmatpush1.bf16.msra.mxu0 %v13862_v35  ;;  %v8899_v42 = vld [vmem:[#allocation22 + $0x2d8] sm:$0xff] }
 0x866   :  { %12128 = vmatprep.subr.bf16.mxu1 %v13369_v26  ;;  %12210 = vmatprep.subr.bf16.mxu0 %v13371_v3  ;;  %v13434_v26 = vcombine.low %v8875_v5, %v8883_v17  ;;  %v8994_v5 = vld [vmem:[#allocation22 + $0x5d0] sm:$0xff]  ;;  %v8987_v17 = vld [vmem:[#allocation22 + $0x598] sm:$0xff] }
 0x87d   :  { %v8481_v36 = vpop.f32.mrb[36].mxu0 }
 0x87e   :  { %v8490_v6 = vadd.f32 %v8481_v36, %v8208_v45  ;;  %v8483_v27 = vpop.f32.mrb[37].mxu0  ;;  %v13416_v45 = vcombine.low %v8858_v51, %v8866_v28  ;;  %v13451_v36 = vcombine.high %v8891_v9, %v8899_v42  ;;  %v8970_v28 = vld [vmem:[#allocation22 + $0x510] sm:$0xff] }
 0x87f   :  { %v8491_v22 = vadd.f32 %v8483_v27, %v8209_v41  ;;  %v8485_v0 = vpop.f32.mrb[38].mxu0  ;;  %v8890_v41 = vld [vmem:[#allocation22 + $0x290] sm:$0xff] }
 0x880   :  { %v8486_v46 = vpop.f32.mrb[39].mxu0  ;;  %v13449_v3 = vcombine.high %v8890_v41, %v8898_v21  ;;  %v8914_v27 = vld [vmem:[#allocation22 + $0x350] sm:$0xff]  ;;  %v8915_v0 = vld [vmem:[#allocation22 + $0x358] sm:$0xff] }
 0x881   :  { %v13448_v46 = vcombine.low %v8890_v41, %v8898_v21  ;;  %v9002_v21 = vld [vmem:[#allocation22 + $0x610] sm:$0xff] }
 0x89d   :  { %v8763_v2 = vpop.f32.mrb[40].mxu0 }
 0x89e   :  { %v8772_v25 = vadd.f32 %v8763_v2, %v8490_v6  ;;  %v8765_v24 = vpop.f32.mrb[41].mxu0  ;;  %v8906_v6 = vld [vmem:[#allocation22 + $0x310] sm:$0xff] }
 0x89f   :  { %v8773_v1 = vadd.f32 %v8765_v24, %v8491_v22  ;;  %v8767_v12 = vpop.f32.mrb[42].mxu0  ;;  %v8907_v22 = vld [vmem:[#allocation22 + $0x318] sm:$0xff]  ;;  %v13465_v2 = vcombine.high %v8906_v6, %v8914_v27  ;;  %v8930_v24 = vld [vmem:[#allocation22 + $0x3d0] sm:$0xff] }
 0x8a0   :  { %v8798_v20 = vadd.f32 %v8787_v19, %v8772_v25  ;;  %v8768_v18 = vpop.f32.mrb[43].mxu0  ;;  %v13450_v19 = vcombine.low %v8891_v9, %v8899_v42  ;;  %v8922_v25 = vld [vmem:[#allocation22 + $0x390] sm:$0xff]  ;;  %v8931_v12 = vld [vmem:[#allocation22 + $0x3d8] sm:$0xff] }
 0x8a1   :  { %v8799_v53 = vadd.f32 %v8791_v37, %v8773_v1  ;;  %v13467_v37 = vcombine.high %v8907_v22, %v8915_v0  ;;  %v8923_v1 = vld [vmem:[#allocation22 + $0x398] sm:$0xff]  ;;  %v13466_v18 = vcombine.low %v8907_v22, %v8915_v0  ;;  %v13480_v56 = vcombine.low %v8922_v25, %v8930_v24  ;;  %v9010_v9 = vld [vmem:[#allocation22 + $0x650] sm:$0xff] }
 0x8a2   :  { %v8802_v7 = vmax.f32 %v8798_v20, 0.0  ;;  %v13464_v20 = vcombine.low %v8906_v6, %v8914_v27  ;;  %v13482_v52 = vcombine.low %v8923_v1, %v8931_v12  ;;  %v9003_v42 = vld [vmem:[#allocation22 + $0x618] sm:$0xff]  ;;  %v9018_v27 = vld [vmem:[#allocation22 + $0x690] sm:$0xff] }
 0x8a3   :  { %v8803_v4 = vmax.f32 %v8799_v53, 0.0  ;;  %v13481_v53 = vcombine.high %v8922_v25, %v8930_v24  ;;  %v9026_v22 = vld [vmem:[#allocation22 + $0x6d0] sm:$0xff]  ;;  %v9019_v0 = vld [vmem:[#allocation22 + $0x698] sm:$0xff] }
 0x8a4   :  { %v17646_v31 = vpack.c.bf16 %v8802_v7, %v8802_v7  ;;  %v13483_v7 = vcombine.high %v8923_v1, %v8931_v12  ;;  %v9034_v24 = vld [vmem:[#allocation22 + $0x710] sm:$0xff]  ;;  %v9035_v12 = vld [vmem:[#allocation22 + $0x718] sm:$0xff] }
 0x8a5   :  { %v17644_v47 = vpack.c.bf16 %v8803_v4, %v8803_v4  ;;  %v8938_v4 = vld [vmem:[#allocation22 + $0x410] sm:$0xff] }
 0x8a6   :  { %v9042_v1 = vld [vmem:[#allocation22 + $0x750] sm:$0xff] }
 0x8a7   :  { %12037 = vmatprep.mubr.bf16.mxu1 %v17644_v47  ;;  %12119 = vmatprep.mubr.bf16.mxu0 %v17644_v47 }
 0x8a8   :  { %12038 = vmatmul.mubr.bf16.vlgmr.msra.gmra.mrb[24].mxu1 %v17646_v31  ;;  %12120 = vmatmul.mubr.bf16.vlgmr.msra.gmra.mrb[44].mxu0 %v17646_v31 }
 0x8a9   :  { %12129 = vmatpush1.bf16.msra.mxu1 %v13368_v8  ;;  %12211 = vmatpush1.bf16.msra.mxu0 %v13370_v44  ;;  %v13419_v8 = vcombine.high %v8859_v34, %v8867_v16  ;;  %v8882_v44 = vld [vmem:[#allocation22 + $0x250] sm:$0xff]  ;;  %v8971_v16 = vld [vmem:[#allocation22 + $0x518] sm:$0xff] }
 0x8aa   :  { %12160 = vmatprep.mubr.bf16.mxu1 %v17599_v13  ;;  %12242 = vmatprep.mubr.bf16.mxu0 %v17599_v13  ;;  %v13433_v39 = vcombine.high %v8874_v60, %v8882_v44  ;;  %v13432_v35 = vcombine.low %v8874_v60, %v8882_v44  ;;  %v8978_v34 = vld [vmem:[#allocation22 + $0x550] sm:$0xff] }
 0x8ab   :  { %12130 = vmatprep.subr.bf16.mxu1 %v13385_v58  ;;  %12212 = vmatprep.subr.bf16.mxu0 %v13387_v50  ;;  %v13497_v58 = vcombine.high %v8938_v4, %v8946_v32  ;;  %v13499_v50 = vcombine.high %v8939_v57, %v8947_v48  ;;  %v8986_v44 = vld [vmem:[#allocation22 + $0x590] sm:$0xff] }
 0x8ad   :  { %12131 = vmatpush1.bf16.msra.mxu1 %v13384_v30  ;;  %12213 = vmatpush1.bf16.msra.mxu0 %v13386_v62  ;;  %v8963_v30 = vld [vmem:[#allocation22 + $0x4d8] sm:$0xff]  ;;  %v13496_v62 = vcombine.low %v8938_v4, %v8946_v32  ;;  %v9050_v32 = vld [vmem:[#allocation22 + $0x790] sm:$0xff] }
 0x8ae   :  { %12132 = vmatprep.subr.bf16.mxu1 %v13401_v54  ;;  %12214 = vmatprep.subr.bf16.mxu0 %v13403_v15  ;;  %v13498_v54 = vcombine.low %v8939_v57, %v8947_v48  ;;  %v13513_v15 = vcombine.high %v8954_v11, %v8962_v61  ;;  %v13515_v51 = vcombine.high %v8955_v23, %v8963_v30  ;;  %v9058_v57 = vld [vmem:[#allocation22 + $0x7d0] sm:$0xff]  ;;  %v9051_v48 = vld [vmem:[#allocation22 + $0x798] sm:$0xff] }
 0x8b1   :  { %12133 = vmatpush1.bf16.msra.mxu1 %v13400_v49  ;;  %12215 = vmatpush1.bf16.msra.mxu0 %v13402_v63  ;;  %v8979_v49 = vld [vmem:[#allocation22 + $0x558] sm:$0xff]  ;;  %v13512_v63 = vcombine.low %v8954_v11, %v8962_v61  ;;  %v9066_v61 = vld [vmem:[#allocation22 + $0x810] sm:$0xff] }
 0x8b2   :  { %12134 = vmatprep.subr.bf16.mxu1 %v13417_v14  ;;  %12216 = vmatprep.subr.bf16.mxu0 %v13419_v8  ;;  %v13514_v14 = vcombine.low %v8955_v23, %v8963_v30  ;;  %v13529_v8 = vcombine.high %v8970_v28, %v8978_v34  ;;  %v13531_v60 = vcombine.high %v8971_v16, %v8979_v49  ;;  %v9074_v23 = vld [vmem:[#allocation22 + $0x850] sm:$0xff]  ;;  %v9067_v30 = vld [vmem:[#allocation22 + $0x818] sm:$0xff] }
 0x8b5   :  { %12135 = vmatpush1.bf16.msra.mxu1 %v13416_v45  ;;  %12217 = vmatpush1.bf16.msra.mxu0 %v13418_v10  ;;  %v8995_v45 = vld [vmem:[#allocation22 + $0x5d8] sm:$0xff]  ;;  %v13528_v10 = vcombine.low %v8970_v28, %v8978_v34  ;;  %v9082_v34 = vld [vmem:[#allocation22 + $0x890] sm:$0xff] }
 0x8b6   :  { %12136 = vmatprep.subr.bf16.mxu1 %v13433_v39  ;;  %12218 = vmatprep.subr.bf16.mxu0 %v13435_v43  ;;  %v13530_v39 = vcombine.low %v8971_v16, %v8979_v49  ;;  %v13545_v43 = vcombine.high %v8986_v44, %v8994_v5  ;;  %v13547_v41 = vcombine.high %v8987_v17, %v8995_v45  ;;  %v9090_v16 = vld [vmem:[#allocation22 + $0x8d0] sm:$0xff]  ;;  %v9083_v49 = vld [vmem:[#allocation22 + $0x898] sm:$0xff] }
 0x8b9   :  { %12137 = vmatpush1.bf16.msra.mxu1 %v13432_v35  ;;  %12219 = vmatpush1.bf16.msra.mxu0 %v13434_v26  ;;  %v9011_v35 = vld [vmem:[#allocation22 + $0x658] sm:$0xff]  ;;  %v13544_v26 = vcombine.low %v8986_v44, %v8994_v5  ;;  %v9098_v5 = vld [vmem:[#allocation22 + $0x910] sm:$0xff] }
 0x8ba   :  { %12138 = vmatprep.subr.bf16.mxu1 %v13449_v3  ;;  %12220 = vmatprep.subr.bf16.mxu0 %v13451_v36  ;;  %v13546_v3 = vcombine.low %v8987_v17, %v8995_v45  ;;  %v13561_v36 = vcombine.high %v9002_v21, %v9010_v9  ;;  %v13563_v6 = vcombine.high %v9003_v42, %v9011_v35  ;;  %v9106_v17 = vld [vmem:[#allocation22 + $0x950] sm:$0xff]  ;;  %v9099_v45 = vld [vmem:[#allocation22 + $0x918] sm:$0xff] }
 0x8bd   :  { %12139 = vmatpush1.bf16.msra.mxu1 %v13448_v46  ;;  %12221 = vmatpush1.bf16.msra.mxu0 %v13450_v19  ;;  %v9027_v46 = vld [vmem:[#allocation22 + $0x6d8] sm:$0xff]  ;;  %v13560_v19 = vcombine.low %v9002_v21, %v9010_v9  ;;  %v9114_v9 = vld [vmem:[#allocation22 + $0x990] sm:$0xff] }
 0x8be   :  { %12140 = vmatprep.subr.bf16.mxu1 %v13465_v2  ;;  %12222 = vmatprep.subr.bf16.mxu0 %v13467_v37  ;;  %v13562_v2 = vcombine.low %v9003_v42, %v9011_v35  ;;  %v13577_v37 = vcombine.high %v9018_v27, %v9026_v22  ;;  %v13579_v25 = vcombine.high %v9019_v0, %v9027_v46  ;;  %v9122_v42 = vld [vmem:[#allocation22 + $0x9d0] sm:$0xff]  ;;  %v9115_v35 = vld [vmem:[#allocation22 + $0x998] sm:$0xff] }
 0x8c1   :  { %12141 = vmatpush1.bf16.msra.mxu1 %v13464_v20  ;;  %12223 = vmatpush1.bf16.msra.mxu0 %v13466_v18  ;;  %v9043_v20 = vld [vmem:[#allocation22 + $0x758] sm:$0xff]  ;;  %v13576_v18 = vcombine.low %v9018_v27, %v9026_v22  ;;  %v9130_v22 = vld [vmem:[#allocation22 + $0xa10] sm:$0xff] }
 0x8c2   :  { %12142 = vmatprep.subr.bf16.mxu1 %v13481_v53  ;;  %12224 = vmatprep.subr.bf16.mxu0 %v13483_v7  ;;  %v13578_v53 = vcombine.low %v9019_v0, %v9027_v46  ;;  %v13593_v7 = vcombine.high %v9034_v24, %v9042_v1  ;;  %v13595_v4 = vcombine.high %v9035_v12, %v9043_v20  ;;  %v9138_v0 = vld [vmem:[#allocation22 + $0xa50] sm:$0xff]  ;;  %v9131_v46 = vld [vmem:[#allocation22 + $0xa18] sm:$0xff] }
 0x8c5   :  { %12143 = vmatpush1.bf16.msra.mxu1 %v13480_v56  ;;  %12225 = vmatpush1.bf16.msra.mxu0 %v13482_v52  ;;  %v9059_v56 = vld [vmem:[#allocation22 + $0x7d8] sm:$0xff]  ;;  %v13592_v52 = vcombine.low %v9034_v24, %v9042_v1  ;;  %v9146_v1 = vld [vmem:[#allocation22 + $0xa90] sm:$0xff] }
 0x8c6   :  { %12144 = vmatprep.subr.bf16.mxu1 %v13497_v58  ;;  %12226 = vmatprep.subr.bf16.mxu0 %v13499_v50  ;;  %v13594_v58 = vcombine.low %v9035_v12, %v9043_v20  ;;  %v13609_v50 = vcombine.high %v9050_v32, %v9058_v57  ;;  %v13611_v11 = vcombine.high %v9051_v48, %v9059_v56  ;;  %v9154_v12 = vld [vmem:[#allocation22 + $0xad0] sm:$0xff]  ;;  %v9147_v20 = vld [vmem:[#allocation22 + $0xa98] sm:$0xff] }
 0x8c9   :  { %12145 = vmatpush1.bf16.msra.mxu1 %v13496_v62  ;;  %12227 = vmatpush1.bf16.msra.mxu0 %v13498_v54  ;;  %v9075_v62 = vld [vmem:[#allocation22 + $0x858] sm:$0xff]  ;;  %v13608_v54 = vcombine.low %v9050_v32, %v9058_v57  ;;  %v9162_v57 = vld [vmem:[#allocation22 + $0xb10] sm:$0xff] }
 0x8ca   :  { %12146 = vmatprep.subr.bf16.mxu1 %v13513_v15  ;;  %12228 = vmatprep.subr.bf16.mxu0 %v13515_v51  ;;  %v13610_v15 = vcombine.low %v9051_v48, %v9059_v56  ;;  %v13625_v51 = vcombine.high %v9066_v61, %v9074_v23  ;;  %v13627_v28 = vcombine.high %v9067_v30, %v9075_v62  ;;  %v9170_v48 = vld [vmem:[#allocation22 + $0xb50] sm:$0xff]  ;;  %v9163_v56 = vld [vmem:[#allocation22 + $0xb18] sm:$0xff] }
 0x8cd   :  { %12147 = vmatpush1.bf16.msra.mxu1 %v13512_v63  ;;  %12229 = vmatpush1.bf16.msra.mxu0 %v13514_v14  ;;  %v9091_v63 = vld [vmem:[#allocation22 + $0x8d8] sm:$0xff]  ;;  %v13624_v14 = vcombine.low %v9066_v61, %v9074_v23  ;;  %v9178_v23 = vld [vmem:[#allocation22 + $0xb90] sm:$0xff] }
 0x8ce   :  { %12148 = vmatprep.subr.bf16.mxu1 %v13529_v8  ;;  %12230 = vmatprep.subr.bf16.mxu0 %v13531_v60  ;;  %v13626_v8 = vcombine.low %v9067_v30, %v9075_v62  ;;  %v13641_v60 = vcombine.high %v9082_v34, %v9090_v16  ;;  %v13643_v44 = vcombine.high %v9083_v49, %v9091_v63  ;;  %v9186_v30 = vld [vmem:[#allocation22 + $0xbd0] sm:$0xff]  ;;  %v9179_v62 = vld [vmem:[#allocation22 + $0xb98] sm:$0xff] }
 0x8d1   :  { %12149 = vmatpush1.bf16.msra.mxu1 %v13528_v10  ;;  %12231 = vmatpush1.bf16.msra.mxu0 %v13530_v39  ;;  %v9107_v10 = vld [vmem:[#allocation22 + $0x958] sm:$0xff]  ;;  %v13640_v39 = vcombine.low %v9082_v34, %v9090_v16  ;;  %v9194_v16 = vld [vmem:[#allocation22 + $0xc10] sm:$0xff] }
 0x8d2   :  { %12150 = vmatprep.subr.bf16.mxu1 %v13545_v43  ;;  %12232 = vmatprep.subr.bf16.mxu0 %v13547_v41  ;;  %v13642_v43 = vcombine.low %v9083_v49, %v9091_v63  ;;  %v13657_v41 = vcombine.high %v9098_v5, %v9106_v17  ;;  %v13659_v21 = vcombine.high %v9099_v45, %v9107_v10  ;;  %v9202_v49 = vld [vmem:[#allocation22 + $0xc50] sm:$0xff]  ;;  %v9195_v63 = vld [vmem:[#allocation22 + $0xc18] sm:$0xff] }
 0x8d5   :  { %12151 = vmatpush1.bf16.msra.mxu1 %v13544_v26  ;;  %12233 = vmatpush1.bf16.msra.mxu0 %v13546_v3  ;;  %v9123_v26 = vld [vmem:[#allocation22 + $0x9d8] sm:$0xff]  ;;  %v13656_v3 = vcombine.low %v9098_v5, %v9106_v17  ;;  %v9210_v17 = vld [vmem:[#allocation22 + $0xc90] sm:$0xff] }
 0x8d6   :  { %12152 = vmatprep.subr.bf16.mxu1 %v13561_v36  ;;  %12234 = vmatprep.subr.bf16.mxu0 %v13563_v6  ;;  %v13658_v36 = vcombine.low %v9099_v45, %v9107_v10  ;;  %v13673_v6 = vcombine.high %v9114_v9, %v9122_v42  ;;  %v13675_v27 = vcombine.high %v9115_v35, %v9123_v26  ;;  %v9218_v45 = vld [vmem:[#allocation22 + $0xcd0] sm:$0xff]  ;;  %v9211_v10 = vld [vmem:[#allocation22 + $0xc98] sm:$0xff] }
 0x8d9   :  { %12153 = vmatpush1.bf16.msra.mxu1 %v13560_v19  ;;  %12235 = vmatpush1.bf16.msra.mxu0 %v13562_v2  ;;  %v9139_v19 = vld [vmem:[#allocation22 + $0xa58] sm:$0xff]  ;;  %v13672_v2 = vcombine.low %v9114_v9, %v9122_v42  ;;  %v9226_v42 = vld [vmem:[#allocation22 + $0xd10] sm:$0xff] }
 0x8da   :  { %12154 = vmatprep.subr.bf16.mxu1 %v13577_v37  ;;  %12236 = vmatprep.subr.bf16.mxu0 %v13579_v25  ;;  %v13674_v37 = vcombine.low %v9115_v35, %v9123_v26  ;;  %v13689_v25 = vcombine.high %v9130_v22, %v9138_v0  ;;  %v13691_v24 = vcombine.high %v9131_v46, %v9139_v19  ;;  %v9234_v35 = vld [vmem:[#allocation22 + $0xd50] sm:$0xff]  ;;  %v9227_v26 = vld [vmem:[#allocation22 + $0xd18] sm:$0xff] }
 0x8dd   :  { %12155 = vmatpush1.bf16.msra.mxu1 %v13576_v18  ;;  %12237 = vmatpush1.bf16.msra.mxu0 %v13578_v53  ;;  %v9155_v18 = vld [vmem:[#allocation22 + $0xad8] sm:$0xff]  ;;  %v13688_v53 = vcombine.low %v9130_v22, %v9138_v0  ;;  %v9242_v0 = vld [vmem:[#allocation22 + $0xd90] sm:$0xff] }
 0x8de   :  { %12156 = vmatprep.subr.bf16.mxu1 %v13593_v7  ;;  %12238 = vmatprep.subr.bf16.mxu0 %v13595_v4  ;;  %v13690_v7 = vcombine.low %v9131_v46, %v9139_v19  ;;  %v13705_v4 = vcombine.high %v9146_v1, %v9154_v12  ;;  %v13707_v32 = vcombine.high %v9147_v20, %v9155_v18  ;;  %v9250_v46 = vld [vmem:[#allocation22 + $0xdd0] sm:$0xff]  ;;  %v9243_v19 = vld [vmem:[#allocation22 + $0xd98] sm:$0xff] }
 0x8e1   :  { %12157 = vmatpush1.bf16.msra.mxu1 %v13592_v52  ;;  %12239 = vmatpush1.bf16.msra.mxu0 %v13594_v58  ;;  %v9171_v52 = vld [vmem:[#allocation22 + $0xb58] sm:$0xff]  ;;  %v13704_v58 = vcombine.low %v9146_v1, %v9154_v12  ;;  %v9258_v12 = vld [vmem:[#allocation22 + $0xe10] sm:$0xff] }
 0x8e2   :  { %12158 = vmatprep.subr.bf16.mxu1 %v13609_v50  ;;  %12240 = vmatprep.subr.bf16.mxu0 %v13611_v11  ;;  %v13706_v50 = vcombine.low %v9147_v20, %v9155_v18  ;;  %v13721_v11 = vcombine.high %v9162_v57, %v9170_v48  ;;  %v13723_v61 = vcombine.high %v9163_v56, %v9171_v52  ;;  %v9266_v20 = vld [vmem:[#allocation22 + $0xe50] sm:$0xff]  ;;  %v9259_v18 = vld [vmem:[#allocation22 + $0xe18] sm:$0xff] }
 0x8e5   :  { %12159 = vmatpush1.bf16.msra.mxu1 %v13608_v54  ;;  %12241 = vmatpush1.bf16.msra.mxu0 %v13610_v15  ;;  %v9187_v54 = vld [vmem:[#allocation22 + $0xbd8] sm:$0xff]  ;;  %v13720_v15 = vcombine.low %v9162_v57, %v9170_v48  ;;  %v9274_v48 = vld [vmem:[#allocation22 + $0xe90] sm:$0xff] }
 0x8e6   :  { %12169 = vmatprep.subr.bf16.mxu1 %v13625_v51  ;;  %12251 = vmatprep.subr.bf16.mxu0 %v13627_v28  ;;  %v13722_v51 = vcombine.low %v9163_v56, %v9171_v52  ;;  %v13737_v28 = vcombine.high %v9178_v23, %v9186_v30  ;;  %v13739_v34 = vcombine.high %v9179_v62, %v9187_v54  ;;  %v9282_v56 = vld [vmem:[#allocation22 + $0xed0] sm:$0xff]  ;;  %v9275_v52 = vld [vmem:[#allocation22 + $0xe98] sm:$0xff] }
 0x8e8   :  { %12161 = vmatmul.mubr.bf16.vlgmr.msra.gmra.mrb[28].mxu1 %v17601_v59  ;;  %12243 = vmatmul.mubr.bf16.vlgmr.msra.gmra.mrb[48].mxu0 %v17601_v59 }
 0x8e9   :  { %12170 = vmatpush1.bf16.msra.mxu1 %v13624_v14  ;;  %12201 = vmatprep.mubr.bf16.mxu1 %v17644_v47  ;;  %v9203_v14 = vld [vmem:[#allocation22 + $0xc58] sm:$0xff] }
 0x8ea   :  { %12252 = vmatpush1.bf16.msra.mxu0 %v13626_v8  ;;  %12283 = vmatprep.mubr.bf16.mxu0 %v17644_v47  ;;  %v13736_v8 = vcombine.low %v9178_v23, %v9186_v30  ;;  %v13755_v5 = vcombine.high %v9195_v63, %v9203_v14  ;;  %v9290_v30 = vld [vmem:[#allocation22 + $0xf10] sm:$0xff] }
 0x8eb   :  { %12171 = vmatprep.subr.bf16.mxu1 %v13641_v60  ;;  %12253 = vmatprep.subr.bf16.mxu0 %v13643_v44  ;;  %v13738_v60 = vcombine.low %v9179_v62, %v9187_v54  ;;  %v13753_v44 = vcombine.high %v9194_v16, %v9202_v49  ;;  %v9298_v62 = vld [vmem:[#allocation22 + $0xf50] sm:$0xff]  ;;  %v9291_v54 = vld [vmem:[#allocation22 + $0xf18] sm:$0xff] }
 0x8ed   :  { %12172 = vmatpush1.bf16.msra.mxu1 %v13640_v39  ;;  %v9219_v39 = vld [vmem:[#allocation22 + $0xcd8] sm:$0xff] }
 0x8ee   :  { %12254 = vmatpush1.bf16.msra.mxu0 %v13642_v43  ;;  %12173 = vmatprep.subr.bf16.mxu1 %v13657_v41  ;;  %v13752_v43 = vcombine.low %v9194_v16, %v9202_v49  ;;  %v13754_v41 = vcombine.low %v9195_v63, %v9203_v14  ;;  %v13771_v9 = vcombine.high %v9211_v10, %v9219_v39  ;;  %v9306_v49 = vld [vmem:[#allocation22 + $0xf90] sm:$0xff]  ;;  %v9307_v14 = vld [vmem:[#allocation22 + $0xf98] sm:$0xff] }
 0x8ef   :  { %12255 = vmatprep.subr.bf16.mxu0 %v13659_v21  ;;  %v13769_v21 = vcombine.high %v9210_v17, %v9218_v45  ;;  %v9314_v63 = vld [vmem:[#allocation22 + $0xfd0] sm:$0xff] }
 0x8f1   :  { %12174 = vmatpush1.bf16.msra.mxu1 %v13656_v3  ;;  %v9235_v3 = vld [vmem:[#allocation22 + $0xd58] sm:$0xff] }
 0x8f2   :  { %12256 = vmatpush1.bf16.msra.mxu0 %v13658_v36  ;;  %12175 = vmatprep.subr.bf16.mxu1 %v13673_v6  ;;  %v13768_v36 = vcombine.low %v9210_v17, %v9218_v45  ;;  %v13770_v6 = vcombine.low %v9211_v10, %v9219_v39  ;;  %v13787_v22 = vcombine.high %v9227_v26, %v9235_v3  ;;  %v8812_v45 = vld [vmem:[#allocation22 + $0x20] sm:$0xff]  ;;  %v8813_v39 = vld [vmem:[#allocation22 + $0x28] sm:$0xff] }
 0x8f3   :  { %12257 = vmatprep.subr.bf16.mxu0 %v13675_v27  ;;  %v13785_v27 = vcombine.high %v9226_v42, %v9234_v35  ;;  %v8820_v10 = vld [vmem:[#allocation22 + $0x60] sm:$0xff] }
 0x8f5   :  { %12176 = vmatpush1.bf16.msra.mxu1 %v13672_v2  ;;  %v9251_v2 = vld [vmem:[#allocation22 + $0xdd8] sm:$0xff] }
 0x8f6   :  { %12258 = vmatpush1.bf16.msra.mxu0 %v13674_v37  ;;  %12177 = vmatprep.subr.bf16.mxu1 %v13689_v25  ;;  %v13784_v37 = vcombine.low %v9226_v42, %v9234_v35  ;;  %v13786_v25 = vcombine.low %v9227_v26, %v9235_v3  ;;  %v13803_v1 = vcombine.high %v9243_v19, %v9251_v2  ;;  %v8828_v35 = vld [vmem:[#allocation22 + $0xa0] sm:$0xff] }
 0x8f7   :  { %12259 = vmatprep.subr.bf16.mxu0 %v13691_v24  ;;  %v13801_v24 = vcombine.high %v9242_v0, %v9250_v46  ;;  %v8836_v26 = vld [vmem:[#allocation22 + $0xe0] sm:$0xff]  ;;  %v13372_v3 = vcombine.low %v8812_v45, %v8820_v10 }
 0x8f9   :  { %12178 = vmatpush1.bf16.msra.mxu1 %v13688_v53  ;;  %v9267_v53 = vld [vmem:[#allocation22 + $0xe58] sm:$0xff] }
 0x8fa   :  { %12260 = vmatpush1.bf16.msra.mxu0 %v13690_v7  ;;  %12179 = vmatprep.subr.bf16.mxu1 %v13705_v4  ;;  %v13800_v7 = vcombine.low %v9242_v0, %v9250_v46  ;;  %v13802_v4 = vcombine.low %v9243_v19, %v9251_v2  ;;  %v13819_v57 = vcombine.high %v9259_v18, %v9267_v53  ;;  %v8844_v0 = vld [vmem:[#allocation22 + $0x120] sm:$0xff]  ;;  %v8845_v2 = vld [vmem:[#allocation22 + $0x128] sm:$0xff] }
 0x8fb   :  { %12261 = vmatprep.subr.bf16.mxu0 %v13707_v32  ;;  %v13817_v32 = vcombine.high %v9258_v12, %v9266_v20  ;;  %v8852_v46 = vld [vmem:[#allocation22 + $0x160] sm:$0xff] }
 0x8fd   :  { %12180 = vmatpush1.bf16.msra.mxu1 %v13704_v58  ;;  %v9283_v58 = vld [vmem:[#allocation22 + $0xed8] sm:$0xff] }
 0x8fe   :  { %12262 = vmatpush1.bf16.msra.mxu0 %v13706_v50  ;;  %12181 = vmatprep.subr.bf16.mxu1 %v13721_v11  ;;  %v13816_v50 = vcombine.low %v9258_v12, %v9266_v20  ;;  %v13818_v11 = vcombine.low %v9259_v18, %v9267_v53  ;;  %v13835_v23 = vcombine.high %v9275_v52, %v9283_v58  ;;  %v8860_v20 = vld [vmem:[#allocation22 + $0x1a0] sm:$0xff]  ;;  %v8861_v53 = vld [vmem:[#allocation22 + $0x1a8] sm:$0xff] }
 0x8ff   :  { %12263 = vmatprep.subr.bf16.mxu0 %v13723_v61  ;;  %v13833_v61 = vcombine.high %v9274_v48, %v9282_v56  ;;  %v8868_v18 = vld [vmem:[#allocation22 + $0x1e0] sm:$0xff] }
 0x901   :  { %12182 = vmatpush1.bf16.msra.mxu1 %v13720_v15  ;;  %v9299_v15 = vld [vmem:[#allocation22 + $0xf58] sm:$0xff] }
 0x902   :  { %12264 = vmatpush1.bf16.msra.mxu0 %v13722_v51  ;;  %12183 = vmatprep.subr.bf16.mxu1 %v13737_v28  ;;  %v13832_v51 = vcombine.low %v9274_v48, %v9282_v56  ;;  %v13834_v28 = vcombine.low %v9275_v52, %v9283_v58  ;;  %v13851_v16 = vcombine.high %v9291_v54, %v9299_v15  ;;  %v8876_v56 = vld [vmem:[#allocation22 + $0x220] sm:$0xff]  ;;  %v8877_v58 = vld [vmem:[#allocation22 + $0x228] sm:$0xff] }
 0x903   :  { %12265 = vmatprep.subr.bf16.mxu0 %v13739_v34  ;;  %v13849_v34 = vcombine.high %v9290_v30, %v9298_v62  ;;  %v8884_v52 = vld [vmem:[#allocation22 + $0x260] sm:$0xff] }
 0x905   :  { %12184 = vmatpush1.bf16.msra.mxu1 %v13736_v8  ;;  %v9315_v8 = vld [vmem:[#allocation22 + $0xfd8] sm:$0xff] }
 0x906   :  { %12266 = vmatpush1.bf16.msra.mxu0 %v13738_v60  ;;  %12185 = vmatprep.subr.bf16.mxu1 %v13753_v44  ;;  %v13848_v60 = vcombine.low %v9290_v30, %v9298_v62  ;;  %v13850_v44 = vcombine.low %v9291_v54, %v9299_v15  ;;  %v13867_v17 = vcombine.high %v9307_v14, %v9315_v8  ;;  %v8892_v62 = vld [vmem:[#allocation22 + $0x2a0] sm:$0xff]  ;;  %v8893_v15 = vld [vmem:[#allocation22 + $0x2a8] sm:$0xff] }
 0x907   :  { %12267 = vmatprep.subr.bf16.mxu0 %v13755_v5  ;;  %v13865_v5 = vcombine.high %v9306_v49, %v9314_v63  ;;  %v8900_v54 = vld [vmem:[#allocation22 + $0x2e0] sm:$0xff] }
 0x909   :  { %12186 = vmatpush1.bf16.msra.mxu1 %v13752_v43  ;;  %v8821_v43 = vld [vmem:[#allocation22 + $0x68] sm:$0xff] }
 0x90a   :  { %12268 = vmatpush1.bf16.msra.mxu0 %v13754_v41  ;;  %12187 = vmatprep.subr.bf16.mxu1 %v13769_v21  ;;  %v13864_v41 = vcombine.low %v9306_v49, %v9314_v63  ;;  %v13866_v21 = vcombine.low %v9307_v14, %v9315_v8  ;;  %v13375_v42 = vcombine.high %v8813_v39, %v8821_v43  ;;  %v8908_v63 = vld [vmem:[#allocation22 + $0x320] sm:$0xff]  ;;  %v8909_v8 = vld [vmem:[#allocation22 + $0x328] sm:$0xff] }
 0x90b   :  { %12269 = vmatprep.subr.bf16.mxu0 %v13771_v9  ;;  %v13373_v9 = vcombine.high %v8812_v45, %v8820_v10  ;;  %v8916_v14 = vld [vmem:[#allocation22 + $0x360] sm:$0xff] }
 0x90c   :  { %v8924_v10 = vld [vmem:[#allocation22 + $0x3a0] sm:$0xff] }
 0x90d   :  { %12188 = vmatpush1.bf16.msra.mxu1 %v13768_v36  ;;  %v8829_v36 = vld [vmem:[#allocation22 + $0xa8] sm:$0xff] }
 0x90e   :  { %12270 = vmatpush1.bf16.msra.mxu0 %v13770_v6  ;;  %12189 = vmatprep.subr.bf16.mxu1 %v13785_v27  ;;  %v8837_v6 = vld [vmem:[#allocation22 + $0xe8] sm:$0xff]  ;;  %v13374_v27 = vcombine.low %v8813_v39, %v8821_v43  ;;  %v8932_v39 = vld [vmem:[#allocation22 + $0x3e0] sm:$0xff] }
 0x90f   :  { %12271 = vmatprep.subr.bf16.mxu0 %v13787_v22  ;;  %v13389_v22 = vcombine.high %v8828_v35, %v8836_v26  ;;  %v13391_v19 = vcombine.high %v8829_v36, %v8837_v6  ;;  %v8925_v43 = vld [vmem:[#allocation22 + $0x3a8] sm:$0xff] }
 0x911   :  { %12190 = vmatpush1.bf16.msra.mxu1 %v13784_v37  ;;  %v8853_v37 = vld [vmem:[#allocation22 + $0x168] sm:$0xff] }
 0x912   :  { %12272 = vmatpush1.bf16.msra.mxu0 %v13786_v25  ;;  %12191 = vmatprep.subr.bf16.mxu1 %v13801_v24  ;;  %v13388_v25 = vcombine.low %v8828_v35, %v8836_v26  ;;  %v13390_v24 = vcombine.low %v8829_v36, %v8837_v6  ;;  %v13407_v12 = vcombine.high %v8845_v2, %v8853_v37  ;;  %v8940_v26 = vld [vmem:[#allocation22 + $0x420] sm:$0xff]  ;;  %v8941_v36 = vld [vmem:[#allocation22 + $0x428] sm:$0xff] }
 0x913   :  { %12273 = vmatprep.subr.bf16.mxu0 %v13803_v1  ;;  %v13405_v1 = vcombine.high %v8844_v0, %v8852_v46  ;;  %v8949_v6 = vld [vmem:[#allocation22 + $0x468] sm:$0xff] }
 0x915   :  { %12192 = vmatpush1.bf16.msra.mxu1 %v13800_v7  ;;  %v8869_v7 = vld [vmem:[#allocation22 + $0x1e8] sm:$0xff] }
 0x916   :  { %12274 = vmatpush1.bf16.msra.mxu0 %v13802_v4  ;;  %12193 = vmatprep.subr.bf16.mxu1 %v13817_v32  ;;  %v13404_v4 = vcombine.low %v8844_v0, %v8852_v46  ;;  %v13406_v32 = vcombine.low %v8845_v2, %v8853_v37  ;;  %v13423_v48 = vcombine.high %v8861_v53, %v8869_v7  ;;  %v8964_v2 = vld [vmem:[#allocation22 + $0x4e0] sm:$0xff]  ;;  %v8957_v37 = vld [vmem:[#allocation22 + $0x4a8] sm:$0xff] }
 0x917   :  { %12275 = vmatprep.subr.bf16.mxu0 %v13819_v57  ;;  %v13421_v57 = vcombine.high %v8860_v20, %v8868_v18  ;;  %v13503_v46 = vcombine.high %v8941_v36, %v8949_v6 }
 0x919   :  { %12194 = vmatpush1.bf16.msra.mxu1 %v13816_v50  ;;  %v8885_v50 = vld [vmem:[#allocation22 + $0x268] sm:$0xff] }
 0x91a   :  { %12276 = vmatpush1.bf16.msra.mxu0 %v13818_v11  ;;  %12195 = vmatprep.subr.bf16.mxu1 %v13833_v61  ;;  %v13420_v11 = vcombine.low %v8860_v20, %v8868_v18  ;;  %v13422_v61 = vcombine.low %v8861_v53, %v8869_v7  ;;  %v13439_v30 = vcombine.high %v8877_v58, %v8885_v50  ;;  %v8972_v18 = vld [vmem:[#allocation22 + $0x520] sm:$0xff]  ;;  %v8973_v7 = vld [vmem:[#allocation22 + $0x528] sm:$0xff] }
 0x91b   :  { %12277 = vmatprep.subr.bf16.mxu0 %v13835_v23  ;;  %v13437_v23 = vcombine.high %v8876_v56, %v8884_v52  ;;  %v8980_v53 = vld [vmem:[#allocation22 + $0x560] sm:$0xff] }
 0x91d   :  { %12196 = vmatpush1.bf16.msra.mxu1 %v13832_v51  ;;  %v8901_v51 = vld [vmem:[#allocation22 + $0x2e8] sm:$0xff] }
 0x91e   :  { %12278 = vmatpush1.bf16.msra.mxu0 %v13834_v28  ;;  %12197 = vmatprep.subr.bf16.mxu1 %v13849_v34  ;;  %v13436_v28 = vcombine.low %v8876_v56, %v8884_v52  ;;  %v13438_v34 = vcombine.low %v8877_v58, %v8885_v50  ;;  %v13455_v49 = vcombine.high %v8893_v15, %v8901_v51  ;;  %v8988_v52 = vld [vmem:[#allocation22 + $0x5a0] sm:$0xff]  ;;  %v8989_v50 = vld [vmem:[#allocation22 + $0x5a8] sm:$0xff] }
 0x91f   :  { %12279 = vmatprep.subr.bf16.mxu0 %v13851_v16  ;;  %v13453_v16 = vcombine.high %v8892_v62, %v8900_v54  ;;  %v8996_v58 = vld [vmem:[#allocation22 + $0x5e0] sm:$0xff] }
 0x921   :  { %12198 = vmatpush1.bf16.msra.mxu1 %v13848_v60  ;;  %v8917_v60 = vld [vmem:[#allocation22 + $0x368] sm:$0xff] }
 0x922   :  { %12280 = vmatpush1.bf16.msra.mxu0 %v13850_v44  ;;  %12199 = vmatprep.subr.bf16.mxu1 %v13865_v5  ;;  %v13452_v44 = vcombine.low %v8892_v62, %v8900_v54  ;;  %v13454_v5 = vcombine.low %v8893_v15, %v8901_v51  ;;  %v13471_v45 = vcombine.high %v8909_v8, %v8917_v60  ;;  %v9004_v54 = vld [vmem:[#allocation22 + $0x620] sm:$0xff]  ;;  %v9005_v51 = vld [vmem:[#allocation22 + $0x628] sm:$0xff] }
 0x923   :  { %12281 = vmatprep.subr.bf16.mxu0 %v13867_v17  ;;  %v13469_v17 = vcombine.high %v8908_v63, %v8916_v14  ;;  %v9012_v15 = vld [vmem:[#allocation22 + $0x660] sm:$0xff] }
 0x925   :  { %12200 = vmatpush1.bf16.msra.mxu1 %v13864_v41  ;;  %v8933_v41 = vld [vmem:[#allocation22 + $0x3e8] sm:$0xff] }
 0x926   :  { %12282 = vmatpush1.bf16.msra.mxu0 %v13866_v21  ;;  %12292 = vmatprep.subr.bf16.mxu1 %v13373_v9  ;;  %v13468_v21 = vcombine.low %v8908_v63, %v8916_v14  ;;  %v13470_v9 = vcombine.low %v8909_v8, %v8917_v60  ;;  %v13487_v35 = vcombine.high %v8925_v43, %v8933_v41  ;;  %v9020_v14 = vld [vmem:[#allocation22 + $0x6a0] sm:$0xff]  ;;  %v9021_v60 = vld [vmem:[#allocation22 + $0x6a8] sm:$0xff] }
 0x927   :  { %12374 = vmatprep.subr.bf16.mxu0 %v13375_v42  ;;  %v13485_v42 = vcombine.high %v8924_v10, %v8932_v39  ;;  %v9028_v8 = vld [vmem:[#allocation22 + $0x6e0] sm:$0xff] }
 0x928   :  { %12202 = vmatmul.mubr.bf16.vlgmr.msra.gmra.mrb[28].mxu1 %v17646_v31 }
 0x929   :  { %12284 = vmatmul.mubr.bf16.vlgmr.msra.gmra.mrb[48].mxu0 %v17646_v31  ;;  %12293 = vmatpush1.bf16.msra.mxu1 %v13372_v3  ;;  %v8948_v3 = vld [vmem:[#allocation22 + $0x460] sm:$0xff] }
 0x92a   :  { %12324 = vmatprep.mubr.bf16.mxu1 %v17599_v13  ;;  %12375 = vmatpush1.bf16.msra.mxu0 %v13374_v27  ;;  %v13484_v27 = vcombine.low %v8924_v10, %v8932_v39  ;;  %v13501_v0 = vcombine.high %v8940_v26, %v8948_v3  ;;  %v9036_v39 = vld [vmem:[#allocation22 + $0x720] sm:$0xff] }
 0x92b   :  { %12406 = vmatprep.mubr.bf16.mxu0 %v17599_v13  ;;  %12294 = vmatprep.subr.bf16.mxu1 %v13389_v22  ;;  %v13486_v22 = vcombine.low %v8925_v43, %v8933_v41  ;;  %v9044_v43 = vld [vmem:[#allocation22 + $0x760] sm:$0xff]  ;;  %v9037_v41 = vld [vmem:[#allocation22 + $0x728] sm:$0xff] }
 0x92c   :  { %12376 = vmatprep.subr.bf16.mxu0 %v13391_v19  ;;  %v8956_v19 = vld [vmem:[#allocation22 + $0x4a0] sm:$0xff] }
 0x92d   :  { %12295 = vmatpush1.bf16.msra.mxu1 %v13388_v25  ;;  %v8965_v25 = vld [vmem:[#allocation22 + $0x4e8] sm:$0xff] }
 0x92e   :  { %12377 = vmatpush1.bf16.msra.mxu0 %v13390_v24  ;;  %12296 = vmatprep.subr.bf16.mxu1 %v13405_v1  ;;  %v13500_v24 = vcombine.low %v8940_v26, %v8948_v3  ;;  %v13502_v1 = vcombine.low %v8941_v36, %v8949_v6  ;;  %v13519_v20 = vcombine.high %v8957_v37, %v8965_v25  ;;  %v9052_v3 = vld [vmem:[#allocation22 + $0x7a0] sm:$0xff]  ;;  %v9053_v6 = vld [vmem:[#allocation22 + $0x7a8] sm:$0xff] }
 0x92f   :  { %12378 = vmatprep.subr.bf16.mxu0 %v13407_v12  ;;  %v13517_v12 = vcombine.high %v8956_v19, %v8964_v2  ;;  %v9060_v36 = vld [vmem:[#allocation22 + $0x7e0] sm:$0xff] }
 0x931   :  { %12297 = vmatpush1.bf16.msra.mxu1 %v13404_v4  ;;  %v8981_v4 = vld [vmem:[#allocation22 + $0x568] sm:$0xff] }
 0x932   :  { %12379 = vmatpush1.bf16.msra.mxu0 %v13406_v32  ;;  %12298 = vmatprep.subr.bf16.mxu1 %v13421_v57  ;;  %v13516_v32 = vcombine.low %v8956_v19, %v8964_v2  ;;  %v13518_v57 = vcombine.low %v8957_v37, %v8965_v25  ;;  %v13535_v56 = vcombine.high %v8973_v7, %v8981_v4  ;;  %v9068_v2 = vld [vmem:[#allocation22 + $0x820] sm:$0xff]  ;;  %v9069_v25 = vld [vmem:[#allocation22 + $0x828] sm:$0xff] }
 0x933   :  { %12380 = vmatprep.subr.bf16.mxu0 %v13423_v48  ;;  %v13533_v48 = vcombine.high %v8972_v18, %v8980_v53  ;;  %v9076_v37 = vld [vmem:[#allocation22 + $0x860] sm:$0xff] }
 0x935   :  { %12299 = vmatpush1.bf16.msra.mxu1 %v13420_v11  ;;  %v8997_v11 = vld [vmem:[#allocation22 + $0x5e8] sm:$0xff] }
 0x936   :  { %12381 = vmatpush1.bf16.msra.mxu0 %v13422_v61  ;;  %12300 = vmatprep.subr.bf16.mxu1 %v13437_v23  ;;  %v13532_v61 = vcombine.low %v8972_v18, %v8980_v53  ;;  %v13534_v23 = vcombine.low %v8973_v7, %v8981_v4  ;;  %v13551_v62 = vcombine.high %v8989_v50, %v8997_v11  ;;  %v9084_v53 = vld [vmem:[#allocation22 + $0x8a0] sm:$0xff] }
 0x937   :  { %12382 = vmatprep.subr.bf16.mxu0 %v13439_v30  ;;  %v13549_v30 = vcombine.high %v8988_v52, %v8996_v58  ;;  %v9092_v7 = vld [vmem:[#allocation22 + $0x8e0] sm:$0xff]  ;;  %v13628_v4 = vcombine.low %v9068_v2, %v9076_v37 }
 0x939   :  { %12301 = vmatpush1.bf16.msra.mxu1 %v13436_v28  ;;  %v9013_v28 = vld [vmem:[#allocation22 + $0x668] sm:$0xff] }
 0x93a   :  { %12383 = vmatpush1.bf16.msra.mxu0 %v13438_v34  ;;  %12302 = vmatprep.subr.bf16.mxu1 %v13453_v16  ;;  %v13548_v34 = vcombine.low %v8988_v52, %v8996_v58  ;;  %v13550_v16 = vcombine.low %v8989_v50, %v8997_v11  ;;  %v13567_v63 = vcombine.high %v9005_v51, %v9013_v28  ;;  %v9100_v52 = vld [vmem:[#allocation22 + $0x920] sm:$0xff]  ;;  %v9101_v11 = vld [vmem:[#allocation22 + $0x928] sm:$0xff] }
 0x93b   :  { %12384 = vmatprep.subr.bf16.mxu0 %v13455_v49  ;;  %v13565_v49 = vcombine.high %v9004_v54, %v9012_v15  ;;  %v9108_v58 = vld [vmem:[#allocation22 + $0x960] sm:$0xff] }
 0x93d   :  { %12303 = vmatpush1.bf16.msra.mxu1 %v13452_v44  ;;  %v9029_v44 = vld [vmem:[#allocation22 + $0x6e8] sm:$0xff] }
 0x93e   :  { %12385 = vmatpush1.bf16.msra.mxu0 %v13454_v5  ;;  %12304 = vmatprep.subr.bf16.mxu1 %v13469_v17  ;;  %v13564_v5 = vcombine.low %v9004_v54, %v9012_v15  ;;  %v13566_v17 = vcombine.low %v9005_v51, %v9013_v28  ;;  %v13583_v10 = vcombine.high %v9021_v60, %v9029_v44  ;;  %v9116_v15 = vld [vmem:[#allocation22 + $0x9a0] sm:$0xff]  ;;  %v9117_v28 = vld [vmem:[#allocation22 + $0x9a8] sm:$0xff] }
 0x93f   :  { %12386 = vmatprep.subr.bf16.mxu0 %v13471_v45  ;;  %v13581_v45 = vcombine.high %v9020_v14, %v9028_v8  ;;  %v9124_v51 = vld [vmem:[#allocation22 + $0x9e0] sm:$0xff] }
 0x941   :  { %12305 = vmatpush1.bf16.msra.mxu1 %v13468_v21  ;;  %v9045_v21 = vld [vmem:[#allocation22 + $0x768] sm:$0xff] }
 0x942   :  { %12387 = vmatpush1.bf16.msra.mxu0 %v13470_v9  ;;  %12306 = vmatprep.subr.bf16.mxu1 %v13485_v42  ;;  %v13580_v9 = vcombine.low %v9020_v14, %v9028_v8  ;;  %v13582_v42 = vcombine.low %v9021_v60, %v9029_v44  ;;  %v13599_v26 = vcombine.high %v9037_v41, %v9045_v21  ;;  %v9132_v8 = vld [vmem:[#allocation22 + $0xa20] sm:$0xff]  ;;  %v9133_v44 = vld [vmem:[#allocation22 + $0xa28] sm:$0xff] }
 0x943   :  { %12388 = vmatprep.subr.bf16.mxu0 %v13487_v35  ;;  %v13597_v35 = vcombine.high %v9036_v39, %v9044_v43  ;;  %v9140_v60 = vld [vmem:[#allocation22 + $0xa60] sm:$0xff] }
 0x945   :  { %12307 = vmatpush1.bf16.msra.mxu1 %v13484_v27  ;;  %v9061_v27 = vld [vmem:[#allocation22 + $0x7e8] sm:$0xff] }
 0x946   :  { %12389 = vmatpush1.bf16.msra.mxu0 %v13486_v22  ;;  %12308 = vmatprep.subr.bf16.mxu1 %v13501_v0  ;;  %v13596_v22 = vcombine.low %v9036_v39, %v9044_v43  ;;  %v13598_v0 = vcombine.low %v9037_v41, %v9045_v21  ;;  %v13615_v19 = vcombine.high %v9053_v6, %v9061_v27  ;;  %v9148_v43 = vld [vmem:[#allocation22 + $0xaa0] sm:$0xff]  ;;  %v9149_v21 = vld [vmem:[#allocation22 + $0xaa8] sm:$0xff] }
 0x947   :  { %12390 = vmatprep.subr.bf16.mxu0 %v13503_v46  ;;  %v13613_v46 = vcombine.high %v9052_v3, %v9060_v36  ;;  %v9156_v41 = vld [vmem:[#allocation22 + $0xae0] sm:$0xff] }
 0x949   :  { %12309 = vmatpush1.bf16.msra.mxu1 %v13500_v24  ;;  %v9077_v24 = vld [vmem:[#allocation22 + $0x868] sm:$0xff] }
 0x94a   :  { %12391 = vmatpush1.bf16.msra.mxu0 %v13502_v1  ;;  %12310 = vmatprep.subr.bf16.mxu1 %v13517_v12  ;;  %v13612_v1 = vcombine.low %v9052_v3, %v9060_v36  ;;  %v13614_v12 = vcombine.low %v9053_v6, %v9061_v27  ;;  %v13631_v18 = vcombine.high %v9069_v25, %v9077_v24 }
 0x94b   :  { %12392 = vmatprep.subr.bf16.mxu0 %v13519_v20  ;;  %v13629_v20 = vcombine.high %v9068_v2, %v9076_v37  ;;  %v13709_v6 = vcombine.high %v9148_v43, %v9156_v41  ;;  %v9165_v2 = vld [vmem:[#allocation22 + $0xb28] sm:$0xff] }
 0x94c   :  { %v9173_v37 = vld [vmem:[#allocation22 + $0xb68] sm:$0xff] }
 0x94d   :  { %12311 = vmatpush1.bf16.msra.mxu1 %v13516_v32  ;;  %v9085_v32 = vld [vmem:[#allocation22 + $0x8a8] sm:$0xff] }
 0x94e   :  { %12393 = vmatpush1.bf16.msra.mxu0 %v13518_v57  ;;  %12312 = vmatprep.subr.bf16.mxu1 %v13533_v48  ;;  %v9093_v57 = vld [vmem:[#allocation22 + $0x8e8] sm:$0xff]  ;;  %v13630_v48 = vcombine.low %v9069_v25, %v9077_v24  ;;  %v13708_v25 = vcombine.low %v9148_v43, %v9156_v41 }
 0x94f   :  { %12394 = vmatprep.subr.bf16.mxu0 %v13535_v56  ;;  %v13645_v56 = vcombine.high %v9084_v53, %v9092_v7  ;;  %v13647_v50 = vcombine.high %v9085_v32, %v9093_v57 }
 0x951   :  { %12313 = vmatpush1.bf16.msra.mxu1 %v13532_v61  ;;  %v9109_v61 = vld [vmem:[#allocation22 + $0x968] sm:$0xff] }
 0x952   :  { %12395 = vmatpush1.bf16.msra.mxu0 %v13534_v23  ;;  %12314 = vmatprep.subr.bf16.mxu1 %v13549_v30  ;;  %v13644_v23 = vcombine.low %v9084_v53, %v9092_v7  ;;  %v13646_v30 = vcombine.low %v9085_v32, %v9093_v57  ;;  %v13663_v54 = vcombine.high %v9101_v11, %v9109_v61  ;;  %v9180_v32 = vld [vmem:[#allocation22 + $0xba0] sm:$0xff] }
 0x953   :  { %12396 = vmatprep.subr.bf16.mxu0 %v13551_v62  ;;  %v13661_v62 = vcombine.high %v9100_v52, %v9108_v58  ;;  %v9188_v57 = vld [vmem:[#allocation22 + $0xbe0] sm:$0xff] }
 0x955   :  { %12315 = vmatpush1.bf16.msra.mxu1 %v13548_v34  ;;  %v9125_v34 = vld [vmem:[#allocation22 + $0x9e8] sm:$0xff] }
 0x956   :  { %12397 = vmatpush1.bf16.msra.mxu0 %v13550_v16  ;;  %12316 = vmatprep.subr.bf16.mxu1 %v13565_v49  ;;  %v13660_v16 = vcombine.low %v9100_v52, %v9108_v58  ;;  %v13662_v49 = vcombine.low %v9101_v11, %v9109_v61  ;;  %v13679_v14 = vcombine.high %v9117_v28, %v9125_v34  ;;  %v9189_v11 = vld [vmem:[#allocation22 + $0xbe8] sm:$0xff] }
 0x957   :  { %12398 = vmatprep.subr.bf16.mxu0 %v13567_v63  ;;  %v13677_v63 = vcombine.high %v9116_v15, %v9124_v51 }
 0x959   :  { %12317 = vmatpush1.bf16.msra.mxu1 %v13564_v5  ;;  %v9141_v5 = vld [vmem:[#allocation22 + $0xa68] sm:$0xff] }
 0x95a   :  { %12399 = vmatpush1.bf16.msra.mxu0 %v13566_v17  ;;  %12318 = vmatprep.subr.bf16.mxu1 %v13581_v45  ;;  %v13676_v17 = vcombine.low %v9116_v15, %v9124_v51  ;;  %v13678_v45 = vcombine.low %v9117_v28, %v9125_v34  ;;  %v13695_v39 = vcombine.high %v9133_v44, %v9141_v5 }
 0x95b   :  { %12400 = vmatprep.subr.bf16.mxu0 %v13583_v10  ;;  %v13693_v10 = vcombine.high %v9132_v8, %v9140_v60  ;;  %v13694_v36 = vcombine.low %v9133_v44, %v9141_v5  ;;  %v13726_v34 = vcombine.low %v9165_v2, %v9173_v37  ;;  %v9197_v44 = vld [vmem:[#allocation22 + $0xc28] sm:$0xff] }
 0x95c   :  { %v9205_v5 = vld [vmem:[#allocation22 + $0xc68] sm:$0xff] }
 0x95d   :  { %12319 = vmatpush1.bf16.msra.mxu1 %v13580_v9  ;;  %v9157_v9 = vld [vmem:[#allocation22 + $0xae8] sm:$0xff] }
 0x95e   :  { %12401 = vmatpush1.bf16.msra.mxu0 %v13582_v42  ;;  %12320 = vmatprep.subr.bf16.mxu1 %v13597_v35  ;;  %v13692_v42 = vcombine.low %v9132_v8, %v9140_v60  ;;  %v17672_v35 = vld [vmem:[#allocation23] sm:$0xff]  ;;  %v13711_v27 = vcombine.high %v9149_v21, %v9157_v9 }
 0x95f   :  { %12402 = vmatprep.subr.bf16.mxu0 %v13599_v26  ;;  %v16011_v26 = vmov 1983009808   ;;  %v9331_v24 = vrot.slane %v17672_v35, %v17589_v38  ;;  %v9196_v8 = vld [vmem:[#allocation22 + $0xc20] sm:$0xff] }
 0x960   :  { %v12639_v3 = vunpack.c.l.s4 %v16011_v26  ;;  %v9204_v60 = vld [vmem:[#allocation22 + $0xc60] sm:$0xff]  ;;  %v9213_v26 = vld [vmem:[#allocation22 + $0xca8] sm:$0xff] }
 0x961   :  { %12321 = vmatpush1.bf16.msra.mxu1 %v13596_v22  ;;  %v9164_v22 = vld [vmem:[#allocation22 + $0xb20] sm:$0xff]  ;;  %v13757_v43 = vcombine.high %v9196_v8, %v9204_v60 }
 0x962   :  { %12403 = vmatpush1.bf16.msra.mxu0 %v13598_v0  ;;  %12322 = vmatprep.subr.bf16.mxu1 %v13613_v46  ;;  %v9172_v0 = vld [vmem:[#allocation22 + $0xb60] sm:$0xff]  ;;  %v9327_v46 = vrot.slane %v17672_v35, %v17584_v55 }
 0x963   :  { %12404 = vmatprep.subr.bf16.mxu0 %v13615_v19  ;;  %v9335_v19 = vrot.slane %v17672_v35, %v17635_v29  ;;  %v13724_v15 = vcombine.low %v9164_v22, %v9172_v0 }
 0x965   :  { %12323 = vmatpush1.bf16.msra.mxu1 %v13612_v1  ;;  %v12640_v1 = vunpack.c.0.s8 %v12639_v3  ;;  %v9221_v3 = vld [vmem:[#allocation22 + $0xce8] sm:$0xff] }
 0x966   :  { %12405 = vmatpush1.bf16.msra.mxu0 %v13614_v12  ;;  %12333 = vmatprep.subr.bf16.mxu1 %v13629_v20  ;;  %v9339_v12 = vrot.slane %v17672_v35, %v17638_v40  ;;  %v13710_v20 = vcombine.low %v9149_v21, %v9157_v9  ;;  %v13759_v21 = vcombine.high %v9197_v44, %v9205_v5  ;;  %v9212_v9 = vld [vmem:[#allocation22 + $0xca0] sm:$0xff] }
 0x967   :  { %12415 = vmatprep.subr.bf16.mxu0 %v13631_v18  ;;  %v13725_v18 = vcombine.high %v9164_v22, %v9172_v0  ;;  %v13775_v22 = vcombine.high %v9213_v26, %v9221_v3  ;;  %v9228_v0 = vld [vmem:[#allocation22 + $0xd20] sm:$0xff] }
 0x968   :  { %12325 = vmatmul.mubr.bf16.vlgmr.msra.gmra.mrb[32].mxu1 %v17601_v59 }
 0x969   :  { %12407 = vmatmul.mubr.bf16.vlgmr.msra.gmra.mrb[52].mxu0 %v17601_v59  ;;  %12334 = vmatpush1.bf16.msra.mxu1 %v13628_v4  ;;  %v13727_v4 = vcombine.high %v9165_v2, %v9173_v37  ;;  %v9237_v2 = vld [vmem:[#allocation22 + $0xd68] sm:$0xff] }
 0x96a   :  { %12365 = vmatprep.mubr.bf16.mxu1 %v17644_v47  ;;  %12416 = vmatpush1.bf16.msra.mxu0 %v13630_v48 }
 0x96b   :  { %12447 = vmatprep.mubr.bf16.mxu0 %v17644_v47  ;;  %12335 = vmatprep.subr.bf16.mxu1 %v13645_v56 }
 0x96c   :  { %12417 = vmatprep.subr.bf16.mxu0 %v13647_v50  ;;  %v9181_v50 = vld [vmem:[#allocation22 + $0xba8] sm:$0xff] }
 0x96d   :  { %12336 = vmatpush1.bf16.msra.mxu1 %v13644_v23  ;;  %v17683_v23 = vsub.s32 %v12640_v1, %v17581_v33 }
 0x96e   :  { %12418 = vmatpush1.bf16.msra.mxu0 %v13646_v30  ;;  %12337 = vmatprep.subr.bf16.mxu1 %v13661_v62 }
 0x96f   :  { %12419 = vmatprep.subr.bf16.mxu0 %v13663_v54 }
 0x971   :  { %12338 = vmatpush1.bf16.msra.mxu1 %v13660_v16  ;;  %v13741_v16 = vcombine.high %v9180_v32, %v9188_v57 }
 0x972   :  { %12420 = vmatpush1.bf16.msra.mxu0 %v13662_v49  ;;  %12339 = vmatprep.subr.bf16.mxu1 %v13677_v63 }
 0x973   :  { %12421 = vmatprep.subr.bf16.mxu0 %v13679_v14  ;;  %v13743_v14 = vcombine.high %v9181_v50, %v9189_v11 }
 0x975   :  { %12340 = vmatpush1.bf16.msra.mxu1 %v13676_v17 }
 0x976   :  { %12422 = vmatpush1.bf16.msra.mxu0 %v13678_v45  ;;  %12341 = vmatprep.subr.bf16.mxu1 %v13693_v10  ;;  %v13740_v10 = vcombine.low %v9180_v32, %v9188_v57 }
 0x977   :  { %12423 = vmatprep.subr.bf16.mxu0 %v13695_v39  ;;  %v13742_v39 = vcombine.low %v9181_v50, %v9189_v11 }
 0x979   :  { %12342 = vmatpush1.bf16.msra.mxu1 %v13692_v42  ;;  %v9220_v42 = vld [vmem:[#allocation22 + $0xce0] sm:$0xff] }
 0x97a   :  { %12424 = vmatpush1.bf16.msra.mxu0 %v13694_v36  ;;  %12343 = vmatprep.subr.bf16.mxu1 %v13709_v6  ;;  %v13756_v36 = vcombine.low %v9196_v8, %v9204_v60  ;;  %v13758_v6 = vcombine.low %v9197_v44, %v9205_v5  ;;  %v13772_v37 = vcombine.low %v9212_v9, %v9220_v42  ;;  %v9293_v8 = vld [vmem:[#allocation22 + $0xf28] sm:$0xff] }
 0x97b   :  { %v12039_v53 = vpop.f32.mrb[24].mxu1  ;;  %v12121_v7 = vpop.f32.mrb[44].mxu0  ;;  %12425 = vmatprep.subr.bf16.mxu0 %v13711_v27  ;;  %v13773_v27 = vcombine.high %v9212_v9, %v9220_v42  ;;  %v9301_v60 = vld [vmem:[#allocation22 + $0xf68] sm:$0xff] }
 0x97c   :  { %v14884_v48 = vadd.f32 %v12039_v53, %v9327_v46  ;;  %v14886_v56 = vadd.f32 %v12121_v7, %v9335_v19  ;;  %v12041_v52 = vpop.f32.mrb[25].mxu1  ;;  %v12123_v58 = vpop.f32.mrb[45].mxu0  ;;  %v9236_v46 = vld [vmem:[#allocation22 + $0xd60] sm:$0xff]  ;;  %v9229_v19 = vld [vmem:[#allocation22 + $0xd28] sm:$0xff]  ;;  %v13854_v9 = vcombine.low %v9293_v8, %v9301_v60 }
 0x97d   :  { %v14885_v61 = vadd.f32 %v12041_v52, %v9331_v24  ;;  %v14887_v30 = vadd.f32 %v12123_v58, %v9339_v12  ;;  %12344 = vmatpush1.bf16.msra.mxu1 %v13708_v25  ;;  %v12043_v62 = vpop.f32.mrb[26].mxu1  ;;  %v12125_v54 = vpop.f32.mrb[46].mxu0  ;;  %v13774_v25 = vcombine.low %v9213_v26, %v9221_v3  ;;  %v13789_v24 = vcombine.high %v9228_v0, %v9236_v46  ;;  %v9244_v12 = vld [vmem:[#allocation22 + $0xda0] sm:$0xff]  ;;  %v9253_v53 = vld [vmem:[#allocation22 + $0xde8] sm:$0xff]  ;;  %v8814_v3 = vld [vmem:[#allocation22 + $0x30] sm:$0xff] }
 0x97e   :  { %12426 = vmatpush1.bf16.msra.mxu0 %v13710_v20  ;;  %v12044_v51 = vpop.f32.mrb[27].mxu1  ;;  %v12126_v28 = vpop.f32.mrb[47].mxu0  ;;  %12345 = vmatprep.subr.bf16.mxu1 %v13725_v18  ;;  %v13791_v1 = vcombine.high %v9229_v19, %v9237_v2  ;;  %v9252_v20 = vld [vmem:[#allocation22 + $0xde0] sm:$0xff]  ;;  %v9245_v18 = vld [vmem:[#allocation22 + $0xda8] sm:$0xff]  ;;  %v13788_v7 = vcombine.low %v9228_v0, %v9236_v46 }
 0x97f   :  { %v12636_v49 = vcombine.low %v14884_v48, %v14885_v61  ;;  %v12637_v63 = vcombine.low %v14886_v56, %v14887_v30  ;;  %12427 = vmatprep.subr.bf16.mxu0 %v13727_v4  ;;  %v13790_v4 = vcombine.low %v9229_v19, %v9237_v2  ;;  %v13805_v32 = vcombine.high %v9244_v12, %v9252_v20  ;;  %v9260_v48 = vld [vmem:[#allocation22 + $0xe20] sm:$0xff]  ;;  %v9261_v52 = vld [vmem:[#allocation22 + $0xe28] sm:$0xff]  ;;  %v8830_v2 = vld [vmem:[#allocation22 + $0xb0] sm:$0xff] }
 0x980   :  { %v13807_v57 = vcombine.high %v9245_v18, %v9253_v53  ;;  %v9268_v56 = vld [vmem:[#allocation22 + $0xe60] sm:$0xff]  ;;  %v9269_v58 = vld [vmem:[#allocation22 + $0xe68] sm:$0xff]  ;;  %v13804_v50 = vcombine.low %v9244_v12, %v9252_v20  ;;  %v13806_v11 = vcombine.low %v9245_v18, %v9253_v53  ;;  %v8846_v18 = vld [vmem:[#allocation22 + $0x130] sm:$0xff] }
 0x981   :  { %v12644_v17 = vrot.slane %v12636_v49, %v17683_v23  ;;  %v12651_v45 = vrot.slane %v12637_v63, %v17683_v23  ;;  %12346 = vmatpush1.bf16.msra.mxu1 %v13724_v15  ;;  %v13821_v61 = vcombine.high %v9260_v48, %v9268_v56  ;;  %v13823_v30 = vcombine.high %v9261_v52, %v9269_v58  ;;  %v9276_v62 = vld [vmem:[#allocation22 + $0xea0] sm:$0xff]  ;;  %v9277_v15 = vld [vmem:[#allocation22 + $0xea8] sm:$0xff]  ;;  %v8854_v53 = vld [vmem:[#allocation22 + $0x170] sm:$0xff] }
 0x982   :  { %12428 = vmatpush1.bf16.msra.mxu0 %v13726_v34  ;;  %12347 = vmatprep.subr.bf16.mxu1 %v13741_v16  ;;  %v9284_v54 = vld [vmem:[#allocation22 + $0xee0] sm:$0xff]  ;;  %v9285_v51 = vld [vmem:[#allocation22 + $0xee8] sm:$0xff]  ;;  %v13820_v28 = vcombine.low %v9260_v48, %v9268_v56  ;;  %v13822_v34 = vcombine.low %v9261_v52, %v9269_v58  ;;  %v13409_v56 = vcombine.high %v8846_v18, %v8854_v53  ;;  %v8862_v58 = vld [vmem:[#allocation22 + $0x1b0] sm:$0xff] }
 0x983   :  { %v12652_v41 = vcombine.low %v12644_v17, %v12651_v45  ;;  %12429 = vmatprep.subr.bf16.mxu0 %v13743_v14  ;;  %v13837_v16 = vcombine.high %v9276_v62, %v9284_v54  ;;  %v13839_v49 = vcombine.high %v9277_v15, %v9285_v51  ;;  %v9292_v63 = vld [vmem:[#allocation22 + $0xf20] sm:$0xff]  ;;  %v13836_v44 = vcombine.low %v9276_v62, %v9284_v54 }
 0x984   :  { %v9300_v14 = vld [vmem:[#allocation22 + $0xf60] sm:$0xff]  ;;  %v13838_v5 = vcombine.low %v9277_v15, %v9285_v51  ;;  %v13855_v45 = vcombine.high %v9293_v8, %v9301_v60  ;;  %v8878_v51 = vld [vmem:[#allocation22 + $0x230] sm:$0xff] }
 0x985   :  { %12708 = vst [vmem:[#allocation25] sm:$0xff] %v12652_v41  ;;  %12348 = vmatpush1.bf16.msra.mxu1 %v13740_v10  ;;  %v13853_v17 = vcombine.high %v9292_v63, %v9300_v14  ;;  %v9308_v10 = vld [vmem:[#allocation22 + $0xfa0] sm:$0xff]  ;;  %v9317_v41 = vld [vmem:[#allocation22 + $0xfe8] sm:$0xff]  ;;  %v8894_v8 = vld [vmem:[#allocation22 + $0x2b0] sm:$0xff] }
 0x986   :  { %12430 = vmatpush1.bf16.msra.mxu0 %v13742_v39  ;;  %12349 = vmatprep.subr.bf16.mxu1 %v13757_v43  ;;  %v9316_v39 = vld [vmem:[#allocation22 + $0xfe0] sm:$0xff]  ;;  %v9309_v43 = vld [vmem:[#allocation22 + $0xfa8] sm:$0xff]  ;;  %v8902_v60 = vld [vmem:[#allocation22 + $0x2f0] sm:$0xff] }
 0x987   :  { %12431 = vmatprep.subr.bf16.mxu0 %v13759_v21  ;;  %v13852_v21 = vcombine.low %v9292_v63, %v9300_v14  ;;  %v13869_v42 = vcombine.high %v9308_v10, %v9316_v39  ;;  %v13871_v26 = vcombine.high %v9309_v43, %v9317_v41  ;;  %v13870_v0 = vcombine.low %v9309_v43, %v9317_v41  ;;  %v8910_v43 = vld [vmem:[#allocation22 + $0x330] sm:$0xff] }
 0x988   :  { %v8918_v41 = vld [vmem:[#allocation22 + $0x370] sm:$0xff] }
 0x989   :  { %12350 = vmatpush1.bf16.msra.mxu1 %v13756_v36  ;;  %v8822_v36 = vld [vmem:[#allocation22 + $0x70] sm:$0xff] }
 0x98a   :  { %12432 = vmatpush1.bf16.msra.mxu0 %v13758_v6  ;;  %12351 = vmatprep.subr.bf16.mxu1 %v13773_v27  ;;  %v8815_v6 = vld [vmem:[#allocation22 + $0x38] sm:$0xff]  ;;  %v13377_v46 = vcombine.high %v8814_v3, %v8822_v36 }
 0x98b   :  { %12433 = vmatprep.subr.bf16.mxu0 %v13775_v22  ;;  %v8823_v27 = vld [vmem:[#allocation22 + $0x78] sm:$0xff]  ;;  %v13868_v22 = vcombine.low %v9308_v10, %v9316_v39  ;;  %v13457_v10 = vcombine.high %v8894_v8, %v8902_v60 }
 0x98c   :  { %v13379_v19 = vcombine.high %v8815_v6, %v8823_v27  ;;  %v13378_v12 = vcombine.low %v8815_v6, %v8823_v27  ;;  %v8926_v6 = vld [vmem:[#allocation22 + $0x3b0] sm:$0xff] }
 0x98d   :  { %12352 = vmatpush1.bf16.msra.mxu1 %v13772_v37  ;;  %v8838_v37 = vld [vmem:[#allocation22 + $0xf0] sm:$0xff] }
 0x98e   :  { %12434 = vmatpush1.bf16.msra.mxu0 %v13774_v25  ;;  %12353 = vmatprep.subr.bf16.mxu1 %v13789_v24  ;;  %v13376_v25 = vcombine.low %v8814_v3, %v8822_v36  ;;  %v8831_v24 = vld [vmem:[#allocation22 + $0xb8] sm:$0xff]  ;;  %v13393_v20 = vcombine.high %v8830_v2, %v8838_v37  ;;  %v13473_v3 = vcombine.high %v8910_v43, %v8918_v41  ;;  %v8934_v27 = vld [vmem:[#allocation22 + $0x3f0] sm:$0xff] }
 0x98f   :  { %12435 = vmatprep.subr.bf16.mxu0 %v13791_v1  ;;  %v8839_v1 = vld [vmem:[#allocation22 + $0xf8] sm:$0xff] }
 0x990   :  { %v13394_v48 = vcombine.low %v8831_v24, %v8839_v1 }
 0x991   :  { %12354 = vmatpush1.bf16.msra.mxu1 %v13788_v7  ;;  %v13395_v7 = vcombine.high %v8831_v24, %v8839_v1  ;;  %v8950_v24 = vld [vmem:[#allocation22 + $0x470] sm:$0xff]  ;;  %v8943_v1 = vld [vmem:[#allocation22 + $0x438] sm:$0xff] }
 0x992   :  { %12436 = vmatpush1.bf16.msra.mxu0 %v13790_v4  ;;  %12355 = vmatprep.subr.bf16.mxu1 %v13805_v32  ;;  %v8847_v4 = vld [vmem:[#allocation22 + $0x138] sm:$0xff] }
 0x993   :  { %12437 = vmatprep.subr.bf16.mxu0 %v13807_v57  ;;  %v8855_v32 = vld [vmem:[#allocation22 + $0x178] sm:$0xff]  ;;  %v13392_v57 = vcombine.low %v8830_v2, %v8838_v37  ;;  %v13489_v2 = vcombine.high %v8926_v6, %v8934_v27 }
 0x994   :  { %v13411_v52 = vcombine.high %v8847_v4, %v8855_v32  ;;  %v13410_v62 = vcombine.low %v8847_v4, %v8855_v32  ;;  %v8958_v4 = vld [vmem:[#allocation22 + $0x4b0] sm:$0xff] }
 0x995   :  { %12356 = vmatpush1.bf16.msra.mxu1 %v13804_v50  ;;  %v8870_v50 = vld [vmem:[#allocation22 + $0x1f0] sm:$0xff] }
 0x996   :  { %12438 = vmatpush1.bf16.msra.mxu0 %v13806_v11  ;;  %12357 = vmatprep.subr.bf16.mxu1 %v13821_v61  ;;  %v8863_v11 = vld [vmem:[#allocation22 + $0x1b8] sm:$0xff]  ;;  %v13425_v54 = vcombine.high %v8862_v58, %v8870_v50  ;;  %v8966_v32 = vld [vmem:[#allocation22 + $0x4f0] sm:$0xff] }
 0x997   :  { %12439 = vmatprep.subr.bf16.mxu0 %v13823_v30  ;;  %v8871_v61 = vld [vmem:[#allocation22 + $0x1f8] sm:$0xff]  ;;  %v13408_v30 = vcombine.low %v8846_v18, %v8854_v53 }
 0x998   :  { %v13427_v15 = vcombine.high %v8863_v11, %v8871_v61 }
 0x999   :  { %12358 = vmatpush1.bf16.msra.mxu1 %v13820_v28  ;;  %v8886_v28 = vld [vmem:[#allocation22 + $0x270] sm:$0xff] }
 0x99a   :  { %12440 = vmatpush1.bf16.msra.mxu0 %v13822_v34  ;;  %12359 = vmatprep.subr.bf16.mxu1 %v13837_v16  ;;  %v8879_v34 = vld [vmem:[#allocation22 + $0x238] sm:$0xff]  ;;  %v13441_v63 = vcombine.high %v8878_v51, %v8886_v28 }
 0x99b   :  { %12441 = vmatprep.subr.bf16.mxu0 %v13839_v49  ;;  %v8887_v16 = vld [vmem:[#allocation22 + $0x278] sm:$0xff]  ;;  %v13426_v49 = vcombine.low %v8863_v11, %v8871_v61  ;;  %v8974_v11 = vld [vmem:[#allocation22 + $0x530] sm:$0xff] }
 0x99c   :  { %v13443_v14 = vcombine.high %v8879_v34, %v8887_v16  ;;  %v8982_v61 = vld [vmem:[#allocation22 + $0x570] sm:$0xff] }
 0x99d   :  { %12360 = vmatpush1.bf16.msra.mxu1 %v13836_v44  ;;  %v8895_v44 = vld [vmem:[#allocation22 + $0x2b8] sm:$0xff] }
 0x99e   :  { %12442 = vmatpush1.bf16.msra.mxu0 %v13838_v5  ;;  %12361 = vmatprep.subr.bf16.mxu1 %v13853_v17  ;;  %v8903_v5 = vld [vmem:[#allocation22 + $0x2f8] sm:$0xff]  ;;  %v13440_v17 = vcombine.low %v8878_v51, %v8886_v28  ;;  %v13537_v51 = vcombine.high %v8974_v11, %v8982_v61 }
 0x99f   :  { %12443 = vmatprep.subr.bf16.mxu0 %v13855_v45  ;;  %v13442_v45 = vcombine.low %v8879_v34, %v8887_v16  ;;  %v13459_v39 = vcombine.high %v8895_v44, %v8903_v5  ;;  %v8990_v34 = vld [vmem:[#allocation22 + $0x5b0] sm:$0xff] }
 0x9a0   :  { %v8998_v16 = vld [vmem:[#allocation22 + $0x5f0] sm:$0xff] }
 0x9a1   :  { %12362 = vmatpush1.bf16.msra.mxu1 %v13852_v21  ;;  %v8911_v21 = vld [vmem:[#allocation22 + $0x338] sm:$0xff] }
 0x9a2   :  { %12444 = vmatpush1.bf16.msra.mxu0 %v13854_v9  ;;  %12363 = vmatprep.subr.bf16.mxu1 %v13869_v42  ;;  %v8919_v9 = vld [vmem:[#allocation22 + $0x378] sm:$0xff]  ;;  %v13456_v42 = vcombine.low %v8894_v8, %v8902_v60  ;;  %v13553_v8 = vcombine.high %v8990_v34, %v8998_v16 }
 0x9a3   :  { %12445 = vmatprep.subr.bf16.mxu0 %v13871_v26  ;;  %v13458_v26 = vcombine.low %v8895_v44, %v8903_v5  ;;  %v13475_v36 = vcombine.high %v8911_v21, %v8919_v9  ;;  %v9006_v44 = vld [vmem:[#allocation22 + $0x630] sm:$0xff] }
 0x9a4   :  { %v9014_v5 = vld [vmem:[#allocation22 + $0x670] sm:$0xff] }
 0x9a5   :  { %12364 = vmatpush1.bf16.msra.mxu1 %v13868_v22  ;;  %v8927_v22 = vld [vmem:[#allocation22 + $0x3b8] sm:$0xff] }
 0x9a6   :  { %12446 = vmatpush1.bf16.msra.mxu0 %v13870_v0  ;;  %12456 = vmatprep.subr.bf16.mxu1 %v13377_v46  ;;  %v8935_v0 = vld [vmem:[#allocation22 + $0x3f8] sm:$0xff]  ;;  %v13472_v46 = vcombine.low %v8910_v43, %v8918_v41  ;;  %v13569_v43 = vcombine.high %v9006_v44, %v9014_v5 }
 0x9a7   :  { %12538 = vmatprep.subr.bf16.mxu0 %v13379_v19  ;;  %v13474_v19 = vcombine.low %v8911_v21, %v8919_v9  ;;  %v13491_v37 = vcombine.high %v8927_v22, %v8935_v0  ;;  %v13490_v18 = vcombine.low %v8927_v22, %v8935_v0  ;;  %v9022_v21 = vld [vmem:[#allocation22 + $0x6b0] sm:$0xff] }
 0x9a8   :  { %12366 = vmatmul.mubr.bf16.vlgmr.msra.gmra.mrb[32].mxu1 %v17646_v31  ;;  %v9030_v9 = vld [vmem:[#allocation22 + $0x6f0] sm:$0xff] }
 0x9a9   :  { %12448 = vmatmul.mubr.bf16.vlgmr.msra.gmra.mrb[52].mxu0 %v17646_v31  ;;  %12457 = vmatpush1.bf16.msra.mxu1 %v13376_v25  ;;  %v8942_v25 = vld [vmem:[#allocation22 + $0x430] sm:$0xff] }
 0x9aa   :  { %12488 = vmatprep.mubr.bf16.mxu1 %v17599_v13  ;;  %12539 = vmatpush1.bf16.msra.mxu0 %v13378_v12  ;;  %v8951_v12 = vld [vmem:[#allocation22 + $0x478] sm:$0xff]  ;;  %v13505_v53 = vcombine.high %v8942_v25, %v8950_v24  ;;  %v9038_v22 = vld [vmem:[#allocation22 + $0x730] sm:$0xff] }
 0x9ab   :  { %12570 = vmatprep.mubr.bf16.mxu0 %v17599_v13  ;;  %12458 = vmatprep.subr.bf16.mxu1 %v13393_v20  ;;  %v13424_v13 = vcombine.low %v8862_v58, %v8870_v50  ;;  %v13488_v20 = vcombine.low %v8926_v6, %v8934_v27  ;;  %v13521_v58 = vcombine.high %v8958_v4, %v8966_v32  ;;  %v9046_v0 = vld [vmem:[#allocation22 + $0x770] sm:$0xff] }
 0x9ac   :  { %12540 = vmatprep.subr.bf16.mxu0 %v13395_v7  ;;  %v13507_v7 = vcombine.high %v8943_v1, %v8951_v12  ;;  %v13585_v6 = vcombine.high %v9022_v21, %v9030_v9 }
 0x9ad   :  { %12459 = vmatpush1.bf16.msra.mxu1 %v13392_v57  ;;  %v8959_v57 = vld [vmem:[#allocation22 + $0x4b8] sm:$0xff] }
 0x9ae   :  { %12541 = vmatpush1.bf16.msra.mxu0 %v13394_v48  ;;  %12460 = vmatprep.subr.bf16.mxu1 %v13409_v56  ;;  %v8967_v48 = vld [vmem:[#allocation22 + $0x4f8] sm:$0xff]  ;;  %v13504_v56 = vcombine.low %v8942_v25, %v8950_v24  ;;  %v13601_v25 = vcombine.high %v9038_v22, %v9046_v0 }
 0x9af   :  { %12542 = vmatprep.subr.bf16.mxu0 %v13411_v52  ;;  %v13506_v52 = vcombine.low %v8943_v1, %v8951_v12  ;;  %v13523_v50 = vcombine.high %v8959_v57, %v8967_v48  ;;  %v9054_v1 = vld [vmem:[#allocation22 + $0x7b0] sm:$0xff] }
 0x9b0   :  { %v9062_v12 = vld [vmem:[#allocation22 + $0x7f0] sm:$0xff] }
 0x9b1   :  { %12461 = vmatpush1.bf16.msra.mxu1 %v13408_v30  ;;  %v8975_v30 = vld [vmem:[#allocation22 + $0x538] sm:$0xff] }
 0x9b2   :  { %12543 = vmatpush1.bf16.msra.mxu0 %v13410_v62  ;;  %12462 = vmatprep.subr.bf16.mxu1 %v13425_v54  ;;  %v8983_v62 = vld [vmem:[#allocation22 + $0x578] sm:$0xff]  ;;  %v13520_v54 = vcombine.low %v8958_v4, %v8966_v32  ;;  %v13617_v4 = vcombine.high %v9054_v1, %v9062_v12 }
 0x9b3   :  { %12544 = vmatprep.subr.bf16.mxu0 %v13427_v15  ;;  %v13522_v15 = vcombine.low %v8959_v57, %v8967_v48  ;;  %v13539_v28 = vcombine.high %v8975_v30, %v8983_v62  ;;  %v9070_v57 = vld [vmem:[#allocation22 + $0x830] sm:$0xff] }
 0x9b4   :  { %v9078_v48 = vld [vmem:[#allocation22 + $0x870] sm:$0xff] }
 0x9b5   :  { %12463 = vmatpush1.bf16.msra.mxu1 %v13424_v13  ;;  %v8991_v13 = vld [vmem:[#allocation22 + $0x5b8] sm:$0xff] }
 0x9b6   :  { %12545 = vmatpush1.bf16.msra.mxu0 %v13426_v49  ;;  %12464 = vmatprep.subr.bf16.mxu1 %v13441_v63  ;;  %v8999_v49 = vld [vmem:[#allocation22 + $0x5f8] sm:$0xff]  ;;  %v13536_v63 = vcombine.low %v8974_v11, %v8982_v61  ;;  %v13633_v11 = vcombine.high %v9070_v57, %v9078_v48 }
 0x9b7   :  { %12546 = vmatprep.subr.bf16.mxu0 %v13443_v14  ;;  %v13538_v14 = vcombine.low %v8975_v30, %v8983_v62  ;;  %v13555_v60 = vcombine.high %v8991_v13, %v8999_v49  ;;  %v9086_v30 = vld [vmem:[#allocation22 + $0x8b0] sm:$0xff] }
 0x9b8   :  { %v9094_v62 = vld [vmem:[#allocation22 + $0x8f0] sm:$0xff] }
 0x9b9   :  { %12465 = vmatpush1.bf16.msra.mxu1 %v13440_v17  ;;  %v9007_v17 = vld [vmem:[#allocation22 + $0x638] sm:$0xff] }
 0x9ba   :  { %12547 = vmatpush1.bf16.msra.mxu0 %v13442_v45  ;;  %12466 = vmatprep.subr.bf16.mxu1 %v13457_v10  ;;  %v9015_v45 = vld [vmem:[#allocation22 + $0x678] sm:$0xff]  ;;  %v13552_v10 = vcombine.low %v8990_v34, %v8998_v16  ;;  %v13649_v34 = vcombine.high %v9086_v30, %v9094_v62  ;;  %v9102_v16 = vld [vmem:[#allocation22 + $0x930] sm:$0xff] }
 0x9bb   :  { %12548 = vmatprep.subr.bf16.mxu0 %v13459_v39  ;;  %v13554_v39 = vcombine.low %v8991_v13, %v8999_v49  ;;  %v13571_v41 = vcombine.high %v9007_v17, %v9015_v45  ;;  %v9110_v13 = vld [vmem:[#allocation22 + $0x970] sm:$0xff] }
 0x9bd   :  { %12467 = vmatpush1.bf16.msra.mxu1 %v13456_v42  ;;  %v9023_v42 = vld [vmem:[#allocation22 + $0x6b8] sm:$0xff] }
 0x9be   :  { %12549 = vmatpush1.bf16.msra.mxu0 %v13458_v26  ;;  %12468 = vmatprep.subr.bf16.mxu1 %v13473_v3  ;;  %v9031_v26 = vld [vmem:[#allocation22 + $0x6f8] sm:$0xff]  ;;  %v13568_v3 = vcombine.low %v9006_v44, %v9014_v5  ;;  %v13665_v44 = vcombine.high %v9102_v16, %v9110_v13 }
 0x9bf   :  { %12550 = vmatprep.subr.bf16.mxu0 %v13475_v36  ;;  %v13570_v36 = vcombine.low %v9007_v17, %v9015_v45  ;;  %v13587_v27 = vcombine.high %v9023_v42, %v9031_v26  ;;  %v9118_v17 = vld [vmem:[#allocation22 + $0x9b0] sm:$0xff] }
 0x9c0   :  { %v9126_v45 = vld [vmem:[#allocation22 + $0x9f0] sm:$0xff] }
 0x9c1   :  { %12469 = vmatpush1.bf16.msra.mxu1 %v13472_v46  ;;  %v9039_v46 = vld [vmem:[#allocation22 + $0x738] sm:$0xff] }
 0x9c2   :  { %12551 = vmatpush1.bf16.msra.mxu0 %v13474_v19  ;;  %12470 = vmatprep.subr.bf16.mxu1 %v13489_v2  ;;  %v9047_v19 = vld [vmem:[#allocation22 + $0x778] sm:$0xff]  ;;  %v13584_v2 = vcombine.low %v9022_v21, %v9030_v9  ;;  %v9134_v9 = vld [vmem:[#allocation22 + $0xa30] sm:$0xff] }
 0x9c3   :  { %12552 = vmatprep.subr.bf16.mxu0 %v13491_v37  ;;  %v13586_v37 = vcombine.low %v9023_v42, %v9031_v26  ;;  %v13603_v24 = vcombine.high %v9039_v46, %v9047_v19  ;;  %v9142_v42 = vld [vmem:[#allocation22 + $0xa70] sm:$0xff]  ;;  %v9135_v26 = vld [vmem:[#allocation22 + $0xa38] sm:$0xff] }
 0x9c5   :  { %12471 = vmatpush1.bf16.msra.mxu1 %v13488_v20  ;;  %v9055_v20 = vld [vmem:[#allocation22 + $0x7b8] sm:$0xff] }
 0x9c6   :  { %12553 = vmatpush1.bf16.msra.mxu0 %v13490_v18  ;;  %12472 = vmatprep.subr.bf16.mxu1 %v13505_v53  ;;  %v9063_v18 = vld [vmem:[#allocation22 + $0x7f8] sm:$0xff]  ;;  %v13600_v53 = vcombine.low %v9038_v22, %v9046_v0  ;;  %v9150_v22 = vld [vmem:[#allocation22 + $0xab0] sm:$0xff] }
 0x9c7   :  { %12554 = vmatprep.subr.bf16.mxu0 %v13507_v7  ;;  %v13602_v7 = vcombine.low %v9039_v46, %v9047_v19  ;;  %v13619_v32 = vcombine.high %v9055_v20, %v9063_v18  ;;  %v9158_v0 = vld [vmem:[#allocation22 + $0xaf0] sm:$0xff]  ;;  %v9342_v46 = vsub.s32 4, %v17581_v33  ;;  %v9151_v19 = vld [vmem:[#allocation22 + $0xab8] sm:$0xff] }
 0x9c9   :  { %12473 = vmatpush1.bf16.msra.mxu1 %v13504_v56  ;;  %v9071_v56 = vld [vmem:[#allocation22 + $0x838] sm:$0xff] }
 0x9ca   :  { %12555 = vmatpush1.bf16.msra.mxu0 %v13506_v52  ;;  %12474 = vmatprep.subr.bf16.mxu1 %v13521_v58  ;;  %v9079_v52 = vld [vmem:[#allocation22 + $0x878] sm:$0xff]  ;;  %v13616_v58 = vcombine.low %v9054_v1, %v9062_v12  ;;  %v9354_v12 = vsub.s32 7, %v17581_v33 }
 0x9cb   :  { %12556 = vmatprep.subr.bf16.mxu0 %v13523_v50  ;;  %v13618_v50 = vcombine.low %v9055_v20, %v9063_v18  ;;  %v13635_v61 = vcombine.high %v9071_v56, %v9079_v52  ;;  %v13713_v20 = vcombine.high %v9150_v22, %v9158_v0 }
 0x9cd   :  { %12475 = vmatpush1.bf16.msra.mxu1 %v13520_v54  ;;  %v13632_v54 = vcombine.low %v9070_v57, %v9078_v48  ;;  %v9175_v57 = vld [vmem:[#allocation22 + $0xb78] sm:$0xff] }
 0x9ce   :  { %12557 = vmatpush1.bf16.msra.mxu0 %v13522_v15  ;;  %12476 = vmatprep.subr.bf16.mxu1 %v13537_v51  ;;  %v9087_v15 = vld [vmem:[#allocation22 + $0x8b8] sm:$0xff] }
 0x9cf   :  { %12558 = vmatprep.subr.bf16.mxu0 %v13539_v28  ;;  %v9095_v51 = vld [vmem:[#allocation22 + $0x8f8] sm:$0xff]  ;;  %v13634_v28 = vcombine.low %v9071_v56, %v9079_v52  ;;  %v13712_v52 = vcombine.low %v9150_v22, %v9158_v0  ;;  %v9222_v22 = vld [vmem:[#allocation22 + $0xcf0] sm:$0xff] }
 0x9d0   :  { %v13651_v49 = vcombine.high %v9087_v15, %v9095_v51 }
 0x9d1   :  { %12477 = vmatpush1.bf16.msra.mxu1 %v13536_v63  ;;  %v9103_v63 = vld [vmem:[#allocation22 + $0x938] sm:$0xff] }
 0x9d2   :  { %12559 = vmatpush1.bf16.msra.mxu0 %v13538_v14  ;;  %12478 = vmatprep.subr.bf16.mxu1 %v13553_v8  ;;  %v9111_v14 = vld [vmem:[#allocation22 + $0x978] sm:$0xff]  ;;  %v13648_v8 = vcombine.low %v9086_v30, %v9094_v62  ;;  %v9182_v62 = vld [vmem:[#allocation22 + $0xbb0] sm:$0xff] }
 0x9d3   :  { %12560 = vmatprep.subr.bf16.mxu0 %v13555_v60  ;;  %v13650_v60 = vcombine.low %v9087_v15, %v9095_v51  ;;  %v13667_v5 = vcombine.high %v9103_v63, %v9111_v14 }
 0x9d5   :  { %12479 = vmatpush1.bf16.msra.mxu1 %v13552_v10  ;;  %v9119_v10 = vld [vmem:[#allocation22 + $0x9b8] sm:$0xff] }
 0x9d6   :  { %12561 = vmatpush1.bf16.msra.mxu0 %v13554_v39  ;;  %12480 = vmatprep.subr.bf16.mxu1 %v13569_v43  ;;  %v9127_v39 = vld [vmem:[#allocation22 + $0x9f8] sm:$0xff]  ;;  %v13664_v43 = vcombine.low %v9102_v16, %v9110_v13 }
 0x9d7   :  { %12562 = vmatprep.subr.bf16.mxu0 %v13571_v41  ;;  %v13681_v41 = vcombine.high %v9118_v17, %v9126_v45  ;;  %v13683_v21 = vcombine.high %v9119_v10, %v9127_v39  ;;  %v9191_v16 = vld [vmem:[#allocation22 + $0xbf8] sm:$0xff] }
 0x9d9   :  { %12481 = vmatpush1.bf16.msra.mxu1 %v13568_v3  ;;  %v9143_v3 = vld [vmem:[#allocation22 + $0xa78] sm:$0xff] }
 0x9da   :  { %12563 = vmatpush1.bf16.msra.mxu0 %v13570_v36  ;;  %12482 = vmatprep.subr.bf16.mxu1 %v13585_v6  ;;  %v13682_v36 = vcombine.low %v9119_v10, %v9127_v39  ;;  %v13697_v6 = vcombine.high %v9134_v9, %v9142_v42  ;;  %v13698_v1 = vcombine.low %v9135_v26, %v9143_v3 }
 0x9db   :  { %12564 = vmatprep.subr.bf16.mxu0 %v13587_v27  ;;  %v13699_v27 = vcombine.high %v9135_v26, %v9143_v3 }
 0x9dd   :  { %12483 = vmatpush1.bf16.msra.mxu1 %v13584_v2  ;;  %v9159_v2 = vld [vmem:[#allocation22 + $0xaf8] sm:$0xff] }
 0x9de   :  { %12565 = vmatpush1.bf16.msra.mxu0 %v13586_v37  ;;  %12484 = vmatprep.subr.bf16.mxu1 %v13601_v25  ;;  %v13696_v37 = vcombine.low %v9134_v9, %v9142_v42  ;;  %v9350_v25 = vsub.s32 6, %v17581_v33  ;;  %v13715_v18 = vcombine.high %v9151_v19, %v9159_v2  ;;  %v9207_v9 = vld [vmem:[#allocation22 + $0xc78] sm:$0xff] }
 0x9df   :  { %12566 = vmatprep.subr.bf16.mxu0 %v13603_v24  ;;  %v9346_v24 = vsub.s32 5, %v17581_v33 }
 0x9e0   :  { %v9351_v48 = vrot.slane %v17672_v35, %v9350_v25 }
 0x9e1   :  { %12485 = vmatpush1.bf16.msra.mxu1 %v13600_v53  ;;  %v9166_v53 = vld [vmem:[#allocation22 + $0xb30] sm:$0xff]  ;;  %v9347_v56 = vrot.slane %v17672_v35, %v9346_v24 }
 0x9e2   :  { %12567 = vmatpush1.bf16.msra.mxu0 %v13602_v7  ;;  %12486 = vmatprep.subr.bf16.mxu1 %v13617_v4  ;;  %v9174_v7 = vld [vmem:[#allocation22 + $0xb70] sm:$0xff]  ;;  %v9343_v4 = vrot.slane %v17672_v35, %v9342_v46 }
 0x9e3   :  { %12568 = vmatprep.subr.bf16.mxu0 %v13619_v32  ;;  %v9167_v32 = vld [vmem:[#allocation22 + $0xb38] sm:$0xff] }
 0x9e4   :  { %v13731_v30 = vcombine.high %v9167_v32, %v9175_v57 }
 0x9e5   :  { %12487 = vmatpush1.bf16.msra.mxu1 %v13616_v58  ;;  %v9355_v58 = vrot.slane %v17672_v35, %v9354_v12 }
 0x9e6   :  { %12569 = vmatpush1.bf16.msra.mxu0 %v13618_v50  ;;  %12497 = vmatprep.subr.bf16.mxu1 %v13633_v11  ;;  %v13714_v50 = vcombine.low %v9151_v19, %v9159_v2  ;;  %v13729_v11 = vcombine.high %v9166_v53, %v9174_v7  ;;  %v9215_v19 = vld [vmem:[#allocation22 + $0xcb8] sm:$0xff] }
 0x9e7   :  { %12579 = vmatprep.subr.bf16.mxu0 %v13635_v61  ;;  %v9223_v2 = vld [vmem:[#allocation22 + $0xcf8] sm:$0xff] }
 0x9e8   :  { %12489 = vmatmul.mubr.bf16.vlgmr.msra.gmra.mrb[36].mxu1 %v17601_v59 }
 0x9e9   :  { %12571 = vmatmul.mubr.bf16.vlgmr.msra.gmra.mrb[56].mxu0 %v17601_v59  ;;  %12498 = vmatpush1.bf16.msra.mxu1 %v13632_v54  ;;  %v13666_v59 = vcombine.low %v9103_v63, %v9111_v14  ;;  %v9190_v54 = vld [vmem:[#allocation22 + $0xbf0] sm:$0xff] }
 0x9ea   :  { %12529 = vmatprep.mubr.bf16.mxu1 %v17644_v47  ;;  %12580 = vmatpush1.bf16.msra.mxu0 %v13634_v28  ;;  %v13744_v26 = vcombine.low %v9182_v62, %v9190_v54 }
 0x9eb   :  { %12611 = vmatprep.mubr.bf16.mxu0 %v17644_v47  ;;  %12499 = vmatprep.subr.bf16.mxu1 %v13649_v34  ;;  %v13680_v47 = vcombine.low %v9118_v17, %v9126_v45  ;;  %v9183_v34 = vld [vmem:[#allocation22 + $0xbb8] sm:$0xff]  ;;  %v13745_v17 = vcombine.high %v9182_v62, %v9190_v54 }
 0x9ec   :  { %12581 = vmatprep.subr.bf16.mxu0 %v13651_v49  ;;  %v13747_v39 = vcombine.high %v9183_v34, %v9191_v16 }
 0x9ed   :  { %12500 = vmatpush1.bf16.msra.mxu1 %v13648_v8  ;;  %v13728_v8 = vcombine.low %v9166_v53, %v9174_v7  ;;  %v9230_v53 = vld [vmem:[#allocation22 + $0xd30] sm:$0xff] }
 0x9ee   :  { %12582 = vmatpush1.bf16.msra.mxu0 %v13650_v60  ;;  %12501 = vmatprep.subr.bf16.mxu1 %v13665_v44  ;;  %v9238_v7 = vld [vmem:[#allocation22 + $0xd70] sm:$0xff] }
 0x9ef   :  { %12583 = vmatprep.subr.bf16.mxu0 %v13667_v5  ;;  %v13730_v5 = vcombine.low %v9167_v32, %v9175_v57  ;;  %v9239_v32 = vld [vmem:[#allocation22 + $0xd78] sm:$0xff] }
 0x9f1   :  { %12502 = vmatpush1.bf16.msra.mxu1 %v13664_v43  ;;  %v9198_v43 = vld [vmem:[#allocation22 + $0xc30] sm:$0xff] }
 0x9f2   :  { %12584 = vmatpush1.bf16.msra.mxu0 %v13666_v59  ;;  %12503 = vmatprep.subr.bf16.mxu1 %v13681_v41  ;;  %v9206_v59 = vld [vmem:[#allocation22 + $0xc70] sm:$0xff] }
 0x9f3   :  { %12585 = vmatprep.subr.bf16.mxu0 %v13683_v21  ;;  %v9199_v21 = vld [vmem:[#allocation22 + $0xc38] sm:$0xff] }
 0x9f5   :  { %12504 = vmatpush1.bf16.msra.mxu1 %v13680_v47  ;;  %v13746_v47 = vcombine.low %v9183_v34, %v9191_v16  ;;  %v9263_v34 = vld [vmem:[#allocation22 + $0xe38] sm:$0xff] }
 0x9f6   :  { %12586 = vmatpush1.bf16.msra.mxu0 %v13682_v36  ;;  %12505 = vmatprep.subr.bf16.mxu1 %v13697_v6  ;;  %v13761_v36 = vcombine.high %v9198_v43, %v9206_v59  ;;  %v13763_v6 = vcombine.high %v9199_v21, %v9207_v9  ;;  %v9271_v16 = vld [vmem:[#allocation22 + $0xe78] sm:$0xff] }
 0x9f7   :  { %12587 = vmatprep.subr.bf16.mxu0 %v13699_v27  ;;  %v9214_v27 = vld [vmem:[#allocation22 + $0xcb0] sm:$0xff] }
 0x9f8   :  { %v13776_v57 = vcombine.low %v9214_v27, %v9222_v22 }
 0x9f9   :  { %12506 = vmatpush1.bf16.msra.mxu1 %v13696_v37  ;;  %v13760_v37 = vcombine.low %v9198_v43, %v9206_v59  ;;  %v9302_v43 = vld [vmem:[#allocation22 + $0xf70] sm:$0xff]  ;;  %v9295_v59 = vld [vmem:[#allocation22 + $0xf38] sm:$0xff] }
 0x9fa   :  { %12588 = vmatpush1.bf16.msra.mxu0 %v13698_v1  ;;  %12507 = vmatprep.subr.bf16.mxu1 %v13713_v20  ;;  %v13762_v1 = vcombine.low %v9199_v21, %v9207_v9  ;;  %v13777_v20 = vcombine.high %v9214_v27, %v9222_v22 }
 0x9fb   :  { %v12203_v61 = vpop.f32.mrb[28].mxu1  ;;  %12589 = vmatprep.subr.bf16.mxu0 %v13715_v18  ;;  %v13779_v18 = vcombine.high %v9215_v19, %v9223_v2 }
 0x9fc   :  { %v14888_v15 = vadd.f32 %v12203_v61, %v9343_v4  ;;  %v12285_v51 = vpop.f32.mrb[48].mxu0  ;;  %v12205_v28 = vpop.f32.mrb[29].mxu1  ;;  %v9231_v4 = vld [vmem:[#allocation22 + $0xd38] sm:$0xff] }
 0x9fd   :  { %v14890_v13 = vadd.f32 %v12285_v51, %v9351_v48  ;;  %v14889_v49 = vadd.f32 %v12205_v28, %v9347_v56  ;;  %v12287_v63 = vpop.f32.mrb[49].mxu0  ;;  %v12207_v14 = vpop.f32.mrb[30].mxu1  ;;  %12508 = vmatpush1.bf16.msra.mxu1 %v13712_v52  ;;  %v13778_v48 = vcombine.low %v9215_v19, %v9223_v2  ;;  %v13793_v56 = vcombine.high %v9230_v53, %v9238_v7  ;;  %v9255_v61 = vld [vmem:[#allocation22 + $0xdf8] sm:$0xff]  ;;  %v9262_v51 = vld [vmem:[#allocation22 + $0xe30] sm:$0xff] }
 0x9fe   :  { %v14891_v35 = vadd.f32 %v12287_v63, %v9355_v58  ;;  %v12289_v60 = vpop.f32.mrb[50].mxu0  ;;  %12590 = vmatpush1.bf16.msra.mxu0 %v13714_v50  ;;  %v12208_v44 = vpop.f32.mrb[31].mxu1  ;;  %12509 = vmatprep.subr.bf16.mxu1 %v13729_v11  ;;  %v13795_v52 = vcombine.high %v9231_v4, %v9239_v32  ;;  %v9246_v58 = vld [vmem:[#allocation22 + $0xdb0] sm:$0xff]  ;;  %v9247_v11 = vld [vmem:[#allocation22 + $0xdb8] sm:$0xff]  ;;  %v13794_v62 = vcombine.low %v9231_v4, %v9239_v32 }
 0x9ff   :  { %v12653_v45 = vcombine.low %v14888_v15, %v14889_v49  ;;  %v12290_v10 = vpop.f32.mrb[51].mxu0  ;;  %12591 = vmatprep.subr.bf16.mxu0 %v13731_v30  ;;  %v9254_v50 = vld [vmem:[#allocation22 + $0xdf0] sm:$0xff]  ;;  %v13792_v30 = vcombine.low %v9230_v53, %v9238_v7  ;;  %v13811_v15 = vcombine.high %v9247_v11, %v9255_v61  ;;  %v13810_v49 = vcombine.low %v9247_v11, %v9255_v61  ;;  %v9279_v60 = vld [vmem:[#allocation22 + $0xeb8] sm:$0xff] }
 0xa00   :  { %v12654_v41 = vcombine.low %v14890_v13, %v14891_v35  ;;  %v13809_v54 = vcombine.high %v9246_v58, %v9254_v50  ;;  %v9270_v28 = vld [vmem:[#allocation22 + $0xe70] sm:$0xff]  ;;  %v13808_v13 = vcombine.low %v9246_v58, %v9254_v50  ;;  %v13827_v14 = vcombine.high %v9263_v34, %v9271_v16  ;;  %v9287_v44 = vld [vmem:[#allocation22 + $0xef8] sm:$0xff] }
 0xa01   :  { %v12661_v42 = vrot.slane %v12653_v45, %v17683_v23  ;;  %12510 = vmatpush1.bf16.msra.mxu1 %v13728_v8  ;;  %v13825_v63 = vcombine.high %v9262_v51, %v9270_v28  ;;  %v9278_v8 = vld [vmem:[#allocation22 + $0xeb0] sm:$0xff]  ;;  %v13843_v10 = vcombine.high %v9279_v60, %v9287_v44  ;;  %v13842_v9 = vcombine.low %v9279_v60, %v9287_v44 }
 0xa02   :  { %v12668_v3 = vrot.slane %v12654_v41, %v17683_v23  ;;  %12592 = vmatpush1.bf16.msra.mxu0 %v13730_v5  ;;  %12511 = vmatprep.subr.bf16.mxu1 %v13745_v17  ;;  %v9286_v35 = vld [vmem:[#allocation22 + $0xef0] sm:$0xff]  ;;  %v13824_v5 = vcombine.low %v9262_v51, %v9270_v28  ;;  %v13826_v17 = vcombine.low %v9263_v34, %v9271_v16  ;;  %v9303_v41 = vld [vmem:[#allocation22 + $0xf78] sm:$0xff] }
 0xa03   :  { %12593 = vmatprep.subr.bf16.mxu0 %v13747_v39  ;;  %v13841_v45 = vcombine.high %v9278_v8, %v9286_v35  ;;  %v9294_v39 = vld [vmem:[#allocation22 + $0xf30] sm:$0xff]  ;;  %v13840_v21 = vcombine.low %v9278_v8, %v9286_v35  ;;  %v13858_v22 = vcombine.low %v9295_v59, %v9303_v41 }
 0xa04   :  { %v12669_v0 = vcombine.low %v12661_v42, %v12668_v3  ;;  %v13857_v42 = vcombine.high %v9294_v39, %v9302_v43  ;;  %v9310_v3 = vld [vmem:[#allocation22 + $0xfb0] sm:$0xff]  ;;  %v13856_v27 = vcombine.low %v9294_v39, %v9302_v43 }
 0xa05   :  { %12512 = vmatpush1.bf16.msra.mxu1 %v13744_v26  ;;  %v13859_v26 = vcombine.high %v9295_v59, %v9303_v41 }
 0xa06   :  { %12709 = vst [vmem:[#allocation25 + $0x8] sm:$0xff] %v12669_v0  ;;  %12594 = vmatpush1.bf16.msra.mxu0 %v13746_v47  ;;  %12513 = vmatprep.subr.bf16.mxu1 %v13761_v36  ;;  %v9318_v47 = vld [vmem:[#allocation22 + $0xff0] sm:$0xff]  ;;  %v9311_v36 = vld [vmem:[#allocation22 + $0xfb8] sm:$0xff] }
 0xa07   :  { %12595 = vmatprep.subr.bf16.mxu0 %v13763_v6  ;;  %v9319_v6 = vld [vmem:[#allocation22 + $0xff8] sm:$0xff]  ;;  %v13873_v0 = vcombine.high %v9310_v3, %v9318_v47  ;;  %v13872_v2 = vcombine.low %v9310_v3, %v9318_v47 }
 0xa08   :  { %v13875_v19 = vcombine.high %v9311_v36, %v9319_v6 }
 0xa09   :  { %12514 = vmatpush1.bf16.msra.mxu1 %v13760_v37  ;;  %v13874_v37 = vcombine.low %v9311_v36, %v9319_v6 }
 0xa0a   :  { %12596 = vmatpush1.bf16.msra.mxu0 %v13762_v1  ;;  %12515 = vmatprep.subr.bf16.mxu1 %v13777_v20  ;;  %v9321_v1 = vld [vmem:[#allocation23 + $0x8] sm:$0xff] }
 0xa0b   :  { %12597 = vmatprep.subr.bf16.mxu0 %v13779_v18  ;;  %v9359_v20 = vrot.slane %v9321_v1, %v17584_v55  ;;  %v9367_v18 = vrot.slane %v9321_v1, %v17635_v29  ;;  %v9363_v53 = vrot.slane %v9321_v1, %v17589_v38  ;;  %v9371_v7 = vrot.slane %v9321_v1, %v17638_v40 }
 0xa0c   :  { %v9375_v40 = vrot.slane %v9321_v1, %v9342_v46  ;;  %v9379_v51 = vrot.slane %v9321_v1, %v9346_v24  ;;  %v9387_v28 = vrot.slane %v9321_v1, %v9354_v12 }
 0xa0d   :  { %12516 = vmatpush1.bf16.msra.mxu1 %v13776_v57 }
 0xa0e   :  { %12598 = vmatpush1.bf16.msra.mxu0 %v13778_v48  ;;  %12517 = vmatprep.subr.bf16.mxu1 %v13793_v56 }
 0xa0f   :  { %12599 = vmatprep.subr.bf16.mxu0 %v13795_v52 }
 0xa11   :  { %12518 = vmatpush1.bf16.msra.mxu1 %v13792_v30 }
 0xa12   :  { %12600 = vmatpush1.bf16.msra.mxu0 %v13794_v62  ;;  %12519 = vmatprep.subr.bf16.mxu1 %v13809_v54 }
 0xa13   :  { %12601 = vmatprep.subr.bf16.mxu0 %v13811_v15  ;;  %v9383_v15 = vrot.slane %v9321_v1, %v9350_v25 }
 0xa15   :  { %12520 = vmatpush1.bf16.msra.mxu1 %v13808_v13 }
 0xa16   :  { %12602 = vmatpush1.bf16.msra.mxu0 %v13810_v49  ;;  %12521 = vmatprep.subr.bf16.mxu1 %v13825_v63 }
 0xa17   :  { %12603 = vmatprep.subr.bf16.mxu0 %v13827_v14 }
 0xa19   :  { %12522 = vmatpush1.bf16.msra.mxu1 %v13824_v5 }
 0xa1a   :  { %12604 = vmatpush1.bf16.msra.mxu0 %v13826_v17  ;;  %12523 = vmatprep.subr.bf16.mxu1 %v13841_v45 }
 0xa1b   :  { %12605 = vmatprep.subr.bf16.mxu0 %v13843_v10 }
 0xa1d   :  { %12524 = vmatpush1.bf16.msra.mxu1 %v13840_v21 }
 0xa1e   :  { %12606 = vmatpush1.bf16.msra.mxu0 %v13842_v9  ;;  %12525 = vmatprep.subr.bf16.mxu1 %v13857_v42 }
 0xa1f   :  { %12607 = vmatprep.subr.bf16.mxu0 %v13859_v26 }
 0xa21   :  { %12526 = vmatpush1.bf16.msra.mxu1 %v13856_v27 }
 0xa22   :  { %12608 = vmatpush1.bf16.msra.mxu0 %v13858_v22  ;;  %12527 = vmatprep.subr.bf16.mxu1 %v13873_v0 }
 0xa23   :  { %12609 = vmatprep.subr.bf16.mxu0 %v13875_v19 }
 0xa25   :  { %12528 = vmatpush1.bf16.msra.mxu1 %v13872_v2 }
 0xa26   :  { %12610 = vmatpush1.bf16.msra.mxu0 %v13874_v37 }
 0xa28   :  { %12530 = vmatmul.mubr.bf16.vlgmr.msra.gmra.mrb[36].mxu1 %v17646_v31 }
 0xa29   :  { %12612 = vmatmul.mubr.bf16.vlgmr.msra.gmra.mrb[56].mxu0 %v17646_v31 }
 0xa7b   :  { %v12367_v4 = vpop.f32.mrb[32].mxu1 }
 0xa7c   :  { %v14892_v32 = vadd.f32 %v12367_v4, %v9359_v20  ;;  %v12449_v57 = vpop.f32.mrb[52].mxu0  ;;  %v12369_v48 = vpop.f32.mrb[33].mxu1 }
 0xa7d   :  { %v14894_v56 = vadd.f32 %v12449_v57, %v9367_v18  ;;  %v14893_v52 = vadd.f32 %v12369_v48, %v9363_v53  ;;  %v12451_v58 = vpop.f32.mrb[53].mxu0  ;;  %v12371_v50 = vpop.f32.mrb[34].mxu1 }
 0xa7e   :  { %v14895_v11 = vadd.f32 %v12451_v58, %v9371_v7  ;;  %v12453_v61 = vpop.f32.mrb[54].mxu0  ;;  %v12372_v31 = vpop.f32.mrb[35].mxu1 }
 0xa7f   :  { %v12670_v30 = vcombine.low %v14892_v32, %v14893_v52  ;;  %v12454_v62 = vpop.f32.mrb[55].mxu0 }
 0xa80   :  { %v12671_v55 = vcombine.low %v14894_v56, %v14895_v11 }
 0xa81   :  { %v12678_v29 = vrot.slane %v12670_v30, %v17683_v23 }
 0xa82   :  { %v12685_v38 = vrot.slane %v12671_v55, %v17683_v23 }
 0xa84   :  { %v12686_v54 = vcombine.low %v12678_v29, %v12685_v38 }
 0xa86   :  { %12710 = vst [vmem:[#allocation25 + $0x10] sm:$0xff] %v12686_v54 }
 0xafb   :  { %v12531_v34 = vpop.f32.mrb[36].mxu1 }
 0xafc   :  { %v14896_v16 = vadd.f32 %v12531_v34, %v9375_v40  ;;  %v12613_v13 = vpop.f32.mrb[56].mxu0  ;;  %v12533_v49 = vpop.f32.mrb[37].mxu1 }
 0xafd   :  { %v14898_v63 = vadd.f32 %v12613_v13, %v9383_v15  ;;  %v14897_v14 = vadd.f32 %v12533_v49, %v9379_v51  ;;  %v12615_v8 = vpop.f32.mrb[57].mxu0  ;;  %v12535_v35 = vpop.f32.mrb[38].mxu1 }
 0xafe   :  { %v14899_v60 = vadd.f32 %v12615_v8, %v9387_v28  ;;  %v12617_v44 = vpop.f32.mrb[58].mxu0  ;;  %v12536_v46 = vpop.f32.mrb[39].mxu1 }
 0xaff   :  { %v12687_v5 = vcombine.low %v14896_v16, %v14897_v14  ;;  %v12618_v17 = vpop.f32.mrb[59].mxu0 }
 0xb00   :  { %v12688_v25 = vcombine.low %v14898_v63, %v14899_v60 }
 0xb01   :  { %v12695_v45 = vrot.slane %v12687_v5, %v17683_v23 }
 0xb02   :  { %v12702_v33 = vrot.slane %v12688_v25, %v17683_v23 }
 0xb04   :  { %v12703_v24 = vcombine.low %v12695_v45, %v12702_v33 }
 0xb06   :  { %12711 = vst [vmem:[#allocation25 + $0x18] sm:$0xff] %v12703_v24 }
 0xb07   :  { %15968 = shalt.err (!%p15965_p0)
}
 0xb08   :  { %s15969_s29 = scalar_lea.hbm %s17754_s11, 512 }
 0xb09   :  { %p15970_p1 = scmp.ne.s32.totalorder %s17754_s11, %s15969_s29  ;;  %p15973_p2 = scmp.lt.u32.totalorder %s15969_s29, %s17754_s11 }
 0xb0b   :  { %p15975_p3 = pnand %p15973_p2, %p15970_p1 }
 0xb0d   :  { %15978 = shalt.err (!%p15975_p3)
}
 0xb0e   :  { %12721 = dma.vmem_to_hbm [thread:$0]  %s12719_s5, 512, %s17754_s11, [#allocation10]  }
 0xb0f   :  { %15991 = dma.done.wait [#allocation10], 512  }
 0xb10   :  { %15992 = vsyncadd [#allocation10], 4294966784 }
 0xb11   :  { %12725 = vsyncpa [#allocation9], 1 }
 0xb12   :  { %12726 = vsyncpa [#allocation12], 1 }
 0xb13   :  { %12727 = vsyncpa [#allocation15], 1 }
 0xb14   :  { %12728 = vsyncpa [#allocation18], 1 }
 0xb15   :  { %12729 = vsyncpa [#allocation21], 1 }
 0xb16   :  { %12730 = vsyncpa [#allocation24], 1 }
 0xb17   :  { %12731 = vsyncpa [#allocation10], 1 }

</bundles_post_ra>
